<compile_context>
chip_gen: v7x
topology: tpu7x:2x2x1
jax: 0.10.0
libtpu: 0.0.40
codegen_flags: <defaults>
</compile_context>

<pallas_src>
import numpy as np
import jax
import jax.numpy as jnp
from jax import lax
from jax.experimental import pallas as pl
from jax.experimental.pallas import tpu as pltpu  # noqa: F401


# ------------------------------------------------------------------ kernel --
def _mish(y):
    # x * tanh(softplus(x)) with a single exp:
    #   t = e^x ;  tanh(softplus(x)) = t*(t+2) / (t*(t+2) + 2)
    # clamp keeps t^2 finite; for y >= 20 the ratio is 1.0 in f32.
    # u + 2 >= 2 > 0, so the approx (EUP) reciprocal is safe.
    t = jnp.exp(jnp.minimum(y, 20.0))
    u = t * (t + 2.0)
    return y * (u * pl.reciprocal(u + 2.0, approx=True))


def _mm(a, b):
    # bf16 MXU operands, f32 accumulation.
    return jnp.dot(a.astype(jnp.bfloat16), b, preferred_element_type=jnp.float32)


def _downsample1_kernel(xc1_ref, s2_ref, s6_ref,
                        w1_ref, w2_ref, w34_ref, w5_ref, w6_ref,
                        w7_ref, w8_ref, b_ref, o_ref):
    rows1 = s2_ref.shape[1]           # 256 = 16*16 input pixels / image
    rows2 = s2_ref.shape[0] // 9      # 64  = 8*8  output pixels / image
    n_img = xc1_ref.shape[0] // rows1

    # packed folded-BN biases (one lane-dense [8,128] f32 array)
    b1 = b_ref[0:1, 0:32]
    b2 = b_ref[1:2, 0:64]
    b34 = b_ref[2:3, 0:128]
    b5 = b_ref[3:4, 0:32]
    b6 = b_ref[4:5, 0:64]
    b7 = b_ref[5:6, 0:64]
    b8 = b_ref[6:7, 0:64]

    def conv3x3(x_bf16, s, w_ref):
        """3x3 conv on a batch-folded [n_img*rows_in, Cin] bf16 activation.

        s: [9*rows2, rows_in] stacked 0/1 gather matrix (per tap: stride,
           spatial shift, zero padding) -> ONE MXU dot per image.
        w_ref: [9*Cin, Cout] BN-folded bf16 tap weights (free sublane slices).
        Gather rows are exact copies of bf16 rows (or zero), so the bf16
        re-cast of the gathered block is exact.
        """
        rows_in = s.shape[1]
        cin = x_bf16.shape[1]
        cout = w_ref.shape[1]
        outs = []
        for n in range(n_img):
            g = jnp.dot(s, x_bf16[n * rows_in:(n + 1) * rows_in],
                        preferred_element_type=jnp.float32)      # [9*rows2, cin]
            acc = jnp.zeros((rows2, cout), jnp.float32)
            for t in range(9):
                gt = g[t * rows2:(t + 1) * rows2].astype(jnp.bfloat16)
                acc = acc + jnp.dot(gt, w_ref[t * cin:(t + 1) * cin, :],
                                    preferred_element_type=jnp.float32)
            outs.append(acc)
        return jnp.concatenate(outs, axis=0)                     # [n_img*rows2, cout]

    # conv1: 3x3 s1, wrapper-side im2col (K=27 -> 32)                  [512, 32]
    x1 = _mish(_mm(xc1_ref[...], w1_ref[...]) + b1).astype(jnp.bfloat16)
    # conv2: 3x3 stride-2 via one stacked gather dot per image         [128, 64]
    x2 = _mish(conv3x3(x1, s2_ref[...], w2_ref) + b2).astype(jnp.bfloat16)
    # conv3 + conv4 fused: 1x1, both from x2, lane-dense Mish          [128, 128]
    x34 = _mish(_mm(x2, w34_ref[...]) + b34)
    x3 = x34[:, 0:64].astype(jnp.bfloat16)     # only feeds conv8 (bf16 LHS)
    x4 = x34[:, 64:128]                        # f32 (residual path)
    # conv5: 1x1                                                       [128, 32]
    x5 = _mish(_mm(x4, w5_ref[...]) + b5).astype(jnp.bfloat16)
    # conv6: 3x3 s1 + residual                                         [128, 64]
    x6 = _mish(conv3x3(x5, s6_ref[...], w6_ref) + b6) + x4
    # conv7: 1x1                                                       [128, 64]
    x7 = _mish(_mm(x6, w7_ref[...]) + b7).astype(jnp.bfloat16)
    # conv8 on cat([x7, x3], channel) == x7 @ w8[:64] + x3 @ w8[64:]   [128, 64]
    x8 = _mish(_mm(x7, w8_ref[0:64, :]) + _mm(x3, w8_ref[64:128, :]) + b8)
    o_ref[...] = x8


# ----------------------------------------------------------------- wrapper --
def _gather_mats(hin, win, hout, wout, stride):
    """Stacked 0/1 row-selection matrix [9*hout*wout, hin*win] for a padded
    3x3 conv; rows [t*hout*wout:(t+1)*hout*wout] encode tap t = kh*3+kw."""
    s = np.zeros((9, hout * wout, hin * win), np.float32)
    for kh in range(3):
        for kw in range(3):
            t = kh * 3 + kw
            for oh in range(hout):
                for ow in range(wout):
                    h = oh * stride + kh - 1
                    w = ow * stride + kw - 1
                    if 0 <= h < hin and 0 <= w < win:
                        s[t, oh * wout + ow, h * win + w] = 1.0
    return jnp.asarray(s.reshape(9 * hout * wout, hin * win), dtype=jnp.bfloat16)


def downsample1_forward(x_nchw, params):
    x = jnp.transpose(x_nchw, (0, 2, 3, 1)).astype(jnp.float32)  # NCHW -> NHWC
    N, H, W, _ = x.shape                     # 2, 16, 16, 3
    Ho, Wo = H // 2, W // 2                  # 8, 8 (after the stride-2 conv2)
    rows1, rows2 = H * W, Ho * Wo            # 256, 64

    def fold(name):
        w, scale, bias = params[name]
        wf = (w * scale).astype(jnp.bfloat16)   # fold BN scale into the weight
        return wf, bias.astype(jnp.float32)

    w1, b1 = fold('conv1'); w2, b2 = fold('conv2'); w3, b3 = fold('conv3')
    w4, b4 = fold('conv4'); w5, b5 = fold('conv5'); w6, b6 = fold('conv6')
    w7, b7 = fold('conv7'); w8, b8 = fold('conv8')

    # conv1 im2col, batch folded into rows; contraction K = 27, padded to 32.
    xp = jnp.pad(x, ((0, 0), (1, 1), (1, 1), (0, 0)))
    cols = [xp[:, kh:kh + H, kw:kw + W, :] for kh in range(3) for kw in range(3)]
    xc1 = jnp.concatenate(cols, axis=-1).reshape(N * rows1, 27)
    xc1 = jnp.pad(xc1, ((0, 0), (0, 5))).astype(jnp.bfloat16)      # [512, 32]

    w1c = jnp.pad(w1.reshape(27, 32), ((0, 5), (0, 0)))            # [32, 32]
    w2s = w2.reshape(9 * 32, 64)                                   # [288, 64]
    w34 = jnp.concatenate([w3.reshape(64, 64), w4.reshape(64, 64)], axis=1)
    w5c = w5.reshape(64, 32)
    w6s = w6.reshape(9 * 32, 64)                                   # [288, 64]
    w7c = w7.reshape(64, 64)
    w8c = w8.reshape(128, 64)    # rows 0:64 act on x7, rows 64:128 on x3

    # all folded-BN biases packed into one lane-dense [8,128] f32 array
    b_all = jnp.zeros((8, 128), jnp.float32)
    b_all = b_all.at[0, 0:32].set(b1)
    b_all = b_all.at[1, 0:64].set(b2)
    b_all = b_all.at[2, 0:128].set(jnp.concatenate([b3, b4]))
    b_all = b_all.at[3, 0:32].set(b5)
    b_all = b_all.at[4, 0:64].set(b6)
    b_all = b_all.at[5, 0:64].set(b7)
    b_all = b_all.at[6, 0:64].set(b8)

    s2 = _gather_mats(H, W, Ho, Wo, 2)       # [576, 256]
    s6 = _gather_mats(Ho, Wo, Ho, Wo, 1)     # [576, 64]

    out = pl.pallas_call(
        _downsample1_kernel,
        out_shape=jax.ShapeDtypeStruct((N * rows2, 64), jnp.float32),
    )(xc1, s2, s6, w1c, w2s, w34, w5c, w6s, w7c, w8c, b_all)

    return jnp.transpose(out.reshape(N, Ho, Wo, 64), (0, 3, 1, 2))  # -> NCHW


# --------------------- pure-JAX reference (matching bf16-operand numerics) --
def _ref_conv_bn_mish(x, w, scale, bias, stride=1, residual=None):
    # Model the kernel's math: bf16-rounded operands, exact products,
    # f32 accumulation (MXU semantics), f32 epilogue.
    pad = (w.shape[0] - 1) // 2
    xq = x.astype(jnp.bfloat16).astype(jnp.float32)
    wq = (w * scale).astype(jnp.bfloat16).astype(jnp.float32)
    y = lax.conv_general_dilated(
        xq, wq, window_strides=(stride, stride),
        padding=((pad, pad), (pad, pad)),
        dimension_numbers=('NHWC', 'HWIO', 'NHWC'),
        precision=lax.Precision.HIGHEST)
    y = y + bias
    y = y * jnp.tanh(jax.nn.softplus(y))
    if residual is not None:
        y = y + residual
    return y


def ref_forward(x_nchw, params):
    x = jnp.transpose(x_nchw, (0, 2, 3, 1)).astype(jnp.float32)
    x1 = _ref_conv_bn_mish(x,  *params['conv1'], 1)
    x2 = _ref_conv_bn_mish(x1, *params['conv2'], 2)
    x3 = _ref_conv_bn_mish(x2, *params['conv3'], 1)
    x4 = _ref_conv_bn_mish(x2, *params['conv4'], 1)
    x5 = _ref_conv_bn_mish(x4, *params['conv5'], 1)
    x6 = _ref_conv_bn_mish(x5, *params['conv6'], 1, x4)
    x7 = _ref_conv_bn_mish(x6, *params['conv7'], 1)
    x7 = jnp.concatenate([x7, x3], axis=-1)
    x8 = _ref_conv_bn_mish(x7, *params['conv8'], 1)
    return jnp.transpose(x8, (0, 3, 1, 2))


# ---------------------------------------- deterministic synthetic parameters
def init_params(key):
    cfgs = {
        'conv1': (3, 32, 3),
        'conv2': (32, 64, 3),
        'conv3': (64, 64, 1),
        'conv4': (64, 64, 1),
        'conv5': (64, 32, 1),
        'conv6': (32, 64, 3),
        'conv7': (64, 64, 1),
        'conv8': (128, 64, 1),
    }
    eps = 1e-5
    params = {}
    for name, (cin, cout, k) in cfgs.items():
        key, kw_, kg, kb, km, kv = jax.random.split(key, 6)
        w = jax.random.normal(kw_, (k, k, cin, cout), jnp.float32)
        w = w * (1.0 / (k * k * cin)) ** 0.5
        gamma = 1.0 + 0.1 * jax.random.normal(kg, (cout,), jnp.float32)
        beta = 0.1 * jax.random.normal(kb, (cout,), jnp.float32)
        mean = 0.1 * jax.random.normal(km, (cout,), jnp.float32)
        var = jnp.abs(1.0 + 0.1 * jax.random.normal(kv, (cout,), jnp.float32))
        scale = gamma / jnp.sqrt(var + eps)
        bias = beta - mean * scale
        params[name] = (w, scale, bias)
    return params


if __name__ == "__main__":
    key = jax.random.PRNGKey(0)
    kx, kp = jax.random.split(key)
    x = jax.random.normal(kx, (2, 3, 16, 16), jnp.float32)  # NCHW, like PyTorch
    params = init_params(kp)

    fwd = jax.jit(downsample1_forward)
    out = jax.block_until_ready(fwd(x, params))
    assert out.shape == (2, 64, 8, 8), out.shape

    ref = jax.block_until_ready(jax.jit(ref_forward)(x, params))
    # bf16 MXU operands with f32 accumulation + approx (EUP) reciprocal in the
    # Mish epilogue: tolerance covers rare one-ulp bf16 re-rounding plus the
    # small relative error of the hardware reciprocal, cascaded over 8 convs.
    np.testing.assert_allclose(np.asarray(out), np.asarray(ref),
                               rtol=2e-2, atol=2e-2)
    print("KERNEL_OK")
</pallas_src>

<mosaic_0001>
module attributes {stable_mosaic.version = 11 : i64} {
  func.func @_downsample1_kernel(%arg0: memref<512x32xbf16, #tpu.memory_space<vmem>>, %arg1: memref<576x256xbf16, #tpu.memory_space<vmem>>, %arg2: memref<576x64xbf16, #tpu.memory_space<vmem>>, %arg3: memref<32x32xbf16, #tpu.memory_space<vmem>>, %arg4: memref<288x64xbf16, #tpu.memory_space<vmem>>, %arg5: memref<64x128xbf16, #tpu.memory_space<vmem>>, %arg6: memref<64x32xbf16, #tpu.memory_space<vmem>>, %arg7: memref<288x64xbf16, #tpu.memory_space<vmem>>, %arg8: memref<64x64xbf16, #tpu.memory_space<vmem>>, %arg9: memref<128x64xbf16, #tpu.memory_space<vmem>>, %arg10: memref<8x128xf32, #tpu.memory_space<vmem>>, %arg11: memref<128x64xf32, #tpu.memory_space<vmem>>) attributes {dimension_semantics = [], scalar_prefetch = 0 : i64, scratch_operands = 0 : i64, tpu.core_type = #tpu.core_type<tc>} {
    %c0 = arith.constant 0 : index
    %c0_0 = arith.constant 0 : index
    %0 = vector.load %arg10[%c0, %c0_0] : memref<8x128xf32, #tpu.memory_space<vmem>>, vector<1x32xf32>
    %c1 = arith.constant 1 : index
    %c0_1 = arith.constant 0 : index
    %1 = vector.load %arg10[%c1, %c0_1] : memref<8x128xf32, #tpu.memory_space<vmem>>, vector<1x64xf32>
    %c2 = arith.constant 2 : index
    %c0_2 = arith.constant 0 : index
    %2 = vector.load %arg10[%c2, %c0_2] : memref<8x128xf32, #tpu.memory_space<vmem>>, vector<1x128xf32>
    %c3 = arith.constant 3 : index
    %c0_3 = arith.constant 0 : index
    %3 = vector.load %arg10[%c3, %c0_3] : memref<8x128xf32, #tpu.memory_space<vmem>>, vector<1x32xf32>
    %c4 = arith.constant 4 : index
    %c0_4 = arith.constant 0 : index
    %4 = vector.load %arg10[%c4, %c0_4] : memref<8x128xf32, #tpu.memory_space<vmem>>, vector<1x64xf32>
    %c5 = arith.constant 5 : index
    %c0_5 = arith.constant 0 : index
    %5 = vector.load %arg10[%c5, %c0_5] : memref<8x128xf32, #tpu.memory_space<vmem>>, vector<1x64xf32>
    %c6 = arith.constant 6 : index
    %c0_6 = arith.constant 0 : index
    %6 = vector.load %arg10[%c6, %c0_6] : memref<8x128xf32, #tpu.memory_space<vmem>>, vector<1x64xf32>
    %c0_7 = arith.constant 0 : index
    %c0_8 = arith.constant 0 : index
    %7 = vector.load %arg0[%c0_7, %c0_8] : memref<512x32xbf16, #tpu.memory_space<vmem>>, vector<512x32xbf16>
    %c0_9 = arith.constant 0 : index
    %c0_10 = arith.constant 0 : index
    %8 = vector.load %arg3[%c0_9, %c0_10] : memref<32x32xbf16, #tpu.memory_space<vmem>>, vector<32x32xbf16>
    %cst = arith.constant dense<0.000000e+00> : vector<512x32xf32>
    %9 = tpu.matmul %7, %8, %cst {dimension_numbers = #tpu.dot_dimension_numbers<[1], [0], [0], [1], [0, 0, 1, 1], [], []>} : vector<512x32xbf16>, vector<32x32xbf16>, vector<512x32xf32> -> vector<512x32xf32>
    %10 = vector.broadcast %0 : vector<1x32xf32> to vector<512x32xf32>
    %11 = arith.addf %9, %10 : vector<512x32xf32>
    %cst_11 = arith.constant 2.000000e+01 : f32
    %12 = vector.broadcast %cst_11 : f32 to vector<512x32xf32>
    %13 = arith.minimumf %11, %12 : vector<512x32xf32>
    %14 = math.exp %13 : vector<512x32xf32>
    %cst_12 = arith.constant 2.000000e+00 : f32
    %15 = vector.broadcast %cst_12 : f32 to vector<512x32xf32>
    %16 = arith.addf %14, %15 : vector<512x32xf32>
    %17 = arith.mulf %14, %16 : vector<512x32xf32>
    %cst_13 = arith.constant 2.000000e+00 : f32
    %18 = vector.broadcast %cst_13 : f32 to vector<512x32xf32>
    %19 = arith.addf %17, %18 : vector<512x32xf32>
    %20 = tpu.reciprocal %19 {approx = true} : vector<512x32xf32> -> vector<512x32xf32>
    %21 = arith.mulf %17, %20 : vector<512x32xf32>
    %22 = arith.mulf %11, %21 : vector<512x32xf32>
    %23 = arith.truncf %22 : vector<512x32xf32> to vector<512x32xbf16>
    %c0_14 = arith.constant 0 : index
    %c0_15 = arith.constant 0 : index
    %24 = vector.load %arg1[%c0_14, %c0_15] : memref<576x256xbf16, #tpu.memory_space<vmem>>, vector<576x256xbf16>
    %25 = vector.extract_strided_slice %23 {offsets = [0, 0], sizes = [256, 32], strides = [1, 1]} : vector<512x32xbf16> to vector<256x32xbf16>
    %cst_16 = arith.constant dense<0.000000e+00> : vector<576x32xf32>
    %26 = tpu.matmul %24, %25, %cst_16 {dimension_numbers = #tpu.dot_dimension_numbers<[1], [0], [0], [1], [0, 0, 1, 1], [], []>} : vector<576x256xbf16>, vector<256x32xbf16>, vector<576x32xf32> -> vector<576x32xf32>
    %cst_17 = arith.constant 0.000000e+00 : f32
    %27 = vector.broadcast %cst_17 : f32 to vector<64x64xf32>
    %28 = vector.extract_strided_slice %26 {offsets = [0, 0], sizes = [64, 32], strides = [1, 1]} : vector<576x32xf32> to vector<64x32xf32>
    %29 = arith.truncf %28 : vector<64x32xf32> to vector<64x32xbf16>
    %c0_18 = arith.constant 0 : index
    %c0_19 = arith.constant 0 : index
    %30 = vector.load %arg4[%c0_18, %c0_19] : memref<288x64xbf16, #tpu.memory_space<vmem>>, vector<32x64xbf16>
    %cst_20 = arith.constant dense<0.000000e+00> : vector<64x64xf32>
    %31 = tpu.matmul %29, %30, %cst_20 {dimension_numbers = #tpu.dot_dimension_numbers<[1], [0], [0], [1], [0, 0, 1, 1], [], []>} : vector<64x32xbf16>, vector<32x64xbf16>, vector<64x64xf32> -> vector<64x64xf32>
    %32 = arith.addf %27, %31 : vector<64x64xf32>
    %33 = vector.extract_strided_slice %26 {offsets = [64, 0], sizes = [64, 32], strides = [1, 1]} : vector<576x32xf32> to vector<64x32xf32>
    %34 = arith.truncf %33 : vector<64x32xf32> to vector<64x32xbf16>
    %c32 = arith.constant 32 : index
    %c0_21 = arith.constant 0 : index
    %35 = vector.load %arg4[%c32, %c0_21] : memref<288x64xbf16, #tpu.memory_space<vmem>>, vector<32x64xbf16>
    %cst_22 = arith.constant dense<0.000000e+00> : vector<64x64xf32>
    %36 = tpu.matmul %34, %35, %cst_22 {dimension_numbers = #tpu.dot_dimension_numbers<[1], [0], [0], [1], [0, 0, 1, 1], [], []>} : vector<64x32xbf16>, vector<32x64xbf16>, vector<64x64xf32> -> vector<64x64xf32>
    %37 = arith.addf %32, %36 : vector<64x64xf32>
    %38 = vector.extract_strided_slice %26 {offsets = [128, 0], sizes = [64, 32], strides = [1, 1]} : vector<576x32xf32> to vector<64x32xf32>
    %39 = arith.truncf %38 : vector<64x32xf32> to vector<64x32xbf16>
    %c64 = arith.constant 64 : index
    %c0_23 = arith.constant 0 : index
    %40 = vector.load %arg4[%c64, %c0_23] : memref<288x64xbf16, #tpu.memory_space<vmem>>, vector<32x64xbf16>
    %cst_24 = arith.constant dense<0.000000e+00> : vector<64x64xf32>
    %41 = tpu.matmul %39, %40, %cst_24 {dimension_numbers = #tpu.dot_dimension_numbers<[1], [0], [0], [1], [0, 0, 1, 1], [], []>} : vector<64x32xbf16>, vector<32x64xbf16>, vector<64x64xf32> -> vector<64x64xf32>
    %42 = arith.addf %37, %41 : vector<64x64xf32>
    %43 = vector.extract_strided_slice %26 {offsets = [192, 0], sizes = [64, 32], strides = [1, 1]} : vector<576x32xf32> to vector<64x32xf32>
    %44 = arith.truncf %43 : vector<64x32xf32> to vector<64x32xbf16>
    %c96 = arith.constant 96 : index
    %c0_25 = arith.constant 0 : index
    %45 = vector.load %arg4[%c96, %c0_25] : memref<288x64xbf16, #tpu.memory_space<vmem>>, vector<32x64xbf16>
    %cst_26 = arith.constant dense<0.000000e+00> : vector<64x64xf32>
    %46 = tpu.matmul %44, %45, %cst_26 {dimension_numbers = #tpu.dot_dimension_numbers<[1], [0], [0], [1], [0, 0, 1, 1], [], []>} : vector<64x32xbf16>, vector<32x64xbf16>, vector<64x64xf32> -> vector<64x64xf32>
    %47 = arith.addf %42, %46 : vector<64x64xf32>
    %48 = vector.extract_strided_slice %26 {offsets = [256, 0], sizes = [64, 32], strides = [1, 1]} : vector<576x32xf32> to vector<64x32xf32>
    %49 = arith.truncf %48 : vector<64x32xf32> to vector<64x32xbf16>
    %c128 = arith.constant 128 : index
    %c0_27 = arith.constant 0 : index
    %50 = vector.load %arg4[%c128, %c0_27] : memref<288x64xbf16, #tpu.memory_space<vmem>>, vector<32x64xbf16>
    %cst_28 = arith.constant dense<0.000000e+00> : vector<64x64xf32>
    %51 = tpu.matmul %49, %50, %cst_28 {dimension_numbers = #tpu.dot_dimension_numbers<[1], [0], [0], [1], [0, 0, 1, 1], [], []>} : vector<64x32xbf16>, vector<32x64xbf16>, vector<64x64xf32> -> vector<64x64xf32>
    %52 = arith.addf %47, %51 : vector<64x64xf32>
    %53 = vector.extract_strided_slice %26 {offsets = [320, 0], sizes = [64, 32], strides = [1, 1]} : vector<576x32xf32> to vector<64x32xf32>
    %54 = arith.truncf %53 : vector<64x32xf32> to vector<64x32xbf16>
    %c160 = arith.constant 160 : index
    %c0_29 = arith.constant 0 : index
    %55 = vector.load %arg4[%c160, %c0_29] : memref<288x64xbf16, #tpu.memory_space<vmem>>, vector<32x64xbf16>
    %cst_30 = arith.constant dense<0.000000e+00> : vector<64x64xf32>
    %56 = tpu.matmul %54, %55, %cst_30 {dimension_numbers = #tpu.dot_dimension_numbers<[1], [0], [0], [1], [0, 0, 1, 1], [], []>} : vector<64x32xbf16>, vector<32x64xbf16>, vector<64x64xf32> -> vector<64x64xf32>
    %57 = arith.addf %52, %56 : vector<64x64xf32>
    %58 = vector.extract_strided_slice %26 {offsets = [384, 0], sizes = [64, 32], strides = [1, 1]} : vector<576x32xf32> to vector<64x32xf32>
    %59 = arith.truncf %58 : vector<64x32xf32> to vector<64x32xbf16>
    %c192 = arith.constant 192 : index
    %c0_31 = arith.constant 0 : index
    %60 = vector.load %arg4[%c192, %c0_31] : memref<288x64xbf16, #tpu.memory_space<vmem>>, vector<32x64xbf16>
    %cst_32 = arith.constant dense<0.000000e+00> : vector<64x64xf32>
    %61 = tpu.matmul %59, %60, %cst_32 {dimension_numbers = #tpu.dot_dimension_numbers<[1], [0], [0], [1], [0, 0, 1, 1], [], []>} : vector<64x32xbf16>, vector<32x64xbf16>, vector<64x64xf32> -> vector<64x64xf32>
    %62 = arith.addf %57, %61 : vector<64x64xf32>
    %63 = vector.extract_strided_slice %26 {offsets = [448, 0], sizes = [64, 32], strides = [1, 1]} : vector<576x32xf32> to vector<64x32xf32>
    %64 = arith.truncf %63 : vector<64x32xf32> to vector<64x32xbf16>
    %c224 = arith.constant 224 : index
    %c0_33 = arith.constant 0 : index
    %65 = vector.load %arg4[%c224, %c0_33] : memref<288x64xbf16, #tpu.memory_space<vmem>>, vector<32x64xbf16>
    %cst_34 = arith.constant dense<0.000000e+00> : vector<64x64xf32>
    %66 = tpu.matmul %64, %65, %cst_34 {dimension_numbers = #tpu.dot_dimension_numbers<[1], [0], [0], [1], [0, 0, 1, 1], [], []>} : vector<64x32xbf16>, vector<32x64xbf16>, vector<64x64xf32> -> vector<64x64xf32>
    %67 = arith.addf %62, %66 : vector<64x64xf32>
    %68 = vector.extract_strided_slice %26 {offsets = [512, 0], sizes = [64, 32], strides = [1, 1]} : vector<576x32xf32> to vector<64x32xf32>
    %69 = arith.truncf %68 : vector<64x32xf32> to vector<64x32xbf16>
    %c256 = arith.constant 256 : index
    %c0_35 = arith.constant 0 : index
    %70 = vector.load %arg4[%c256, %c0_35] : memref<288x64xbf16, #tpu.memory_space<vmem>>, vector<32x64xbf16>
    %cst_36 = arith.constant dense<0.000000e+00> : vector<64x64xf32>
    %71 = tpu.matmul %69, %70, %cst_36 {dimension_numbers = #tpu.dot_dimension_numbers<[1], [0], [0], [1], [0, 0, 1, 1], [], []>} : vector<64x32xbf16>, vector<32x64xbf16>, vector<64x64xf32> -> vector<64x64xf32>
    %72 = arith.addf %67, %71 : vector<64x64xf32>
    %73 = vector.extract_strided_slice %23 {offsets = [256, 0], sizes = [256, 32], strides = [1, 1]} : vector<512x32xbf16> to vector<256x32xbf16>
    %cst_37 = arith.constant dense<0.000000e+00> : vector<576x32xf32>
    %74 = tpu.matmul %24, %73, %cst_37 {dimension_numbers = #tpu.dot_dimension_numbers<[1], [0], [0], [1], [0, 0, 1, 1], [], []>} : vector<576x256xbf16>, vector<256x32xbf16>, vector<576x32xf32> -> vector<576x32xf32>
    %cst_38 = arith.constant 0.000000e+00 : f32
    %75 = vector.broadcast %cst_38 : f32 to vector<64x64xf32>
    %76 = vector.extract_strided_slice %74 {offsets = [0, 0], sizes = [64, 32], strides = [1, 1]} : vector<576x32xf32> to vector<64x32xf32>
    %77 = arith.truncf %76 : vector<64x32xf32> to vector<64x32xbf16>
    %c0_39 = arith.constant 0 : index
    %c0_40 = arith.constant 0 : index
    %78 = vector.load %arg4[%c0_39, %c0_40] : memref<288x64xbf16, #tpu.memory_space<vmem>>, vector<32x64xbf16>
    %cst_41 = arith.constant dense<0.000000e+00> : vector<64x64xf32>
    %79 = tpu.matmul %77, %78, %cst_41 {dimension_numbers = #tpu.dot_dimension_numbers<[1], [0], [0], [1], [0, 0, 1, 1], [], []>} : vector<64x32xbf16>, vector<32x64xbf16>, vector<64x64xf32> -> vector<64x64xf32>
    %80 = arith.addf %75, %79 : vector<64x64xf32>
    %81 = vector.extract_strided_slice %74 {offsets = [64, 0], sizes = [64, 32], strides = [1, 1]} : vector<576x32xf32> to vector<64x32xf32>
    %82 = arith.truncf %81 : vector<64x32xf32> to vector<64x32xbf16>
    %c32_42 = arith.constant 32 : index
    %c0_43 = arith.constant 0 : index
    %83 = vector.load %arg4[%c32_42, %c0_43] : memref<288x64xbf16, #tpu.memory_space<vmem>>, vector<32x64xbf16>
    %cst_44 = arith.constant dense<0.000000e+00> : vector<64x64xf32>
    %84 = tpu.matmul %82, %83, %cst_44 {dimension_numbers = #tpu.dot_dimension_numbers<[1], [0], [0], [1], [0, 0, 1, 1], [], []>} : vector<64x32xbf16>, vector<32x64xbf16>, vector<64x64xf32> -> vector<64x64xf32>
    %85 = arith.addf %80, %84 : vector<64x64xf32>
    %86 = vector.extract_strided_slice %74 {offsets = [128, 0], sizes = [64, 32], strides = [1, 1]} : vector<576x32xf32> to vector<64x32xf32>
    %87 = arith.truncf %86 : vector<64x32xf32> to vector<64x32xbf16>
    %c64_45 = arith.constant 64 : index
    %c0_46 = arith.constant 0 : index
    %88 = vector.load %arg4[%c64_45, %c0_46] : memref<288x64xbf16, #tpu.memory_space<vmem>>, vector<32x64xbf16>
    %cst_47 = arith.constant dense<0.000000e+00> : vector<64x64xf32>
    %89 = tpu.matmul %87, %88, %cst_47 {dimension_numbers = #tpu.dot_dimension_numbers<[1], [0], [0], [1], [0, 0, 1, 1], [], []>} : vector<64x32xbf16>, vector<32x64xbf16>, vector<64x64xf32> -> vector<64x64xf32>
    %90 = arith.addf %85, %89 : vector<64x64xf32>
    %91 = vector.extract_strided_slice %74 {offsets = [192, 0], sizes = [64, 32], strides = [1, 1]} : vector<576x32xf32> to vector<64x32xf32>
    %92 = arith.truncf %91 : vector<64x32xf32> to vector<64x32xbf16>
    %c96_48 = arith.constant 96 : index
    %c0_49 = arith.constant 0 : index
    %93 = vector.load %arg4[%c96_48, %c0_49] : memref<288x64xbf16, #tpu.memory_space<vmem>>, vector<32x64xbf16>
    %cst_50 = arith.constant dense<0.000000e+00> : vector<64x64xf32>
    %94 = tpu.matmul %92, %93, %cst_50 {dimension_numbers = #tpu.dot_dimension_numbers<[1], [0], [0], [1], [0, 0, 1, 1], [], []>} : vector<64x32xbf16>, vector<32x64xbf16>, vector<64x64xf32> -> vector<64x64xf32>
    %95 = arith.addf %90, %94 : vector<64x64xf32>
    %96 = vector.extract_strided_slice %74 {offsets = [256, 0], sizes = [64, 32], strides = [1, 1]} : vector<576x32xf32> to vector<64x32xf32>
    %97 = arith.truncf %96 : vector<64x32xf32> to vector<64x32xbf16>
    %c128_51 = arith.constant 128 : index
    %c0_52 = arith.constant 0 : index
    %98 = vector.load %arg4[%c128_51, %c0_52] : memref<288x64xbf16, #tpu.memory_space<vmem>>, vector<32x64xbf16>
    %cst_53 = arith.constant dense<0.000000e+00> : vector<64x64xf32>
    %99 = tpu.matmul %97, %98, %cst_53 {dimension_numbers = #tpu.dot_dimension_numbers<[1], [0], [0], [1], [0, 0, 1, 1], [], []>} : vector<64x32xbf16>, vector<32x64xbf16>, vector<64x64xf32> -> vector<64x64xf32>
    %100 = arith.addf %95, %99 : vector<64x64xf32>
    %101 = vector.extract_strided_slice %74 {offsets = [320, 0], sizes = [64, 32], strides = [1, 1]} : vector<576x32xf32> to vector<64x32xf32>
    %102 = arith.truncf %101 : vector<64x32xf32> to vector<64x32xbf16>
    %c160_54 = arith.constant 160 : index
    %c0_55 = arith.constant 0 : index
    %103 = vector.load %arg4[%c160_54, %c0_55] : memref<288x64xbf16, #tpu.memory_space<vmem>>, vector<32x64xbf16>
    %cst_56 = arith.constant dense<0.000000e+00> : vector<64x64xf32>
    %104 = tpu.matmul %102, %103, %cst_56 {dimension_numbers = #tpu.dot_dimension_numbers<[1], [0], [0], [1], [0, 0, 1, 1], [], []>} : vector<64x32xbf16>, vector<32x64xbf16>, vector<64x64xf32> -> vector<64x64xf32>
    %105 = arith.addf %100, %104 : vector<64x64xf32>
    %106 = vector.extract_strided_slice %74 {offsets = [384, 0], sizes = [64, 32], strides = [1, 1]} : vector<576x32xf32> to vector<64x32xf32>
    %107 = arith.truncf %106 : vector<64x32xf32> to vector<64x32xbf16>
    %c192_57 = arith.constant 192 : index
    %c0_58 = arith.constant 0 : index
    %108 = vector.load %arg4[%c192_57, %c0_58] : memref<288x64xbf16, #tpu.memory_space<vmem>>, vector<32x64xbf16>
    %cst_59 = arith.constant dense<0.000000e+00> : vector<64x64xf32>
    %109 = tpu.matmul %107, %108, %cst_59 {dimension_numbers = #tpu.dot_dimension_numbers<[1], [0], [0], [1], [0, 0, 1, 1], [], []>} : vector<64x32xbf16>, vector<32x64xbf16>, vector<64x64xf32> -> vector<64x64xf32>
    %110 = arith.addf %105, %109 : vector<64x64xf32>
    %111 = vector.extract_strided_slice %74 {offsets = [448, 0], sizes = [64, 32], strides = [1, 1]} : vector<576x32xf32> to vector<64x32xf32>
    %112 = arith.truncf %111 : vector<64x32xf32> to vector<64x32xbf16>
    %c224_60 = arith.constant 224 : index
    %c0_61 = arith.constant 0 : index
    %113 = vector.load %arg4[%c224_60, %c0_61] : memref<288x64xbf16, #tpu.memory_space<vmem>>, vector<32x64xbf16>
    %cst_62 = arith.constant dense<0.000000e+00> : vector<64x64xf32>
    %114 = tpu.matmul %112, %113, %cst_62 {dimension_numbers = #tpu.dot_dimension_numbers<[1], [0], [0], [1], [0, 0, 1, 1], [], []>} : vector<64x32xbf16>, vector<32x64xbf16>, vector<64x64xf32> -> vector<64x64xf32>
    %115 = arith.addf %110, %114 : vector<64x64xf32>
    %116 = vector.extract_strided_slice %74 {offsets = [512, 0], sizes = [64, 32], strides = [1, 1]} : vector<576x32xf32> to vector<64x32xf32>
    %117 = arith.truncf %116 : vector<64x32xf32> to vector<64x32xbf16>
    %c256_63 = arith.constant 256 : index
    %c0_64 = arith.constant 0 : index
    %118 = vector.load %arg4[%c256_63, %c0_64] : memref<288x64xbf16, #tpu.memory_space<vmem>>, vector<32x64xbf16>
    %cst_65 = arith.constant dense<0.000000e+00> : vector<64x64xf32>
    %119 = tpu.matmul %117, %118, %cst_65 {dimension_numbers = #tpu.dot_dimension_numbers<[1], [0], [0], [1], [0, 0, 1, 1], [], []>} : vector<64x32xbf16>, vector<32x64xbf16>, vector<64x64xf32> -> vector<64x64xf32>
    %120 = arith.addf %115, %119 : vector<64x64xf32>
    %121 = tpu.concatenate %72, %120 in 0 : vector<64x64xf32>, vector<64x64xf32> -> vector<128x64xf32>
    %122 = vector.broadcast %1 : vector<1x64xf32> to vector<128x64xf32>
    %123 = arith.addf %121, %122 : vector<128x64xf32>
    %cst_66 = arith.constant 2.000000e+01 : f32
    %124 = vector.broadcast %cst_66 : f32 to vector<128x64xf32>
    %125 = arith.minimumf %123, %124 : vector<128x64xf32>
    %126 = math.exp %125 : vector<128x64xf32>
    %cst_67 = arith.constant 2.000000e+00 : f32
    %127 = vector.broadcast %cst_67 : f32 to vector<128x64xf32>
    %128 = arith.addf %126, %127 : vector<128x64xf32>
    %129 = arith.mulf %126, %128 : vector<128x64xf32>
    %cst_68 = arith.constant 2.000000e+00 : f32
    %130 = vector.broadcast %cst_68 : f32 to vector<128x64xf32>
    %131 = arith.addf %129, %130 : vector<128x64xf32>
    %132 = tpu.reciprocal %131 {approx = true} : vector<128x64xf32> -> vector<128x64xf32>
    %133 = arith.mulf %129, %132 : vector<128x64xf32>
    %134 = arith.mulf %123, %133 : vector<128x64xf32>
    %135 = arith.truncf %134 : vector<128x64xf32> to vector<128x64xbf16>
    %c0_69 = arith.constant 0 : index
    %c0_70 = arith.constant 0 : index
    %136 = vector.load %arg5[%c0_69, %c0_70] : memref<64x128xbf16, #tpu.memory_space<vmem>>, vector<64x128xbf16>
    %cst_71 = arith.constant dense<0.000000e+00> : vector<128x128xf32>
    %137 = tpu.matmul %135, %136, %cst_71 {dimension_numbers = #tpu.dot_dimension_numbers<[1], [0], [0], [1], [0, 0, 1, 1], [], []>} : vector<128x64xbf16>, vector<64x128xbf16>, vector<128x128xf32> -> vector<128x128xf32>
    %138 = vector.broadcast %2 : vector<1x128xf32> to vector<128x128xf32>
    %139 = arith.addf %137, %138 : vector<128x128xf32>
    %cst_72 = arith.constant 2.000000e+01 : f32
    %140 = vector.broadcast %cst_72 : f32 to vector<128x128xf32>
    %141 = arith.minimumf %139, %140 : vector<128x128xf32>
    %142 = math.exp %141 : vector<128x128xf32>
    %cst_73 = arith.constant 2.000000e+00 : f32
    %143 = vector.broadcast %cst_73 : f32 to vector<128x128xf32>
    %144 = arith.addf %142, %143 : vector<128x128xf32>
    %145 = arith.mulf %142, %144 : vector<128x128xf32>
    %cst_74 = arith.constant 2.000000e+00 : f32
    %146 = vector.broadcast %cst_74 : f32 to vector<128x128xf32>
    %147 = arith.addf %145, %146 : vector<128x128xf32>
    %148 = tpu.reciprocal %147 {approx = true} : vector<128x128xf32> -> vector<128x128xf32>
    %149 = arith.mulf %145, %148 : vector<128x128xf32>
    %150 = arith.mulf %139, %149 : vector<128x128xf32>
    %151 = vector.extract_strided_slice %150 {offsets = [0, 0], sizes = [128, 64], strides = [1, 1]} : vector<128x128xf32> to vector<128x64xf32>
    %152 = arith.truncf %151 : vector<128x64xf32> to vector<128x64xbf16>
    %153 = vector.extract_strided_slice %150 {offsets = [0, 64], sizes = [128, 64], strides = [1, 1]} : vector<128x128xf32> to vector<128x64xf32>
    %c0_75 = arith.constant 0 : index
    %c0_76 = arith.constant 0 : index
    %154 = vector.load %arg6[%c0_75, %c0_76] : memref<64x32xbf16, #tpu.memory_space<vmem>>, vector<64x32xbf16>
    %155 = arith.truncf %153 : vector<128x64xf32> to vector<128x64xbf16>
    %cst_77 = arith.constant dense<0.000000e+00> : vector<128x32xf32>
    %156 = tpu.matmul %155, %154, %cst_77 {dimension_numbers = #tpu.dot_dimension_numbers<[1], [0], [0], [1], [0, 0, 1, 1], [], []>} : vector<128x64xbf16>, vector<64x32xbf16>, vector<128x32xf32> -> vector<128x32xf32>
    %157 = vector.broadcast %3 : vector<1x32xf32> to vector<128x32xf32>
    %158 = arith.addf %156, %157 : vector<128x32xf32>
    %cst_78 = arith.constant 2.000000e+01 : f32
    %159 = vector.broadcast %cst_78 : f32 to vector<128x32xf32>
    %160 = arith.minimumf %158, %159 : vector<128x32xf32>
    %161 = math.exp %160 : vector<128x32xf32>
    %cst_79 = arith.constant 2.000000e+00 : f32
    %162 = vector.broadcast %cst_79 : f32 to vector<128x32xf32>
    %163 = arith.addf %161, %162 : vector<128x32xf32>
    %164 = arith.mulf %161, %163 : vector<128x32xf32>
    %cst_80 = arith.constant 2.000000e+00 : f32
    %165 = vector.broadcast %cst_80 : f32 to vector<128x32xf32>
    %166 = arith.addf %164, %165 : vector<128x32xf32>
    %167 = tpu.reciprocal %166 {approx = true} : vector<128x32xf32> -> vector<128x32xf32>
    %168 = arith.mulf %164, %167 : vector<128x32xf32>
    %169 = arith.mulf %158, %168 : vector<128x32xf32>
    %170 = arith.truncf %169 : vector<128x32xf32> to vector<128x32xbf16>
    %c0_81 = arith.constant 0 : index
    %c0_82 = arith.constant 0 : index
    %171 = vector.load %arg2[%c0_81, %c0_82] : memref<576x64xbf16, #tpu.memory_space<vmem>>, vector<576x64xbf16>
    %172 = vector.extract_strided_slice %170 {offsets = [0, 0], sizes = [64, 32], strides = [1, 1]} : vector<128x32xbf16> to vector<64x32xbf16>
    %cst_83 = arith.constant dense<0.000000e+00> : vector<576x32xf32>
    %173 = tpu.matmul %171, %172, %cst_83 {dimension_numbers = #tpu.dot_dimension_numbers<[1], [0], [0], [1], [0, 0, 1, 1], [], []>} : vector<576x64xbf16>, vector<64x32xbf16>, vector<576x32xf32> -> vector<576x32xf32>
    %cst_84 = arith.constant 0.000000e+00 : f32
    %174 = vector.broadcast %cst_84 : f32 to vector<64x64xf32>
    %175 = vector.extract_strided_slice %173 {offsets = [0, 0], sizes = [64, 32], strides = [1, 1]} : vector<576x32xf32> to vector<64x32xf32>
    %176 = arith.truncf %175 : vector<64x32xf32> to vector<64x32xbf16>
    %c0_85 = arith.constant 0 : index
    %c0_86 = arith.constant 0 : index
    %177 = vector.load %arg7[%c0_85, %c0_86] : memref<288x64xbf16, #tpu.memory_space<vmem>>, vector<32x64xbf16>
    %cst_87 = arith.constant dense<0.000000e+00> : vector<64x64xf32>
    %178 = tpu.matmul %176, %177, %cst_87 {dimension_numbers = #tpu.dot_dimension_numbers<[1], [0], [0], [1], [0, 0, 1, 1], [], []>} : vector<64x32xbf16>, vector<32x64xbf16>, vector<64x64xf32> -> vector<64x64xf32>
    %179 = arith.addf %174, %178 : vector<64x64xf32>
    %180 = vector.extract_strided_slice %173 {offsets = [64, 0], sizes = [64, 32], strides = [1, 1]} : vector<576x32xf32> to vector<64x32xf32>
    %181 = arith.truncf %180 : vector<64x32xf32> to vector<64x32xbf16>
    %c32_88 = arith.constant 32 : index
    %c0_89 = arith.constant 0 : index
    %182 = vector.load %arg7[%c32_88, %c0_89] : memref<288x64xbf16, #tpu.memory_space<vmem>>, vector<32x64xbf16>
    %cst_90 = arith.constant dense<0.000000e+00> : vector<64x64xf32>
    %183 = tpu.matmul %181, %182, %cst_90 {dimension_numbers = #tpu.dot_dimension_numbers<[1], [0], [0], [1], [0, 0, 1, 1], [], []>} : vector<64x32xbf16>, vector<32x64xbf16>, vector<64x64xf32> -> vector<64x64xf32>
    %184 = arith.addf %179, %183 : vector<64x64xf32>
    %185 = vector.extract_strided_slice %173 {offsets = [128, 0], sizes = [64, 32], strides = [1, 1]} : vector<576x32xf32> to vector<64x32xf32>
    %186 = arith.truncf %185 : vector<64x32xf32> to vector<64x32xbf16>
    %c64_91 = arith.constant 64 : index
    %c0_92 = arith.constant 0 : index
    %187 = vector.load %arg7[%c64_91, %c0_92] : memref<288x64xbf16, #tpu.memory_space<vmem>>, vector<32x64xbf16>
    %cst_93 = arith.constant dense<0.000000e+00> : vector<64x64xf32>
    %188 = tpu.matmul %186, %187, %cst_93 {dimension_numbers = #tpu.dot_dimension_numbers<[1], [0], [0], [1], [0, 0, 1, 1], [], []>} : vector<64x32xbf16>, vector<32x64xbf16>, vector<64x64xf32> -> vector<64x64xf32>
    %189 = arith.addf %184, %188 : vector<64x64xf32>
    %190 = vector.extract_strided_slice %173 {offsets = [192, 0], sizes = [64, 32], strides = [1, 1]} : vector<576x32xf32> to vector<64x32xf32>
    %191 = arith.truncf %190 : vector<64x32xf32> to vector<64x32xbf16>
    %c96_94 = arith.constant 96 : index
    %c0_95 = arith.constant 0 : index
    %192 = vector.load %arg7[%c96_94, %c0_95] : memref<288x64xbf16, #tpu.memory_space<vmem>>, vector<32x64xbf16>
    %cst_96 = arith.constant dense<0.000000e+00> : vector<64x64xf32>
    %193 = tpu.matmul %191, %192, %cst_96 {dimension_numbers = #tpu.dot_dimension_numbers<[1], [0], [0], [1], [0, 0, 1, 1], [], []>} : vector<64x32xbf16>, vector<32x64xbf16>, vector<64x64xf32> -> vector<64x64xf32>
    %194 = arith.addf %189, %193 : vector<64x64xf32>
    %195 = vector.extract_strided_slice %173 {offsets = [256, 0], sizes = [64, 32], strides = [1, 1]} : vector<576x32xf32> to vector<64x32xf32>
    %196 = arith.truncf %195 : vector<64x32xf32> to vector<64x32xbf16>
    %c128_97 = arith.constant 128 : index
    %c0_98 = arith.constant 0 : index
    %197 = vector.load %arg7[%c128_97, %c0_98] : memref<288x64xbf16, #tpu.memory_space<vmem>>, vector<32x64xbf16>
    %cst_99 = arith.constant dense<0.000000e+00> : vector<64x64xf32>
    %198 = tpu.matmul %196, %197, %cst_99 {dimension_numbers = #tpu.dot_dimension_numbers<[1], [0], [0], [1], [0, 0, 1, 1], [], []>} : vector<64x32xbf16>, vector<32x64xbf16>, vector<64x64xf32> -> vector<64x64xf32>
    %199 = arith.addf %194, %198 : vector<64x64xf32>
    %200 = vector.extract_strided_slice %173 {offsets = [320, 0], sizes = [64, 32], strides = [1, 1]} : vector<576x32xf32> to vector<64x32xf32>
    %201 = arith.truncf %200 : vector<64x32xf32> to vector<64x32xbf16>
    %c160_100 = arith.constant 160 : index
    %c0_101 = arith.constant 0 : index
    %202 = vector.load %arg7[%c160_100, %c0_101] : memref<288x64xbf16, #tpu.memory_space<vmem>>, vector<32x64xbf16>
    %cst_102 = arith.constant dense<0.000000e+00> : vector<64x64xf32>
    %203 = tpu.matmul %201, %202, %cst_102 {dimension_numbers = #tpu.dot_dimension_numbers<[1], [0], [0], [1], [0, 0, 1, 1], [], []>} : vector<64x32xbf16>, vector<32x64xbf16>, vector<64x64xf32> -> vector<64x64xf32>
    %204 = arith.addf %199, %203 : vector<64x64xf32>
    %205 = vector.extract_strided_slice %173 {offsets = [384, 0], sizes = [64, 32], strides = [1, 1]} : vector<576x32xf32> to vector<64x32xf32>
    %206 = arith.truncf %205 : vector<64x32xf32> to vector<64x32xbf16>
    %c192_103 = arith.constant 192 : index
    %c0_104 = arith.constant 0 : index
    %207 = vector.load %arg7[%c192_103, %c0_104] : memref<288x64xbf16, #tpu.memory_space<vmem>>, vector<32x64xbf16>
    %cst_105 = arith.constant dense<0.000000e+00> : vector<64x64xf32>
    %208 = tpu.matmul %206, %207, %cst_105 {dimension_numbers = #tpu.dot_dimension_numbers<[1], [0], [0], [1], [0, 0, 1, 1], [], []>} : vector<64x32xbf16>, vector<32x64xbf16>, vector<64x64xf32> -> vector<64x64xf32>
    %209 = arith.addf %204, %208 : vector<64x64xf32>
    %210 = vector.extract_strided_slice %173 {offsets = [448, 0], sizes = [64, 32], strides = [1, 1]} : vector<576x32xf32> to vector<64x32xf32>
    %211 = arith.truncf %210 : vector<64x32xf32> to vector<64x32xbf16>
    %c224_106 = arith.constant 224 : index
    %c0_107 = arith.constant 0 : index
    %212 = vector.load %arg7[%c224_106, %c0_107] : memref<288x64xbf16, #tpu.memory_space<vmem>>, vector<32x64xbf16>
    %cst_108 = arith.constant dense<0.000000e+00> : vector<64x64xf32>
    %213 = tpu.matmul %211, %212, %cst_108 {dimension_numbers = #tpu.dot_dimension_numbers<[1], [0], [0], [1], [0, 0, 1, 1], [], []>} : vector<64x32xbf16>, vector<32x64xbf16>, vector<64x64xf32> -> vector<64x64xf32>
    %214 = arith.addf %209, %213 : vector<64x64xf32>
    %215 = vector.extract_strided_slice %173 {offsets = [512, 0], sizes = [64, 32], strides = [1, 1]} : vector<576x32xf32> to vector<64x32xf32>
    %216 = arith.truncf %215 : vector<64x32xf32> to vector<64x32xbf16>
    %c256_109 = arith.constant 256 : index
    %c0_110 = arith.constant 0 : index
    %217 = vector.load %arg7[%c256_109, %c0_110] : memref<288x64xbf16, #tpu.memory_space<vmem>>, vector<32x64xbf16>
    %cst_111 = arith.constant dense<0.000000e+00> : vector<64x64xf32>
    %218 = tpu.matmul %216, %217, %cst_111 {dimension_numbers = #tpu.dot_dimension_numbers<[1], [0], [0], [1], [0, 0, 1, 1], [], []>} : vector<64x32xbf16>, vector<32x64xbf16>, vector<64x64xf32> -> vector<64x64xf32>
    %219 = arith.addf %214, %218 : vector<64x64xf32>
    %220 = vector.extract_strided_slice %170 {offsets = [64, 0], sizes = [64, 32], strides = [1, 1]} : vector<128x32xbf16> to vector<64x32xbf16>
    %cst_112 = arith.constant dense<0.000000e+00> : vector<576x32xf32>
    %221 = tpu.matmul %171, %220, %cst_112 {dimension_numbers = #tpu.dot_dimension_numbers<[1], [0], [0], [1], [0, 0, 1, 1], [], []>} : vector<576x64xbf16>, vector<64x32xbf16>, vector<576x32xf32> -> vector<576x32xf32>
    %cst_113 = arith.constant 0.000000e+00 : f32
    %222 = vector.broadcast %cst_113 : f32 to vector<64x64xf32>
    %223 = vector.extract_strided_slice %221 {offsets = [0, 0], sizes = [64, 32], strides = [1, 1]} : vector<576x32xf32> to vector<64x32xf32>
    %224 = arith.truncf %223 : vector<64x32xf32> to vector<64x32xbf16>
    %c0_114 = arith.constant 0 : index
    %c0_115 = arith.constant 0 : index
    %225 = vector.load %arg7[%c0_114, %c0_115] : memref<288x64xbf16, #tpu.memory_space<vmem>>, vector<32x64xbf16>
    %cst_116 = arith.constant dense<0.000000e+00> : vector<64x64xf32>
    %226 = tpu.matmul %224, %225, %cst_116 {dimension_numbers = #tpu.dot_dimension_numbers<[1], [0], [0], [1], [0, 0, 1, 1], [], []>} : vector<64x32xbf16>, vector<32x64xbf16>, vector<64x64xf32> -> vector<64x64xf32>
    %227 = arith.addf %222, %226 : vector<64x64xf32>
    %228 = vector.extract_strided_slice %221 {offsets = [64, 0], sizes = [64, 32], strides = [1, 1]} : vector<576x32xf32> to vector<64x32xf32>
    %229 = arith.truncf %228 : vector<64x32xf32> to vector<64x32xbf16>
    %c32_117 = arith.constant 32 : index
    %c0_118 = arith.constant 0 : index
    %230 = vector.load %arg7[%c32_117, %c0_118] : memref<288x64xbf16, #tpu.memory_space<vmem>>, vector<32x64xbf16>
    %cst_119 = arith.constant dense<0.000000e+00> : vector<64x64xf32>
    %231 = tpu.matmul %229, %230, %cst_119 {dimension_numbers = #tpu.dot_dimension_numbers<[1], [0], [0], [1], [0, 0, 1, 1], [], []>} : vector<64x32xbf16>, vector<32x64xbf16>, vector<64x64xf32> -> vector<64x64xf32>
    %232 = arith.addf %227, %231 : vector<64x64xf32>
    %233 = vector.extract_strided_slice %221 {offsets = [128, 0], sizes = [64, 32], strides = [1, 1]} : vector<576x32xf32> to vector<64x32xf32>
    %234 = arith.truncf %233 : vector<64x32xf32> to vector<64x32xbf16>
    %c64_120 = arith.constant 64 : index
    %c0_121 = arith.constant 0 : index
    %235 = vector.load %arg7[%c64_120, %c0_121] : memref<288x64xbf16, #tpu.memory_space<vmem>>, vector<32x64xbf16>
    %cst_122 = arith.constant dense<0.000000e+00> : vector<64x64xf32>
    %236 = tpu.matmul %234, %235, %cst_122 {dimension_numbers = #tpu.dot_dimension_numbers<[1], [0], [0], [1], [0, 0, 1, 1], [], []>} : vector<64x32xbf16>, vector<32x64xbf16>, vector<64x64xf32> -> vector<64x64xf32>
    %237 = arith.addf %232, %236 : vector<64x64xf32>
    %238 = vector.extract_strided_slice %221 {offsets = [192, 0], sizes = [64, 32], strides = [1, 1]} : vector<576x32xf32> to vector<64x32xf32>
    %239 = arith.truncf %238 : vector<64x32xf32> to vector<64x32xbf16>
    %c96_123 = arith.constant 96 : index
    %c0_124 = arith.constant 0 : index
    %240 = vector.load %arg7[%c96_123, %c0_124] : memref<288x64xbf16, #tpu.memory_space<vmem>>, vector<32x64xbf16>
    %cst_125 = arith.constant dense<0.000000e+00> : vector<64x64xf32>
    %241 = tpu.matmul %239, %240, %cst_125 {dimension_numbers = #tpu.dot_dimension_numbers<[1], [0], [0], [1], [0, 0, 1, 1], [], []>} : vector<64x32xbf16>, vector<32x64xbf16>, vector<64x64xf32> -> vector<64x64xf32>
    %242 = arith.addf %237, %241 : vector<64x64xf32>
    %243 = vector.extract_strided_slice %221 {offsets = [256, 0], sizes = [64, 32], strides = [1, 1]} : vector<576x32xf32> to vector<64x32xf32>
    %244 = arith.truncf %243 : vector<64x32xf32> to vector<64x32xbf16>
    %c128_126 = arith.constant 128 : index
    %c0_127 = arith.constant 0 : index
    %245 = vector.load %arg7[%c128_126, %c0_127] : memref<288x64xbf16, #tpu.memory_space<vmem>>, vector<32x64xbf16>
    %cst_128 = arith.constant dense<0.000000e+00> : vector<64x64xf32>
    %246 = tpu.matmul %244, %245, %cst_128 {dimension_numbers = #tpu.dot_dimension_numbers<[1], [0], [0], [1], [0, 0, 1, 1], [], []>} : vector<64x32xbf16>, vector<32x64xbf16>, vector<64x64xf32> -> vector<64x64xf32>
    %247 = arith.addf %242, %246 : vector<64x64xf32>
    %248 = vector.extract_strided_slice %221 {offsets = [320, 0], sizes = [64, 32], strides = [1, 1]} : vector<576x32xf32> to vector<64x32xf32>
    %249 = arith.truncf %248 : vector<64x32xf32> to vector<64x32xbf16>
    %c160_129 = arith.constant 160 : index
    %c0_130 = arith.constant 0 : index
    %250 = vector.load %arg7[%c160_129, %c0_130] : memref<288x64xbf16, #tpu.memory_space<vmem>>, vector<32x64xbf16>
    %cst_131 = arith.constant dense<0.000000e+00> : vector<64x64xf32>
    %251 = tpu.matmul %249, %250, %cst_131 {dimension_numbers = #tpu.dot_dimension_numbers<[1], [0], [0], [1], [0, 0, 1, 1], [], []>} : vector<64x32xbf16>, vector<32x64xbf16>, vector<64x64xf32> -> vector<64x64xf32>
    %252 = arith.addf %247, %251 : vector<64x64xf32>
    %253 = vector.extract_strided_slice %221 {offsets = [384, 0], sizes = [64, 32], strides = [1, 1]} : vector<576x32xf32> to vector<64x32xf32>
    %254 = arith.truncf %253 : vector<64x32xf32> to vector<64x32xbf16>
    %c192_132 = arith.constant 192 : index
    %c0_133 = arith.constant 0 : index
    %255 = vector.load %arg7[%c192_132, %c0_133] : memref<288x64xbf16, #tpu.memory_space<vmem>>, vector<32x64xbf16>
    %cst_134 = arith.constant dense<0.000000e+00> : vector<64x64xf32>
    %256 = tpu.matmul %254, %255, %cst_134 {dimension_numbers = #tpu.dot_dimension_numbers<[1], [0], [0], [1], [0, 0, 1, 1], [], []>} : vector<64x32xbf16>, vector<32x64xbf16>, vector<64x64xf32> -> vector<64x64xf32>
    %257 = arith.addf %252, %256 : vector<64x64xf32>
    %258 = vector.extract_strided_slice %221 {offsets = [448, 0], sizes = [64, 32], strides = [1, 1]} : vector<576x32xf32> to vector<64x32xf32>
    %259 = arith.truncf %258 : vector<64x32xf32> to vector<64x32xbf16>
    %c224_135 = arith.constant 224 : index
    %c0_136 = arith.constant 0 : index
    %260 = vector.load %arg7[%c224_135, %c0_136] : memref<288x64xbf16, #tpu.memory_space<vmem>>, vector<32x64xbf16>
    %cst_137 = arith.constant dense<0.000000e+00> : vector<64x64xf32>
    %261 = tpu.matmul %259, %260, %cst_137 {dimension_numbers = #tpu.dot_dimension_numbers<[1], [0], [0], [1], [0, 0, 1, 1], [], []>} : vector<64x32xbf16>, vector<32x64xbf16>, vector<64x64xf32> -> vector<64x64xf32>
    %262 = arith.addf %257, %261 : vector<64x64xf32>
    %263 = vector.extract_strided_slice %221 {offsets = [512, 0], sizes = [64, 32], strides = [1, 1]} : vector<576x32xf32> to vector<64x32xf32>
    %264 = arith.truncf %263 : vector<64x32xf32> to vector<64x32xbf16>
    %c256_138 = arith.constant 256 : index
    %c0_139 = arith.constant 0 : index
    %265 = vector.load %arg7[%c256_138, %c0_139] : memref<288x64xbf16, #tpu.memory_space<vmem>>, vector<32x64xbf16>
    %cst_140 = arith.constant dense<0.000000e+00> : vector<64x64xf32>
    %266 = tpu.matmul %264, %265, %cst_140 {dimension_numbers = #tpu.dot_dimension_numbers<[1], [0], [0], [1], [0, 0, 1, 1], [], []>} : vector<64x32xbf16>, vector<32x64xbf16>, vector<64x64xf32> -> vector<64x64xf32>
    %267 = arith.addf %262, %266 : vector<64x64xf32>
    %268 = tpu.concatenate %219, %267 in 0 : vector<64x64xf32>, vector<64x64xf32> -> vector<128x64xf32>
    %269 = vector.broadcast %4 : vector<1x64xf32> to vector<128x64xf32>
    %270 = arith.addf %268, %269 : vector<128x64xf32>
    %cst_141 = arith.constant 2.000000e+01 : f32
    %271 = vector.broadcast %cst_141 : f32 to vector<128x64xf32>
    %272 = arith.minimumf %270, %271 : vector<128x64xf32>
    %273 = math.exp %272 : vector<128x64xf32>
    %cst_142 = arith.constant 2.000000e+00 : f32
    %274 = vector.broadcast %cst_142 : f32 to vector<128x64xf32>
    %275 = arith.addf %273, %274 : vector<128x64xf32>
    %276 = arith.mulf %273, %275 : vector<128x64xf32>
    %cst_143 = arith.constant 2.000000e+00 : f32
    %277 = vector.broadcast %cst_143 : f32 to vector<128x64xf32>
    %278 = arith.addf %276, %277 : vector<128x64xf32>
    %279 = tpu.reciprocal %278 {approx = true} : vector<128x64xf32> -> vector<128x64xf32>
    %280 = arith.mulf %276, %279 : vector<128x64xf32>
    %281 = arith.mulf %270, %280 : vector<128x64xf32>
    %282 = arith.addf %281, %153 : vector<128x64xf32>
    %c0_144 = arith.constant 0 : index
    %c0_145 = arith.constant 0 : index
    %283 = vector.load %arg8[%c0_144, %c0_145] : memref<64x64xbf16, #tpu.memory_space<vmem>>, vector<64x64xbf16>
    %284 = arith.truncf %282 : vector<128x64xf32> to vector<128x64xbf16>
    %cst_146 = arith.constant dense<0.000000e+00> : vector<128x64xf32>
    %285 = tpu.matmul %284, %283, %cst_146 {dimension_numbers = #tpu.dot_dimension_numbers<[1], [0], [0], [1], [0, 0, 1, 1], [], []>} : vector<128x64xbf16>, vector<64x64xbf16>, vector<128x64xf32> -> vector<128x64xf32>
    %286 = vector.broadcast %5 : vector<1x64xf32> to vector<128x64xf32>
    %287 = arith.addf %285, %286 : vector<128x64xf32>
    %cst_147 = arith.constant 2.000000e+01 : f32
    %288 = vector.broadcast %cst_147 : f32 to vector<128x64xf32>
    %289 = arith.minimumf %287, %288 : vector<128x64xf32>
    %290 = math.exp %289 : vector<128x64xf32>
    %cst_148 = arith.constant 2.000000e+00 : f32
    %291 = vector.broadcast %cst_148 : f32 to vector<128x64xf32>
    %292 = arith.addf %290, %291 : vector<128x64xf32>
    %293 = arith.mulf %290, %292 : vector<128x64xf32>
    %cst_149 = arith.constant 2.000000e+00 : f32
    %294 = vector.broadcast %cst_149 : f32 to vector<128x64xf32>
    %295 = arith.addf %293, %294 : vector<128x64xf32>
    %296 = tpu.reciprocal %295 {approx = true} : vector<128x64xf32> -> vector<128x64xf32>
    %297 = arith.mulf %293, %296 : vector<128x64xf32>
    %298 = arith.mulf %287, %297 : vector<128x64xf32>
    %299 = arith.truncf %298 : vector<128x64xf32> to vector<128x64xbf16>
    %c0_150 = arith.constant 0 : index
    %c0_151 = arith.constant 0 : index
    %300 = vector.load %arg9[%c0_150, %c0_151] : memref<128x64xbf16, #tpu.memory_space<vmem>>, vector<64x64xbf16>
    %cst_152 = arith.constant dense<0.000000e+00> : vector<128x64xf32>
    %301 = tpu.matmul %299, %300, %cst_152 {dimension_numbers = #tpu.dot_dimension_numbers<[1], [0], [0], [1], [0, 0, 1, 1], [], []>} : vector<128x64xbf16>, vector<64x64xbf16>, vector<128x64xf32> -> vector<128x64xf32>
    %c64_153 = arith.constant 64 : index
    %c0_154 = arith.constant 0 : index
    %302 = vector.load %arg9[%c64_153, %c0_154] : memref<128x64xbf16, #tpu.memory_space<vmem>>, vector<64x64xbf16>
    %cst_155 = arith.constant dense<0.000000e+00> : vector<128x64xf32>
    %303 = tpu.matmul %152, %302, %cst_155 {dimension_numbers = #tpu.dot_dimension_numbers<[1], [0], [0], [1], [0, 0, 1, 1], [], []>} : vector<128x64xbf16>, vector<64x64xbf16>, vector<128x64xf32> -> vector<128x64xf32>
    %304 = arith.addf %301, %303 : vector<128x64xf32>
    %305 = vector.broadcast %6 : vector<1x64xf32> to vector<128x64xf32>
    %306 = arith.addf %304, %305 : vector<128x64xf32>
    %cst_156 = arith.constant 2.000000e+01 : f32
    %307 = vector.broadcast %cst_156 : f32 to vector<128x64xf32>
    %308 = arith.minimumf %306, %307 : vector<128x64xf32>
    %309 = math.exp %308 : vector<128x64xf32>
    %cst_157 = arith.constant 2.000000e+00 : f32
    %310 = vector.broadcast %cst_157 : f32 to vector<128x64xf32>
    %311 = arith.addf %309, %310 : vector<128x64xf32>
    %312 = arith.mulf %309, %311 : vector<128x64xf32>
    %cst_158 = arith.constant 2.000000e+00 : f32
    %313 = vector.broadcast %cst_158 : f32 to vector<128x64xf32>
    %314 = arith.addf %312, %313 : vector<128x64xf32>
    %315 = tpu.reciprocal %314 {approx = true} : vector<128x64xf32> -> vector<128x64xf32>
    %316 = arith.mulf %312, %315 : vector<128x64xf32>
    %317 = arith.mulf %306, %316 : vector<128x64xf32>
    %c0_159 = arith.constant 0 : index
    %c0_160 = arith.constant 0 : index
    %318 = vector.load %arg11[%c0_159, %c0_160] : memref<128x64xf32, #tpu.memory_space<vmem>>, vector<128x64xf32>
    tpu.vector_store %arg11[%c0_159, %c0_160], %317 {strides = array<i32>} : memref<128x64xf32, #tpu.memory_space<vmem>>, vector<128x64xf32>,
    return
  }
}

</mosaic_0001>

<bundles_post_ra>
// kernel: downsample1_forward.1
= control target key start
LH: loop header
LB: loop body
LE: loop exit
PB: predicated region body
PF: predicated region fallthrough
CT: control target
= control target key end

     0   :  { %vm291_vm0 = vcmask 261120   ;;  %s14673_s0 = inlined_call_operand.vmem [shape: bf16[512,32], index: 0, kind: input, shape index: {}]   ;;  %s14674_s1 = inlined_call_operand.vmem [shape: bf16[576,256], index: 1, kind: input, shape index: {}]   ;;  %s14675_s2 = inlined_call_operand.vmem [shape: bf16[576,64], index: 2, kind: input, shape index: {}]   ;;  %s14676_s3 = inlined_call_operand.vmem [shape: bf16[32,32], index: 3, kind: input, shape index: {}]   ;;  %s14677_s4 = inlined_call_operand.vmem [shape: bf16[288,64], index: 4, kind: input, shape index: {}]   ;;  %s14678_s5 = inlined_call_operand.vmem [shape: bf16[64,128], index: 5, kind: input, shape index: {}]   ;;  %s14679_s6 = inlined_call_operand.vmem [shape: bf16[64,32], index: 6, kind: input, shape index: {}]   ;;  %s14680_s7 = inlined_call_operand.vmem [shape: bf16[288,64], index: 7, kind: input, shape index: {}]   ;;  %s14681_s8 = inlined_call_operand.vmem [shape: bf16[64,64], index: 8, kind: input, shape index: {}]   ;;  %s14682_s9 = inlined_call_operand.vmem [shape: bf16[128,64], index: 9, kind: input, shape index: {}]   ;;  %s14683_s10 = inlined_call_operand.vmem [shape: f32[8,128], index: 10, kind: input, shape index: {}]   ;;  %s14684_s11 = inlined_call_operand.hbm [shape: f32[128,64], index: 11, kind: output, shape index: {}]  }
   0x1   :  { %v10639_v0 = vld [vmem:[%s14676_s3] sm:$0xff]   ;;  %v10640_v1 = vld [vmem:[%s14676_s3 + $0x8] sm:$0xff]   ;;  %v10643_v4 = vld [vmem:[%s14673_s0 + $0x10] sm:$0xff]  }
   0x2   :  { %9550 = vmatprep.subr.bf16.mxu0 %v10639_v0  ;;  %v10641_v2 = vld [vmem:[%s14673_s0] sm:$0xff]   ;;  %v10642_v3 = vld [vmem:[%s14673_s0 + $0x8] sm:$0xff]   ;;  %v10644_v5 = vld [vmem:[%s14673_s0 + $0x18] sm:$0xff]  }
   0x3   :  { %9551 = vmatpush3.bf16.msra.mxu0 %v10639_v0  ;;  %9554 = vmatprep.mubr.msk.bf16.mxu0 %vm291_vm0, %v10641_v2  ;;  %v10645_v6 = vld [vmem:[%s14673_s0 + $0x20] sm:$0xff]   ;;  %v10646_v7 = vld [vmem:[%s14673_s0 + $0x28] sm:$0xff]   ;;  %v10647_v8 = vld [vmem:[%s14673_s0 + $0x30] sm:$0xff]  }
   0x4   :  { %9552 = vmatprep.subr.bf16.mxu0 %v10640_v1  ;;  %v10648_v9 = vld [vmem:[%s14673_s0 + $0x38] sm:$0xff]   ;;  %v10649_v10 = vld [vmem:[%s14673_s0 + $0x40] sm:$0xff]   ;;  %v10650_v11 = vld [vmem:[%s14673_s0 + $0x48] sm:$0xff]  }
   0x5   :  { %v10651_v12 = vld [vmem:[%s14673_s0 + $0x50] sm:$0xff]   ;;  %v10652_v13 = vld [vmem:[%s14673_s0 + $0x58] sm:$0xff]   ;;  %v10653_v14 = vld [vmem:[%s14673_s0 + $0x60] sm:$0xff]  }
   0x6   :  { %v10654_v15 = vld [vmem:[%s14673_s0 + $0x68] sm:$0xff]   ;;  %v10655_v16 = vld [vmem:[%s14673_s0 + $0x70] sm:$0xff]   ;;  %v10656_v17 = vld [vmem:[%s14673_s0 + $0x78] sm:$0xff]  }
   0x7   :  { %9553 = vmatpush3.bf16.msra.mxu0 %v10640_v1 }
   0xa   :  { %9555 = vmatmul.mubr.msk.bf16.vlgmr.msra.gmra.mrb[0].mxu0 %vm291_vm0, %v10642_v3 }
   0xb   :  { %9558 = vmatprep.mubr.msk.bf16.mxu0 %vm291_vm0, %v10643_v4 }
  0x12   :  { %9559 = vmatmul.mubr.msk.bf16.gmra.mrb[4].mxu0 %vm291_vm0, %v10644_v5 }
  0x13   :  { %9562 = vmatprep.mubr.msk.bf16.mxu0 %vm291_vm0, %v10645_v6 }
  0x1a   :  { %9563 = vmatmul.mubr.msk.bf16.gmra.mrb[8].mxu0 %vm291_vm0, %v10646_v7 }
  0x1b   :  { %9566 = vmatprep.mubr.msk.bf16.mxu0 %vm291_vm0, %v10647_v8 }
  0x22   :  { %9567 = vmatmul.mubr.msk.bf16.gmra.mrb[12].mxu0 %vm291_vm0, %v10648_v9 }
  0x23   :  { %9570 = vmatprep.mubr.msk.bf16.mxu0 %vm291_vm0, %v10649_v10 }
  0x2a   :  { %9571 = vmatmul.mubr.msk.bf16.gmra.mrb[16].mxu0 %vm291_vm0, %v10650_v11 }
  0x2b   :  { %9574 = vmatprep.mubr.msk.bf16.mxu0 %vm291_vm0, %v10651_v12 }
  0x32   :  { %9575 = vmatmul.mubr.msk.bf16.gmra.mrb[20].mxu0 %vm291_vm0, %v10652_v13 }
  0x33   :  { %9578 = vmatprep.mubr.msk.bf16.mxu0 %vm291_vm0, %v10653_v14 }
  0x3a   :  { %9579 = vmatmul.mubr.msk.bf16.gmra.mrb[24].mxu0 %vm291_vm0, %v10654_v15 }
  0x3b   :  { %9582 = vmatprep.mubr.msk.bf16.mxu0 %vm291_vm0, %v10655_v16 }
  0x42   :  { %9583 = vmatmul.mubr.msk.bf16.gmra.mrb[28].mxu0 %vm291_vm0, %v10656_v17 }
  0x43   :  { %16 = vsyncpa [#allocation3], 0  ;;  %v14685_v18 = vmov 0   ;;  %v10657_v19 = vld [vmem:[%s14673_s0 + $0x80] sm:$0xff]   ;;  %v10658_v20 = vld [vmem:[%s14673_s0 + $0x88] sm:$0xff]   ;;  %vm4281_vm1 = vcmask 523264  }
  0x44   :  { %1717 = vmatprep.subr.bf16.mxu0 %v14685_v18  ;;  %10330 = vmatprep.subr.bf16.mxu1 %v14685_v18  ;;  %v10659_v21 = vld [vmem:[%s14673_s0 + $0x90] sm:$0xff]   ;;  %v10660_v22 = vld [vmem:[%s14673_s0 + $0x98] sm:$0xff]   ;;  %v10661_v23 = vld [vmem:[%s14673_s0 + $0xa0] sm:$0xff]  }
  0x45   :  { %9586 = vmatprep.mubr.msk.bf16.mxu0 %vm291_vm0, %v10657_v19  ;;  %v10662_v24 = vld [vmem:[%s14673_s0 + $0xa8] sm:$0xff]   ;;  %v10663_v25 = vld [vmem:[%s14673_s0 + $0xb0] sm:$0xff]   ;;  %v10667_v27 = vld [vmem:[%s14673_s0 + $0xb8] sm:$0xff]  }
  0x46   :  { %v10666_v26 = vld [vmem:[%s14674_s1 + $0x24] ss:$8 sps:$4 sm:$0xff]   ;;  %v11771_v29 = vld [vmem:[%s14683_s10] ss:$0 sm:$0xff]  ;;  %v10673_v39 = vld [vmem:[%s14673_s0 + $0xd0] sm:$0xff]  }
  0x47   :  { %1765 = vmatprep.mubr.bf16.mxu1 %v10666_v26  ;;  %v10668_v28 = vld [vmem:[%s14673_s0 + $0xc0] sm:$0xff]   ;;  %v10671_v30 = vld [vmem:[%s14673_s0 + $0xc8] sm:$0xff]   ;;  %v10676_v47 = vld [vmem:[%s14673_s0 + $0xd8] sm:$0xff]  }
  0x48   :  { %v10678_v57 = vld [vmem:[%s14673_s0 + $0xe0] sm:$0xff]   ;;  %v10681_v1 = vld [vmem:[%s14673_s0 + $0xe8] sm:$0xff]   ;;  %v10683_v16 = vld [vmem:[%s14673_s0 + $0xf0] sm:$0xff]  }
  0x4a   :  { %9587 = vmatmul.mubr.msk.bf16.gmra.mrb[32].mxu0 %vm291_vm0, %v10658_v20 }
  0x4b   :  { %9590 = vmatprep.mubr.msk.bf16.mxu0 %vm291_vm0, %v10659_v21 }
  0x52   :  { %9591 = vmatmul.mubr.msk.bf16.gmra.mrb[36].mxu0 %vm291_vm0, %v10660_v22 }
  0x53   :  { %9594 = vmatprep.mubr.msk.bf16.mxu0 %vm291_vm0, %v10661_v23 }
  0x5a   :  { %9595 = vmatmul.mubr.msk.bf16.gmra.mrb[40].mxu0 %vm291_vm0, %v10662_v24 }
  0x5b   :  { %9598 = vmatprep.mubr.msk.bf16.mxu0 %vm291_vm0, %v10663_v25 }
  0x62   :  { %9599 = vmatmul.mubr.msk.bf16.gmra.mrb[44].mxu0 %vm291_vm0, %v10667_v27 }
  0x63   :  { %9602 = vmatprep.mubr.msk.bf16.mxu0 %vm291_vm0, %v10668_v28 }
  0x6a   :  { %9603 = vmatmul.mubr.msk.bf16.gmra.mrb[48].mxu0 %vm291_vm0, %v10671_v30 }
  0x6b   :  { %9606 = vmatprep.mubr.msk.bf16.mxu0 %vm291_vm0, %v10673_v39 }
  0x72   :  { %9607 = vmatmul.mubr.msk.bf16.gmra.mrb[52].mxu0 %vm291_vm0, %v10676_v47 }
  0x73   :  { %9610 = vmatprep.mubr.msk.bf16.mxu0 %vm291_vm0, %v10678_v57 }
  0x7a   :  { %9611 = vmatmul.mubr.msk.bf16.gmra.mrb[56].mxu0 %vm291_vm0, %v10681_v1 }
  0x7b   :  { %9614 = vmatprep.mubr.msk.bf16.mxu0 %vm291_vm0, %v10683_v16 }
  0xdd   :  { %v9556_v31 = vpop.f32.mrb[0].mxu0 }
  0xde   :  { %v11777_v32 = vadd.f32 %v9556_v31, %v11771_v29  ;;  %v422_v33 = vpop.f32.mrb[1].mxu0 }
  0xdf   :  { %v11780_v34 = vadd.f32 %v11771_v29, %v422_v33  ;;  %v9557_v35 = vpop.f32.mrb[2].mxu0 }
  0xe0   :  { %v679_v36 = vmin.f32 %v11777_v32, 20.0  ;;  %v11784_v37 = vadd.f32 %v9557_v35, %v11771_v29  ;;  %v425_v38 = vpop.f32.mrb[3].mxu0  ;;  %v10686_v35 = vld [vmem:[%s14673_s0 + $0xf8] sm:$0xff]  }
  0xe1   :  { %v677_v40 = vmin.f32 %v11780_v34, 20.0  ;;  %v11792_v41 = vadd.f32 %v11771_v29, %v425_v38  ;;  %9615 = vmatmul.mubr.msk.bf16.gmra.mrb[60].mxu0 %vm291_vm0, %v10686_v35 }
  0xe2   :  { %v745_v42 = vmul.f32 1.442695, %v679_v36  ;;  %v680_v43 = vmin.f32 %v11784_v37, 20.0 }
  0xe3   :  { %v741_v44 = vmul.f32 1.442695, %v677_v40  ;;  %v678_v45 = vmin.f32 %v11792_v41, 20.0 }
  0xe4   :  { %10873 = vpow2.f32 %v745_v42  ;;  %v747_v46 = vmul.f32 1.442695, %v680_v43 }
  0xe5   :  { %10875 = vpow2.f32 %v741_v44  ;;  %v743_v48 = vmul.f32 1.442695, %v678_v45  ;;  %v9560_v49 = vpop.f32.mrb[4].mxu0 }
  0xe6   :  { %10877 = vpow2.f32 %v747_v46  ;;  %v11801_v50 = vadd.f32 %v9560_v49, %v11771_v29  ;;  %v438_v51 = vpop.f32.mrb[5].mxu0 }
  0xe7   :  { %10879 = vpow2.f32 %v743_v48  ;;  %v11804_v52 = vadd.f32 %v11771_v29, %v438_v51  ;;  %v9561_v53 = vpop.f32.mrb[6].mxu0 }
  0xe8   :  { %v683_v54 = vmin.f32 %v11801_v50, 20.0  ;;  %v11808_v55 = vadd.f32 %v9561_v53, %v11771_v29  ;;  %v441_v56 = vpop.f32.mrb[7].mxu0 }
  0xe9   :  { %v681_v58 = vmin.f32 %v11804_v52, 20.0  ;;  %v11816_v59 = vadd.f32 %v11771_v29, %v441_v56 }
  0xea   :  { %v753_v60 = vmul.f32 1.442695, %v683_v54  ;;  %v684_v61 = vmin.f32 %v11808_v55, 20.0 }
  0xeb   :  { %v749_v62 = vmul.f32 1.442695, %v681_v58  ;;  %v682_v63 = vmin.f32 %v11816_v59, 20.0 }
  0xec   :  { %10881 = vpow2.f32 %v753_v60  ;;  %v755_v0 = vmul.f32 1.442695, %v684_v61 }
  0xed   :  { %10883 = vpow2.f32 %v749_v62  ;;  %v751_v2 = vmul.f32 1.442695, %v682_v63  ;;  %v9564_v3 = vpop.f32.mrb[8].mxu0 }
  0xee   :  { %v10874_v4 = vpop.eup %10873  ;;  %10885 = vpow2.f32 %v755_v0  ;;  %v11825_v5 = vadd.f32 %v9564_v3, %v11771_v29  ;;  %v454_v6 = vpop.f32.mrb[9].mxu0  ;;  %v10690_v0 = vld [vmem:[%s14674_s1 + $0x4] ss:$8 sps:$4 sm:$0xff]  }
  0xef   :  { %v10876_v7 = vpop.eup %10875  ;;  %v871_v8 = vadd.f32 2.0, %v10874_v4  ;;  %10887 = vpow2.f32 %v751_v2  ;;  %v11828_v9 = vadd.f32 %v11771_v29, %v454_v6  ;;  %v9565_v10 = vpop.f32.mrb[10].mxu0  ;;  %1749 = vmatprep.mubr.bf16.mxu0 %v10690_v0 }
  0xf0   :  { %v10878_v11 = vpop.eup %10877  ;;  %v869_v12 = vadd.f32 2.0, %v10876_v7  ;;  %v687_v13 = vmin.f32 %v11825_v5, 20.0  ;;  %v11832_v14 = vadd.f32 %v9565_v10, %v11771_v29  ;;  %v457_v15 = vpop.f32.mrb[11].mxu0 }
  0xf1   :  { %v10880_v17 = vpop.eup %10879  ;;  %v11838_v19 = vmul.f32 %v10874_v4, %v871_v8  ;;  %v872_v20 = vadd.f32 2.0, %v10878_v11  ;;  %v685_v21 = vmin.f32 %v11828_v9, 20.0  ;;  %v11842_v22 = vadd.f32 %v11771_v29, %v457_v15 }
  0xf2   :  { %v11844_v23 = vmul.f32 %v10876_v7, %v869_v12  ;;  %v870_v24 = vadd.f32 2.0, %v10880_v17  ;;  %v761_v25 = vmul.f32 1.442695, %v687_v13  ;;  %v688_v26 = vmin.f32 %v11832_v14, 20.0 }
  0xf3   :  { %v999_v27 = vadd.f32 2.0, %v11838_v19  ;;  %v11849_v28 = vmul.f32 %v10878_v11, %v872_v20  ;;  %v686_v30 = vmin.f32 %v11842_v22, 20.0  ;;  %v757_v38 = vmul.f32 1.442695, %v685_v21 }
  0xf4   :  { %v997_v31 = vadd.f32 2.0, %v11844_v23  ;;  %v11853_v33 = vmul.f32 %v10880_v17, %v870_v24  ;;  %10889 = vpow2.f32 %v761_v25  ;;  %v763_v43 = vmul.f32 1.442695, %v688_v26 }
  0xf5   :  { %10891 = vrcp.f32 %v999_v27  ;;  %v1000_v36 = vadd.f32 2.0, %v11849_v28  ;;  %v9568_v39 = vpop.f32.mrb[12].mxu0  ;;  %v759_v48 = vmul.f32 1.442695, %v686_v30 }
  0xf6   :  { %v10882_v40 = vpop.eup %10881  ;;  %10893 = vrcp.f32 %v997_v31  ;;  %v998_v42 = vadd.f32 2.0, %v11853_v33  ;;  %v11861_v44 = vadd.f32 %v9568_v39, %v11771_v29  ;;  %v470_v45 = vpop.f32.mrb[13].mxu0 }
  0xf7   :  { %v10884_v46 = vpop.eup %10883  ;;  %10895 = vrcp.f32 %v1000_v36  ;;  %v875_v47 = vadd.f32 2.0, %v10882_v40  ;;  %v11864_v49 = vadd.f32 %v11771_v29, %v470_v45  ;;  %v9569_v51 = vpop.f32.mrb[14].mxu0 }
  0xf8   :  { %v10886_v53 = vpop.eup %10885  ;;  %10897 = vrcp.f32 %v998_v42  ;;  %v873_v54 = vadd.f32 2.0, %v10884_v46  ;;  %v691_v56 = vmin.f32 %v11861_v44, 20.0  ;;  %v11868_v57 = vadd.f32 %v9569_v51, %v11771_v29  ;;  %v473_v58 = vpop.f32.mrb[15].mxu0 }
  0xf9   :  { %v10888_v60 = vpop.eup %10887  ;;  %v11871_v61 = vmul.f32 %v10882_v40, %v875_v47  ;;  %v876_v62 = vadd.f32 2.0, %v10886_v53  ;;  %10899 = vpow2.f32 %v757_v38  ;;  %v689_v63 = vmin.f32 %v11864_v49, 20.0 }
  0xfa   :  { %v11877_v1 = vmul.f32 %v10884_v46, %v873_v54  ;;  %v874_v2 = vadd.f32 2.0, %v10888_v60  ;;  %10901 = vpow2.f32 %v763_v43  ;;  %v769_v3 = vmul.f32 1.442695, %v691_v56 }
  0xfb   :  { %v1003_v4 = vadd.f32 2.0, %v11871_v61  ;;  %v11880_v6 = vmul.f32 %v10886_v53, %v876_v62  ;;  %10903 = vpow2.f32 %v759_v48  ;;  %v692_v10 = vmin.f32 %v11868_v57, 20.0 }
  0xfc   :  { %v1001_v7 = vadd.f32 2.0, %v11877_v1  ;;  %v11883_v8 = vmul.f32 %v10888_v60, %v874_v2  ;;  %10905 = vpow2.f32 %v769_v3  ;;  %v765_v12 = vmul.f32 1.442695, %v689_v63 }
  0xfd   :  { %10907 = vrcp.f32 %v1003_v4  ;;  %v1004_v11 = vadd.f32 2.0, %v11880_v6  ;;  %v11888_v13 = vadd.f32 %v11771_v29, %v473_v58  ;;  %v9572_v15 = vpop.f32.mrb[16].mxu0  ;;  %v771_v20 = vmul.f32 1.442695, %v692_v10 }
  0xfe   :  { %v10890_v16 = vpop.eup %10889  ;;  %10909 = vrcp.f32 %v1001_v7  ;;  %v1002_v17 = vadd.f32 2.0, %v11883_v8  ;;  %v11892_v21 = vadd.f32 %v9572_v15, %v11771_v29  ;;  %v486_v24 = vpop.f32.mrb[17].mxu0 }
  0xff   :  { %v10892_v25 = vpop.eup %10891  ;;  %10911 = vrcp.f32 %v1004_v11  ;;  %v879_v26 = vadd.f32 2.0, %v10890_v16  ;;  %v690_v27 = vmin.f32 %v11888_v13, 20.0  ;;  %v11896_v30 = vadd.f32 %v11771_v29, %v486_v24  ;;  %v9573_v31 = vpop.f32.mrb[18].mxu0 }
 0x100   :  { %v10894_v35 = vpop.eup %10893  ;;  %v1127_v36 = vmul.f32 %v10892_v25, %v11838_v19  ;;  %10913 = vrcp.f32 %v1002_v17  ;;  %v695_v38 = vmin.f32 %v11892_v21, 20.0  ;;  %v11901_v39 = vadd.f32 %v9573_v31, %v11771_v29  ;;  %v11903_v40 = vpop.f32.mrb[19].mxu0 }
 0x101   :  { %v10896_v42 = vpop.eup %10895  ;;  %v1125_v43 = vmul.f32 %v10894_v35, %v11844_v23  ;;  %v11906_v45 = vmul.f32 %v10890_v16, %v879_v26  ;;  %10915 = vpow2.f32 %v765_v12  ;;  %v767_v46 = vmul.f32 1.442695, %v690_v27 }
 0x102   :  { %v10898_v47 = vpop.eup %10897  ;;  %v1191_v48 = vmul.f32 %v1127_v36, %v11777_v32  ;;  %v1128_v19 = vmul.f32 %v10896_v42, %v11849_v28  ;;  %10917 = vpow2.f32 %v771_v20  ;;  %v777_v51 = vmul.f32 1.442695, %v695_v38 }
 0x103   :  { %v10900_v53 = vpop.eup %10899  ;;  %v1189_v54 = vmul.f32 %v1125_v43, %v11780_v34  ;;  %v1126_v56 = vmul.f32 %v10898_v47, %v11853_v33  ;;  %v1007_v58 = vadd.f32 2.0, %v11906_v45  ;;  %10919 = vpow2.f32 %v767_v46 }
 0x104   :  { %v10902_v23 = vpop.eup %10901  ;;  %v1192_v60 = vmul.f32 %v1128_v19, %v11784_v37  ;;  %v877_v62 = vadd.f32 2.0, %v10900_v53  ;;  %10921 = vpow2.f32 %v777_v51  ;;  %v693_v63 = vmin.f32 %v11896_v30, 20.0 }
 0x105   :  { %v10904_v32 = vpop.eup %10903  ;;  %v1190_v28 = vmul.f32 %v1126_v56, %v11792_v41  ;;  %10923 = vrcp.f32 %v1007_v58  ;;  %v880_v0 = vadd.f32 2.0, %v10902_v23  ;;  %v696_v2 = vmin.f32 %v11901_v39, 20.0  ;;  %v9576_v34 = vpop.f32.mrb[20].mxu0 }
 0x106   :  { %v10906_v3 = vpop.eup %10905  ;;  %v1254_v33 = vpack.c.bf16 %v1192_v60, %v1191_v48  ;;  %v11917_v4 = vmul.f32 %v10900_v53, %v877_v62  ;;  %v878_v7 = vadd.f32 2.0, %v10904_v32  ;;  %v773_v10 = vmul.f32 1.442695, %v693_v63  ;;  %v11919_v11 = vpop.f32.mrb[21].mxu0 }
 0x107   :  { %v10908_v37 = vpop.eup %10907  ;;  %v1253_v12 = vpack.c.bf16 %v1190_v28, %v1189_v54  ;;  %v11921_v15 = vmul.f32 %v10902_v23, %v880_v0  ;;  %v883_v16 = vadd.f32 2.0, %v10906_v3  ;;  %v779_v17 = vmul.f32 1.442695, %v696_v2  ;;  %v11923_v41 = vpop.f32.mrb[22].mxu0 }
 0x108   :  { %v10910_v20 = vpop.eup %10909  ;;  %v1131_v24 = vmul.f32 %v10908_v37, %v11871_v61  ;;  %v1005_v25 = vadd.f32 2.0, %v11917_v4  ;;  %v11927_v26 = vmul.f32 %v10904_v32, %v878_v7  ;;  %10925 = vpow2.f32 %v773_v10  ;;  %v11929_v27 = vpop.f32.mrb[23].mxu0 }
 0x109   :  { %v10912_v31 = vpop.eup %10911  ;;  %v1129_v35 = vmul.f32 %v10910_v20, %v11877_v1  ;;  %v1008_v36 = vadd.f32 2.0, %v11921_v15  ;;  %v11933_v38 = vmul.f32 %v10906_v3, %v883_v16  ;;  %10927 = vpow2.f32 %v779_v17  ;;  %1718 = vmatpush1.bf16.msra.mxu0 %v1253_v12  ;;  %10346 = vmatpush1.bf16.msra.mxu1 %v1253_v12 }
 0x10a   :  { %v10914_v42 = vpop.eup %10913  ;;  %v1195_v61 = vmul.f32 %v1131_v24, %v11801_v50  ;;  %v1132_v43 = vmul.f32 %v10912_v31, %v11880_v6  ;;  %10929 = vrcp.f32 %v1005_v25  ;;  %v1006_v46 = vadd.f32 2.0, %v11927_v26  ;;  %1719 = vmatprep.subr.bf16.mxu0 %v14685_v18  ;;  %10331 = vmatprep.subr.bf16.mxu1 %v14685_v18 }
 0x10b   :  { %v10916_v1 = vpop.eup %10915  ;;  %v1193_v47 = vmul.f32 %v1129_v35, %v11804_v52  ;;  %v1130_v48 = vmul.f32 %v10914_v42, %v11883_v8  ;;  %10931 = vrcp.f32 %v1008_v36  ;;  %v1011_v19 = vadd.f32 2.0, %v11933_v38 }
 0x10c   :  { %v10918_v51 = vpop.eup %10917  ;;  %v1196_v50 = vmul.f32 %v1132_v43, %v11808_v55  ;;  %10933 = vrcp.f32 %v1006_v46  ;;  %v881_v6 = vadd.f32 2.0, %v10916_v1  ;;  %v11946_v53 = vadd.f32 %v11771_v29, %v11903_v40 }
 0x10d   :  { %v10920_v54 = vpop.eup %10919  ;;  %v1194_v56 = vmul.f32 %v1130_v48, %v11816_v59  ;;  %10935 = vrcp.f32 %v1011_v19  ;;  %v884_v58 = vadd.f32 2.0, %v10918_v51  ;;  %v11950_v52 = vadd.f32 %v9576_v34, %v11771_v29  ;;  %v11952_v8 = vpop.f32.mrb[24].mxu0  ;;  %1720 = vmatpush1.bf16.msra.mxu0 %v1254_v33  ;;  %10347 = vmatpush1.bf16.msra.mxu1 %v1254_v33 }
 0x10e   :  { %v10922_v23 = vpop.eup %10921  ;;  %v1256_v55 = vpack.c.bf16 %v1196_v50, %v1195_v61  ;;  %v11954_v60 = vmul.f32 %v10916_v1, %v881_v6  ;;  %v882_v62 = vadd.f32 2.0, %v10920_v54  ;;  %v694_v40 = vmin.f32 %v11946_v53, 20.0  ;;  %v11957_v63 = vpop.f32.mrb[25].mxu0  ;;  %1721 = vmatprep.subr.bf16.mxu0 %v14685_v18  ;;  %10332 = vmatprep.subr.bf16.mxu1 %v14685_v18 }
 0x10f   :  { %v10924_v59 = vpop.eup %10923  ;;  %v1255_v32 = vpack.c.bf16 %v1194_v56, %v1193_v47  ;;  %v11961_v28 = vmul.f32 %v10918_v51, %v884_v58  ;;  %v887_v0 = vadd.f32 2.0, %v10922_v23  ;;  %v699_v2 = vmin.f32 %v11950_v52, 20.0  ;;  %v11964_v34 = vpop.f32.mrb[26].mxu0 }
 0x110   :  { %v1135_v3 = vmul.f32 %v10924_v59, %v11906_v45  ;;  %v1009_v33 = vadd.f32 2.0, %v11954_v60  ;;  %v11968_v7 = vmul.f32 %v10920_v54, %v882_v62  ;;  %v775_v10 = vmul.f32 1.442695, %v694_v40  ;;  %v11970_v37 = vpop.f32.mrb[27].mxu0 }
 0x111   :  { %v1012_v12 = vadd.f32 2.0, %v11961_v28  ;;  %v11973_v16 = vmul.f32 %v10922_v23, %v887_v0  ;;  %v785_v17 = vmul.f32 1.442695, %v699_v2  ;;  %v11977_v20 = vadd.f32 %v11771_v29, %v11919_v11  ;;  %1722 = vmatpush1.bf16.msra.mxu0 %v1255_v32  ;;  %10348 = vmatpush1.bf16.msra.mxu1 %v1255_v32 }
 0x112   :  { %v10926_v24 = vpop.eup %10925  ;;  %v1199_v45 = vmul.f32 %v1135_v3, %v11825_v5  ;;  %10937 = vrcp.f32 %v1009_v33  ;;  %v1010_v25 = vadd.f32 2.0, %v11968_v7  ;;  %v11983_v31 = vadd.f32 %v11923_v41, %v11771_v29  ;;  %1723 = vmatprep.subr.bf16.mxu0 %v14685_v18  ;;  %10333 = vmatprep.subr.bf16.mxu1 %v14685_v18 }
 0x113   :  { %v10928_v35 = vpop.eup %10927  ;;  %10939 = vrcp.f32 %v1012_v12  ;;  %v1015_v11 = vadd.f32 2.0, %v11973_v16  ;;  %v885_v36 = vadd.f32 2.0, %v10926_v24  ;;  %v697_v42 = vmin.f32 %v11977_v20, 20.0 }
 0x114   :  { %v10930_v61 = vpop.eup %10929  ;;  %10941 = vrcp.f32 %v1010_v25  ;;  %v888_v5 = vadd.f32 2.0, %v10928_v35  ;;  %v700_v43 = vmin.f32 %v11983_v31, 20.0  ;;  %v11992_v41 = vadd.f32 %v11771_v29, %v11929_v27 }
 0x115   :  { %v10932_v46 = vpop.eup %10931  ;;  %v1133_v1 = vmul.f32 %v10930_v61, %v11917_v4  ;;  %10943 = vrcp.f32 %v1015_v11  ;;  %v11995_v47 = vmul.f32 %v10926_v24, %v885_v36  ;;  %v781_v48 = vmul.f32 1.442695, %v697_v42  ;;  %v9584_v19 = vpop.f32.mrb[28].mxu0  ;;  %1724 = vmatpush1.bf16.msra.mxu0 %v1256_v55  ;;  %10349 = vmatpush1.bf16.msra.mxu1 %v1256_v55 }
 0x116   :  { %v10934_v51 = vpop.eup %10933  ;;  %v1136_v50 = vmul.f32 %v10932_v46, %v11921_v15  ;;  %v11998_v6 = vmul.f32 %v10928_v35, %v888_v5  ;;  %10945 = vpow2.f32 %v775_v10  ;;  %v787_v54 = vmul.f32 1.442695, %v700_v43  ;;  %v534_v56 = vpop.f32.mrb[29].mxu0  ;;  %1725 = vmatprep.subr.bf16.mxu0 %v14685_v18  ;;  %10334 = vmatprep.subr.bf16.mxu1 %v14685_v18 }
 0x117   :  { %v10936_v4 = vpop.eup %10935  ;;  %v1197_v27 = vmul.f32 %v1133_v1, %v11828_v9  ;;  %v1134_v58 = vmul.f32 %v10934_v51, %v11927_v26  ;;  %v1013_v23 = vadd.f32 2.0, %v11995_v47  ;;  %10947 = vpow2.f32 %v785_v17  ;;  %v12005_v55 = vpop.f32.mrb[30].mxu0 }
 0x118   :  { %v1200_v15 = vmul.f32 %v1136_v50, %v11832_v14  ;;  %v1139_v62 = vmul.f32 %v10936_v4, %v11933_v38  ;;  %v1016_v40 = vadd.f32 2.0, %v11998_v6  ;;  %10949 = vpow2.f32 %v781_v48  ;;  %v12010_v59 = vpop.f32.mrb[31].mxu0 }
 0x119   :  { %v1198_v32 = vmul.f32 %v1134_v58, %v11842_v22  ;;  %10951 = vrcp.f32 %v1013_v23  ;;  %v698_v9 = vmin.f32 %v11992_v41, 20.0  ;;  %v12016_v26 = vadd.f32 %v11952_v8, %v11771_v29 }
 0x11a   :  { %v1258_v0 = vpack.c.bf16 %v1200_v15, %v1199_v45  ;;  %10953 = vrcp.f32 %v1016_v40  ;;  %v12020_v14 = vadd.f32 %v11771_v29, %v11957_v63  ;;  %v12026_v10 = vadd.f32 %v11964_v34, %v11771_v29 }
 0x11b   :  { %v1257_v38 = vpack.c.bf16 %v1198_v32, %v1197_v27  ;;  %10955 = vpow2.f32 %v787_v54  ;;  %v783_v2 = vmul.f32 1.442695, %v698_v9  ;;  %v703_v3 = vmin.f32 %v12016_v26, 20.0 }
 0x11c   :  { %v10938_v33 = vpop.eup %10937  ;;  %v701_v22 = vmin.f32 %v12020_v14, 20.0  ;;  %v12030_v8 = vadd.f32 %v11771_v29, %v11970_v37  ;;  %v12033_v12 = vadd.f32 %v9584_v19, %v11771_v29  ;;  %v1203_v17 = vmul.f32 %v1139_v62, %v11861_v44 }
 0x11d   :  { %v10940_v63 = vpop.eup %10939  ;;  %v1137_v24 = vmul.f32 %v10938_v33, %v11954_v60  ;;  %10957 = vpow2.f32 %v783_v2  ;;  %v793_v45 = vmul.f32 1.442695, %v703_v3  ;;  %1726 = vmatpush1.bf16.msra.mxu0 %v1257_v38  ;;  %10350 = vmatpush1.bf16.msra.mxu1 %v1257_v38  ;;  %v704_v11 = vmin.f32 %v12026_v10, 20.0 }
 0x11e   :  { %v10942_v25 = vpop.eup %10941  ;;  %v1140_v34 = vmul.f32 %v10940_v63, %v11961_v28  ;;  %v789_v35 = vmul.f32 1.442695, %v701_v22  ;;  %v702_v37 = vmin.f32 %v12030_v8, 20.0  ;;  %1727 = vmatprep.subr.bf16.mxu0 %v14685_v18  ;;  %10335 = vmatprep.subr.bf16.mxu1 %v14685_v18  ;;  %v707_v60 = vmin.f32 %v12033_v12, 20.0 }
 0x11f   :  { %v10944_v36 = vpop.eup %10943  ;;  %v1138_v44 = vmul.f32 %v10942_v25, %v11968_v7  ;;  %10959 = vpow2.f32 %v793_v45  ;;  %v12045_v42 = vadd.f32 %v11771_v29, %v534_v56  ;;  %v1201_v28 = vmul.f32 %v1137_v24, %v11864_v49 }
 0x120   :  { %v10946_v61 = vpop.eup %10945  ;;  %v1204_v5 = vmul.f32 %v1140_v34, %v11868_v57  ;;  %10961 = vpow2.f32 %v789_v35  ;;  %v795_v43 = vmul.f32 1.442695, %v704_v11  ;;  %v791_v19 = vmul.f32 1.442695, %v702_v37 }
 0x121   :  { %v10948_v46 = vpop.eup %10947  ;;  %v1202_v1 = vmul.f32 %v1138_v44, %v11888_v13  ;;  %v886_v48 = vadd.f32 2.0, %v10946_v61  ;;  %v801_v51 = vmul.f32 1.442695, %v707_v60  ;;  %1728 = vmatpush1.bf16.msra.mxu0 %v1258_v0  ;;  %10351 = vmatpush1.bf16.msra.mxu1 %v1258_v0  ;;  %v1143_v54 = vmul.f32 %v10944_v36, %v11973_v16 }
 0x122   :  { %v10950_v7 = vpop.eup %10949  ;;  %v1260_v50 = vpack.c.bf16 %v1204_v5, %v1203_v17  ;;  %v891_v56 = vadd.f32 2.0, %v10948_v46  ;;  %10963 = vpow2.f32 %v795_v43  ;;  %1729 = vmatprep.subr.bf16.mxu0 %v14685_v18  ;;  %10336 = vmatprep.subr.bf16.mxu1 %v14685_v18  ;;  %v705_v23 = vmin.f32 %v12045_v42, 20.0 }
 0x123   :  { %v12053_v49 = vpop.eup %10951  ;;  %v1259_v57 = vpack.c.bf16 %v1202_v1, %v1201_v28  ;;  %v12055_v4 = vmul.f32 %v10946_v61, %v886_v48  ;;  %v889_v13 = vadd.f32 2.0, %v10950_v7  ;;  %10965 = vpow2.f32 %v791_v19 }
 0x124   :  { %v10954_v27 = vpop.eup %10953  ;;  %v12057_v58 = vmul.f32 %v10948_v46, %v891_v56  ;;  %10967 = vpow2.f32 %v801_v51  ;;  %v12066_v32 = vadd.f32 %v12005_v55, %v11771_v29  ;;  %v1207_v9 = vmul.f32 %v1143_v54, %v11892_v21 }
 0x125   :  { %v10956_v16 = vpop.eup %10955  ;;  %v1144_v15 = vmul.f32 %v10954_v27, %v11998_v6  ;;  %v1014_v62 = vadd.f32 2.0, %v12055_v4  ;;  %v12062_v40 = vmul.f32 %v10950_v7, %v889_v13  ;;  %1730 = vmatpush1.bf16.msra.mxu0 %v1259_v57  ;;  %10352 = vmatpush1.bf16.msra.mxu1 %v1259_v57  ;;  %v797_v2 = vmul.f32 1.442695, %v705_v23 }
 0x126   :  { %v1019_v0 = vadd.f32 2.0, %v12057_v58  ;;  %v892_v38 = vadd.f32 2.0, %v10956_v16  ;;  %1731 = vmatprep.subr.bf16.mxu0 %v14685_v18  ;;  %10337 = vmatprep.subr.bf16.mxu1 %v14685_v18  ;;  %v708_v55 = vmin.f32 %v12066_v32, 20.0  ;;  %v12077_v21 = vadd.f32 %v11771_v29, %v12010_v59 }
 0x127   :  { %v10958_v6 = vpop.eup %10957  ;;  %v1208_v3 = vmul.f32 %v1144_v15, %v11901_v39  ;;  %10969 = vrcp.f32 %v1014_v62  ;;  %v1017_v33 = vadd.f32 2.0, %v12062_v40  ;;  %v1141_v51 = vmul.f32 %v12053_v49, %v11995_v47 }
 0x128   :  { %10971 = vrcp.f32 %v1019_v0  ;;  %v956_v22 = vmul.f32 %v10956_v16, %v892_v38  ;;  %v890_v63 = vadd.f32 2.0, %v10958_v6  ;;  %v803_v45 = vmul.f32 1.442695, %v708_v55 }
 0x129   :  { %v10960_v17 = vpop.eup %10959  ;;  %v12079_v24 = vpack.c.bf16 %v1208_v3, %v1207_v9  ;;  %10973 = vrcp.f32 %v1017_v33  ;;  %1732 = vmatpush1.bf16.msra.mxu0 %v1260_v50  ;;  %10353 = vmatpush1.bf16.msra.mxu1 %v1260_v50  ;;  %v706_v29 = vmin.f32 %v12077_v21, 20.0  ;;  %v1205_v15 = vmul.f32 %v1141_v51, %v11896_v30 }
 0x12a   :  { %v10962_v39 = vpop.eup %10961  ;;  %v1020_v25 = vadd.f32 2.0, %v956_v22  ;;  %v954_v34 = vmul.f32 %v10958_v6, %v890_v63  ;;  %v895_v35 = vadd.f32 2.0, %v10960_v17  ;;  %10975 = vpow2.f32 %v797_v2  ;;  %1733 = vmatprep.subr.bf16.mxu0 %v14685_v18  ;;  %10338 = vmatprep.subr.bf16.mxu1 %v14685_v18 }
 0x12b   :  { %v893_v11 = vadd.f32 2.0, %v10962_v39  ;;  %10977 = vpow2.f32 %v803_v45  ;;  %v799_v28 = vmul.f32 1.442695, %v706_v29 }
 0x12c   :  { %v10964_v59 = vpop.eup %10963  ;;  %10979 = vrcp.f32 %v1020_v25  ;;  %v1018_v37 = vadd.f32 2.0, %v954_v34  ;;  %v959_v36 = vmul.f32 %v10960_v17, %v895_v35 }
 0x12d   :  { %v10966_v44 = vpop.eup %10965  ;;  %v12084_v60 = vmul.f32 %v10962_v39, %v893_v11  ;;  %v896_v61 = vadd.f32 2.0, %v10964_v59 }
 0x12e   :  { %v10968_v5 = vpop.eup %10967  ;;  %10981 = vrcp.f32 %v1018_v37  ;;  %v1023_v43 = vadd.f32 2.0, %v959_v36  ;;  %v894_v46 = vadd.f32 2.0, %v10966_v44 }
 0x12f   :  { %v1021_v1 = vadd.f32 2.0, %v12084_v60  ;;  %v960_v48 = vmul.f32 %v10964_v59, %v896_v61  ;;  %v899_v19 = vadd.f32 2.0, %v10968_v5  ;;  %10983 = vpow2.f32 %v799_v28 }
 0x130   :  { %10985 = vrcp.f32 %v1023_v43  ;;  %v958_v7 = vmul.f32 %v10966_v44, %v894_v46 }
 0x131   :  { %v10970_v50 = vpop.eup %10969  ;;  %10987 = vrcp.f32 %v1021_v1  ;;  %v1024_v54 = vadd.f32 2.0, %v960_v48  ;;  %v12089_v56 = vmul.f32 %v10968_v5, %v899_v19 }
 0x132   :  { %v10972_v57 = vpop.eup %10971  ;;  %v1142_v13 = vmul.f32 %v10970_v50, %v12055_v4  ;;  %v1022_v27 = vadd.f32 2.0, %v958_v7 }
 0x133   :  { %v10974_v23 = vpop.eup %10973  ;;  %10989 = vrcp.f32 %v1024_v54  ;;  %v1027_v47 = vadd.f32 2.0, %v12089_v56  ;;  %v1147_v9 = vmul.f32 %v10972_v57, %v12057_v58  ;;  %v10694_v57 = vld [vmem:[%s14674_s1 + $0x14] ss:$8 sps:$4 sm:$0xff]  }
 0x134   :  { %v10976_v16 = vpop.eup %10975  ;;  %v1206_v62 = vmul.f32 %v1142_v13, %v11946_v53  ;;  %10991 = vrcp.f32 %v1022_v27  ;;  %v1145_v4 = vmul.f32 %v10974_v23, %v12062_v40  ;;  %v10672_v13 = vld [vmem:[%s14674_s1 + $0x30] ss:$8 sps:$4 sm:$0xff]   ;;  %v10674_v23 = vld [vmem:[%s14674_s1 + $0x44] ss:$8 sps:$4 sm:$0xff]  }
 0x135   :  { %v10978_v49 = vpop.eup %10977  ;;  %v897_v0 = vadd.f32 2.0, %v10976_v16  ;;  %10993 = vrcp.f32 %v1027_v47  ;;  %v1211_v53 = vmul.f32 %v1147_v9, %v11950_v52  ;;  %v10698_v27 = vld [vmem:[%s14674_s1 + $0x10] ss:$8 sps:$4 sm:$0xff]   ;;  %v10684_v47 = vld [vmem:[%s14674_s1 + $0x64] ss:$8 sps:$4 sm:$0xff]  }
 0x136   :  { %v10980_v38 = vpop.eup %10979  ;;  %v1261_v2 = vpack.c.bf16 %v1206_v62, %v1205_v15  ;;  %v900_v6 = vadd.f32 2.0, %v10978_v49  ;;  %v1209_v35 = vmul.f32 %v1145_v4, %v11977_v20  ;;  %v10679_v15 = vld [vmem:[%s14674_s1 + $0x54] ss:$8 sps:$4 sm:$0xff]   ;;  %v10682_v62 = vld [vmem:[%s14674_s1 + $0x50] ss:$8 sps:$4 sm:$0xff]  }
 0x137   :  { %v1148_v3 = vmul.f32 %v10980_v38, %v956_v22  ;;  %v961_v33 = vmul.f32 %v10976_v16, %v897_v0  ;;  %v10677_v16 = vld [vmem:[%s14674_s1 + $0x40] ss:$8 sps:$4 sm:$0xff]   ;;  %v10691_v9 = vld [vmem:[%s14674_s1 + $0x74] ss:$8 sps:$4 sm:$0xff]   ;;  %v10693_v0 = vld [vmem:[%s14674_s1 + $0x70] ss:$8 sps:$4 sm:$0xff]  }
 0x138   :  { %v10982_v55 = vpop.eup %10981  ;;  %v964_v63 = vmul.f32 %v10978_v49, %v900_v6  ;;  %1734 = vmatpush1.bf16.msra.mxu0 %v1261_v2  ;;  %10354 = vmatpush1.bf16.msra.mxu1 %v1261_v2  ;;  %v10687_v49 = vld [vmem:[%s14674_s1 + $0x60] ss:$8 sps:$4 sm:$0xff]   ;;  %v10696_v38 = vld [vmem:[%s14674_s1 + $0x84] ss:$8 sps:$4 sm:$0xff]   ;;  %v10700_v6 = vld [vmem:[%s14674_s1 + $0x94] ss:$8 sps:$4 sm:$0xff]  }
 0x139   :  { %v10984_v30 = vpop.eup %10983  ;;  %v1212_v17 = vmul.f32 %v1148_v3, %v11983_v31  ;;  %v1146_v45 = vmul.f32 %v10982_v55, %v954_v34  ;;  %v1025_v58 = vadd.f32 2.0, %v961_v33  ;;  %1735 = vmatprep.subr.bf16.mxu0 %v14685_v18  ;;  %10339 = vmatprep.subr.bf16.mxu1 %v14685_v18  ;;  %v10699_v2 = vld [vmem:[%s14674_s1 + $0x80] ss:$8 sps:$4 sm:$0xff]   ;;  %v10702_v4 = vld [vmem:[%s14674_s1 + $0x90] ss:$8 sps:$4 sm:$0xff]  }
 0x13a   :  { %v10986_v39 = vpop.eup %10985  ;;  %v1028_v40 = vadd.f32 2.0, %v964_v63  ;;  %v898_v22 = vadd.f32 2.0, %v10984_v30  ;;  %v10703_v3 = vld [vmem:[%s14674_s1 + $0xa4] ss:$8 sps:$4 sm:$0xff]   ;;  %v10706_v55 = vld [vmem:[%s14674_s1 + $0xb4] ss:$8 sps:$4 sm:$0xff]  }
 0x13b   :  { %v10988_v25 = vpop.eup %10987  ;;  %v1264_v11 = vpack.c.bf16 %v1212_v17, %v1211_v53  ;;  %v1210_v29 = vmul.f32 %v1146_v45, %v11992_v41  ;;  %10995 = vrcp.f32 %v1025_v58  ;;  %v1151_v59 = vmul.f32 %v10986_v39, %v959_v36  ;;  %v10711_v53 = vld [vmem:[%s14674_s1 + $0xc0] ss:$8 sps:$4 sm:$0xff]   ;;  %v10712_v17 = vld [vmem:[%s14674_s1 + $0xd4] ss:$8 sps:$4 sm:$0xff]   ;;  %v10714_v45 = vld [vmem:[%s14674_s1 + $0xd0] ss:$8 sps:$4 sm:$0xff]  }
 0x13c   :  { %10997 = vrcp.f32 %v1028_v40  ;;  %v962_v52 = vmul.f32 %v10984_v30, %v898_v22  ;;  %1736 = vmatpush1.bf16.msra.mxu0 %v12079_v24  ;;  %10355 = vmatpush1.bf16.msra.mxu1 %v12079_v24  ;;  %v1149_v37 = vmul.f32 %v10988_v25, %v12084_v60  ;;  %v10709_v30 = vld [vmem:[%s14674_s1 + $0xc4] ss:$8 sps:$4 sm:$0xff]   ;;  %v10717_v39 = vld [vmem:[%s14674_s1 + $0xe0] ss:$8 sps:$4 sm:$0xff]   ;;  %v10718_v40 = vld [vmem:[%s14674_s1 + $0xf4] ss:$8 sps:$4 sm:$0xff]  }
 0x13d   :  { %v10990_v31 = vpop.eup %10989  ;;  %v1263_v34 = vpack.c.bf16 %v1210_v29, %v1209_v35  ;;  %1737 = vmatprep.subr.bf16.mxu0 %v14685_v18  ;;  %10340 = vmatprep.subr.bf16.mxu1 %v14685_v18  ;;  %v1215_v36 = vmul.f32 %v1151_v59, %v12016_v26  ;;  %v10715_v58 = vld [vmem:[%s14674_s1 + $0xe4] ss:$8 sps:$4 sm:$0xff]   ;;  %v9588_v22 = vpop.f32.mrb[32].mxu0  ;;  %v12217_v25 = vld [vmem:[%s14683_s10] ss:$0 sm:$0xff] }
 0x13e   :  { %v10992_v20 = vpop.eup %10991  ;;  %v1152_v44 = vmul.f32 %v10990_v31, %v960_v48  ;;  %v1026_v61 = vadd.f32 2.0, %v962_v52  ;;  %v1213_v24 = vmul.f32 %v1149_v37, %v12020_v14  ;;  %v12220_v35 = vadd.f32 %v12217_v25, %v9588_v22 }
 0x13f   :  { %v1150_v41 = vmul.f32 %v10992_v20, %v958_v7  ;;  %v10994_v60 = vpop.eup %10993 }
 0x140   :  { %v1216_v28 = vmul.f32 %v1152_v44, %v12026_v10  ;;  %10999 = vrcp.f32 %v1026_v61  ;;  %1738 = vmatpush1.bf16.msra.mxu0 %v1263_v34  ;;  %10356 = vmatpush1.bf16.msra.mxu1 %v1263_v34  ;;  %v1155_v26 = vmul.f32 %v10994_v60, %v12089_v56 }
 0x141   :  { %v1214_v5 = vmul.f32 %v1150_v41, %v12030_v8  ;;  %1739 = vmatprep.subr.bf16.mxu0 %v14685_v18  ;;  %10341 = vmatprep.subr.bf16.mxu1 %v14685_v18 }
 0x142   :  { %v1266_v43 = vpack.c.bf16 %v1216_v28, %v1215_v36  ;;  %v1219_v8 = vmul.f32 %v1155_v26, %v12033_v12 }
 0x143   :  { %v1265_v46 = vpack.c.bf16 %v1214_v5, %v1213_v24  ;;  %v10720_v24 = vld [vmem:[%s14674_s1 + $0xf0] ss:$8 sps:$4 sm:$0xff]  }
 0x144   :  { %1740 = vmatpush1.bf16.msra.mxu0 %v1264_v11  ;;  %10357 = vmatpush1.bf16.msra.mxu1 %v1264_v11  ;;  %v550_v11 = vpop.f32.mrb[33].mxu0 }
 0x145   :  { %v10996_v1 = vpop.eup %10995  ;;  %1741 = vmatprep.subr.bf16.mxu0 %v14685_v18  ;;  %10342 = vmatprep.subr.bf16.mxu1 %v14685_v18  ;;  %v12223_v29 = vadd.f32 %v12217_v25, %v550_v11  ;;  %v9589_v59 = vpop.f32.mrb[34].mxu0 }
 0x146   :  { %v10998_v10 = vpop.eup %10997  ;;  %v1153_v48 = vmul.f32 %v10996_v1, %v961_v33  ;;  %v10705_v33 = vld [vmem:[%s14674_s1 + $0xa0] ss:$8 sps:$4 sm:$0xff]   ;;  %v12227_v31 = vadd.f32 %v12217_v25, %v9589_v59  ;;  %v553_v34 = vpop.f32.mrb[35].mxu0  ;;  %v10721_v1 = vld [vmem:[%s14674_s1 + $0x104] ss:$8 sps:$4 sm:$0xff]  }
 0x147   :  { %v1156_v14 = vmul.f32 %v10998_v10, %v964_v63  ;;  %v10708_v63 = vld [vmem:[%s14674_s1 + $0xb0] ss:$8 sps:$4 sm:$0xff]   ;;  %v709_v37 = vmin.f32 %v12223_v29, 20.0  ;;  %v12231_v20 = vadd.f32 %v12217_v25, %v553_v34  ;;  %v9592_v44 = vpop.f32.mrb[36].mxu0 }
 0x148   :  { %1742 = vmatpush1.bf16.msra.mxu0 %v1265_v46  ;;  %10358 = vmatpush1.bf16.msra.mxu1 %v1265_v46  ;;  %v1217_v54 = vmul.f32 %v1153_v48, %v12045_v42  ;;  %v10688_v42 = vld [vmem:[%s14674_s1] ss:$8 sps:$4 sm:$0xff]   ;;  %v712_v41 = vmin.f32 %v12227_v31, 20.0  ;;  %v12235_v36 = vadd.f32 %v12217_v25, %v9592_v44  ;;  %v566_v28 = vpop.f32.mrb[37].mxu0 }
 0x149   :  { %v1220_v19 = vmul.f32 %v1156_v14, %v12066_v32  ;;  %1743 = vmatprep.subr.bf16.mxu0 %v14685_v18  ;;  %10343 = vmatprep.subr.bf16.mxu1 %v14685_v18  ;;  %v10664_v32 = vld [vmem:[%s14674_s1 + $0x20] ss:$8 sps:$4 sm:$0xff]   ;;  %v805_v5 = vmul.f32 1.442695, %v709_v37  ;;  %v710_v60 = vmin.f32 %v12231_v20, 20.0  ;;  %v9593_v46 = vpop.f32.mrb[38].mxu0 }
 0x14a   :  { %v11000_v51 = vpop.eup %10999  ;;  %v811_v26 = vmul.f32 1.442695, %v712_v41  ;;  %v715_v10 = vmin.f32 %v12235_v36, 20.0  ;;  %v12249_v14 = vadd.f32 %v12217_v25, %v9593_v46 }
 0x14b   :  { %v1268_v7 = vpack.c.bf16 %v1220_v19, %v1219_v8  ;;  %v1154_v50 = vmul.f32 %v11000_v51, %v962_v52  ;;  %v711_v52 = vmin.f32 %v12220_v35, 20.0  ;;  %v807_v8 = vmul.f32 1.442695, %v710_v60  ;;  %v569_v19 = vpop.f32.mrb[39].mxu0 }
 0x14c   :  { %1744 = vmatpush1.bf16.msra.mxu0 %v1266_v43  ;;  %10359 = vmatpush1.bf16.msra.mxu1 %v1266_v43  ;;  %v12242_v43 = vadd.f32 %v12217_v25, %v566_v28  ;;  %v817_v51 = vmul.f32 1.442695, %v715_v10 }
 0x14d   :  { %v1218_v56 = vmul.f32 %v1154_v50, %v12077_v21  ;;  %1745 = vmatprep.subr.bf16.mxu0 %v14685_v18  ;;  %10344 = vmatprep.subr.bf16.mxu1 %v14685_v18  ;;  %v10669_v21 = vld [vmem:[%s14674_s1 + $0x34] ss:$8 sps:$4 sm:$0xff]   ;;  %v809_v61 = vmul.f32 1.442695, %v711_v52  ;;  %v12254_v50 = vadd.f32 %v12217_v25, %v569_v19 }
 0x14e   :  { %v713_v48 = vmin.f32 %v12242_v43, 20.0 }
 0x14f   :  { %v1267_v12 = vpack.c.bf16 %v1218_v56, %v1217_v54  ;;  %11001 = vpow2.f32 %v809_v61  ;;  %v9596_v54 = vpop.f32.mrb[40].mxu0  ;;  %v10769_v56 = vld [vmem:[%s14677_s4 + $0x10] sm:$0xff]  }
 0x150   :  { %11003 = vpow2.f32 %v805_v5 }
 0x151   :  { %1746 = vmatpush1.bf16.msra.mxu0 %v1267_v12  ;;  %10360 = vmatpush1.bf16.msra.mxu1 %v1267_v12  ;;  %11005 = vpow2.f32 %v811_v26  ;;  %v813_v12 = vmul.f32 1.442695, %v713_v48 }
 0x152   :  { %1747 = vmatprep.subr.bf16.mxu0 %v14685_v18  ;;  %10345 = vmatprep.subr.bf16.mxu1 %v14685_v18  ;;  %11007 = vpow2.f32 %v807_v8 }
 0x153   :  { %11009 = vpow2.f32 %v817_v51 }
 0x154   :  { %11011 = vpow2.f32 %v813_v12 }
 0x155   :  { %1748 = vmatpush1.bf16.msra.mxu0 %v1268_v7  ;;  %10361 = vmatpush1.bf16.msra.mxu1 %v1268_v7  ;;  %v716_v7 = vmin.f32 %v12249_v14, 20.0 }
 0x156   :  { %9618 = vmatprep.subr.bf16.mxu0 %v10769_v56  ;;  %9726 = vmatprep.subr.bf16.mxu1 %v10769_v56 }
 0x158   :  { %1766 = vmatmul.mubr.bf16.vlgmr.msra.gmra.mrb[0].mxu1 %v10664_v32  ;;  %1750 = vmatmul.mubr.bf16.vlgmr.msra.gmra.mrb[64].mxu0 %v10688_v42  ;;  %v12260_v32 = vadd.f32 %v12217_v25, %v9596_v54  ;;  %v582_v42 = vpop.f32.mrb[41].mxu0 }
 0x159   :  { %1773 = vmatprep.mubr.bf16.mxu1 %v10669_v21  ;;  %1757 = vmatprep.mubr.bf16.mxu0 %v10694_v57  ;;  %v819_v21 = vmul.f32 1.442695, %v716_v7  ;;  %v714_v57 = vmin.f32 %v12254_v50, 20.0 }
 0x15a   :  { %9619 = vmatpush3.bf16.msra.mxu0 %v10769_v56  ;;  %9727 = vmatpush3.bf16.msra.mxu1 %v10769_v56 }
 0x15b   :  { %11013 = vpow2.f32 %v819_v21 }
 0x160   :  { %1774 = vmatmul.mubr.bf16.gmra.mrb[4].mxu1 %v10672_v13  ;;  %1758 = vmatmul.mubr.bf16.gmra.mrb[68].mxu0 %v10698_v27  ;;  %v12264_v13 = vadd.f32 %v12217_v25, %v582_v42  ;;  %v9597_v27 = vpop.f32.mrb[42].mxu0  ;;  %v10726_v42 = vld [vmem:[%s14674_s1 + $0x110] ss:$8 sps:$4 sm:$0xff]  }
 0x161   :  { %1781 = vmatprep.mubr.bf16.mxu1 %v10674_v23  ;;  %v719_v23 = vmin.f32 %v12260_v32, 20.0 }
 0x168   :  { %1782 = vmatmul.mubr.bf16.gmra.mrb[8].mxu1 %v10677_v16  ;;  %v12268_v16 = vadd.f32 %v12217_v25, %v9597_v27 }
 0x169   :  { %1789 = vmatprep.mubr.bf16.mxu1 %v10679_v15  ;;  %v585_v15 = vpop.f32.mrb[43].mxu0 }
 0x170   :  { %1790 = vmatmul.mubr.bf16.gmra.mrb[12].mxu1 %v10682_v62  ;;  %v10770_v62 = vld [vmem:[%s14677_s4 + $0x18] sm:$0xff]  }
 0x171   :  { %1797 = vmatprep.mubr.bf16.mxu1 %v10684_v47  ;;  %v815_v47 = vmul.f32 1.442695, %v714_v57  ;;  %9620 = vmatprep.subr.bf16.mxu0 %v10770_v62 }
 0x172   :  { %9728 = vmatprep.subr.bf16.mxu1 %v10770_v62  ;;  %9621 = vmatpush3.bf16.msra.mxu0 %v10770_v62 }
 0x173   :  { %11015 = vpow2.f32 %v815_v47  ;;  %9729 = vmatpush3.bf16.msra.mxu1 %v10770_v62  ;;  %v10727_v62 = vld [vmem:[%s14674_s1 + $0x124] ss:$8 sps:$4 sm:$0xff]  }
 0x178   :  { %1798 = vmatmul.mubr.bf16.gmra.mrb[16].mxu1 %v10687_v49  ;;  %v717_v49 = vmin.f32 %v12264_v13, 20.0 }
 0x179   :  { %1805 = vmatprep.mubr.bf16.mxu1 %v10691_v9  ;;  %v12275_v9 = vadd.f32 %v12217_v25, %v585_v15 }
 0x180   :  { %1806 = vmatmul.mubr.bf16.gmra.mrb[20].mxu1 %v10693_v0  ;;  %v9600_v0 = vpop.f32.mrb[44].mxu0 }
 0x181   :  { %1813 = vmatprep.mubr.bf16.mxu1 %v10696_v38  ;;  %v10723_v38 = vld [vmem:[%s14674_s1 + $0x100] ss:$8 sps:$4 sm:$0xff]  }
 0x188   :  { %1814 = vmatmul.mubr.bf16.gmra.mrb[24].mxu1 %v10699_v2  ;;  %v825_v2 = vmul.f32 1.442695, %v719_v23 }
 0x189   :  { %1821 = vmatprep.mubr.bf16.mxu1 %v10700_v6  ;;  %v720_v6 = vmin.f32 %v12268_v16, 20.0 }
 0x18a   :  { %11017 = vpow2.f32 %v825_v2 }
 0x190   :  { %1822 = vmatmul.mubr.bf16.gmra.mrb[28].mxu1 %v10702_v4  ;;  %v12282_v4 = vadd.f32 %v12217_v25, %v9600_v0 }
 0x191   :  { %1829 = vmatprep.mubr.bf16.mxu1 %v10703_v3  ;;  %v598_v3 = vpop.f32.mrb[45].mxu0 }
 0x198   :  { %1830 = vmatmul.mubr.bf16.gmra.mrb[32].mxu1 %v10705_v33  ;;  %v10724_v33 = vld [vmem:[%s14674_s1 + $0x114] ss:$8 sps:$4 sm:$0xff]  }
 0x199   :  { %1837 = vmatprep.mubr.bf16.mxu1 %v10706_v55  ;;  %v821_v55 = vmul.f32 1.442695, %v717_v49 }
 0x19b   :  { %11019 = vpow2.f32 %v821_v55 }
 0x1a0   :  { %1838 = vmatmul.mubr.bf16.gmra.mrb[36].mxu1 %v10708_v63  ;;  %v718_v63 = vmin.f32 %v12275_v9, 20.0 }
 0x1a1   :  { %1845 = vmatprep.mubr.bf16.mxu1 %v10709_v30  ;;  %v12289_v30 = vadd.f32 %v12217_v25, %v598_v3 }
 0x1a2   :  { %v823_v22 = vmul.f32 1.442695, %v718_v63 }
 0x1a3   :  { %v721_v11 = vmin.f32 %v12289_v30, 20.0 }
 0x1a5   :  { %v829_v5 = vmul.f32 1.442695, %v721_v11 }
 0x1a8   :  { %1846 = vmatmul.mubr.bf16.gmra.mrb[40].mxu1 %v10711_v53  ;;  %v9601_v53 = vpop.f32.mrb[46].mxu0 }
 0x1a9   :  { %1853 = vmatprep.mubr.bf16.mxu1 %v10712_v17  ;;  %v827_v17 = vmul.f32 1.442695, %v720_v6 }
 0x1ab   :  { %11021 = vpow2.f32 %v827_v17 }
 0x1ac   :  { %11023 = vpow2.f32 %v823_v22 }
 0x1b0   :  { %1854 = vmatmul.mubr.bf16.gmra.mrb[44].mxu1 %v10714_v45  ;;  %v723_v45 = vmin.f32 %v12282_v4, 20.0 }
 0x1b1   :  { %1861 = vmatprep.mubr.bf16.mxu1 %v10715_v58  ;;  %v12293_v58 = vadd.f32 %v12217_v25, %v9601_v53 }
 0x1b2   :  { %v833_v44 = vmul.f32 1.442695, %v723_v45 }
 0x1b3   :  { %v724_v61 = vmin.f32 %v12293_v58, 20.0 }
 0x1b4   :  { %11025 = vpow2.f32 %v833_v44 }
 0x1b5   :  { %v835_v8 = vmul.f32 1.442695, %v724_v61  ;;  %11027 = vpow2.f32 %v829_v5 }
 0x1b7   :  { %11029 = vpow2.f32 %v835_v8 }
 0x1b8   :  { %1862 = vmatmul.mubr.bf16.gmra.mrb[48].mxu1 %v10717_v39  ;;  %v601_v39 = vpop.f32.mrb[47].mxu0 }
 0x1b9   :  { %1869 = vmatprep.mubr.bf16.mxu1 %v10718_v40  ;;  %v11002_v40 = vpop.eup %11001  ;;  %v12297_v59 = vadd.f32 %v12217_v25, %v601_v39  ;;  %v9604_v52 = vpop.f32.mrb[48].mxu0 }
 0x1ba   :  { %v11004_v34 = vpop.eup %11003  ;;  %v903_v37 = vadd.f32 2.0, %v11002_v40  ;;  %v12300_v41 = vpop.f32.mrb[49].mxu0  ;;  %v12338_v17 = vadd.f32 %v12217_v25, %v9604_v52 }
 0x1bb   :  { %v11006_v28 = vpop.eup %11005  ;;  %v722_v60 = vmin.f32 %v12297_v59, 20.0  ;;  %v12303_v46 = vpop.f32.mrb[50].mxu0 }
 0x1bc   :  { %v12305_v26 = vmul.f32 %v11002_v40, %v903_v37  ;;  %v904_v10 = vadd.f32 2.0, %v11006_v28  ;;  %v12307_v48 = vpop.f32.mrb[51].mxu0  ;;  %14735 = vst [vmem:[#allocation5_spill] sm:$0xff] %v12338_v17  ;;  %v727_v52 = vmin.f32 %v12338_v17, 20.0 }
 0x1bd   :  { %v831_v54 = vmul.f32 1.442695, %v722_v60  ;;  %v12311_v56 = vpop.f32.mrb[52].mxu0 }
 0x1be   :  { %v1031_v21 = vadd.f32 2.0, %v12305_v26  ;;  %v12317_v57 = vmul.f32 %v11006_v28, %v904_v10  ;;  %v12319_v23 = vpop.f32.mrb[53].mxu0 }
 0x1bf   :  { %11031 = vpow2.f32 %v831_v54  ;;  %v841_v54 = vmul.f32 1.442695, %v727_v52  ;;  %v12384_v52 = vld [vmem:[%s14677_s4] sm:$0xff]  }
 0x1c0   :  { %1870 = vmatmul.mubr.bf16.gmra.mrb[52].mxu1 %v10720_v24  ;;  %v901_v24 = vadd.f32 2.0, %v11004_v34  ;;  %11033 = vrcp.f32 %v1031_v21  ;;  %v1032_v2 = vadd.f32 2.0, %v12317_v57  ;;  %v10729_v21 = vld [vmem:[%s14674_s1 + $0x120] ss:$8 sps:$4 sm:$0xff]   ;;  %9630 = vmatprep.subr.bf16.mxu0 %v12384_v52 }
 0x1c1   :  { %1877 = vmatprep.mubr.bf16.mxu1 %v10721_v1  ;;  %v11008_v1 = vpop.eup %11007  ;;  %9738 = vmatprep.subr.bf16.mxu1 %v12384_v52 }
 0x1c2   :  { %v11010_v19 = vpop.eup %11009  ;;  %v12309_v51 = vmul.f32 %v11004_v34, %v901_v24  ;;  %v902_v7 = vadd.f32 2.0, %v11008_v1 }
 0x1c3   :  { %v11012_v12 = vpop.eup %11011  ;;  %v907_v27 = vadd.f32 2.0, %v11010_v19 }
 0x1c4   :  { %v11014_v15 = vpop.eup %11013  ;;  %v1029_v47 = vadd.f32 2.0, %v12309_v51  ;;  %v12325_v49 = vmul.f32 %v11008_v1, %v902_v7  ;;  %v905_v0 = vadd.f32 2.0, %v11012_v12 }
 0x1c5   :  { %v12330_v6 = vmul.f32 %v11010_v19, %v907_v27  ;;  %v908_v3 = vadd.f32 2.0, %v11014_v15  ;;  %v11016_v55 = vpop.eup %11015 }
 0x1c6   :  { %11035 = vrcp.f32 %v1029_v47  ;;  %v1030_v63 = vadd.f32 2.0, %v12325_v49  ;;  %v12335_v53 = vmul.f32 %v11012_v12, %v905_v0  ;;  %v11018_v39 = vpop.eup %11017  ;;  %v906_v11 = vadd.f32 2.0, %v11016_v55 }
 0x1c7   :  { %11037 = vrcp.f32 %v1032_v2  ;;  %v1035_v40 = vadd.f32 2.0, %v12330_v6  ;;  %v12343_v22 = vmul.f32 %v11014_v15, %v908_v3  ;;  %v11020_v37 = vpop.eup %11019  ;;  %v911_v61 = vadd.f32 2.0, %v11018_v39  ;;  %v10730_v2 = vld [vmem:[%s14674_s1 + $0x134] ss:$8 sps:$4 sm:$0xff]  }
 0x1c8   :  { %1878 = vmatmul.mubr.bf16.gmra.mrb[56].mxu1 %v10723_v38  ;;  %v12327_v38 = vpop.f32.mrb[54].mxu0  ;;  %11039 = vrcp.f32 %v1030_v63  ;;  %v1033_v44 = vadd.f32 2.0, %v12335_v53  ;;  %v11022_v24 = vpop.eup %11021  ;;  %v12352_v60 = vmul.f32 %v11016_v55, %v906_v11  ;;  %v909_v1 = vadd.f32 2.0, %v11020_v37 }
 0x1c9   :  { %1885 = vmatprep.mubr.bf16.mxu1 %v10724_v33  ;;  %v12332_v33 = vpop.f32.mrb[55].mxu0  ;;  %11041 = vrcp.f32 %v1035_v40  ;;  %v1036_v5 = vadd.f32 2.0, %v12343_v22  ;;  %v11024_v8 = vpop.eup %11023  ;;  %v12356_v19 = vmul.f32 %v11018_v39, %v911_v61  ;;  %v912_v7 = vadd.f32 2.0, %v11022_v24 }
 0x1ca   :  { %v12340_v45 = vpop.f32.mrb[56].mxu0  ;;  %11043 = vrcp.f32 %v1033_v44  ;;  %v1034_v27 = vadd.f32 2.0, %v12352_v60  ;;  %v12364_v15 = vmul.f32 %v11020_v37, %v909_v1 }
 0x1cb   :  { %v12345_v34 = vpop.f32.mrb[57].mxu0  ;;  %11045 = vrcp.f32 %v1036_v5  ;;  %v1039_v3 = vadd.f32 2.0, %v12356_v19  ;;  %v12372_v55 = vmul.f32 %v11022_v24, %v912_v7 }
 0x1cc   :  { %v12349_v28 = vpop.f32.mrb[58].mxu0  ;;  %11047 = vpow2.f32 %v841_v54  ;;  %v1037_v11 = vadd.f32 2.0, %v12364_v15 }
 0x1cd   :  { %v12354_v10 = vpop.f32.mrb[59].mxu0  ;;  %11049 = vrcp.f32 %v1034_v27  ;;  %v1040_v5 = vadd.f32 2.0, %v12372_v55 }
 0x1ce   :  { %v12358_v12 = vpop.f32.mrb[60].mxu0  ;;  %11051 = vrcp.f32 %v1039_v3 }
 0x1cf   :  { %v12366_v47 = vpop.f32.mrb[61].mxu0  ;;  %11053 = vrcp.f32 %v1037_v11 }
 0x1d0   :  { %1886 = vmatmul.mubr.bf16.gmra.mrb[60].mxu1 %v10726_v42  ;;  %v11026_v42 = vpop.eup %11025  ;;  %v12374_v39 = vpop.f32.mrb[62].mxu0  ;;  %11055 = vrcp.f32 %v1040_v5 }
 0x1d1   :  { %1893 = vmatprep.mubr.bf16.mxu1 %v10727_v62  ;;  %v910_v62 = vadd.f32 2.0, %v11024_v8  ;;  %v11028_v0 = vpop.eup %11027  ;;  %v915_v63 = vadd.f32 2.0, %v11026_v42  ;;  %v12379_v61 = vpop.f32.mrb[63].mxu0 }
 0x1d2   :  { %v11030_v40 = vpop.eup %11029  ;;  %v913_v44 = vadd.f32 2.0, %v11028_v0 }
 0x1d3   :  { %v12377_v37 = vmul.f32 %v11024_v8, %v910_v62  ;;  %v11032_v24 = vpop.eup %11031  ;;  %v12387_v1 = vmul.f32 %v11026_v42, %v915_v63  ;;  %v916_v7 = vadd.f32 2.0, %v11030_v40 }
 0x1d4   :  { %v11034_v54 = vpop.eup %11033  ;;  %v12390_v27 = vmul.f32 %v11028_v0, %v913_v44  ;;  %v914_v62 = vadd.f32 2.0, %v11032_v24 }
 0x1d5   :  { %v1038_v8 = vadd.f32 2.0, %v12377_v37  ;;  %v11036_v18 = vpop.eup %11035  ;;  %v1159_v17 = vmul.f32 %v11034_v54, %v12305_v26  ;;  %v1043_v3 = vadd.f32 2.0, %v12387_v1  ;;  %v12395_v42 = vmul.f32 %v11030_v40, %v916_v7  ;;  %v10732_v7 = vld [vmem:[%s14674_s1 + $0x130] ss:$8 sps:$4 sm:$0xff]  }
 0x1d6   :  { %v1157_v63 = vmul.f32 %v11036_v18, %v12309_v51  ;;  %v1041_v0 = vadd.f32 2.0, %v12390_v27  ;;  %v12400_v11 = vmul.f32 %v11032_v24, %v914_v62 }
 0x1d7   :  { %11057 = vrcp.f32 %v1038_v8  ;;  %v1044_v40 = vadd.f32 2.0, %v12395_v42 }
 0x1d8   :  { %1894 = vmatmul.mubr.bf16.gmra.mrb[64].mxu1 %v10729_v21  ;;  %v11038_v21 = vpop.eup %11037  ;;  %11059 = vrcp.f32 %v1043_v3  ;;  %v12411_v18 = vmul.f32 %v1157_v63, %v12223_v29  ;;  %v1042_v24 = vadd.f32 2.0, %v12400_v11  ;;  %v12424_v29 = vadd.f32 %v12217_v25, %v12300_v41 }
 0x1d9   :  { %1901 = vmatprep.mubr.bf16.mxu1 %v10730_v2  ;;  %v11040_v44 = vpop.eup %11039  ;;  %v12403_v2 = vmul.f32 %v1159_v17, %v12220_v35  ;;  %v1160_v26 = vmul.f32 %v11038_v21, %v12317_v57  ;;  %11061 = vrcp.f32 %v1041_v0  ;;  %v10733_v57 = vld [vmem:[%s14674_s1 + $0x144] ss:$8 sps:$4 sm:$0xff]   ;;  %v12432_v3 = vadd.f32 %v12217_v25, %v12303_v46 }
 0x1da   :  { %v11042_v5 = vpop.eup %11041  ;;  %v1158_v51 = vmul.f32 %v11040_v44, %v12325_v49  ;;  %11063 = vrcp.f32 %v1044_v40  ;;  %v725_v63 = vmin.f32 %v12424_v29, 20.0 }
 0x1db   :  { %v11044_v35 = vpop.eup %11043  ;;  %v12419_v17 = vmul.f32 %v1160_v26, %v12227_v31  ;;  %v1163_v54 = vmul.f32 %v11042_v5, %v12330_v6  ;;  %11065 = vrcp.f32 %v1042_v24  ;;  %v728_v44 = vmin.f32 %v12432_v3, 20.0 }
 0x1dc   :  { %v11046_v8 = vpop.eup %11045  ;;  %v12427_v49 = vmul.f32 %v1158_v51, %v12231_v20  ;;  %v1161_v62 = vmul.f32 %v11044_v35, %v12335_v53  ;;  %v837_v40 = vmul.f32 1.442695, %v725_v63  ;;  %v12453_v5 = vadd.f32 %v12217_v25, %v12307_v48 }
 0x1dd   :  { %v11048_v31 = vpop.eup %11047  ;;  %v12437_v21 = vmul.f32 %v1163_v54, %v12235_v36  ;;  %v1164_v41 = vmul.f32 %v11046_v8, %v12343_v22  ;;  %v843_v24 = vmul.f32 1.442695, %v728_v44  ;;  %v12460_v35 = vadd.f32 %v12217_v25, %v12311_v56 }
 0x1de   :  { %v11050_v20 = vpop.eup %11049  ;;  %v12444_v0 = vmul.f32 %v1161_v62, %v12242_v43  ;;  %v919_v46 = vadd.f32 2.0, %v11048_v31  ;;  %11067 = vpow2.f32 %v837_v40 }
 0x1df   :  { %v11052_v26 = vpop.eup %11051  ;;  %v12448_v36 = vmul.f32 %v1164_v41, %v12249_v14  ;;  %v1162_v22 = vmul.f32 %v11050_v20, %v12352_v60  ;;  %11069 = vpow2.f32 %v843_v24  ;;  %v731_v44 = vmin.f32 %v12460_v35, 20.0 }
 0x1e0   :  { %1902 = vmatmul.mubr.bf16.gmra.mrb[68].mxu1 %v10732_v7  ;;  %v11054_v7 = vpop.eup %11053  ;;  %v1167_v51 = vmul.f32 %v11052_v26, %v12356_v19  ;;  %v12456_v43 = vmul.f32 %v11048_v31, %v919_v46  ;;  %v10735_v19 = vld [vmem:[%s14674_s1 + $0x140] ss:$8 sps:$4 sm:$0xff]  }
 0x1e1   :  { %1909 = vmatprep.mubr.bf16.mxu1 %v10733_v57  ;;  %v11056_v57 = vpop.eup %11055  ;;  %v12465_v60 = vmul.f32 %v1162_v22, %v12254_v50  ;;  %v1165_v48 = vmul.f32 %v11054_v7, %v12364_v15  ;;  %v10736_v50 = vld [vmem:[%s14674_s1 + $0x154] ss:$8 sps:$4 sm:$0xff]   ;;  %v849_v24 = vmul.f32 1.442695, %v731_v44 }
 0x1e2   :  { %v11058_v54 = vpop.eup %11057  ;;  %v12472_v8 = vmul.f32 %v1167_v51, %v12260_v32  ;;  %v1168_v56 = vmul.f32 %v11056_v57, %v12372_v55  ;;  %v1047_v62 = vadd.f32 2.0, %v12456_v43  ;;  %v726_v32 = vmin.f32 %v12453_v5, 20.0 }
 0x1e3   :  { %v11060_v31 = vpop.eup %11059  ;;  %v12482_v41 = vmul.f32 %v1165_v48, %v12264_v13  ;;  %v1166_v63 = vmul.f32 %v11058_v54, %v12377_v37  ;;  %v12497_v37 = vadd.f32 %v12217_v25, %v12319_v23 }
 0x1e4   :  { %v11062_v20 = vpop.eup %11061  ;;  %v12487_v55 = vmul.f32 %v1168_v56, %v12268_v16  ;;  %v1171_v46 = vmul.f32 %v11060_v31, %v12387_v1  ;;  %11071 = vrcp.f32 %v1047_v62  ;;  %v839_v40 = vmul.f32 1.442695, %v726_v32  ;;  %v14736_v56 = vld [vmem:[#allocation5_spill] sm:$0xff] }
 0x1e5   :  { %v11064_v26 = vpop.eup %11063  ;;  %v12492_v22 = vmul.f32 %v1166_v63, %v12275_v9  ;;  %v1169_v13 = vmul.f32 %v11062_v20, %v12390_v27 }
 0x1e6   :  { %v11066_v7 = vpop.eup %11065  ;;  %v12502_v1 = vmul.f32 %v1171_v46, %v12282_v4  ;;  %v1172_v51 = vmul.f32 %v11064_v26, %v12395_v42  ;;  %11073 = vpow2.f32 %v839_v40  ;;  %v729_v4 = vmin.f32 %v12497_v37, 20.0 }
 0x1e7   :  { %v12508_v27 = vmul.f32 %v1169_v13, %v12289_v30  ;;  %v1170_v23 = vmul.f32 %v11066_v7, %v12400_v11  ;;  %11075 = vpow2.f32 %v849_v24  ;;  %v12517_v42 = vadd.f32 %v12217_v25, %v12327_v38  ;;  %v10738_v38 = vld [vmem:[%s14674_s1 + $0x150] ss:$8 sps:$4 sm:$0xff]  }
 0x1e8   :  { %1910 = vmatmul.mubr.bf16.gmra.mrb[72].mxu1 %v10735_v19  ;;  %v12512_v57 = vmul.f32 %v1172_v51, %v12293_v58  ;;  %v12524_v30 = vadd.f32 %v12217_v25, %v12332_v33  ;;  %v12528_v11 = vadd.f32 %v12217_v25, %v12340_v45  ;;  %v12532_v58 = vadd.f32 %v12217_v25, %v12345_v34  ;;  %v11068_v45 = vpop.eup %11067  ;;  %v10739_v34 = vld [vmem:[%s14674_s1 + $0x164] ss:$8 sps:$4 sm:$0xff]  }
 0x1e9   :  { %1917 = vmatprep.mubr.bf16.mxu1 %v10736_v50  ;;  %v12520_v48 = vmul.f32 %v1170_v23, %v12297_v59  ;;  %v845_v54 = vmul.f32 1.442695, %v729_v4  ;;  %v732_v19 = vmin.f32 %v12517_v42, 20.0  ;;  %v12542_v33 = vadd.f32 %v12217_v25, %v12349_v28  ;;  %v11070_v63 = vpop.eup %11069 }
 0x1ea   :  { %v730_v62 = vmin.f32 %v12524_v30, 20.0  ;;  %v735_v31 = vmin.f32 %v12528_v11, 20.0  ;;  %v733_v50 = vmin.f32 %v12532_v58, 20.0  ;;  %v917_v32 = vadd.f32 2.0, %v11068_v45 }
 0x1eb   :  { %11077 = vpow2.f32 %v845_v54  ;;  %v851_v20 = vmul.f32 1.442695, %v732_v19  ;;  %v736_v28 = vmin.f32 %v12542_v33, 20.0  ;;  %v920_v46 = vadd.f32 2.0, %v11070_v63 }
 0x1ec   :  { %v847_v44 = vmul.f32 1.442695, %v730_v62  ;;  %v857_v26 = vmul.f32 1.442695, %v735_v31  ;;  %v12555_v13 = vadd.f32 %v12217_v25, %v12354_v10  ;;  %v12557_v7 = vmul.f32 %v11068_v45, %v917_v32  ;;  %v10741_v31 = vld [vmem:[%s14674_s1 + $0x160] ss:$8 sps:$4 sm:$0xff]  }
 0x1ed   :  { %11079 = vpow2.f32 %v851_v20  ;;  %v853_v51 = vmul.f32 1.442695, %v733_v50  ;;  %v12559_v24 = vmul.f32 %v11070_v63, %v920_v46  ;;  %v859_v23 = vmul.f32 1.442695, %v736_v28 }
 0x1ee   :  { %v11072_v40 = vpop.eup %11071  ;;  %11081 = vpow2.f32 %v847_v44  ;;  %v734_v4 = vmin.f32 %v12555_v13, 20.0  ;;  %v1045_v54 = vadd.f32 2.0, %v12557_v7  ;;  %v12565_v10 = vadd.f32 %v12217_v25, %v12358_v12 }
 0x1ef   :  { %11083 = vpow2.f32 %v857_v26  ;;  %v1048_v45 = vadd.f32 2.0, %v12559_v24  ;;  %v12582_v20 = vadd.f32 %v12217_v25, %v12374_v39  ;;  %v12586_v28 = vadd.f32 %v12217_v25, %v12379_v61 }
 0x1f0   :  { %1918 = vmatmul.mubr.bf16.gmra.mrb[76].mxu1 %v10738_v38  ;;  %v12569_v38 = vadd.f32 %v12217_v25, %v12366_v47  ;;  %v11074_v19 = vpop.eup %11073  ;;  %11085 = vpow2.f32 %v853_v51  ;;  %v739_v63 = vmin.f32 %v12565_v10, 20.0  ;;  %v10742_v47 = vld [vmem:[%s14674_s1 + $0x174] ss:$8 sps:$4 sm:$0xff]  }
 0x1f1   :  { %1925 = vmatprep.mubr.bf16.mxu1 %v10739_v34  ;;  %v855_v34 = vmul.f32 1.442695, %v734_v4  ;;  %v11076_v62 = vpop.eup %11075  ;;  %11087 = vrcp.f32 %v1045_v54  ;;  %v918_v50 = vadd.f32 2.0, %v11074_v19  ;;  %v740_v4 = vmin.f32 %v12582_v20, 20.0 }
 0x1f2   :  { %v737_v12 = vmin.f32 %v12569_v38, 20.0  ;;  %11089 = vrcp.f32 %v1048_v45  ;;  %v923_v32 = vadd.f32 2.0, %v11076_v62  ;;  %v865_v44 = vmul.f32 1.442695, %v739_v63 }
 0x1f3   :  { %v12588_v46 = vmul.f32 %v11074_v19, %v918_v50  ;;  %11091 = vpow2.f32 %v859_v23  ;;  %v738_v54 = vmin.f32 %v12586_v28, 20.0  ;;  %v867_v23 = vmul.f32 1.442695, %v740_v4 }
 0x1f4   :  { %v861_v26 = vmul.f32 1.442695, %v737_v12  ;;  %v12590_v51 = vmul.f32 %v11076_v62, %v923_v32  ;;  %11093 = vpow2.f32 %v855_v34 }
 0x1f5   :  { %v11078_v45 = vpop.eup %11077  ;;  %v1046_v39 = vadd.f32 2.0, %v12588_v46  ;;  %11095 = vpow2.f32 %v865_v44  ;;  %v863_v62 = vmul.f32 1.442695, %v738_v54 }
 0x1f6   :  { %v1051_v25 = vadd.f32 2.0, %v12590_v51  ;;  %v921_v61 = vadd.f32 2.0, %v11078_v45  ;;  %11097 = vpow2.f32 %v861_v26  ;;  %v10745_v26 = vld [vmem:[%s14674_s1 + $0x184] ss:$8 sps:$4 sm:$0xff]  }
 0x1f7   :  { %v11080_v19 = vpop.eup %11079  ;;  %11099 = vrcp.f32 %v1046_v39 }
 0x1f8   :  { %1926 = vmatmul.mubr.bf16.gmra.mrb[80].mxu1 %v10741_v31  ;;  %v11082_v50 = vpop.eup %11081  ;;  %11101 = vrcp.f32 %v1051_v25  ;;  %v12596_v34 = vmul.f32 %v11078_v45, %v921_v61  ;;  %v924_v63 = vadd.f32 2.0, %v11080_v19  ;;  %v10744_v31 = vld [vmem:[%s14674_s1 + $0x170] ss:$8 sps:$4 sm:$0xff]  }
 0x1f9   :  { %1933 = vmatprep.mubr.bf16.mxu1 %v10742_v47  ;;  %v11084_v12 = vpop.eup %11083  ;;  %v1175_v47 = vmul.f32 %v11072_v40, %v12456_v43  ;;  %v922_v32 = vadd.f32 2.0, %v11082_v50  ;;  %11103 = vpow2.f32 %v867_v23 }
 0x1fa   :  { %v11086_v44 = vpop.eup %11085  ;;  %v1049_v4 = vadd.f32 2.0, %v12596_v34  ;;  %v12606_v54 = vmul.f32 %v11080_v19, %v924_v63  ;;  %v927_v45 = vadd.f32 2.0, %v11084_v12  ;;  %11105 = vpow2.f32 %v863_v62 }
 0x1fb   :  { %v11088_v39 = vpop.eup %11087  ;;  %v12608_v25 = vmul.f32 %v11082_v50, %v922_v32  ;;  %v925_v61 = vadd.f32 2.0, %v11086_v44  ;;  %v12614_v16 = vmul.f32 %v1175_v47, %v14736_v56 }
 0x1fc   :  { %v11090_v59 = vpop.eup %11089  ;;  %11107 = vrcp.f32 %v1049_v4  ;;  %v1052_v43 = vadd.f32 2.0, %v12606_v54  ;;  %v12611_v40 = vmul.f32 %v11084_v12, %v927_v45  ;;  %v1173_v32 = vmul.f32 %v11088_v39, %v12557_v7  ;;  %v10747_v7 = vld [vmem:[%s14674_s1 + $0x180] ss:$8 sps:$4 sm:$0xff]  }
 0x1fd   :  { %v11092_v23 = vpop.eup %11091  ;;  %v1176_v19 = vmul.f32 %v11090_v59, %v12559_v24  ;;  %v1050_v63 = vadd.f32 2.0, %v12608_v25  ;;  %v12618_v62 = vmul.f32 %v11086_v44, %v925_v61 }
 0x1fe   :  { %v11094_v50 = vpop.eup %11093  ;;  %11109 = vrcp.f32 %v1052_v43  ;;  %v1055_v4 = vadd.f32 2.0, %v12611_v40  ;;  %v928_v12 = vadd.f32 2.0, %v11092_v23 }
 0x1ff   :  { %v11096_v45 = vpop.eup %11095  ;;  %11111 = vrcp.f32 %v1050_v63  ;;  %v1053_v56 = vadd.f32 2.0, %v12618_v62  ;;  %v926_v59 = vadd.f32 2.0, %v11094_v50  ;;  %v12635_v63 = vmul.f32 %v1173_v32, %v12424_v29 }
 0x200   :  { %1934 = vmatmul.mubr.bf16.gmra.mrb[84].mxu1 %v10744_v31  ;;  %v12623_v31 = vmul.f32 %v1176_v19, %v12432_v3  ;;  %v11098_v24 = vpop.eup %11097  ;;  %11113 = vrcp.f32 %v1055_v4  ;;  %v992_v47 = vmul.f32 %v11092_v23, %v928_v12  ;;  %v931_v44 = vadd.f32 2.0, %v11096_v45  ;;  %v10748_v19 = vld [vmem:[%s14674_s1 + $0x194] ss:$8 sps:$4 sm:$0xff]  }
 0x201   :  { %1941 = vmatprep.mubr.bf16.mxu1 %v10745_v26  ;;  %v11100_v61 = vpop.eup %11099  ;;  %11115 = vrcp.f32 %v1053_v56  ;;  %v990_v39 = vmul.f32 %v11094_v50, %v926_v59  ;;  %v929_v3 = vadd.f32 2.0, %v11098_v24 }
 0x202   :  { %v11102_v43 = vpop.eup %11101  ;;  %v1174_v23 = vmul.f32 %v11100_v61, %v12588_v46  ;;  %v1056_v4 = vadd.f32 2.0, %v992_v47  ;;  %v995_v12 = vmul.f32 %v11096_v45, %v931_v44  ;;  %v12808_v46 = vld [vmem:[%s14674_s1 + $0x214] ss:$8 sps:$4 sm:$0xff]  }
 0x203   :  { %v11104_v9 = vpop.eup %11103  ;;  %v1054_v14 = vadd.f32 2.0, %v990_v39  ;;  %v993_v15 = vmul.f32 %v11098_v24, %v929_v3  ;;  %v1179_v26 = vmul.f32 %v11102_v43, %v12590_v51  ;;  %14737 = vst [vmem:[#allocation5_spill] sm:$0xff] %v12808_v46 }
 0x204   :  { %v11106_v6 = vpop.eup %11105  ;;  %v12639_v56 = vmul.f32 %v1174_v23, %v12453_v5  ;;  %11117 = vrcp.f32 %v1056_v4  ;;  %v1059_v50 = vadd.f32 2.0, %v995_v12  ;;  %v932_v59 = vadd.f32 2.0, %v11104_v9 }
 0x205   :  { %11119 = vrcp.f32 %v1054_v14  ;;  %v1057_v29 = vadd.f32 2.0, %v993_v15  ;;  %v930_v32 = vadd.f32 2.0, %v11106_v6  ;;  %v10750_v14 = vld [vmem:[%s14674_s1 + $0x190] ss:$8 sps:$4 sm:$0xff]   ;;  %v12649_v51 = vmul.f32 %v1179_v26, %v12460_v35 }
 0x206   :  { %v11108_v53 = vpop.eup %11107  ;;  %11121 = vrcp.f32 %v1059_v50  ;;  %v996_v45 = vmul.f32 %v11104_v9, %v932_v59 }
 0x207   :  { %v1177_v24 = vmul.f32 %v11108_v53, %v12596_v34  ;;  %11123 = vrcp.f32 %v1057_v29  ;;  %v994_v5 = vmul.f32 %v11106_v6, %v930_v32  ;;  %v10751_v53 = vld [vmem:[%s14674_s1 + $0x1a4] ss:$8 sps:$4 sm:$0xff]   ;;  %v12680_v32 = vld [vmem:[%s14674_s1 + $0x1a0] ss:$8 sps:$4 sm:$0xff]  }
 0x208   :  { %1942 = vmatmul.mubr.bf16.gmra.mrb[88].mxu1 %v10747_v7  ;;  %v11110_v44 = vpop.eup %11109  ;;  %v1060_v61 = vadd.f32 2.0, %v996_v45 }
 0x209   :  { %1949 = vmatprep.mubr.bf16.mxu1 %v10748_v19  ;;  %v11112_v3 = vpop.eup %11111  ;;  %v1180_v7 = vmul.f32 %v11110_v44, %v12606_v54  ;;  %v1058_v43 = vadd.f32 2.0, %v994_v5  ;;  %v12656_v6 = vmul.f32 %v1177_v24, %v12497_v37 }
 0x20a   :  { %v11114_v19 = vpop.eup %11113  ;;  %v1178_v9 = vmul.f32 %v11112_v3, %v12608_v25  ;;  %11125 = vrcp.f32 %v1060_v61 }
 0x20b   :  { %v11116_v34 = vpop.eup %11115  ;;  %v12660_v23 = vmul.f32 %v1180_v7, %v12517_v42  ;;  %v1183_v35 = vmul.f32 %v11114_v19, %v12611_v40  ;;  %11127 = vrcp.f32 %v1058_v43  ;;  %v12714_v19 = vld [vmem:[%s14674_s1 + $0x1b0] ss:$8 sps:$4 sm:$0xff]  }
 0x20c   :  { %v12664_v54 = vmul.f32 %v1178_v9, %v12524_v30  ;;  %v1181_v26 = vmul.f32 %v11116_v34, %v12618_v62  ;;  %v12746_v34 = vld [vmem:[%s14674_s1 + $0x1d0] ss:$8 sps:$4 sm:$0xff]  }
 0x20d   :  { %v12672_v42 = vmul.f32 %v1183_v35, %v12528_v11  ;;  %v12688_v11 = vld [vmem:[%s14674_s1 + $0x1b4] ss:$8 sps:$4 sm:$0xff]  }
 0x20e   :  { %v11118_v4 = vpop.eup %11117  ;;  %v12675_v30 = vmul.f32 %v1181_v26, %v12532_v58 }
 0x20f   :  { %v11120_v50 = vpop.eup %11119  ;;  %v1184_v40 = vmul.f32 %v11118_v4, %v992_v47  ;;  %v12753_v4 = vld [vmem:[%s14674_s1 + $0x1e4] ss:$8 sps:$4 sm:$0xff]  }
 0x210   :  { %1950 = vmatmul.mubr.bf16.gmra.mrb[92].mxu1 %v10750_v14  ;;  %v11122_v59 = vpop.eup %11121  ;;  %v1182_v29 = vmul.f32 %v11120_v50, %v990_v39  ;;  %v12790_v39 = vld [vmem:[%s14674_s1 + $0x1f0] ss:$8 sps:$4 sm:$0xff]  }
 0x211   :  { %1957 = vmatprep.mubr.bf16.mxu1 %v10751_v53  ;;  %v11124_v62 = vpop.eup %11123  ;;  %v12683_v24 = vmul.f32 %v1184_v40, %v12542_v33  ;;  %v1187_v44 = vmul.f32 %v11122_v59, %v995_v12 }
 0x212   :  { %v12691_v47 = vmul.f32 %v1182_v29, %v12555_v13  ;;  %v1185_v58 = vmul.f32 %v11124_v62, %v993_v15  ;;  %v12843_v29 = vld [vmem:[%s14674_s1 + $0x220] ss:$8 sps:$4 sm:$0xff]  }
 0x213   :  { %v12699_v33 = vmul.f32 %v1187_v44, %v12565_v10  ;;  %14740 = vst [vmem:[#allocation8_spill] sm:$0xff] %v12843_v29 }
 0x214   :  { %v11126_v61 = vpop.eup %11125  ;;  %v12703_v13 = vmul.f32 %v1185_v58, %v12569_v38  ;;  %v12721_v38 = vld [vmem:[%s14674_s1 + $0x1c4] ss:$8 sps:$4 sm:$0xff]  }
 0x215   :  { %v11128_v14 = vpop.eup %11127  ;;  %v1188_v12 = vmul.f32 %v11126_v61, %v996_v45  ;;  %v12735_v45 = vld [vmem:[%s14674_s1 + $0x1d4] ss:$8 sps:$4 sm:$0xff]  }
 0x216   :  { %v1186_v15 = vmul.f32 %v11128_v14, %v994_v5  ;;  %v12770_v14 = vld [vmem:[%s14674_s1 + $0x1e0] ss:$8 sps:$4 sm:$0xff]  }
 0x217   :  { %v12706_v7 = vmul.f32 %v1188_v12, %v12582_v20 }
 0x218   :  { %1958 = vmatmul.mubr.bf16.gmra.mrb[96].mxu1 %v12680_v32  ;;  %v12709_v43 = vmul.f32 %v1186_v15, %v12586_v28  ;;  %v12730_v28 = vld [vmem:[%s14674_s1 + $0x1c0] ss:$8 sps:$4 sm:$0xff]  }
 0x219   :  { %1965 = vmatprep.mubr.bf16.mxu1 %v12688_v11 }
 0x220   :  { %1966 = vmatmul.mubr.bf16.gmra.mrb[100].mxu1 %v12714_v19 }
 0x221   :  { %1973 = vmatprep.mubr.bf16.mxu1 %v12721_v38 }
 0x228   :  { %1974 = vmatmul.mubr.bf16.gmra.mrb[104].mxu1 %v12730_v28 }
 0x229   :  { %1981 = vmatprep.mubr.bf16.mxu1 %v12735_v45 }
 0x22b   :  { %v12739_v5 = vpop.f32.mrb[0].mxu1  ;;  %v12741_v53 = vpop.f32.mrb[64].mxu0 }
 0x22c   :  { %v1769_v9 = vpop.f32.mrb[1].mxu1  ;;  %v1753_v35 = vpop.f32.mrb[65].mxu0 }
 0x22d   :  { %v12748_v26 = vpop.f32.mrb[2].mxu1  ;;  %v12755_v50 = vpop.f32.mrb[66].mxu0  ;;  %v12777_v9 = vld [vmem:[%s14674_s1 + $0x1f4] ss:$8 sps:$4 sm:$0xff]  }
 0x22e   :  { %v1772_v59 = vpop.f32.mrb[3].mxu1  ;;  %v1756_v62 = vpop.f32.mrb[67].mxu0 }
 0x230   :  { %1982 = vmatmul.mubr.bf16.gmra.mrb[108].mxu1 %v12746_v34 }
 0x231   :  { %1989 = vmatprep.mubr.bf16.mxu1 %v12753_v4 }
 0x233   :  { %v12763_v44 = vpop.f32.mrb[4].mxu1  ;;  %v12765_v58 = vpop.f32.mrb[68].mxu0 }
 0x234   :  { %v1777_v61 = vpop.f32.mrb[5].mxu1  ;;  %v1761_v12 = vpop.f32.mrb[69].mxu0 }
 0x235   :  { %v12772_v15 = vpop.f32.mrb[6].mxu1  ;;  %v12779_v35 = vpop.f32.mrb[70].mxu0 }
 0x236   :  { %v1780_v62 = vpop.f32.mrb[7].mxu1  ;;  %v2039_v61 = vpack.c.bf16 %v12779_v35, %v12765_v58  ;;  %v1764_v10 = vpop.f32.mrb[71].mxu0  ;;  %v12803_v35 = vld [vmem:[%s14674_s1 + $0x200] ss:$8 sps:$4 sm:$0xff]  }
 0x237   :  { %v12795_v62 = vld [vmem:[%s14674_s1 + $0x204] ss:$8 sps:$4 sm:$0xff]  }
 0x238   :  { %1990 = vmatmul.mubr.bf16.gmra.mrb[112].mxu1 %v12770_v14 }
 0x239   :  { %1997 = vmatprep.mubr.bf16.mxu1 %v12777_v9 }
 0x23b   :  { %v1783_v12 = vpop.f32.mrb[8].mxu1 }
 0x23c   :  { %v1785_v20 = vpop.f32.mrb[9].mxu1 }
 0x23d   :  { %v1786_v3 = vpop.f32.mrb[10].mxu1 }
 0x23e   :  { %v2046_v37 = vpack.c.bf16 %v1786_v3, %v1783_v12  ;;  %v1788_v58 = vpop.f32.mrb[11].mxu1 }
 0x240   :  { %1998 = vmatmul.mubr.bf16.gmra.mrb[116].mxu1 %v12790_v39  ;;  %9622 = vmatprep.mubr.msk.bf16.mxu0 %vm291_vm0, %v2046_v37  ;;  %v12813_v37 = vld [vmem:[%s14677_s4 + $0x8] sm:$0xff]  }
 0x241   :  { %2005 = vmatprep.mubr.bf16.mxu1 %v12795_v62 }
 0x243   :  { %v1791_v10 = vpop.f32.mrb[12].mxu1 }
 0x244   :  { %v1793_v20 = vpop.f32.mrb[13].mxu1 }
 0x245   :  { %v1794_v25 = vpop.f32.mrb[14].mxu1  ;;  %v12828_v20 = vld [vmem:[%s14674_s1 + $0x210] ss:$8 sps:$4 sm:$0xff]  }
 0x246   :  { %v2047_v3 = vpack.c.bf16 %v1794_v25, %v1791_v10  ;;  %v1796_v12 = vpop.f32.mrb[15].mxu1  ;;  %v12823_v25 = vld [vmem:[%s14677_s4 + $0x20] sm:$0xff]   ;;  %14738 = vst [vmem:[#allocation6_spill] sm:$0xff] %v12828_v20 }
 0x248   :  { %2006 = vmatmul.mubr.bf16.gmra.mrb[120].mxu1 %v12803_v35  ;;  %9623 = vmatmul.mubr.msk.bf16.vlgmr.msra.gmra.mrb[72].mxu0 %vm291_vm0, %v2047_v3  ;;  %v12833_v3 = vld [vmem:[%s14674_s1 + $0x224] ss:$8 sps:$4 sm:$0xff]  }
 0x249   :  { %2013 = vmatprep.mubr.bf16.mxu1 %v12808_v46  ;;  %9631 = vmatpush3.bf16.msra.mxu0 %v12384_v52  ;;  %14739 = vst [vmem:[#allocation7_spill] sm:$0xff] %v12833_v3 }
 0x24a   :  { %9632 = vmatprep.subr.bf16.mxu0 %v12813_v37 }
 0x24b   :  { %v1799_v58 = vpop.f32.mrb[16].mxu1 }
 0x24c   :  { %v1801_v10 = vpop.f32.mrb[17].mxu1 }
 0x24d   :  { %v1802_v12 = vpop.f32.mrb[18].mxu1  ;;  %9633 = vmatpush3.bf16.msra.mxu0 %v12813_v37 }
 0x24e   :  { %v2048_v52 = vpack.c.bf16 %v1802_v12, %v1799_v58  ;;  %v1804_v59 = vpop.f32.mrb[19].mxu1  ;;  %9642 = vmatprep.subr.bf16.mxu0 %v12823_v25 }
 0x24f   :  { %v12848_v59 = vld [vmem:[%s14674_s1 + $0x234] ss:$8 sps:$4 sm:$0xff]  }
 0x250   :  { %2014 = vmatmul.mubr.bf16.gmra.mrb[124].mxu1 %v12828_v20  ;;  %9626 = vmatprep.mubr.msk.bf16.mxu0 %vm291_vm0, %v2048_v52  ;;  %14741 = vst [vmem:[#allocation9_spill] sm:$0xff] %v12848_v59  ;;  %v12860_v20 = vld [vmem:[%s14674_s1 + $0x230] ss:$8 sps:$4 sm:$0xff]  }
 0x251   :  { %2021 = vmatprep.mubr.bf16.mxu1 %v12833_v3  ;;  %14743 = vst [vmem:[#allocation10_spill] sm:$0xff] %v12860_v20 }
 0x253   :  { %v1807_v10 = vpop.f32.mrb[20].mxu1 }
 0x254   :  { %v1809_v40 = vpop.f32.mrb[21].mxu1 }
 0x255   :  { %v1810_v46 = vpop.f32.mrb[22].mxu1  ;;  %v14742_v40 = vpack.c.bf16 %v12755_v50, %v12741_v53  ;;  %v14745_v53 = vpack.c.bf16 %v12748_v26, %v12739_v5  ;;  %v12878_v50 = vld [vmem:[%s14677_s4 + $0x30] sm:$0xff]   ;;  %v14747_v5 = vpack.c.bf16 %v12772_v15, %v12763_v44  ;;  %v12899_v44 = vld [vmem:[%s14677_s4 + $0x40] sm:$0xff]  }
 0x256   :  { %v2049_v58 = vpack.c.bf16 %v1810_v46, %v1807_v10  ;;  %v1812_v12 = vpop.f32.mrb[23].mxu1  ;;  %14746 = vst [vmem:[#allocation12_spill] sm:$0xff] %v12878_v50  ;;  %14749 = vst [vmem:[#allocation14_spill] sm:$0xff] %v12899_v44 }
 0x258   :  { %2022 = vmatmul.mubr.bf16.gmra.mrb[128].mxu1 %v12843_v29  ;;  %9627 = vmatmul.mubr.msk.bf16.gmra.mrb[76].mxu0 %vm291_vm0, %v2049_v58  ;;  %v12865_v58 = vld [vmem:[%s14677_s4 + $0x28] sm:$0xff]  }
 0x259   :  { %2029 = vmatprep.mubr.bf16.mxu1 %v12848_v59  ;;  %9634 = vmatprep.mubr.msk.bf16.mxu0 %vm291_vm0, %v14742_v40  ;;  %14744 = vst [vmem:[#allocation11_spill] sm:$0xff] %v12865_v58 }
 0x25b   :  { %v1815_v52 = vpop.f32.mrb[24].mxu1 }
 0x25c   :  { %v1817_v3 = vpop.f32.mrb[25].mxu1 }
 0x25d   :  { %v1818_v46 = vpop.f32.mrb[26].mxu1 }
 0x25e   :  { %v2232_v10 = vpack.c.bf16 %v1818_v46, %v1815_v52  ;;  %v1820_v12 = vpop.f32.mrb[27].mxu1 }
 0x260   :  { %2030 = vmatmul.mubr.bf16.gmra.mrb[132].mxu1 %v12860_v20  ;;  %9635 = vmatmul.mubr.msk.bf16.vlgmr.msra.gmra.mrb[72].mxu0 %vm291_vm0, %v2039_v61 }
 0x261   :  { %9638 = vmatprep.mubr.msk.bf16.mxu0 %vm291_vm0, %v14745_v53  ;;  %9643 = vmatpush3.bf16.msra.mxu0 %v12823_v25 }
 0x262   :  { %9644 = vmatprep.subr.bf16.mxu0 %v12865_v58 }
 0x263   :  { %v1823_v3 = vpop.f32.mrb[28].mxu1 }
 0x264   :  { %v1825_v40 = vpop.f32.mrb[29].mxu1 }
 0x265   :  { %v1826_v52 = vpop.f32.mrb[30].mxu1  ;;  %9645 = vmatpush3.bf16.msra.mxu0 %v12865_v58  ;;  %v12890_v40 = vld [vmem:[%s14677_s4 + $0x38] sm:$0xff]  }
 0x266   :  { %v2233_v61 = vpack.c.bf16 %v1826_v52, %v1823_v3  ;;  %v1828_v46 = vpop.f32.mrb[31].mxu1  ;;  %9654 = vmatprep.subr.bf16.mxu0 %v12878_v50  ;;  %14748 = vst [vmem:[#allocation13_spill] sm:$0xff] %v12890_v40 }
 0x268   :  { %9639 = vmatmul.mubr.msk.bf16.gmra.mrb[76].mxu0 %vm291_vm0, %v14747_v5 }
 0x269   :  { %9646 = vmatprep.mubr.msk.bf16.mxu0 %vm291_vm0, %v2232_v10 }
 0x26b   :  { %v1831_v26 = vpop.f32.mrb[32].mxu1 }
 0x26c   :  { %v1833_v12 = vpop.f32.mrb[33].mxu1 }
 0x26d   :  { %v1834_v53 = vpop.f32.mrb[34].mxu1 }
 0x26e   :  { %v2234_v20 = vpack.c.bf16 %v1834_v53, %v1831_v26  ;;  %v1836_v59 = vpop.f32.mrb[35].mxu1 }
 0x270   :  { %9647 = vmatmul.mubr.msk.bf16.vlgmr.msra.gmra.mrb[72].mxu0 %vm291_vm0, %v2233_v61 }
 0x271   :  { %9650 = vmatprep.mubr.msk.bf16.mxu0 %vm291_vm0, %v2234_v20  ;;  %9655 = vmatpush3.bf16.msra.mxu0 %v12878_v50 }
 0x272   :  { %9656 = vmatprep.subr.bf16.mxu0 %v12890_v40 }
 0x273   :  { %v1839_v15 = vpop.f32.mrb[36].mxu1 }
 0x274   :  { %v1841_v59 = vpop.f32.mrb[37].mxu1 }
 0x275   :  { %v1842_v10 = vpop.f32.mrb[38].mxu1  ;;  %9657 = vmatpush3.bf16.msra.mxu0 %v12890_v40 }
 0x276   :  { %v2235_v3 = vpack.c.bf16 %v1842_v10, %v1839_v15  ;;  %v1844_v52 = vpop.f32.mrb[39].mxu1  ;;  %9666 = vmatprep.subr.bf16.mxu0 %v12899_v44  ;;  %v12908_v15 = vld [vmem:[%s14677_s4 + $0x48] sm:$0xff]   ;;  %v12916_v10 = vld [vmem:[%s14677_s4 + $0x50] sm:$0xff]  }
 0x277   :  { %14750 = vst [vmem:[#allocation15_spill] sm:$0xff] %v12908_v15  ;;  %14751 = vst [vmem:[#allocation16_spill] sm:$0xff] %v12916_v10 }
 0x278   :  { %9651 = vmatmul.mubr.msk.bf16.gmra.mrb[76].mxu0 %vm291_vm0, %v2235_v3 }
 0x27b   :  { %v1847_v20 = vpop.f32.mrb[40].mxu1 }
 0x27c   :  { %v1849_v61 = vpop.f32.mrb[41].mxu1 }
 0x27d   :  { %v1850_v46 = vpop.f32.mrb[42].mxu1 }
 0x27e   :  { %v2337_v5 = vpack.c.bf16 %v1850_v46, %v1847_v20  ;;  %v1852_v26 = vpop.f32.mrb[43].mxu1 }
 0x280   :  { %9658 = vmatprep.mubr.msk.bf16.mxu0 %vm291_vm0, %v2337_v5 }
 0x283   :  { %v1855_v12 = vpop.f32.mrb[44].mxu1 }
 0x284   :  { %v1857_v53 = vpop.f32.mrb[45].mxu1 }
 0x285   :  { %v1858_v50 = vpop.f32.mrb[46].mxu1 }
 0x286   :  { %v2338_v59 = vpack.c.bf16 %v1858_v50, %v1855_v12  ;;  %v1860_v58 = vpop.f32.mrb[47].mxu1 }
 0x288   :  { %9659 = vmatmul.mubr.msk.bf16.vlgmr.msra.gmra.mrb[72].mxu0 %vm291_vm0, %v2338_v59 }
 0x289   :  { %9667 = vmatpush3.bf16.msra.mxu0 %v12899_v44 }
 0x28a   :  { %9668 = vmatprep.subr.bf16.mxu0 %v12908_v15 }
 0x28b   :  { %v1863_v3 = vpop.f32.mrb[48].mxu1 }
 0x28c   :  { %v1865_v52 = vpop.f32.mrb[49].mxu1 }
 0x28d   :  { %v1866_v50 = vpop.f32.mrb[50].mxu1  ;;  %9669 = vmatpush3.bf16.msra.mxu0 %v12908_v15 }
 0x28e   :  { %v2339_v58 = vpack.c.bf16 %v1866_v50, %v1863_v3  ;;  %v1868_v20 = vpop.f32.mrb[51].mxu1  ;;  %9678 = vmatprep.subr.bf16.mxu0 %v12916_v10 }
 0x290   :  { %9662 = vmatprep.mubr.msk.bf16.mxu0 %vm291_vm0, %v2339_v58  ;;  %v12926_v58 = vld [vmem:[%s14677_s4 + $0x58] sm:$0xff]  }
 0x291   :  { %14752 = vst [vmem:[#allocation17_spill] sm:$0xff] %v12926_v58 }
 0x293   :  { %v1871_v61 = vpop.f32.mrb[52].mxu1 }
 0x294   :  { %v1873_v46 = vpop.f32.mrb[53].mxu1 }
 0x295   :  { %v1874_v5 = vpop.f32.mrb[54].mxu1 }
 0x296   :  { %v2340_v26 = vpack.c.bf16 %v1874_v5, %v1871_v61  ;;  %v1876_v12 = vpop.f32.mrb[55].mxu1 }
 0x298   :  { %9663 = vmatmul.mubr.msk.bf16.gmra.mrb[76].mxu0 %vm291_vm0, %v2340_v26 }
 0x29b   :  { %v1879_v53 = vpop.f32.mrb[56].mxu1 }
 0x29c   :  { %v1881_v59 = vpop.f32.mrb[57].mxu1 }
 0x29d   :  { %v1882_v44 = vpop.f32.mrb[58].mxu1 }
 0x29e   :  { %v2442_v52 = vpack.c.bf16 %v1882_v44, %v1879_v53  ;;  %v1884_v40 = vpop.f32.mrb[59].mxu1 }
 0x29f   :  { %v12934_v40 = vld [vmem:[%s14677_s4 + $0x60] sm:$0xff]  }
 0x2a0   :  { %9670 = vmatprep.mubr.msk.bf16.mxu0 %vm291_vm0, %v2442_v52  ;;  %14753 = vst [vmem:[#allocation18_spill] sm:$0xff] %v12934_v40 }
 0x2a3   :  { %v1887_v3 = vpop.f32.mrb[60].mxu1 }
 0x2a4   :  { %v1889_v50 = vpop.f32.mrb[61].mxu1 }
 0x2a5   :  { %v1890_v20 = vpop.f32.mrb[62].mxu1 }
 0x2a6   :  { %v2443_v15 = vpack.c.bf16 %v1890_v20, %v1887_v3  ;;  %v1892_v29 = vpop.f32.mrb[63].mxu1 }
 0x2a8   :  { %9671 = vmatmul.mubr.msk.bf16.vlgmr.msra.gmra.mrb[72].mxu0 %vm291_vm0, %v2443_v15 }
 0x2a9   :  { %9679 = vmatpush3.bf16.msra.mxu0 %v12916_v10 }
 0x2aa   :  { %9680 = vmatprep.subr.bf16.mxu0 %v12926_v58 }
 0x2ab   :  { %v1895_v44 = vpop.f32.mrb[64].mxu1 }
 0x2ac   :  { %v1897_v61 = vpop.f32.mrb[65].mxu1 }
 0x2ad   :  { %v1898_v46 = vpop.f32.mrb[66].mxu1  ;;  %9681 = vmatpush3.bf16.msra.mxu0 %v12926_v58 }
 0x2ae   :  { %v2444_v29 = vpack.c.bf16 %v1898_v46, %v1895_v44  ;;  %v1900_v5 = vpop.f32.mrb[67].mxu1  ;;  %9690 = vmatprep.subr.bf16.mxu0 %v12934_v40 }
 0x2b0   :  { %9674 = vmatprep.mubr.msk.bf16.mxu0 %vm291_vm0, %v2444_v29  ;;  %v12944_v29 = vld [vmem:[%s14677_s4 + $0x68] sm:$0xff]  }
 0x2b1   :  { %14754 = vst [vmem:[#allocation19_spill] sm:$0xff] %v12944_v29 }
 0x2b3   :  { %v1903_v15 = vpop.f32.mrb[68].mxu1 }
 0x2b4   :  { %v1905_v26 = vpop.f32.mrb[69].mxu1 }
 0x2b5   :  { %v1906_v12 = vpop.f32.mrb[70].mxu1 }
 0x2b6   :  { %v2445_v53 = vpack.c.bf16 %v1906_v12, %v1903_v15  ;;  %v1908_v59 = vpop.f32.mrb[71].mxu1  ;;  %v12952_v15 = vld [vmem:[%s14677_s4 + $0x70] sm:$0xff]  }
 0x2b7   :  { %14755 = vst [vmem:[#allocation20_spill] sm:$0xff] %v12952_v15 }
 0x2b8   :  { %9675 = vmatmul.mubr.msk.bf16.gmra.mrb[76].mxu0 %vm291_vm0, %v2445_v53 }
 0x2bb   :  { %v1911_v52 = vpop.f32.mrb[72].mxu1 }
 0x2bc   :  { %v1913_v3 = vpop.f32.mrb[73].mxu1 }
 0x2bd   :  { %v1914_v50 = vpop.f32.mrb[74].mxu1 }
 0x2be   :  { %v2547_v20 = vpack.c.bf16 %v1914_v50, %v1911_v52  ;;  %v1916_v61 = vpop.f32.mrb[75].mxu1 }
 0x2c0   :  { %9682 = vmatprep.mubr.msk.bf16.mxu0 %vm291_vm0, %v2547_v20 }
 0x2c3   :  { %v1919_v44 = vpop.f32.mrb[76].mxu1 }
 0x2c4   :  { %v1921_v46 = vpop.f32.mrb[77].mxu1 }
 0x2c5   :  { %v1922_v5 = vpop.f32.mrb[78].mxu1 }
 0x2c6   :  { %v2548_v58 = vpack.c.bf16 %v1922_v5, %v1919_v44  ;;  %v1924_v10 = vpop.f32.mrb[79].mxu1 }
 0x2c8   :  { %9683 = vmatmul.mubr.msk.bf16.vlgmr.msra.gmra.mrb[72].mxu0 %vm291_vm0, %v2548_v58 }
 0x2c9   :  { %9691 = vmatpush3.bf16.msra.mxu0 %v12934_v40 }
 0x2ca   :  { %9692 = vmatprep.subr.bf16.mxu0 %v12944_v29 }
 0x2cb   :  { %v1927_v26 = vpop.f32.mrb[80].mxu1 }
 0x2cc   :  { %v1929_v12 = vpop.f32.mrb[81].mxu1 }
 0x2cd   :  { %v1930_v53 = vpop.f32.mrb[82].mxu1  ;;  %9693 = vmatpush3.bf16.msra.mxu0 %v12944_v29 }
 0x2ce   :  { %v2549_v10 = vpack.c.bf16 %v1930_v53, %v1927_v26  ;;  %v1932_v59 = vpop.f32.mrb[83].mxu1  ;;  %9702 = vmatprep.subr.bf16.mxu0 %v12952_v15 }
 0x2d0   :  { %9686 = vmatprep.mubr.msk.bf16.mxu0 %vm291_vm0, %v2549_v10  ;;  %v12962_v10 = vld [vmem:[%s14677_s4 + $0x78] sm:$0xff]  }
 0x2d1   :  { %14756 = vst [vmem:[#allocation21_spill] sm:$0xff] %v12962_v10 }
 0x2d3   :  { %v1935_v58 = vpop.f32.mrb[84].mxu1 }
 0x2d4   :  { %v1937_v52 = vpop.f32.mrb[85].mxu1 }
 0x2d5   :  { %v1938_v3 = vpop.f32.mrb[86].mxu1 }
 0x2d6   :  { %v2550_v50 = vpack.c.bf16 %v1938_v3, %v1935_v58  ;;  %v1940_v20 = vpop.f32.mrb[87].mxu1  ;;  %v12970_v58 = vld [vmem:[%s14677_s4 + $0x80] sm:$0xff]  }
 0x2d7   :  { %14757 = vst [vmem:[#allocation22_spill] sm:$0xff] %v12970_v58 }
 0x2d8   :  { %9687 = vmatmul.mubr.msk.bf16.gmra.mrb[76].mxu0 %vm291_vm0, %v2550_v50 }
 0x2db   :  { %v1943_v61 = vpop.f32.mrb[88].mxu1 }
 0x2dc   :  { %v1945_v44 = vpop.f32.mrb[89].mxu1 }
 0x2dd   :  { %v1946_v46 = vpop.f32.mrb[90].mxu1 }
 0x2de   :  { %v2652_v5 = vpack.c.bf16 %v1946_v46, %v1943_v61  ;;  %v1948_v12 = vpop.f32.mrb[91].mxu1 }
 0x2e0   :  { %9694 = vmatprep.mubr.msk.bf16.mxu0 %vm291_vm0, %v2652_v5 }
 0x2e3   :  { %v1951_v26 = vpop.f32.mrb[92].mxu1 }
 0x2e4   :  { %v1953_v53 = vpop.f32.mrb[93].mxu1 }
 0x2e5   :  { %v1954_v59 = vpop.f32.mrb[94].mxu1 }
 0x2e6   :  { %v2653_v29 = vpack.c.bf16 %v1954_v59, %v1951_v26  ;;  %v1956_v40 = vpop.f32.mrb[95].mxu1 }
 0x2e8   :  { %9695 = vmatmul.mubr.msk.bf16.vlgmr.msra.gmra.mrb[72].mxu0 %vm291_vm0, %v2653_v29 }
 0x2e9   :  { %9703 = vmatpush3.bf16.msra.mxu0 %v12952_v15 }
 0x2ea   :  { %9704 = vmatprep.subr.bf16.mxu0 %v12962_v10 }
 0x2eb   :  { %v1959_v52 = vpop.f32.mrb[96].mxu1 }
 0x2ec   :  { %v1961_v3 = vpop.f32.mrb[97].mxu1 }
 0x2ed   :  { %v1962_v50 = vpop.f32.mrb[98].mxu1  ;;  %9705 = vmatpush3.bf16.msra.mxu0 %v12962_v10 }
 0x2ee   :  { %v2654_v40 = vpack.c.bf16 %v1962_v50, %v1959_v52  ;;  %v1964_v20 = vpop.f32.mrb[99].mxu1  ;;  %9714 = vmatprep.subr.bf16.mxu0 %v12970_v58 }
 0x2f0   :  { %9698 = vmatprep.mubr.msk.bf16.mxu0 %vm291_vm0, %v2654_v40  ;;  %v12980_v40 = vld [vmem:[%s14677_s4 + $0x88] sm:$0xff]  }
 0x2f1   :  { %14758 = vst [vmem:[#allocation23_spill] sm:$0xff] %v12980_v40 }
 0x2f3   :  { %v1967_v29 = vpop.f32.mrb[100].mxu1 }
 0x2f4   :  { %v1969_v61 = vpop.f32.mrb[101].mxu1 }
 0x2f5   :  { %v1970_v44 = vpop.f32.mrb[102].mxu1 }
 0x2f6   :  { %v2655_v46 = vpack.c.bf16 %v1970_v44, %v1967_v29  ;;  %v1972_v5 = vpop.f32.mrb[103].mxu1 }
 0x2f8   :  { %9699 = vmatmul.mubr.msk.bf16.gmra.mrb[76].mxu0 %vm291_vm0, %v2655_v46 }
 0x2fb   :  { %v1975_v12 = vpop.f32.mrb[104].mxu1 }
 0x2fc   :  { %v1977_v26 = vpop.f32.mrb[105].mxu1 }
 0x2fd   :  { %v1978_v53 = vpop.f32.mrb[106].mxu1 }
 0x2fe   :  { %v2757_v59 = vpack.c.bf16 %v1978_v53, %v1975_v12  ;;  %v1980_v3 = vpop.f32.mrb[107].mxu1  ;;  %v14759_v12 = vmov 0  }
 0x300   :  { %9706 = vmatprep.mubr.msk.bf16.mxu0 %vm291_vm0, %v2757_v59 }
 0x303   :  { %v1983_v52 = vpop.f32.mrb[108].mxu1 }
 0x304   :  { %v1985_v50 = vpop.f32.mrb[109].mxu1 }
 0x305   :  { %v1986_v20 = vpop.f32.mrb[110].mxu1 }
 0x306   :  { %v2758_v10 = vpack.c.bf16 %v1986_v20, %v1983_v52  ;;  %v1988_v15 = vpop.f32.mrb[111].mxu1 }
 0x308   :  { %9707 = vmatmul.mubr.msk.bf16.vlgmr.msra.gmra.mrb[72].mxu0 %vm291_vm0, %v2758_v10 }
 0x309   :  { %9715 = vmatpush3.bf16.msra.mxu0 %v12970_v58 }
 0x30a   :  { %9716 = vmatprep.subr.bf16.mxu0 %v12980_v40 }
 0x30b   :  { %v1991_v29 = vpop.f32.mrb[112].mxu1 }
 0x30c   :  { %v1993_v61 = vpop.f32.mrb[113].mxu1 }
 0x30d   :  { %v1994_v44 = vpop.f32.mrb[114].mxu1  ;;  %9717 = vmatpush3.bf16.msra.mxu0 %v12980_v40 }
 0x30e   :  { %v2759_v46 = vpack.c.bf16 %v1994_v44, %v1991_v29  ;;  %v1996_v5 = vpop.f32.mrb[115].mxu1  ;;  %2967 = vmatprep.subr.bf16.mxu0 %v14759_v12 }
 0x310   :  { %9710 = vmatprep.mubr.msk.bf16.mxu0 %vm291_vm0, %v2759_v46  ;;  %v14760_v46 = vpack.c.bf16 %v12427_v49, %v12411_v18 }
 0x313   :  { %v1999_v15 = vpop.f32.mrb[116].mxu1 }
 0x314   :  { %v2001_v26 = vpop.f32.mrb[117].mxu1 }
 0x315   :  { %v2002_v53 = vpop.f32.mrb[118].mxu1 }
 0x316   :  { %v2760_v59 = vpack.c.bf16 %v2002_v53, %v1999_v15  ;;  %v2004_v10 = vpop.f32.mrb[119].mxu1  ;;  %v14761_v53 = vpack.c.bf16 %v12419_v17, %v12403_v2 }
 0x318   :  { %9711 = vmatmul.mubr.msk.bf16.gmra.mrb[76].mxu0 %vm291_vm0, %v2760_v59 }
 0x31b   :  { %v2007_v3 = vpop.f32.mrb[120].mxu1 }
 0x31c   :  { %v2009_v52 = vpop.f32.mrb[121].mxu1 }
 0x31d   :  { %v2010_v50 = vpop.f32.mrb[122].mxu1 }
 0x31e   :  { %v2862_v20 = vpack.c.bf16 %v2010_v50, %v2007_v3  ;;  %v2012_v61 = vpop.f32.mrb[123].mxu1  ;;  %v14764_v50 = vpack.c.bf16 %v12492_v22, %v12482_v41  ;;  %v14768_v41 = vpack.c.bf16 %v12639_v56, %v12635_v63  ;;  %v14771_v22 = vpack.c.bf16 %v12660_v23, %v12649_v51  ;;  %v11517_v63 = vld [vmem:[%s14674_s1 + $0x10] ss:$8 sps:$4 sm:$0xff]   ;;  %v11518_v56 = vld [vmem:[%s14674_s1 + $0x24] ss:$8 sps:$4 sm:$0xff]  }
 0x31f   :  { %v11519_v51 = vld [vmem:[%s14674_s1 + $0x20] ss:$8 sps:$4 sm:$0xff]   ;;  %v11521_v23 = vld [vmem:[%s14674_s1 + $0x30] ss:$8 sps:$4 sm:$0xff]  }
 0x320   :  { %9718 = vmatprep.mubr.msk.bf16.mxu0 %vm291_vm0, %v2862_v20  ;;  %v11532_v20 = vld [vmem:[%s14674_s1 + $0x94] ss:$8 sps:$4 sm:$0xff]   ;;  %v11533_v61 = vld [vmem:[%s14674_s1 + $0x90] ss:$8 sps:$4 sm:$0xff]  }
 0x323   :  { %v2015_v29 = vpop.f32.mrb[124].mxu1 }
 0x324   :  { %v2017_v44 = vpop.f32.mrb[125].mxu1 }
 0x325   :  { %v2018_v5 = vpop.f32.mrb[126].mxu1  ;;  %v11535_v44 = vld [vmem:[%s14674_s1 + $0xa0] ss:$8 sps:$4 sm:$0xff]  }
 0x326   :  { %v2863_v40 = vpack.c.bf16 %v2018_v5, %v2015_v29  ;;  %v2020_v58 = vpop.f32.mrb[127].mxu1  ;;  %v11534_v29 = vld [vmem:[%s14674_s1 + $0xa4] ss:$8 sps:$4 sm:$0xff]   ;;  %v11536_v5 = vld [vmem:[%s14674_s1 + $0xb4] ss:$8 sps:$4 sm:$0xff]  }
 0x327   :  { %v14762_v58 = vpack.c.bf16 %v12465_v60, %v12444_v0  ;;  %v11514_v0 = vld [vmem:[%s14674_s1 + $0x4] ss:$8 sps:$4 sm:$0xff]   ;;  %v14767_v60 = vpack.c.bf16 %v12512_v57, %v12502_v1  ;;  %v14772_v1 = vpack.c.bf16 %v12691_v47, %v12675_v30  ;;  %v14775_v57 = vpack.c.bf16 %v12706_v7, %v12699_v33  ;;  %v11524_v30 = vld [vmem:[%s14674_s1 + $0x54] ss:$8 sps:$4 sm:$0xff]   ;;  %v11527_v33 = vld [vmem:[%s14674_s1 + $0x60] ss:$8 sps:$4 sm:$0xff]  }
 0x328   :  { %9719 = vmatmul.mubr.msk.bf16.vlgmr.msra.gmra.mrb[72].mxu0 %vm291_vm0, %v2863_v40  ;;  %v14763_v40 = vpack.c.bf16 %v12448_v36, %v12437_v21  ;;  %v14765_v21 = vpack.c.bf16 %v12487_v55, %v12472_v8  ;;  %v14766_v36 = vpack.c.bf16 %v12520_v48, %v12508_v27  ;;  %v14769_v8 = vpack.c.bf16 %v12623_v31, %v12614_v16  ;;  %v11515_v48 = vld [vmem:[%s14674_s1] ss:$8 sps:$4 sm:$0xff]   ;;  %v11516_v31 = vld [vmem:[%s14674_s1 + $0x14] ss:$8 sps:$4 sm:$0xff]   ;;  %v11526_v47 = vld [vmem:[%s14674_s1 + $0x64] ss:$8 sps:$4 sm:$0xff]  }
 0x329   :  { %2968 = vmatpush1.bf16.msra.mxu0 %v14760_v46  ;;  %v14770_v55 = vpack.c.bf16 %v12664_v54, %v12656_v6  ;;  %v14773_v16 = vpack.c.bf16 %v12683_v24, %v12672_v42  ;;  %v14774_v27 = vpack.c.bf16 %v12709_v43, %v12703_v13  ;;  %v11520_v6 = vld [vmem:[%s14674_s1 + $0x34] ss:$8 sps:$4 sm:$0xff]   ;;  %v11522_v54 = vld [vmem:[%s14674_s1 + $0x44] ss:$8 sps:$4 sm:$0xff]   ;;  %v11523_v42 = vld [vmem:[%s14674_s1 + $0x40] ss:$8 sps:$4 sm:$0xff]  }
 0x32a   :  { %2969 = vmatprep.subr.bf16.mxu0 %v14759_v12  ;;  %v11525_v24 = vld [vmem:[%s14674_s1 + $0x50] ss:$8 sps:$4 sm:$0xff]   ;;  %v11528_v13 = vld [vmem:[%s14674_s1 + $0x74] ss:$8 sps:$4 sm:$0xff]   ;;  %v11530_v43 = vld [vmem:[%s14674_s1 + $0x84] ss:$8 sps:$4 sm:$0xff]  }
 0x32b   :  { %v2023_v15 = vpop.f32.mrb[128].mxu1  ;;  %v11529_v7 = vld [vmem:[%s14674_s1 + $0x70] ss:$8 sps:$4 sm:$0xff]  }
 0x32c   :  { %v2025_v26 = vpop.f32.mrb[129].mxu1  ;;  %v11537_v46 = vld [vmem:[%s14674_s1 + $0xb0] ss:$8 sps:$4 sm:$0xff]  }
 0x32d   :  { %2970 = vmatpush1.bf16.msra.mxu0 %v14761_v53  ;;  %v2026_v59 = vpop.f32.mrb[130].mxu1  ;;  %v11539_v26 = vld [vmem:[%s14674_s1 + $0xc0] ss:$8 sps:$4 sm:$0xff]   ;;  %v11540_v53 = vld [vmem:[%s14674_s1 + $0xd4] ss:$8 sps:$4 sm:$0xff]  }
 0x32e   :  { %2971 = vmatprep.subr.bf16.mxu0 %v14759_v12  ;;  %v2864_v10 = vpack.c.bf16 %v2026_v59, %v2023_v15  ;;  %v2028_v3 = vpop.f32.mrb[131].mxu1  ;;  %v11538_v15 = vld [vmem:[%s14674_s1 + $0xc4] ss:$8 sps:$4 sm:$0xff]   ;;  %v11541_v59 = vld [vmem:[%s14674_s1 + $0xd0] ss:$8 sps:$4 sm:$0xff]  }
 0x32f   :  { %v11543_v3 = vld [vmem:[%s14674_s1 + $0xe0] ss:$8 sps:$4 sm:$0xff]  }
 0x330   :  { %9722 = vmatprep.mubr.msk.bf16.mxu0 %vm291_vm0, %v2864_v10  ;;  %v11542_v10 = vld [vmem:[%s14674_s1 + $0xe4] ss:$8 sps:$4 sm:$0xff]  }
 0x331   :  { %2972 = vmatpush1.bf16.msra.mxu0 %v14762_v58  ;;  %v11544_v58 = vld [vmem:[%s14674_s1 + $0xf4] ss:$8 sps:$4 sm:$0xff]  }
 0x332   :  { %2973 = vmatprep.subr.bf16.mxu0 %v14759_v12 }
 0x333   :  { %v2031_v18 = vpop.f32.mrb[132].mxu1 }
 0x334   :  { %v2033_v49 = vpop.f32.mrb[133].mxu1 }
 0x335   :  { %2974 = vmatpush1.bf16.msra.mxu0 %v14763_v40  ;;  %v2034_v2 = vpop.f32.mrb[134].mxu1  ;;  %v11546_v49 = vld [vmem:[%s14674_s1 + $0x104] ss:$8 sps:$4 sm:$0xff]   ;;  %v11547_v40 = vld [vmem:[%s14674_s1 + $0x100] ss:$8 sps:$4 sm:$0xff]  }
 0x336   :  { %v2865_v17 = vpack.c.bf16 %v2034_v2, %v2031_v18  ;;  %2975 = vmatprep.subr.bf16.mxu0 %v14759_v12  ;;  %v2036_v52 = vpop.f32.mrb[135].mxu1  ;;  %v11545_v18 = vld [vmem:[%s14674_s1 + $0xf0] ss:$8 sps:$4 sm:$0xff]   ;;  %v11548_v2 = vld [vmem:[%s14674_s1 + $0x114] ss:$8 sps:$4 sm:$0xff]  }
 0x337   :  { %v11550_v52 = vld [vmem:[%s14674_s1 + $0x124] ss:$8 sps:$4 sm:$0xff]  }
 0x338   :  { %9723 = vmatmul.mubr.msk.bf16.gmra.mrb[76].mxu0 %vm291_vm0, %v2865_v17  ;;  %v11549_v17 = vld [vmem:[%s14674_s1 + $0x110] ss:$8 sps:$4 sm:$0xff]  }
 0x339   :  { %2976 = vmatpush1.bf16.msra.mxu0 %v14764_v50  ;;  %2999 = vmatprep.mubr.bf16.mxu0 %v11514_v0  ;;  %v11551_v50 = vld [vmem:[%s14674_s1 + $0x120] ss:$8 sps:$4 sm:$0xff]  }
 0x33a   :  { %2977 = vmatprep.subr.bf16.mxu0 %v14759_v12  ;;  %v13173_v0 = vld [vmem:[%s14683_s10 + $0x1] ss:$0 sm:$0xff] }
 0x33d   :  { %2978 = vmatpush1.bf16.msra.mxu0 %v14765_v21  ;;  %v11552_v21 = vld [vmem:[%s14674_s1 + $0x134] ss:$8 sps:$4 sm:$0xff]  }
 0x33e   :  { %2979 = vmatprep.subr.bf16.mxu0 %v14759_v12 }
 0x341   :  { %2980 = vmatpush1.bf16.msra.mxu0 %v14766_v36 }
 0x342   :  { %2981 = vmatprep.subr.bf16.mxu0 %v14759_v12 }
 0x345   :  { %2982 = vmatpush1.bf16.msra.mxu0 %v14767_v60 }
 0x346   :  { %2983 = vmatprep.subr.bf16.mxu0 %v14759_v12 }
 0x349   :  { %2984 = vmatpush1.bf16.msra.mxu0 %v14768_v41 }
 0x34a   :  { %2985 = vmatprep.subr.bf16.mxu0 %v14759_v12 }
 0x34d   :  { %2986 = vmatpush1.bf16.msra.mxu0 %v14769_v8 }
 0x34e   :  { %2987 = vmatprep.subr.bf16.mxu0 %v14759_v12 }
 0x351   :  { %2988 = vmatpush1.bf16.msra.mxu0 %v14770_v55 }
 0x352   :  { %2989 = vmatprep.subr.bf16.mxu0 %v14759_v12 }
 0x355   :  { %2990 = vmatpush1.bf16.msra.mxu0 %v14771_v22 }
 0x356   :  { %2991 = vmatprep.subr.bf16.mxu0 %v14759_v12 }
 0x359   :  { %2992 = vmatpush1.bf16.msra.mxu0 %v14772_v1 }
 0x35a   :  { %2993 = vmatprep.subr.bf16.mxu0 %v14759_v12 }
 0x35d   :  { %2994 = vmatpush1.bf16.msra.mxu0 %v14773_v16 }
 0x35e   :  { %2995 = vmatprep.subr.bf16.mxu0 %v14759_v12 }
 0x361   :  { %2996 = vmatpush1.bf16.msra.mxu0 %v14774_v27 }
 0x362   :  { %2997 = vmatprep.subr.bf16.mxu0 %v14759_v12  ;;  %v11531_v12 = vld [vmem:[%s14674_s1 + $0x80] ss:$8 sps:$4 sm:$0xff]  }
 0x365   :  { %2998 = vmatpush1.bf16.msra.mxu0 %v14775_v57 }
 0x368   :  { %3000 = vmatmul.mubr.bf16.vlgmr.msra.gmra.mrb[80].mxu0 %v11515_v48 }
 0x369   :  { %3007 = vmatprep.mubr.bf16.mxu0 %v11516_v31 }
 0x370   :  { %3008 = vmatmul.mubr.bf16.gmra.mrb[84].mxu0 %v11517_v63  ;;  %v11553_v63 = vld [vmem:[%s14674_s1 + $0x130] ss:$8 sps:$4 sm:$0xff]  }
 0x371   :  { %3015 = vmatprep.mubr.bf16.mxu0 %v11518_v56 }
 0x378   :  { %3016 = vmatmul.mubr.bf16.gmra.mrb[88].mxu0 %v11519_v51 }
 0x379   :  { %3023 = vmatprep.mubr.bf16.mxu0 %v11520_v6  ;;  %v11554_v6 = vld [vmem:[%s14674_s1 + $0x144] ss:$8 sps:$4 sm:$0xff]  }
 0x380   :  { %3024 = vmatmul.mubr.bf16.gmra.mrb[92].mxu0 %v11521_v23 }
 0x381   :  { %3031 = vmatprep.mubr.bf16.mxu0 %v11522_v54 }
 0x388   :  { %3032 = vmatmul.mubr.bf16.gmra.mrb[96].mxu0 %v11523_v42  ;;  %v11555_v42 = vld [vmem:[%s14674_s1 + $0x140] ss:$8 sps:$4 sm:$0xff]  }
 0x389   :  { %3039 = vmatprep.mubr.bf16.mxu0 %v11524_v30  ;;  %v11556_v30 = vld [vmem:[%s14674_s1 + $0x154] ss:$8 sps:$4 sm:$0xff]  }
 0x390   :  { %3040 = vmatmul.mubr.bf16.gmra.mrb[100].mxu0 %v11525_v24 }
 0x391   :  { %3047 = vmatprep.mubr.bf16.mxu0 %v11526_v47 }
 0x398   :  { %3048 = vmatmul.mubr.bf16.gmra.mrb[104].mxu0 %v11527_v33 }
 0x399   :  { %3055 = vmatprep.mubr.bf16.mxu0 %v11528_v13 }
 0x3a0   :  { %3056 = vmatmul.mubr.bf16.gmra.mrb[108].mxu0 %v11529_v7 }
 0x3a1   :  { %3063 = vmatprep.mubr.bf16.mxu0 %v11530_v43 }
 0x3a8   :  { %3064 = vmatmul.mubr.bf16.gmra.mrb[112].mxu0 %v11531_v12 }
 0x3a9   :  { %3071 = vmatprep.mubr.bf16.mxu0 %v11532_v20 }
 0x3b0   :  { %3072 = vmatmul.mubr.bf16.gmra.mrb[116].mxu0 %v11533_v61 }
 0x3b1   :  { %3079 = vmatprep.mubr.bf16.mxu0 %v11534_v29 }
 0x3b8   :  { %3080 = vmatmul.mubr.bf16.gmra.mrb[120].mxu0 %v11535_v44 }
 0x3b9   :  { %3087 = vmatprep.mubr.bf16.mxu0 %v11536_v5 }
 0x3c0   :  { %3088 = vmatmul.mubr.bf16.gmra.mrb[124].mxu0 %v11537_v46 }
 0x3c1   :  { %3095 = vmatprep.mubr.bf16.mxu0 %v11538_v15 }
 0x3c8   :  { %3096 = vmatmul.mubr.bf16.gmra.mrb[128].mxu0 %v11539_v26 }
 0x3c9   :  { %3103 = vmatprep.mubr.bf16.mxu0 %v11540_v53 }
 0x3d0   :  { %3104 = vmatmul.mubr.bf16.gmra.mrb[132].mxu0 %v11541_v59 }
 0x3d1   :  { %3111 = vmatprep.mubr.bf16.mxu0 %v11542_v10 }
 0x3d8   :  { %3112 = vmatmul.mubr.bf16.gmra.mrb[136].mxu0 %v11543_v3 }
 0x3d9   :  { %3119 = vmatprep.mubr.bf16.mxu0 %v11544_v58 }
 0x3e0   :  { %3120 = vmatmul.mubr.bf16.gmra.mrb[140].mxu0 %v11545_v18 }
 0x3e1   :  { %3127 = vmatprep.mubr.bf16.mxu0 %v11546_v49 }
 0x3e8   :  { %3128 = vmatmul.mubr.bf16.gmra.mrb[144].mxu0 %v11547_v40  ;;  %v11557_v40 = vld [vmem:[%s14674_s1 + $0x150] ss:$8 sps:$4 sm:$0xff]  }
 0x3e9   :  { %3135 = vmatprep.mubr.bf16.mxu0 %v11548_v2 }
 0x3f0   :  { %3136 = vmatmul.mubr.bf16.gmra.mrb[148].mxu0 %v11549_v17 }
 0x3f1   :  { %3143 = vmatprep.mubr.bf16.mxu0 %v11550_v52 }
 0x3f8   :  { %3144 = vmatmul.mubr.bf16.gmra.mrb[152].mxu0 %v11551_v50  ;;  %v11558_v50 = vld [vmem:[%s14674_s1 + $0x164] ss:$8 sps:$4 sm:$0xff]  }
 0x3f9   :  { %3151 = vmatprep.mubr.bf16.mxu0 %v11552_v21 }
 0x3fb   :  { %v9720_v36 = vpop.f32.mrb[72].mxu0 }
 0x3fc   :  { %v13179_v60 = vadd.f32 %v9720_v36, %v13173_v0  ;;  %v2928_v41 = vpop.f32.mrb[73].mxu0 }
 0x3fd   :  { %v13182_v8 = vadd.f32 %v13173_v0, %v2928_v41  ;;  %v9721_v55 = vpop.f32.mrb[74].mxu0 }
 0x3fe   :  { %v4095_v22 = vmin.f32 %v13179_v60, 20.0  ;;  %v13186_v1 = vadd.f32 %v9721_v55, %v13173_v0  ;;  %v2931_v16 = vpop.f32.mrb[75].mxu0 }
 0x3ff   :  { %v4093_v27 = vmin.f32 %v13182_v8, 20.0  ;;  %v13190_v57 = vadd.f32 %v13173_v0, %v2931_v16 }
 0x400   :  { %v4113_v48 = vmul.f32 1.442695, %v4095_v22  ;;  %v4096_v31 = vmin.f32 %v13186_v1, 20.0  ;;  %3152 = vmatmul.mubr.bf16.gmra.mrb[156].mxu0 %v11553_v63 }
 0x401   :  { %v4109_v56 = vmul.f32 1.442695, %v4093_v27  ;;  %v4094_v51 = vmin.f32 %v13190_v57, 20.0  ;;  %3159 = vmatprep.mubr.bf16.mxu0 %v11554_v6 }
 0x402   :  { %11129 = vpow2.f32 %v4113_v48  ;;  %v4115_v23 = vmul.f32 1.442695, %v4096_v31  ;;  %v11559_v48 = vld [vmem:[%s14674_s1 + $0x160] ss:$8 sps:$4 sm:$0xff]   ;;  %v11560_v31 = vld [vmem:[%s14674_s1 + $0x174] ss:$8 sps:$4 sm:$0xff]  }
 0x403   :  { %11131 = vpow2.f32 %v4109_v56  ;;  %v4111_v54 = vmul.f32 1.442695, %v4094_v51 }
 0x404   :  { %11133 = vpow2.f32 %v4115_v23 }
 0x405   :  { %11135 = vpow2.f32 %v4111_v54 }
 0x408   :  { %3160 = vmatmul.mubr.bf16.gmra.mrb[160].mxu0 %v11555_v42 }
 0x409   :  { %3167 = vmatprep.mubr.bf16.mxu0 %v11556_v30 }
 0x40b   :  { %v9724_v24 = vpop.f32.mrb[76].mxu0 }
 0x40c   :  { %v11130_v47 = vpop.eup %11129  ;;  %v13207_v33 = vadd.f32 %v9724_v24, %v13173_v0  ;;  %v2944_v13 = vpop.f32.mrb[77].mxu0 }
 0x40d   :  { %v11132_v7 = vpop.eup %11131  ;;  %v4143_v43 = vadd.f32 2.0, %v11130_v47  ;;  %v13210_v12 = vadd.f32 %v13173_v0, %v2944_v13  ;;  %v9725_v20 = vpop.f32.mrb[78].mxu0  ;;  %v11561_v13 = vld [vmem:[%s14674_s1 + $0x170] ss:$8 sps:$4 sm:$0xff]  }
 0x40e   :  { %v11134_v61 = vpop.eup %11133  ;;  %v4141_v29 = vadd.f32 2.0, %v11132_v7  ;;  %v4099_v44 = vmin.f32 %v13207_v33, 20.0  ;;  %v13214_v5 = vadd.f32 %v9725_v20, %v13173_v0  ;;  %v2947_v46 = vpop.f32.mrb[79].mxu0 }
 0x40f   :  { %v11136_v15 = vpop.eup %11135  ;;  %v4159_v26 = vmul.f32 %v11130_v47, %v4143_v43  ;;  %v4144_v53 = vadd.f32 2.0, %v11134_v61  ;;  %v4097_v59 = vmin.f32 %v13210_v12, 20.0  ;;  %v13218_v10 = vadd.f32 %v13173_v0, %v2947_v46 }
 0x410   :  { %v4157_v3 = vmul.f32 %v11132_v7, %v4141_v29  ;;  %v4142_v58 = vadd.f32 2.0, %v11136_v15  ;;  %v4121_v18 = vmul.f32 1.442695, %v4099_v44  ;;  %v4100_v49 = vmin.f32 %v13214_v5, 20.0  ;;  %3168 = vmatmul.mubr.bf16.gmra.mrb[164].mxu0 %v11557_v40 }
 0x411   :  { %v4175_v2 = vadd.f32 2.0, %v4159_v26  ;;  %v4160_v17 = vmul.f32 %v11134_v61, %v4144_v53  ;;  %v4098_v52 = vmin.f32 %v13218_v10, 20.0  ;;  %3175 = vmatprep.mubr.bf16.mxu0 %v11558_v50  ;;  %v4117_v55 = vmul.f32 1.442695, %v4097_v59  ;;  %v11562_v61 = vld [vmem:[%s14674_s1 + $0x184] ss:$8 sps:$4 sm:$0xff]  }
 0x412   :  { %v4173_v21 = vadd.f32 2.0, %v4157_v3  ;;  %v4158_v36 = vmul.f32 %v11136_v15, %v4142_v58  ;;  %11137 = vpow2.f32 %v4121_v18  ;;  %v4123_v16 = vmul.f32 1.442695, %v4100_v49 }
 0x413   :  { %11139 = vrcp.f32 %v4175_v2  ;;  %v4176_v41 = vadd.f32 2.0, %v4160_v17  ;;  %v4119_v27 = vmul.f32 1.442695, %v4098_v52  ;;  %v11564_v52 = vld [vmem:[%s14674_s1 + $0x194] ss:$8 sps:$4 sm:$0xff]  }
 0x414   :  { %11141 = vrcp.f32 %v4173_v21  ;;  %v4174_v22 = vadd.f32 2.0, %v4158_v36  ;;  %v11565_v21 = vld [vmem:[%s14674_s1 + $0x190] ss:$8 sps:$4 sm:$0xff]  }
 0x415   :  { %11143 = vrcp.f32 %v4176_v41 }
 0x416   :  { %11145 = vrcp.f32 %v4174_v22 }
 0x417   :  { %11147 = vpow2.f32 %v4117_v55 }
 0x418   :  { %11149 = vpow2.f32 %v4123_v16  ;;  %3176 = vmatmul.mubr.bf16.gmra.mrb[168].mxu0 %v11559_v48 }
 0x419   :  { %11151 = vpow2.f32 %v4119_v27  ;;  %3183 = vmatprep.mubr.bf16.mxu0 %v11560_v31 }
 0x41c   :  { %v11138_v63 = vpop.eup %11137 }
 0x41d   :  { %v11140_v56 = vpop.eup %11139  ;;  %v4147_v51 = vadd.f32 2.0, %v11138_v63 }
 0x41e   :  { %v11142_v6 = vpop.eup %11141  ;;  %v4207_v23 = vmul.f32 %v11140_v56, %v4159_v26 }
 0x41f   :  { %v11144_v54 = vpop.eup %11143  ;;  %v4205_v42 = vmul.f32 %v11142_v6, %v4157_v3  ;;  %v4163_v30 = vmul.f32 %v11138_v63, %v4147_v51 }
 0x420   :  { %v11146_v24 = vpop.eup %11145  ;;  %v4208_v47 = vmul.f32 %v11144_v54, %v4160_v17  ;;  %3184 = vmatmul.mubr.bf16.gmra.mrb[172].mxu0 %v11561_v13  ;;  %v13241_v44 = vmul.f32 %v4207_v23, %v13179_v60 }
 0x421   :  { %v11148_v7 = vpop.eup %11147  ;;  %v4206_v43 = vmul.f32 %v11146_v24, %v4158_v36  ;;  %v4179_v20 = vadd.f32 2.0, %v4163_v30  ;;  %3191 = vmatprep.mubr.bf16.mxu0 %v11562_v61  ;;  %v13247_v53 = vmul.f32 %v4205_v42, %v13182_v8  ;;  %v11566_v36 = vld [vmem:[%s14674_s1 + $0x1a4] ss:$8 sps:$4 sm:$0xff]  }
 0x422   :  { %v11150_v29 = vpop.eup %11149  ;;  %v13244_v46 = vmul.f32 %v4208_v47, %v13186_v1  ;;  %v4145_v15 = vadd.f32 2.0, %v11148_v7 }
 0x423   :  { %v11152_v26 = vpop.eup %11151  ;;  %v13250_v59 = vmul.f32 %v4206_v43, %v13190_v57  ;;  %v4148_v3 = vadd.f32 2.0, %v11150_v29  ;;  %11153 = vrcp.f32 %v4179_v20  ;;  %v11563_v57 = vld [vmem:[%s14674_s1 + $0x180] ss:$8 sps:$4 sm:$0xff]  }
 0x424   :  { %v4238_v58 = vpack.c.bf16 %v13244_v46, %v13241_v44  ;;  %v4161_v18 = vmul.f32 %v11148_v7, %v4145_v15  ;;  %v4146_v49 = vadd.f32 2.0, %v11152_v26  ;;  %v10804_v44 = vld [vmem:[%s14679_s6 + $0x8] sm:$0xff]   ;;  %v10805_v46 = vld [vmem:[%s14679_s6 + $0x10] sm:$0xff]  }
 0x425   :  { %v4237_v60 = vpack.c.bf16 %v13250_v59, %v13247_v53  ;;  %v4164_v1 = vmul.f32 %v11150_v29, %v4148_v3  ;;  %v10803_v53 = vld [vmem:[%s14679_s6] sm:$0xff]  }
 0x426   :  { %v4177_v40 = vadd.f32 2.0, %v4161_v18  ;;  %v4162_v2 = vmul.f32 %v11152_v26, %v4146_v49 }
 0x427   :  { %v4180_v17 = vadd.f32 2.0, %v4164_v1 }
 0x428   :  { %11155 = vrcp.f32 %v4177_v40  ;;  %v4178_v8 = vadd.f32 2.0, %v4162_v2  ;;  %3192 = vmatmul.mubr.bf16.gmra.mrb[176].mxu0 %v11563_v57 }
 0x429   :  { %11157 = vrcp.f32 %v4180_v17  ;;  %3199 = vmatprep.mubr.bf16.mxu0 %v11564_v52  ;;  %v14778_v52 = vld [vmem:[#allocation7_spill] sm:$0xff] }
 0x42a   :  { %11159 = vrcp.f32 %v4178_v8 }
 0x42d   :  { %v11154_v50 = vpop.eup %11153 }
 0x42e   :  { %v4211_v55 = vmul.f32 %v11154_v50, %v4163_v30 }
 0x430   :  { %3200 = vmatmul.mubr.bf16.gmra.mrb[180].mxu0 %v11565_v21  ;;  %v13269_v63 = vmul.f32 %v4211_v55, %v13207_v33 }
 0x431   :  { %3207 = vmatprep.mubr.bf16.mxu0 %v11566_v36 }
 0x432   :  { %v11156_v41 = vpop.eup %11155 }
 0x433   :  { %v11158_v22 = vpop.eup %11157  ;;  %v4209_v16 = vmul.f32 %v11156_v41, %v4161_v18 }
 0x434   :  { %v11160_v27 = vpop.eup %11159  ;;  %v4212_v48 = vmul.f32 %v11158_v22, %v4164_v1  ;;  %v14779_v22 = vld [vmem:[#allocation8_spill] sm:$0xff] }
 0x435   :  { %v4210_v31 = vmul.f32 %v11160_v27, %v4162_v2  ;;  %v13275_v51 = vmul.f32 %v4209_v16, %v13210_v12 }
 0x436   :  { %v13272_v56 = vmul.f32 %v4212_v48, %v13214_v5 }
 0x437   :  { %v13278_v6 = vmul.f32 %v4210_v31, %v13218_v10 }
 0x438   :  { %v4240_v23 = vpack.c.bf16 %v13272_v56, %v13269_v63  ;;  %3208 = vmatmul.mubr.bf16.gmra.mrb[184].mxu0 %v12680_v32 }
 0x439   :  { %v4239_v54 = vpack.c.bf16 %v13278_v6, %v13275_v51  ;;  %3215 = vmatprep.mubr.bf16.mxu0 %v12688_v11 }
 0x43b   :  { %v13286_v33 = vpop.f32.mrb[80].mxu0 }
 0x43c   :  { %v3003_v5 = vpop.f32.mrb[81].mxu0 }
 0x43d   :  { %v13288_v42 = vpop.f32.mrb[82].mxu0  ;;  %v14781_v5 = vld [vmem:[#allocation10_spill] sm:$0xff] }
 0x43e   :  { %v3288_v12 = vpack.c.bf16 %v13288_v42, %v13286_v33  ;;  %v3006_v10 = vpop.f32.mrb[83].mxu0  ;;  %v14782_v42 = vld [vmem:[#allocation11_spill] sm:$0xff] }
 0x440   :  { %3216 = vmatmul.mubr.bf16.gmra.mrb[188].mxu0 %v12714_v19 }
 0x441   :  { %3223 = vmatprep.mubr.bf16.mxu0 %v12721_v38 }
 0x443   :  { %v13294_v30 = vpop.f32.mrb[84].mxu0 }
 0x444   :  { %v3011_v32 = vpop.f32.mrb[85].mxu0 }
 0x445   :  { %v13296_v24 = vpop.f32.mrb[86].mxu0 }
 0x446   :  { %v3289_v11 = vpack.c.bf16 %v13296_v24, %v13294_v30  ;;  %v3014_v47 = vpop.f32.mrb[87].mxu0 }
 0x447   :  { %v14783_v47 = vld [vmem:[#allocation12_spill] sm:$0xff] }
 0x448   :  { %3224 = vmatmul.mubr.bf16.gmra.mrb[192].mxu0 %v12730_v28 }
 0x449   :  { %3231 = vmatprep.mubr.bf16.mxu0 %v12735_v45 }
 0x44b   :  { %v3017_v13 = vpop.f32.mrb[88].mxu0 }
 0x44c   :  { %v3019_v7 = vpop.f32.mrb[89].mxu0 }
 0x44d   :  { %v3020_v43 = vpop.f32.mrb[90].mxu0 }
 0x44e   :  { %v3290_v20 = vpack.c.bf16 %v3020_v43, %v3017_v13  ;;  %v3022_v19 = vpop.f32.mrb[91].mxu0 }
 0x450   :  { %3232 = vmatmul.mubr.bf16.gmra.mrb[196].mxu0 %v12746_v34 }
 0x451   :  { %3239 = vmatprep.mubr.bf16.mxu0 %v12753_v4 }
 0x453   :  { %v13304_v38 = vpop.f32.mrb[92].mxu0 }
 0x454   :  { %v3027_v61 = vpop.f32.mrb[93].mxu0 }
 0x455   :  { %v3028_v29 = vpop.f32.mrb[94].mxu0 }
 0x456   :  { %v3291_v15 = vpack.c.bf16 %v3028_v29, %v13304_v38  ;;  %v3030_v26 = vpop.f32.mrb[95].mxu0 }
 0x457   :  { %v14785_v26 = vld [vmem:[#allocation14_spill] sm:$0xff] }
 0x458   :  { %3240 = vmatmul.mubr.bf16.gmra.mrb[200].mxu0 %v12770_v14  ;;  %v14776_v14 = vld [vmem:[#allocation5_spill] sm:$0xff] }
 0x459   :  { %3247 = vmatprep.mubr.bf16.mxu0 %v12777_v9  ;;  %v11567_v9 = vld [vmem:[%s14677_s4] sm:$0xff]  }
 0x45b   :  { %v3033_v28 = vpop.f32.mrb[96].mxu0 }
 0x45c   :  { %v3035_v45 = vpop.f32.mrb[97].mxu0 }
 0x45d   :  { %v3036_v3 = vpop.f32.mrb[98].mxu0 }
 0x45e   :  { %v3292_v18 = vpack.c.bf16 %v3036_v3, %v3033_v28  ;;  %v3038_v49 = vpop.f32.mrb[99].mxu0 }
 0x460   :  { %3248 = vmatmul.mubr.bf16.gmra.mrb[204].mxu0 %v12790_v39  ;;  %9730 = vmatprep.mubr.msk.bf16.mxu1 %vm291_vm0, %v3292_v18 }
 0x461   :  { %3255 = vmatprep.mubr.bf16.mxu0 %v12795_v62 }
 0x463   :  { %v3041_v34 = vpop.f32.mrb[100].mxu0 }
 0x464   :  { %v3043_v4 = vpop.f32.mrb[101].mxu0 }
 0x465   :  { %v3044_v1 = vpop.f32.mrb[102].mxu0 }
 0x466   :  { %v3293_v40 = vpack.c.bf16 %v3044_v1, %v3041_v34  ;;  %v3046_v2 = vpop.f32.mrb[103].mxu0 }
 0x468   :  { %3256 = vmatmul.mubr.bf16.gmra.mrb[208].mxu0 %v12803_v35  ;;  %9731 = vmatmul.mubr.msk.bf16.vlgmr.msra.gmra.mrb[136].mxu1 %vm291_vm0, %v3293_v40  ;;  %v14777_v35 = vld [vmem:[#allocation6_spill] sm:$0xff] }
 0x469   :  { %3263 = vmatprep.mubr.bf16.mxu0 %v14776_v14  ;;  %9739 = vmatpush3.bf16.msra.mxu1 %v11567_v9  ;;  %v14786_v14 = vld [vmem:[#allocation15_spill] sm:$0xff] }
 0x46a   :  { %9740 = vmatprep.subr.bf16.mxu1 %v12813_v37 }
 0x46b   :  { %v3049_v39 = vpop.f32.mrb[104].mxu0 }
 0x46c   :  { %v3051_v62 = vpop.f32.mrb[105].mxu0 }
 0x46d   :  { %v3052_v17 = vpop.f32.mrb[106].mxu0  ;;  %9741 = vmatpush3.bf16.msra.mxu1 %v12813_v37  ;;  %v14780_v37 = vld [vmem:[#allocation9_spill] sm:$0xff] }
 0x46e   :  { %v3294_v8 = vpack.c.bf16 %v3052_v17, %v3049_v39  ;;  %v3054_v57 = vpop.f32.mrb[107].mxu0  ;;  %9750 = vmatprep.subr.bf16.mxu1 %v12823_v25 }
 0x46f   :  { %v14787_v57 = vld [vmem:[#allocation16_spill] sm:$0xff] }
 0x470   :  { %3264 = vmatmul.mubr.bf16.gmra.mrb[212].mxu0 %v14777_v35  ;;  %9734 = vmatprep.mubr.msk.bf16.mxu1 %vm291_vm0, %v3294_v8 }
 0x471   :  { %3271 = vmatprep.mubr.bf16.mxu0 %v14778_v52 }
 0x473   :  { %v3057_v50 = vpop.f32.mrb[108].mxu0 }
 0x474   :  { %v3059_v21 = vpop.f32.mrb[109].mxu0 }
 0x475   :  { %v3060_v36 = vpop.f32.mrb[110].mxu0 }
 0x476   :  { %v3295_v41 = vpack.c.bf16 %v3060_v36, %v3057_v50  ;;  %v3062_v55 = vpop.f32.mrb[111].mxu0 }
 0x478   :  { %3272 = vmatmul.mubr.bf16.gmra.mrb[216].mxu0 %v14779_v22  ;;  %9735 = vmatmul.mubr.msk.bf16.gmra.mrb[140].mxu1 %vm291_vm0, %v3295_v41 }
 0x479   :  { %9742 = vmatprep.mubr.msk.bf16.mxu1 %vm291_vm0, %v3288_v12  ;;  %3279 = vmatprep.mubr.bf16.mxu0 %v14780_v37 }
 0x47b   :  { %v3065_v16 = vpop.f32.mrb[112].mxu0 }
 0x47c   :  { %v3067_v27 = vpop.f32.mrb[113].mxu0 }
 0x47d   :  { %v3068_v48 = vpop.f32.mrb[114].mxu0 }
 0x47e   :  { %v3450_v31 = vpack.c.bf16 %v3068_v48, %v3065_v16  ;;  %v3070_v33 = vpop.f32.mrb[115].mxu0 }
 0x480   :  { %3280 = vmatmul.mubr.bf16.gmra.mrb[220].mxu0 %v14781_v5  ;;  %9743 = vmatmul.mubr.msk.bf16.vlgmr.msra.gmra.mrb[136].mxu1 %vm291_vm0, %v3289_v11 }
 0x481   :  { %9746 = vmatprep.mubr.msk.bf16.mxu1 %vm291_vm0, %v3290_v20  ;;  %9751 = vmatpush3.bf16.msra.mxu1 %v12823_v25  ;;  %v14784_v20 = vld [vmem:[#allocation13_spill] sm:$0xff] }
 0x482   :  { %9752 = vmatprep.subr.bf16.mxu1 %v14782_v42 }
 0x483   :  { %v3073_v10 = vpop.f32.mrb[116].mxu0 }
 0x484   :  { %v3075_v30 = vpop.f32.mrb[117].mxu0 }
 0x485   :  { %v3076_v12 = vpop.f32.mrb[118].mxu0  ;;  %9753 = vmatpush3.bf16.msra.mxu1 %v14782_v42  ;;  %v14788_v42 = vld [vmem:[#allocation17_spill] sm:$0xff] }
 0x486   :  { %v3451_v32 = vpack.c.bf16 %v3076_v12, %v3073_v10  ;;  %v3078_v24 = vpop.f32.mrb[119].mxu0  ;;  %9762 = vmatprep.subr.bf16.mxu1 %v14783_v47 }
 0x488   :  { %9747 = vmatmul.mubr.msk.bf16.gmra.mrb[140].mxu1 %vm291_vm0, %v3291_v15 }
 0x489   :  { %9754 = vmatprep.mubr.msk.bf16.mxu1 %vm291_vm0, %v3450_v31 }
 0x48b   :  { %v3081_v11 = vpop.f32.mrb[120].mxu0 }
 0x48c   :  { %v3083_v13 = vpop.f32.mrb[121].mxu0 }
 0x48d   :  { %v3084_v7 = vpop.f32.mrb[122].mxu0 }
 0x48e   :  { %v3452_v43 = vpack.c.bf16 %v3084_v7, %v3081_v11  ;;  %v3086_v25 = vpop.f32.mrb[123].mxu0 }
 0x490   :  { %9755 = vmatmul.mubr.msk.bf16.vlgmr.msra.gmra.mrb[136].mxu1 %vm291_vm0, %v3451_v32 }
 0x491   :  { %9758 = vmatprep.mubr.msk.bf16.mxu1 %vm291_vm0, %v3452_v43  ;;  %9763 = vmatpush3.bf16.msra.mxu1 %v14783_v47  ;;  %v14789_v47 = vld [vmem:[#allocation18_spill] sm:$0xff] }
 0x492   :  { %9764 = vmatprep.subr.bf16.mxu1 %v14784_v20 }
 0x493   :  { %v3089_v19 = vpop.f32.mrb[124].mxu0 }
 0x494   :  { %v3091_v38 = vpop.f32.mrb[125].mxu0 }
 0x495   :  { %v3092_v61 = vpop.f32.mrb[126].mxu0  ;;  %9765 = vmatpush3.bf16.msra.mxu1 %v14784_v20 }
 0x496   :  { %v3453_v29 = vpack.c.bf16 %v3092_v61, %v3089_v19  ;;  %v3094_v15 = vpop.f32.mrb[127].mxu0  ;;  %9774 = vmatprep.subr.bf16.mxu1 %v14785_v26 }
 0x498   :  { %9759 = vmatmul.mubr.msk.bf16.gmra.mrb[140].mxu1 %vm291_vm0, %v3453_v29 }
 0x49b   :  { %v3097_v28 = vpop.f32.mrb[128].mxu0 }
 0x49c   :  { %v3099_v45 = vpop.f32.mrb[129].mxu0 }
 0x49d   :  { %v3100_v3 = vpop.f32.mrb[130].mxu0 }
 0x49e   :  { %v3539_v18 = vpack.c.bf16 %v3100_v3, %v3097_v28  ;;  %v3102_v49 = vpop.f32.mrb[131].mxu0 }
 0x4a0   :  { %9766 = vmatprep.mubr.msk.bf16.mxu1 %vm291_vm0, %v3539_v18  ;;  %v14790_v18 = vld [vmem:[#allocation19_spill] sm:$0xff] }
 0x4a3   :  { %v3105_v34 = vpop.f32.mrb[132].mxu0 }
 0x4a4   :  { %v3107_v4 = vpop.f32.mrb[133].mxu0 }
 0x4a5   :  { %v3108_v1 = vpop.f32.mrb[134].mxu0 }
 0x4a6   :  { %v3540_v40 = vpack.c.bf16 %v3108_v1, %v3105_v34  ;;  %v3110_v2 = vpop.f32.mrb[135].mxu0 }
 0x4a7   :  { %v14791_v2 = vld [vmem:[#allocation20_spill] sm:$0xff] }
 0x4a8   :  { %9767 = vmatmul.mubr.msk.bf16.vlgmr.msra.gmra.mrb[136].mxu1 %vm291_vm0, %v3540_v40 }
 0x4a9   :  { %9775 = vmatpush3.bf16.msra.mxu1 %v14785_v26 }
 0x4aa   :  { %9776 = vmatprep.subr.bf16.mxu1 %v14786_v14 }
 0x4ab   :  { %v3113_v9 = vpop.f32.mrb[136].mxu0 }
 0x4ac   :  { %v3115_v39 = vpop.f32.mrb[137].mxu0 }
 0x4ad   :  { %v3116_v62 = vpop.f32.mrb[138].mxu0  ;;  %9777 = vmatpush3.bf16.msra.mxu1 %v14786_v14 }
 0x4ae   :  { %v3541_v17 = vpack.c.bf16 %v3116_v62, %v3113_v9  ;;  %v3118_v8 = vpop.f32.mrb[139].mxu0  ;;  %9786 = vmatprep.subr.bf16.mxu1 %v14787_v57 }
 0x4b0   :  { %9770 = vmatprep.mubr.msk.bf16.mxu1 %vm291_vm0, %v3541_v17 }
 0x4b3   :  { %v3121_v35 = vpop.f32.mrb[140].mxu0 }
 0x4b4   :  { %v3123_v52 = vpop.f32.mrb[141].mxu0 }
 0x4b5   :  { %v3124_v50 = vpop.f32.mrb[142].mxu0 }
 0x4b6   :  { %v3542_v21 = vpack.c.bf16 %v3124_v50, %v3121_v35  ;;  %v3126_v36 = vpop.f32.mrb[143].mxu0 }
 0x4b8   :  { %9771 = vmatmul.mubr.msk.bf16.gmra.mrb[140].mxu1 %vm291_vm0, %v3542_v21 }
 0x4bb   :  { %v3129_v41 = vpop.f32.mrb[144].mxu0 }
 0x4bc   :  { %v3131_v55 = vpop.f32.mrb[145].mxu0 }
 0x4bd   :  { %v3132_v22 = vpop.f32.mrb[146].mxu0 }
 0x4be   :  { %v3628_v37 = vpack.c.bf16 %v3132_v22, %v3129_v41  ;;  %v3134_v16 = vpop.f32.mrb[147].mxu0 }
 0x4c0   :  { %9778 = vmatprep.mubr.msk.bf16.mxu1 %vm291_vm0, %v3628_v37  ;;  %v14792_v37 = vld [vmem:[#allocation21_spill] sm:$0xff] }
 0x4c3   :  { %v3137_v27 = vpop.f32.mrb[148].mxu0 }
 0x4c4   :  { %v3139_v48 = vpop.f32.mrb[149].mxu0 }
 0x4c5   :  { %v3140_v31 = vpop.f32.mrb[150].mxu0 }
 0x4c6   :  { %v3629_v33 = vpack.c.bf16 %v3140_v31, %v3137_v27  ;;  %v3142_v5 = vpop.f32.mrb[151].mxu0 }
 0x4c7   :  { %v14793_v5 = vld [vmem:[#allocation22_spill] sm:$0xff] }
 0x4c8   :  { %9779 = vmatmul.mubr.msk.bf16.vlgmr.msra.gmra.mrb[136].mxu1 %vm291_vm0, %v3629_v33 }
 0x4c9   :  { %9787 = vmatpush3.bf16.msra.mxu1 %v14787_v57 }
 0x4ca   :  { %9788 = vmatprep.subr.bf16.mxu1 %v14788_v42 }
 0x4cb   :  { %v3145_v10 = vpop.f32.mrb[152].mxu0 }
 0x4cc   :  { %v3147_v30 = vpop.f32.mrb[153].mxu0 }
 0x4cd   :  { %v3148_v12 = vpop.f32.mrb[154].mxu0  ;;  %9789 = vmatpush3.bf16.msra.mxu1 %v14788_v42 }
 0x4ce   :  { %v3630_v32 = vpack.c.bf16 %v3148_v12, %v3145_v10  ;;  %v3150_v24 = vpop.f32.mrb[155].mxu0  ;;  %9798 = vmatprep.subr.bf16.mxu1 %v14789_v47 }
 0x4d0   :  { %9782 = vmatprep.mubr.msk.bf16.mxu1 %vm291_vm0, %v3630_v32 }
 0x4d3   :  { %v3153_v11 = vpop.f32.mrb[156].mxu0 }
 0x4d4   :  { %v3155_v13 = vpop.f32.mrb[157].mxu0 }
 0x4d5   :  { %v3156_v7 = vpop.f32.mrb[158].mxu0 }
 0x4d6   :  { %v3631_v43 = vpack.c.bf16 %v3156_v7, %v3153_v11  ;;  %v3158_v25 = vpop.f32.mrb[159].mxu0 }
 0x4d8   :  { %9783 = vmatmul.mubr.msk.bf16.gmra.mrb[140].mxu1 %vm291_vm0, %v3631_v43 }
 0x4db   :  { %v3161_v20 = vpop.f32.mrb[160].mxu0 }
 0x4dc   :  { %v3163_v19 = vpop.f32.mrb[161].mxu0 }
 0x4dd   :  { %v3164_v38 = vpop.f32.mrb[162].mxu0 }
 0x4de   :  { %v3717_v61 = vpack.c.bf16 %v3164_v38, %v3161_v20  ;;  %v3166_v29 = vpop.f32.mrb[163].mxu0 }
 0x4df   :  { %v10799_v29 = vld [vmem:[%s14678_s5] sm:$0xff]  }
 0x4e0   :  { %9790 = vmatprep.mubr.msk.bf16.mxu1 %vm291_vm0, %v3717_v61  ;;  %v14794_v61 = vld [vmem:[#allocation23_spill] sm:$0xff] }
 0x4e3   :  { %v3169_v15 = vpop.f32.mrb[164].mxu0 }
 0x4e4   :  { %v3171_v26 = vpop.f32.mrb[165].mxu0 }
 0x4e5   :  { %v3172_v28 = vpop.f32.mrb[166].mxu0 }
 0x4e6   :  { %v3718_v45 = vpack.c.bf16 %v3172_v28, %v3169_v15  ;;  %v3174_v3 = vpop.f32.mrb[167].mxu0 }
 0x4e8   :  { %9791 = vmatmul.mubr.msk.bf16.vlgmr.msra.gmra.mrb[136].mxu1 %vm291_vm0, %v3718_v45 }
 0x4e9   :  { %9799 = vmatpush3.bf16.msra.mxu1 %v14789_v47 }
 0x4ea   :  { %9800 = vmatprep.subr.bf16.mxu1 %v14790_v18 }
 0x4eb   :  { %v3177_v49 = vpop.f32.mrb[168].mxu0 }
 0x4ec   :  { %v3179_v34 = vpop.f32.mrb[169].mxu0 }
 0x4ed   :  { %v3180_v4 = vpop.f32.mrb[170].mxu0  ;;  %9801 = vmatpush3.bf16.msra.mxu1 %v14790_v18 }
 0x4ee   :  { %v3719_v1 = vpack.c.bf16 %v3180_v4, %v3177_v49  ;;  %v3182_v40 = vpop.f32.mrb[171].mxu0  ;;  %9810 = vmatprep.subr.bf16.mxu1 %v14791_v2 }
 0x4f0   :  { %9794 = vmatprep.mubr.msk.bf16.mxu1 %vm291_vm0, %v3719_v1 }
 0x4f3   :  { %v3185_v14 = vpop.f32.mrb[172].mxu0 }
 0x4f4   :  { %v3187_v9 = vpop.f32.mrb[173].mxu0 }
 0x4f5   :  { %v3188_v39 = vpop.f32.mrb[174].mxu0 }
 0x4f6   :  { %v3720_v62 = vpack.c.bf16 %v3188_v39, %v3185_v14  ;;  %v3190_v17 = vpop.f32.mrb[175].mxu0 }
 0x4f8   :  { %9795 = vmatmul.mubr.msk.bf16.gmra.mrb[140].mxu1 %vm291_vm0, %v3720_v62 }
 0x4fb   :  { %v3193_v8 = vpop.f32.mrb[176].mxu0 }
 0x4fc   :  { %v3195_v57 = vpop.f32.mrb[177].mxu0 }
 0x4fd   :  { %v3196_v35 = vpop.f32.mrb[178].mxu0 }
 0x4fe   :  { %v3806_v52 = vpack.c.bf16 %v3196_v35, %v3193_v8  ;;  %v3198_v50 = vpop.f32.mrb[179].mxu0 }
 0x4ff   :  { %v10801_v50 = vld [vmem:[%s14678_s5 + $0x10] sm:$0xff]  }
 0x500   :  { %9802 = vmatprep.mubr.msk.bf16.mxu1 %vm291_vm0, %v3806_v52  ;;  %v10800_v52 = vld [vmem:[%s14678_s5 + $0x8] sm:$0xff]  }
 0x503   :  { %v3201_v21 = vpop.f32.mrb[180].mxu0 }
 0x504   :  { %v3203_v36 = vpop.f32.mrb[181].mxu0 }
 0x505   :  { %v3204_v41 = vpop.f32.mrb[182].mxu0 }
 0x506   :  { %v3807_v55 = vpack.c.bf16 %v3204_v41, %v3201_v21  ;;  %v3206_v22 = vpop.f32.mrb[183].mxu0 }
 0x508   :  { %9803 = vmatmul.mubr.msk.bf16.vlgmr.msra.gmra.mrb[136].mxu1 %vm291_vm0, %v3807_v55 }
 0x509   :  { %9811 = vmatpush3.bf16.msra.mxu1 %v14791_v2 }
 0x50a   :  { %9812 = vmatprep.subr.bf16.mxu1 %v14792_v37 }
 0x50b   :  { %v3209_v16 = vpop.f32.mrb[184].mxu0 }
 0x50c   :  { %v3211_v27 = vpop.f32.mrb[185].mxu0 }
 0x50d   :  { %v3212_v48 = vpop.f32.mrb[186].mxu0  ;;  %9813 = vmatpush3.bf16.msra.mxu1 %v14792_v37  ;;  %v10802_v37 = vld [vmem:[%s14678_s5 + $0x18] sm:$0xff]  }
 0x50e   :  { %v3808_v31 = vpack.c.bf16 %v3212_v48, %v3209_v16  ;;  %v3214_v33 = vpop.f32.mrb[187].mxu0  ;;  %9822 = vmatprep.subr.bf16.mxu1 %v14793_v5 }
 0x510   :  { %9806 = vmatprep.mubr.msk.bf16.mxu1 %vm291_vm0, %v3808_v31 }
 0x513   :  { %v3217_v42 = vpop.f32.mrb[188].mxu0 }
 0x514   :  { %v3219_v10 = vpop.f32.mrb[189].mxu0 }
 0x515   :  { %v3220_v30 = vpop.f32.mrb[190].mxu0 }
 0x516   :  { %v3809_v12 = vpack.c.bf16 %v3220_v30, %v3217_v42  ;;  %v3222_v32 = vpop.f32.mrb[191].mxu0 }
 0x518   :  { %9807 = vmatmul.mubr.msk.bf16.gmra.mrb[140].mxu1 %vm291_vm0, %v3809_v12 }
 0x51b   :  { %v3225_v24 = vpop.f32.mrb[192].mxu0 }
 0x51c   :  { %v3227_v47 = vpop.f32.mrb[193].mxu0 }
 0x51d   :  { %v3228_v11 = vpop.f32.mrb[194].mxu0 }
 0x51e   :  { %v3895_v13 = vpack.c.bf16 %v3228_v11, %v3225_v24  ;;  %v3230_v7 = vpop.f32.mrb[195].mxu0 }
 0x520   :  { %9814 = vmatprep.mubr.msk.bf16.mxu1 %vm291_vm0, %v3895_v13 }
 0x523   :  { %v3233_v43 = vpop.f32.mrb[196].mxu0 }
 0x524   :  { %v3235_v25 = vpop.f32.mrb[197].mxu0 }
 0x525   :  { %v3236_v20 = vpop.f32.mrb[198].mxu0 }
 0x526   :  { %v3896_v19 = vpack.c.bf16 %v3236_v20, %v3233_v43  ;;  %v3238_v38 = vpop.f32.mrb[199].mxu0 }
 0x528   :  { %9815 = vmatmul.mubr.msk.bf16.vlgmr.msra.gmra.mrb[136].mxu1 %vm291_vm0, %v3896_v19 }
 0x529   :  { %9823 = vmatpush3.bf16.msra.mxu1 %v14793_v5 }
 0x52a   :  { %9824 = vmatprep.subr.bf16.mxu1 %v14794_v61 }
 0x52b   :  { %v3241_v15 = vpop.f32.mrb[200].mxu0 }
 0x52c   :  { %v3243_v26 = vpop.f32.mrb[201].mxu0 }
 0x52d   :  { %v3244_v28 = vpop.f32.mrb[202].mxu0  ;;  %9825 = vmatpush3.bf16.msra.mxu1 %v14794_v61 }
 0x52e   :  { %v3897_v45 = vpack.c.bf16 %v3244_v28, %v3241_v15  ;;  %v3246_v3 = vpop.f32.mrb[203].mxu0  ;;  %9834 = vmatprep.subr.bf16.mxu1 %v10799_v29 }
 0x530   :  { %9818 = vmatprep.mubr.msk.bf16.mxu1 %vm291_vm0, %v3897_v45 }
 0x533   :  { %v3249_v18 = vpop.f32.mrb[204].mxu0 }
 0x534   :  { %v3251_v49 = vpop.f32.mrb[205].mxu0 }
 0x535   :  { %v3252_v34 = vpop.f32.mrb[206].mxu0 }
 0x536   :  { %v3898_v4 = vpack.c.bf16 %v3252_v34, %v3249_v18  ;;  %v3254_v1 = vpop.f32.mrb[207].mxu0 }
 0x538   :  { %9819 = vmatmul.mubr.msk.bf16.gmra.mrb[140].mxu1 %vm291_vm0, %v3898_v4 }
 0x53b   :  { %v3257_v40 = vpop.f32.mrb[208].mxu0 }
 0x53c   :  { %v3259_v2 = vpop.f32.mrb[209].mxu0 }
 0x53d   :  { %v3260_v14 = vpop.f32.mrb[210].mxu0 }
 0x53e   :  { %v3984_v9 = vpack.c.bf16 %v3260_v14, %v3257_v40  ;;  %v3262_v39 = vpop.f32.mrb[211].mxu0 }
 0x53f   :  { %v13459_v39 = vld [vmem:[%s14683_s10 + $0x2] ss:$0 sm:$0xff] }
 0x540   :  { %9826 = vmatprep.mubr.msk.bf16.mxu1 %vm291_vm0, %v3984_v9 }
 0x543   :  { %v3265_v62 = vpop.f32.mrb[212].mxu0 }
 0x544   :  { %v3267_v17 = vpop.f32.mrb[213].mxu0 }
 0x545   :  { %v3268_v8 = vpop.f32.mrb[214].mxu0 }
 0x546   :  { %v3985_v57 = vpack.c.bf16 %v3268_v8, %v3265_v62  ;;  %v3270_v35 = vpop.f32.mrb[215].mxu0 }
 0x548   :  { %9827 = vmatmul.mubr.msk.bf16.vlgmr.msra.gmra.mrb[136].mxu1 %vm291_vm0, %v3985_v57 }
 0x549   :  { %9835 = vmatpush3.bf16.msra.mxu1 %v10799_v29 }
 0x54a   :  { %9836 = vmatprep.subr.bf16.mxu1 %v10800_v52 }
 0x54b   :  { %v3273_v21 = vpop.f32.mrb[216].mxu0 }
 0x54c   :  { %v3275_v36 = vpop.f32.mrb[217].mxu0 }
 0x54d   :  { %v3276_v41 = vpop.f32.mrb[218].mxu0  ;;  %9837 = vmatpush3.bf16.msra.mxu1 %v10800_v52 }
 0x54e   :  { %v3986_v55 = vpack.c.bf16 %v3276_v41, %v3273_v21  ;;  %v3278_v22 = vpop.f32.mrb[219].mxu0  ;;  %9838 = vmatprep.subr.bf16.mxu1 %v10801_v50 }
 0x550   :  { %9830 = vmatprep.mubr.msk.bf16.mxu1 %vm291_vm0, %v3986_v55 }
 0x551   :  { %9839 = vmatpush3.bf16.msra.mxu1 %v10801_v50 }
 0x552   :  { %9840 = vmatprep.subr.bf16.mxu1 %v10802_v37 }
 0x553   :  { %v3281_v16 = vpop.f32.mrb[220].mxu0 }
 0x554   :  { %v3283_v27 = vpop.f32.mrb[221].mxu0 }
 0x555   :  { %v3284_v48 = vpop.f32.mrb[222].mxu0  ;;  %9841 = vmatpush3.bf16.msra.mxu1 %v10802_v37 }
 0x556   :  { %v3987_v31 = vpack.c.bf16 %v3284_v48, %v3281_v16  ;;  %v3286_v33 = vpop.f32.mrb[223].mxu0  ;;  %9858 = vmatprep.subr.bf16.mxu1 %v10803_v53 }
 0x558   :  { %9831 = vmatmul.mubr.msk.bf16.gmra.mrb[140].mxu1 %vm291_vm0, %v3987_v31 }
 0x559   :  { %9842 = vmatprep.mubr.msk.bf16.mxu1 %vm4281_vm1, %v4237_v60 }
 0x560   :  { %9843 = vmatmul.mubr.msk.bf16.vlgmr.msra.gmra.mrb[144].mxu1 %vm4281_vm1, %v4238_v58 }
 0x561   :  { %9846 = vmatprep.mubr.msk.bf16.mxu1 %vm4281_vm1, %v4239_v54  ;;  %9859 = vmatpush3.bf16.msra.mxu1 %v10803_v53 }
 0x562   :  { %9860 = vmatprep.subr.bf16.mxu1 %v10804_v44 }
 0x565   :  { %9861 = vmatpush3.bf16.msra.mxu1 %v10804_v44 }
 0x566   :  { %9862 = vmatprep.subr.bf16.mxu1 %v10805_v46 }
 0x568   :  { %9847 = vmatmul.mubr.msk.bf16.gmra.mrb[148].mxu1 %vm4281_vm1, %v4240_v23 }
 0x569   :  { %9863 = vmatpush3.bf16.msra.mxu1 %v10805_v46 }
 0x61b   :  { %v9828_v59 = vpop.f32.mrb[136].mxu1 }
 0x61c   :  { %v13425_v58 = vadd.f32 %v9828_v59, %v13173_v0  ;;  %v4034_v60 = vpop.f32.mrb[137].mxu1 }
 0x61d   :  { %v13428_v63 = vadd.f32 %v13173_v0, %v4034_v60  ;;  %v9829_v56 = vpop.f32.mrb[138].mxu1 }
 0x61e   :  { %v4103_v51 = vmin.f32 %v13425_v58, 20.0  ;;  %v13432_v6 = vadd.f32 %v9829_v56, %v13173_v0  ;;  %v4037_v23 = vpop.f32.mrb[139].mxu1 }
 0x61f   :  { %v4101_v54 = vmin.f32 %v13428_v63, 20.0  ;;  %v13436_v5 = vadd.f32 %v13173_v0, %v4037_v23 }
 0x620   :  { %v4129_v42 = vmul.f32 1.442695, %v4103_v51  ;;  %v4104_v10 = vmin.f32 %v13432_v6, 20.0 }
 0x621   :  { %v4125_v30 = vmul.f32 1.442695, %v4101_v54  ;;  %v4102_v12 = vmin.f32 %v13436_v5, 20.0 }
 0x622   :  { %11161 = vpow2.f32 %v4129_v42  ;;  %v4131_v32 = vmul.f32 1.442695, %v4104_v10 }
 0x623   :  { %11163 = vpow2.f32 %v4125_v30  ;;  %v4127_v24 = vmul.f32 1.442695, %v4102_v12 }
 0x624   :  { %11165 = vpow2.f32 %v4131_v32 }
 0x625   :  { %11167 = vpow2.f32 %v4127_v24 }
 0x62b   :  { %v9832_v47 = vpop.f32.mrb[140].mxu1 }
 0x62c   :  { %v11162_v11 = vpop.eup %11161  ;;  %v13441_v13 = vadd.f32 %v9832_v47, %v13173_v0  ;;  %v4050_v7 = vpop.f32.mrb[141].mxu1 }
 0x62d   :  { %v11164_v43 = vpop.eup %11163  ;;  %v4151_v25 = vadd.f32 2.0, %v11162_v11  ;;  %v13444_v20 = vadd.f32 %v13173_v0, %v4050_v7  ;;  %v9833_v19 = vpop.f32.mrb[142].mxu1 }
 0x62e   :  { %v11166_v38 = vpop.eup %11165  ;;  %v4149_v61 = vadd.f32 2.0, %v11164_v43  ;;  %v4107_v29 = vmin.f32 %v13441_v13, 20.0  ;;  %v13448_v15 = vadd.f32 %v9833_v19, %v13173_v0  ;;  %v4053_v26 = vpop.f32.mrb[143].mxu1 }
 0x62f   :  { %v11168_v28 = vpop.eup %11167  ;;  %v4167_v45 = vmul.f32 %v11162_v11, %v4151_v25  ;;  %v4152_v3 = vadd.f32 2.0, %v11166_v38  ;;  %v4105_v18 = vmin.f32 %v13444_v20, 20.0  ;;  %v13452_v49 = vadd.f32 %v13173_v0, %v4053_v26 }
 0x630   :  { %v4165_v34 = vmul.f32 %v11164_v43, %v4149_v61  ;;  %v4150_v4 = vadd.f32 2.0, %v11168_v28  ;;  %v4137_v1 = vmul.f32 1.442695, %v4107_v29  ;;  %v4108_v40 = vmin.f32 %v13448_v15, 20.0 }
 0x631   :  { %v4183_v2 = vadd.f32 2.0, %v4167_v45  ;;  %v4168_v14 = vmul.f32 %v11166_v38, %v4152_v3  ;;  %v4106_v9 = vmin.f32 %v13452_v49, 20.0  ;;  %v4133_v8 = vmul.f32 1.442695, %v4105_v18 }
 0x632   :  { %v4181_v62 = vadd.f32 2.0, %v4165_v34  ;;  %v4166_v17 = vmul.f32 %v11168_v28, %v4150_v4  ;;  %11169 = vpow2.f32 %v4137_v1  ;;  %v4139_v52 = vmul.f32 1.442695, %v4108_v40 }
 0x633   :  { %11171 = vrcp.f32 %v4183_v2  ;;  %v4184_v0 = vadd.f32 2.0, %v4168_v14  ;;  %v9844_v57 = vpop.f32.mrb[144].mxu1  ;;  %v4135_v36 = vmul.f32 1.442695, %v4106_v9 }
 0x634   :  { %11173 = vrcp.f32 %v4181_v62  ;;  %v4182_v35 = vadd.f32 2.0, %v4166_v17  ;;  %v13462_v50 = vadd.f32 %v9844_v57, %v13459_v39  ;;  %v4340_v21 = vpop.f32.mrb[145].mxu1 }
 0x635   :  { %11175 = vrcp.f32 %v4184_v0  ;;  %v13465_v41 = vadd.f32 %v13459_v39, %v4340_v21  ;;  %v9845_v55 = vpop.f32.mrb[146].mxu1 }
 0x636   :  { %11177 = vrcp.f32 %v4182_v35  ;;  %v4405_v22 = vmin.f32 %v13462_v50, 20.0  ;;  %v13469_v37 = vadd.f32 %v9845_v55, %v13459_v39  ;;  %v4343_v16 = vpop.f32.mrb[147].mxu1 }
 0x637   :  { %11179 = vpow2.f32 %v4133_v8  ;;  %v4403_v27 = vmin.f32 %v13465_v41, 20.0  ;;  %v13473_v48 = vadd.f32 %v13459_v39, %v4343_v16 }
 0x638   :  { %11181 = vpow2.f32 %v4139_v52  ;;  %v4423_v31 = vmul.f32 1.442695, %v4405_v22  ;;  %v4406_v33 = vmin.f32 %v13469_v37, 20.0 }
 0x639   :  { %11183 = vpow2.f32 %v4135_v36  ;;  %v4419_v53 = vmul.f32 1.442695, %v4403_v27  ;;  %v4404_v44 = vmin.f32 %v13473_v48, 20.0 }
 0x63a   :  { %11185 = vpow2.f32 %v4423_v31  ;;  %v4425_v46 = vmul.f32 1.442695, %v4406_v33 }
 0x63b   :  { %11187 = vpow2.f32 %v4419_v53  ;;  %v4421_v59 = vmul.f32 1.442695, %v4404_v44  ;;  %v9848_v60 = vpop.f32.mrb[148].mxu1 }
 0x63c   :  { %v11170_v56 = vpop.eup %11169  ;;  %11189 = vpow2.f32 %v4425_v46  ;;  %v13478_v51 = vadd.f32 %v9848_v60, %v13459_v39  ;;  %v4356_v23 = vpop.f32.mrb[149].mxu1 }
 0x63d   :  { %v11172_v54 = vpop.eup %11171  ;;  %v4155_v42 = vadd.f32 2.0, %v11170_v56  ;;  %11191 = vpow2.f32 %v4421_v59  ;;  %v13481_v10 = vadd.f32 %v13459_v39, %v4356_v23  ;;  %v9849_v30 = vpop.f32.mrb[150].mxu1 }
 0x63e   :  { %v11174_v12 = vpop.eup %11173  ;;  %v4215_v32 = vmul.f32 %v11172_v54, %v4167_v45  ;;  %v4409_v24 = vmin.f32 %v13478_v51, 20.0  ;;  %v13485_v47 = vadd.f32 %v9849_v30, %v13459_v39  ;;  %v4359_v11 = vpop.f32.mrb[151].mxu1 }
 0x63f   :  { %v11176_v7 = vpop.eup %11175  ;;  %v4213_v43 = vmul.f32 %v11174_v12, %v4165_v34  ;;  %v13487_v25 = vmul.f32 %v11170_v56, %v4155_v42  ;;  %v4407_v19 = vmin.f32 %v13481_v10, 20.0  ;;  %v13492_v26 = vadd.f32 %v13459_v39, %v4359_v11 }
 0x640   :  { %v11178_v38 = vpop.eup %11177  ;;  %v4216_v61 = vmul.f32 %v11176_v7, %v4168_v14  ;;  %v4410_v29 = vmin.f32 %v13485_v47, 20.0  ;;  %v4231_v45 = vmul.f32 %v4215_v32, %v13425_v58  ;;  %v4431_v2 = vmul.f32 1.442695, %v4409_v24 }
 0x641   :  { %v11180_v28 = vpop.eup %11179  ;;  %v4214_v3 = vmul.f32 %v11178_v38, %v4166_v17  ;;  %v4187_v18 = vadd.f32 2.0, %v13487_v25  ;;  %v4427_v4 = vmul.f32 1.442695, %v4407_v19  ;;  %v4229_v14 = vmul.f32 %v4213_v43, %v13428_v63  ;;  %v10806_v19 = vld [vmem:[%s14679_s6 + $0x18] sm:$0xff]   ;;  %s11593_s6 = smov 64  }
 0x642   :  { %v11182_v1 = vpop.eup %11181  ;;  %v4232_v34 = vmul.f32 %v4216_v61, %v13432_v6  ;;  %v4153_v40 = vadd.f32 2.0, %v11180_v28  ;;  %v4433_v9 = vmul.f32 1.442695, %v4410_v29  ;;  %v4408_v53 = vmin.f32 %v13492_v26, 20.0  ;;  %9864 = vmatprep.subr.bf16.mxu1 %v10806_v19 }
 0x643   :  { %v11184_v62 = vpop.eup %11183  ;;  %v4230_v0 = vmul.f32 %v4214_v3, %v13436_v5  ;;  %11193 = vrcp.f32 %v4187_v18  ;;  %v4156_v8 = vadd.f32 2.0, %v11182_v1  ;;  %9865 = vmatpush3.bf16.msra.mxu1 %v10806_v19 }
 0x644   :  { %v11186_v57 = vpop.eup %11185  ;;  %v4242_v35 = vpack.c.bf16 %v4232_v34, %v4231_v45  ;;  %v4169_v58 = vmul.f32 %v11180_v28, %v4153_v40  ;;  %v4154_v17 = vadd.f32 2.0, %v11184_v62  ;;  %11195 = vpow2.f32 %v4427_v4 }
 0x645   :  { %v11188_v52 = vpop.eup %11187  ;;  %v4241_v21 = vpack.c.bf16 %v4230_v0, %v4229_v14  ;;  %v4172_v36 = vmul.f32 %v11182_v1, %v4156_v8  ;;  %v4453_v55 = vadd.f32 2.0, %v11186_v57  ;;  %11197 = vpow2.f32 %v4433_v9 }
 0x646   :  { %v11190_v6 = vpop.eup %11189  ;;  %v4185_v22 = vadd.f32 2.0, %v4169_v58  ;;  %v4170_v16 = vmul.f32 %v11184_v62, %v4154_v17  ;;  %v4451_v27 = vadd.f32 2.0, %v11188_v52  ;;  %11199 = vpow2.f32 %v4431_v2 }
 0x647   :  { %v11192_v63 = vpop.eup %11191  ;;  %v4188_v31 = vadd.f32 2.0, %v4172_v36  ;;  %v4469_v5 = vmul.f32 %v11186_v57, %v4453_v55  ;;  %v4454_v33 = vadd.f32 2.0, %v11190_v6  ;;  %9850 = vmatprep.mubr.msk.bf16.mxu1 %vm4281_vm1, %v4241_v21  ;;  %v4429_v30 = vmul.f32 1.442695, %v4408_v53 }
 0x648   :  { %11201 = vrcp.f32 %v4185_v22  ;;  %v4186_v44 = vadd.f32 2.0, %v4170_v16  ;;  %v4467_v46 = vmul.f32 %v11188_v52, %v4451_v27  ;;  %v4452_v59 = vadd.f32 2.0, %v11192_v63  ;;  %9851 = vmatmul.mubr.msk.bf16.gmra.mrb[152].mxu1 %vm4281_vm1, %v4242_v35 }
 0x649   :  { %11203 = vrcp.f32 %v4188_v31  ;;  %v4485_v60 = vadd.f32 2.0, %v4469_v5  ;;  %v4470_v56 = vmul.f32 %v11190_v6, %v4454_v33 }
 0x64a   :  { %11205 = vrcp.f32 %v4186_v44  ;;  %v4483_v23 = vadd.f32 2.0, %v4467_v46  ;;  %v4468_v54 = vmul.f32 %v11192_v63, %v4452_v59 }
 0x64b   :  { %11207 = vrcp.f32 %v4485_v60  ;;  %v4486_v42 = vadd.f32 2.0, %v4470_v56 }
 0x64c   :  { %11209 = vrcp.f32 %v4483_v23  ;;  %v4484_v12 = vadd.f32 2.0, %v4468_v54 }
 0x64d   :  { %v11194_v32 = vpop.eup %11193  ;;  %11211 = vrcp.f32 %v4486_v42 }
 0x64e   :  { %v11196_v24 = vpop.eup %11195  ;;  %11213 = vrcp.f32 %v4484_v12  ;;  %v4219_v61 = vmul.f32 %v11194_v32, %v13487_v25 }
 0x64f   :  { %v11198_v11 = vpop.eup %11197  ;;  %11215 = vpow2.f32 %v4429_v30  ;;  %v4455_v43 = vadd.f32 2.0, %v11196_v24 }
 0x650   :  { %v11200_v7 = vpop.eup %11199  ;;  %v4458_v29 = vadd.f32 2.0, %v11198_v11  ;;  %v4235_v9 = vmul.f32 %v4219_v61, %v13441_v13 }
 0x651   :  { %v4457_v3 = vadd.f32 2.0, %v11200_v7  ;;  %v4471_v1 = vmul.f32 %v11196_v24, %v4455_v43 }
 0x652   :  { %v11202_v38 = vpop.eup %11201  ;;  %v4474_v14 = vmul.f32 %v11198_v11, %v4458_v29 }
 0x653   :  { %v11204_v28 = vpop.eup %11203  ;;  %v4217_v45 = vmul.f32 %v11202_v38, %v4169_v58  ;;  %v4473_v35 = vmul.f32 %v11200_v7, %v4457_v3  ;;  %v4487_v52 = vadd.f32 2.0, %v4471_v1 }
 0x654   :  { %v11206_v18 = vpop.eup %11205  ;;  %v4220_v4 = vmul.f32 %v11204_v28, %v4172_v36  ;;  %v4490_v22 = vadd.f32 2.0, %v4474_v14 }
 0x655   :  { %v11208_v34 = vpop.eup %11207  ;;  %v4218_v40 = vmul.f32 %v11206_v18, %v4170_v16  ;;  %v4233_v25 = vmul.f32 %v4217_v45, %v13444_v20  ;;  %v4489_v20 = vadd.f32 2.0, %v4473_v35  ;;  %11217 = vrcp.f32 %v4487_v52 }
 0x656   :  { %v11210_v2 = vpop.eup %11209  ;;  %v4236_v62 = vmul.f32 %v4220_v4, %v13448_v15  ;;  %v4517_v13 = vmul.f32 %v11208_v34, %v4469_v5  ;;  %11219 = vrcp.f32 %v4490_v22 }
 0x657   :  { %v11212_v0 = vpop.eup %11211  ;;  %v4234_v8 = vmul.f32 %v4218_v40, %v13452_v49  ;;  %v4515_v57 = vmul.f32 %v11210_v2, %v4467_v46  ;;  %11221 = vrcp.f32 %v4489_v20 }
 0x658   :  { %v11214_v58 = vpop.eup %11213  ;;  %v4244_v17 = vpack.c.bf16 %v4236_v62, %v4235_v9  ;;  %v4518_v55 = vmul.f32 %v11212_v0, %v4470_v56  ;;  %v13526_v5 = vmul.f32 %v4517_v13, %v13462_v50 }
 0x659   :  { %v11216_v21 = vpop.eup %11215  ;;  %v4243_v36 = vpack.c.bf16 %v4234_v8, %v4233_v25  ;;  %v4516_v6 = vmul.f32 %v11214_v58, %v4468_v54  ;;  %v13511_v15 = vmul.f32 %v4515_v57, %v13465_v41 }
 0x65a   :  { %v4456_v16 = vadd.f32 2.0, %v11216_v21  ;;  %v13519_v63 = vmul.f32 %v4518_v55, %v13469_v37 }
 0x65b   :  { %v13514_v27 = vmul.f32 %v4516_v6, %v13473_v48  ;;  %9854 = vmatprep.mubr.msk.bf16.mxu1 %vm4281_vm1, %v4243_v36 }
 0x65c   :  { %v4472_v49 = vmul.f32 %v11216_v21, %v4456_v16  ;;  %9855 = vmatmul.mubr.msk.bf16.gmra.mrb[156].mxu1 %vm4281_vm1, %v4244_v17  ;;  %v13532_v48 = vpack.c.bf16 %v13519_v63, %v13526_v5 }
 0x65d   :  { %v13523_v31 = vpack.c.bf16 %v13514_v27, %v13511_v15 }
 0x65e   :  { %v4488_v41 = vadd.f32 2.0, %v4472_v49  ;;  %14796 = vst [vmem:[#allocation6_spill] sm:$0xff] %v13532_v48 }
 0x65f   :  { %14795 = vst [vmem:[#allocation5_spill] sm:$0xff] %v13523_v31  ;;  %4575 = vrot.lane.b32.xlu0 %v13523_v31, %s11593_s6  ;;  %v11218_v37 = vpop.eup %11217 }
 0x660   :  { %11223 = vrcp.f32 %v4488_v41  ;;  %v11220_v33 = vpop.eup %11219  ;;  %v4519_v44 = vmul.f32 %v11218_v37, %v4471_v1 }
 0x661   :  { %v11222_v53 = vpop.eup %11221  ;;  %v4522_v50 = vmul.f32 %v11220_v33, %v4474_v14 }
 0x662   :  { %v4521_v60 = vmul.f32 %v11222_v53, %v4473_v35  ;;  %v13537_v56 = vmul.f32 %v4519_v44, %v13481_v10 }
 0x663   :  { %4577 = vrot.lane.b32.xlu0 %v13532_v48, %s11593_s6  ;;  %v13543_v54 = vmul.f32 %v4522_v50, %v13485_v47 }
 0x664   :  { %v13550_v30 = vmul.f32 %v4521_v60, %v13478_v51 }
 0x666   :  { %v13556_v10 = vpack.c.bf16 %v13543_v54, %v13550_v30 }
 0x668   :  { %14798 = vst [vmem:[#allocation8_spill] sm:$0xff] %v13556_v10 }
 0x66a   :  { %v11224_v46 = vpop.eup %11223 }
 0x66b   :  { %v4520_v59 = vmul.f32 %v11224_v46, %v4472_v49 }
 0x66d   :  { %v13540_v23 = vmul.f32 %v4520_v59, %v13492_v26 }
 0x66f   :  { %v13547_v42 = vpack.c.bf16 %v13540_v23, %v13537_v56 }
 0x671   :  { %14797 = vst [vmem:[#allocation7_spill] sm:$0xff] %v13547_v42  ;;  %4579 = vrot.lane.b32.xlu1 %v13547_v42, %s11593_s6 }
 0x675   :  { %4581 = vrot.lane.b32.xlu1 %v13556_v10, %s11593_s6 }
 0x6d1   :  { %v4576_v26 = vpop.permute.xlu0 %4575 }
 0x6d2   :  { %9866 = vmatprep.mubr.msk.bf16.mxu1 %vm4281_vm1, %v4576_v26 }
 0x6d5   :  { %v4578_v47 = vpop.permute.xlu0 %4577 }
 0x6d6   :  { %9867 = vmatmul.mubr.msk.bf16.vlgmr.msra.gmra.mrb[160].mxu1 %vm4281_vm1, %v4578_v47 }
 0x6e3   :  { %v4580_v12 = vpop.permute.xlu1 %4579 }
 0x6e4   :  { %9870 = vmatprep.mubr.msk.bf16.mxu1 %vm4281_vm1, %v4580_v12 }
 0x6e7   :  { %v4582_v51 = vpop.permute.xlu1 %4581 }
 0x6e8   :  { %9871 = vmatmul.mubr.msk.bf16.gmra.mrb[164].mxu1 %vm4281_vm1, %v4582_v51 }
 0x71b   :  { %v9852_v32 = vpop.f32.mrb[152].mxu1 }
 0x71c   :  { %v13565_v24 = vadd.f32 %v9852_v32, %v13459_v39  ;;  %v4372_v11 = vpop.f32.mrb[153].mxu1 }
 0x71d   :  { %v13568_v7 = vadd.f32 %v13459_v39, %v4372_v11  ;;  %v9853_v43 = vpop.f32.mrb[154].mxu1 }
 0x71e   :  { %v4413_v19 = vmin.f32 %v13565_v24, 20.0  ;;  %v13572_v38 = vadd.f32 %v9853_v43, %v13459_v39  ;;  %v4375_v61 = vpop.f32.mrb[155].mxu1 }
 0x71f   :  { %v4411_v29 = vmin.f32 %v13568_v7, 20.0  ;;  %v13576_v28 = vadd.f32 %v13459_v39, %v4375_v61 }
 0x720   :  { %v4439_v45 = vmul.f32 1.442695, %v4413_v19  ;;  %v4414_v3 = vmin.f32 %v13572_v38, 20.0 }
 0x721   :  { %v4435_v18 = vmul.f32 1.442695, %v4411_v29  ;;  %v4412_v4 = vmin.f32 %v13576_v28, 20.0 }
 0x722   :  { %11225 = vpow2.f32 %v4439_v45  ;;  %v4441_v1 = vmul.f32 1.442695, %v4414_v3 }
 0x723   :  { %11227 = vpow2.f32 %v4435_v18  ;;  %v4437_v34 = vmul.f32 1.442695, %v4412_v4 }
 0x724   :  { %11229 = vpow2.f32 %v4441_v1 }
 0x725   :  { %11231 = vpow2.f32 %v4437_v34 }
 0x72c   :  { %v11226_v40 = vpop.eup %11225 }
 0x72d   :  { %v11228_v2 = vpop.eup %11227  ;;  %v4461_v9 = vadd.f32 2.0, %v11226_v40 }
 0x72e   :  { %v11230_v62 = vpop.eup %11229  ;;  %v4459_v14 = vadd.f32 2.0, %v11228_v2 }
 0x72f   :  { %v11232_v0 = vpop.eup %11231  ;;  %v4477_v25 = vmul.f32 %v11226_v40, %v4461_v9  ;;  %v4462_v8 = vadd.f32 2.0, %v11230_v62  ;;  %v9856_v57 = vpop.f32.mrb[156].mxu1 }
 0x730   :  { %v4475_v35 = vmul.f32 %v11228_v2, %v4459_v14  ;;  %v4460_v58 = vadd.f32 2.0, %v11232_v0  ;;  %v13581_v17 = vadd.f32 %v9856_v57, %v13459_v39  ;;  %v4388_v52 = vpop.f32.mrb[157].mxu1 }
 0x731   :  { %v4493_v21 = vadd.f32 2.0, %v4477_v25  ;;  %v4478_v36 = vmul.f32 %v11230_v62, %v4462_v8  ;;  %v13584_v55 = vadd.f32 %v13459_v39, %v4388_v52  ;;  %v9857_v6 = vpop.f32.mrb[158].mxu1 }
 0x732   :  { %v4491_v22 = vadd.f32 2.0, %v4475_v35  ;;  %v4476_v16 = vmul.f32 %v11232_v0, %v4460_v58  ;;  %v4417_v13 = vmin.f32 %v13581_v17, 20.0  ;;  %v13588_v20 = vadd.f32 %v9857_v6, %v13459_v39  ;;  %v4391_v49 = vpop.f32.mrb[159].mxu1 }
 0x733   :  { %11233 = vrcp.f32 %v4493_v21  ;;  %v4494_v41 = vadd.f32 2.0, %v4478_v36  ;;  %v4415_v37 = vmin.f32 %v13584_v55, 20.0  ;;  %v4392_v33 = vadd.f32 %v13459_v39, %v4391_v49 }
 0x734   :  { %11235 = vrcp.f32 %v4491_v22  ;;  %v4492_v53 = vadd.f32 2.0, %v4476_v16  ;;  %v4447_v44 = vmul.f32 1.442695, %v4417_v13  ;;  %v4418_v46 = vmin.f32 %v13588_v20, 20.0 }
 0x735   :  { %11237 = vrcp.f32 %v4494_v41  ;;  %v4443_v50 = vmul.f32 1.442695, %v4415_v37  ;;  %v4416_v59 = vmin.f32 %v4392_v33, 20.0 }
 0x736   :  { %11239 = vrcp.f32 %v4492_v53  ;;  %v4449_v60 = vmul.f32 1.442695, %v4418_v46 }
 0x737   :  { %11241 = vpow2.f32 %v4447_v44  ;;  %v4445_v26 = vmul.f32 1.442695, %v4416_v59 }
 0x738   :  { %11243 = vpow2.f32 %v4443_v50 }
 0x739   :  { %11245 = vpow2.f32 %v4449_v60 }
 0x73a   :  { %11247 = vpow2.f32 %v4445_v26 }
 0x73d   :  { %v11234_v47 = vpop.eup %11233 }
 0x73e   :  { %v11236_v12 = vpop.eup %11235  ;;  %v4525_v51 = vmul.f32 %v11234_v47, %v4477_v25 }
 0x73f   :  { %v11238_v32 = vpop.eup %11237  ;;  %v4523_v39 = vmul.f32 %v11236_v12, %v4475_v35 }
 0x740   :  { %v11240_v11 = vpop.eup %11239  ;;  %v4526_v43 = vmul.f32 %v11238_v32, %v4478_v36  ;;  %v4541_v45 = vmul.f32 %v4525_v51, %v13565_v24 }
 0x741   :  { %v11242_v19 = vpop.eup %11241  ;;  %v4524_v61 = vmul.f32 %v11240_v11, %v4476_v16  ;;  %v4539_v1 = vmul.f32 %v4523_v39, %v13568_v7 }
 0x742   :  { %v11244_v29 = vpop.eup %11243  ;;  %v4542_v3 = vmul.f32 %v4526_v43, %v13572_v38  ;;  %v4465_v18 = vadd.f32 2.0, %v11242_v19 }
 0x743   :  { %v11246_v4 = vpop.eup %11245  ;;  %v4540_v34 = vmul.f32 %v4524_v61, %v13576_v28  ;;  %v4463_v40 = vadd.f32 2.0, %v11244_v29 }
 0x744   :  { %v11248_v2 = vpop.eup %11247  ;;  %v4481_v9 = vmul.f32 %v11242_v19, %v4465_v18  ;;  %v4466_v62 = vadd.f32 2.0, %v11246_v4  ;;  %v13597_v14 = vpack.c.bf16 %v4542_v3, %v4541_v45 }
 0x745   :  { %v4479_v0 = vmul.f32 %v11244_v29, %v4463_v40  ;;  %v4464_v25 = vadd.f32 2.0, %v11248_v2  ;;  %v13599_v8 = vpack.c.bf16 %v4540_v34, %v4539_v1 }
 0x746   :  { %14799 = vst [vmem:[#allocation9_spill] sm:$0xff] %v13597_v14  ;;  %v4497_v57 = vadd.f32 2.0, %v4481_v9  ;;  %v4482_v24 = vmul.f32 %v11246_v4, %v4466_v62  ;;  %4585 = vrot.lane.b32.xlu1 %v13597_v14, %s11593_s6 }
 0x747   :  { %14800 = vst [vmem:[#allocation10_spill] sm:$0xff] %v13599_v8  ;;  %v4495_v38 = vadd.f32 2.0, %v4479_v0  ;;  %v4480_v35 = vmul.f32 %v11248_v2, %v4464_v25  ;;  %4583 = vrot.lane.b32.xlu0 %v13599_v8, %s11593_s6 }
 0x748   :  { %11249 = vrcp.f32 %v4497_v57  ;;  %v4498_v7 = vadd.f32 2.0, %v4482_v24 }
 0x749   :  { %11251 = vrcp.f32 %v4495_v38  ;;  %v4496_v28 = vadd.f32 2.0, %v4480_v35 }
 0x74a   :  { %11253 = vrcp.f32 %v4498_v7 }
 0x74b   :  { %11255 = vrcp.f32 %v4496_v28 }
 0x752   :  { %v11250_v58 = vpop.eup %11249 }
 0x753   :  { %v11252_v52 = vpop.eup %11251  ;;  %v4529_v21 = vmul.f32 %v11250_v58, %v4481_v9 }
 0x754   :  { %v11254_v36 = vpop.eup %11253  ;;  %v4527_v6 = vmul.f32 %v11252_v52, %v4479_v0 }
 0x755   :  { %v11256_v22 = vpop.eup %11255  ;;  %v4530_v16 = vmul.f32 %v11254_v36, %v4482_v24  ;;  %v4545_v49 = vmul.f32 %v4529_v21, %v13581_v17 }
 0x756   :  { %v4528_v13 = vmul.f32 %v11256_v22, %v4480_v35  ;;  %v4543_v37 = vmul.f32 %v4527_v6, %v13584_v55 }
 0x757   :  { %v4546_v41 = vmul.f32 %v4530_v16, %v13588_v20 }
 0x758   :  { %v4544_v53 = vmul.f32 %v4528_v13, %v4392_v33 }
 0x759   :  { %v13608_v44 = vpack.c.bf16 %v4546_v41, %v4545_v49 }
 0x75a   :  { %v13610_v46 = vpack.c.bf16 %v4544_v53, %v4543_v37 }
 0x75b   :  { %14801 = vst [vmem:[#allocation11_spill] sm:$0xff] %v13608_v44  ;;  %4589 = vrot.lane.b32.xlu1 %v13608_v44, %s11593_s6 }
 0x75c   :  { %14802 = vst [vmem:[#allocation12_spill] sm:$0xff] %v13610_v46  ;;  %4587 = vrot.lane.b32.xlu0 %v13610_v46, %s11593_s6 }
 0x75f   :  { %7786 = vrot.lane.b32.xlu1 %v13514_v27, %s11593_s6 }
 0x760   :  { %7784 = vrot.lane.b32.xlu0 %v13511_v15, %s11593_s6  ;;  %v13643_v15 = vld [vmem:[%s14683_s10 + $0x3] ss:$0 sm:$0xff] }
 0x763   :  { %7790 = vrot.lane.b32.xlu1 %v13519_v63, %s11593_s6 }
 0x764   :  { %7788 = vrot.lane.b32.xlu0 %v13526_v5, %s11593_s6 }
 0x767   :  { %7794 = vrot.lane.b32.xlu1 %v13540_v23, %s11593_s6 }
 0x768   :  { %7792 = vrot.lane.b32.xlu0 %v13537_v56, %s11593_s6 }
 0x76b   :  { %7798 = vrot.lane.b32.xlu1 %v13543_v54, %s11593_s6 }
 0x76c   :  { %7796 = vrot.lane.b32.xlu0 %v13550_v30, %s11593_s6 }
 0x76f   :  { %7802 = vrot.lane.b32.xlu1 %v4540_v34, %s11593_s6 }
 0x770   :  { %7800 = vrot.lane.b32.xlu0 %v4539_v1, %s11593_s6 }
 0x773   :  { %7806 = vrot.lane.b32.xlu1 %v4542_v3, %s11593_s6 }
 0x774   :  { %7804 = vrot.lane.b32.xlu0 %v4541_v45, %s11593_s6 }
 0x777   :  { %7810 = vrot.lane.b32.xlu1 %v4544_v53, %s11593_s6 }
 0x778   :  { %7808 = vrot.lane.b32.xlu0 %v4543_v37, %s11593_s6 }
 0x77b   :  { %7814 = vrot.lane.b32.xlu1 %v4546_v41, %s11593_s6 }
 0x77c   :  { %7812 = vrot.lane.b32.xlu0 %v4545_v49, %s11593_s6 }
 0x7a9   :  { %v9868_v27 = vpop.f32.mrb[160].mxu1 }
 0x7aa   :  { %v13646_v63 = vadd.f32 %v9868_v27, %v13643_v15  ;;  %v4673_v5 = vpop.f32.mrb[161].mxu1  ;;  %v13682_v27 = vld [vmem:[%s14675_s2] sm:$0xff]  }
 0x7ab   :  { %v13649_v56 = vadd.f32 %v13643_v15, %v4673_v5  ;;  %v9869_v23 = vpop.f32.mrb[162].mxu1 }
 0x7ac   :  { %v4738_v54 = vmin.f32 %v13646_v63, 20.0  ;;  %v13653_v30 = vadd.f32 %v9869_v23, %v13643_v15  ;;  %v4676_v17 = vpop.f32.mrb[163].mxu1 }
 0x7ad   :  { %v4736_v55 = vmin.f32 %v13649_v56, 20.0  ;;  %v13657_v20 = vadd.f32 %v13643_v15, %v4676_v17 }
 0x7ae   :  { %v4756_v33 = vmul.f32 1.442695, %v4738_v54  ;;  %v4739_v50 = vmin.f32 %v13653_v30, 20.0 }
 0x7af   :  { %v4752_v59 = vmul.f32 1.442695, %v4736_v55  ;;  %v4737_v60 = vmin.f32 %v13657_v20, 20.0 }
 0x7b0   :  { %11257 = vpow2.f32 %v4756_v33  ;;  %v4758_v26 = vmul.f32 1.442695, %v4739_v50 }
 0x7b1   :  { %11259 = vpow2.f32 %v4752_v59  ;;  %v4754_v47 = vmul.f32 1.442695, %v4737_v60 }
 0x7b2   :  { %11261 = vpow2.f32 %v4758_v26 }
 0x7b3   :  { %11263 = vpow2.f32 %v4754_v47 }
 0x7b8   :  { %v4586_v32 = vpop.permute.xlu1 %4585 }
 0x7b9   :  { %v4584_v12 = vpop.permute.xlu0 %4583 }
 0x7ba   :  { %v11258_v51 = vpop.eup %11257  ;;  %9874 = vmatprep.mubr.msk.bf16.mxu1 %vm4281_vm1, %v4584_v12 }
 0x7bb   :  { %v11260_v39 = vpop.eup %11259  ;;  %v4786_v11 = vadd.f32 2.0, %v11258_v51  ;;  %v9872_v43 = vpop.f32.mrb[164].mxu1  ;;  %9875 = vmatmul.mubr.msk.bf16.gmra.mrb[168].mxu1 %vm4281_vm1, %v4586_v32 }
 0x7bc   :  { %v11262_v19 = vpop.eup %11261  ;;  %v4784_v61 = vadd.f32 2.0, %v11260_v39  ;;  %v13664_v29 = vadd.f32 %v9872_v43, %v13643_v15  ;;  %v4689_v45 = vpop.f32.mrb[165].mxu1 }
 0x7bd   :  { %v11264_v3 = vpop.eup %11263  ;;  %v4802_v18 = vmul.f32 %v11258_v51, %v4786_v11  ;;  %v4787_v4 = vadd.f32 2.0, %v11262_v19  ;;  %v13667_v1 = vadd.f32 %v13643_v15, %v4689_v45  ;;  %v9873_v34 = vpop.f32.mrb[166].mxu1 }
 0x7be   :  { %v4800_v40 = vmul.f32 %v11260_v39, %v4784_v61  ;;  %v4785_v2 = vadd.f32 2.0, %v11264_v3  ;;  %v4742_v9 = vmin.f32 %v13664_v29, 20.0  ;;  %v13671_v62 = vadd.f32 %v9873_v34, %v13643_v15  ;;  %v4692_v0 = vpop.f32.mrb[167].mxu1 }
 0x7bf   :  { %v4818_v25 = vadd.f32 2.0, %v4802_v18  ;;  %v4803_v57 = vmul.f32 %v11262_v19, %v4787_v4  ;;  %v4740_v24 = vmin.f32 %v13667_v1, 20.0  ;;  %v13675_v38 = vadd.f32 %v13643_v15, %v4692_v0 }
 0x7c0   :  { %v4816_v35 = vadd.f32 2.0, %v4800_v40  ;;  %v4801_v7 = vmul.f32 %v11264_v3, %v4785_v2  ;;  %v4743_v28 = vmin.f32 %v13671_v62, 20.0  ;;  %v4764_v52 = vmul.f32 1.442695, %v4742_v9 }
 0x7c1   :  { %11265 = vrcp.f32 %v4818_v25  ;;  %v4819_v58 = vadd.f32 2.0, %v4803_v57  ;;  %v4741_v21 = vmin.f32 %v13675_v38, 20.0  ;;  %v4760_v6 = vmul.f32 1.442695, %v4740_v24 }
 0x7c2   :  { %11267 = vrcp.f32 %v4816_v35  ;;  %v4817_v36 = vadd.f32 2.0, %v4801_v7  ;;  %v4766_v22 = vmul.f32 1.442695, %v4743_v28 }
 0x7c3   :  { %11269 = vrcp.f32 %v4819_v58  ;;  %v4762_v16 = vmul.f32 1.442695, %v4741_v21 }
 0x7c4   :  { %11271 = vrcp.f32 %v4817_v36  ;;  %v13699_v36 = vld [vmem:[%s14675_s2 + $0x8] sm:$0xff]  }
 0x7c5   :  { %11273 = vpow2.f32 %v4764_v52 }
 0x7c6   :  { %11275 = vpow2.f32 %v4760_v6  ;;  %v13734_v6 = vld [vmem:[%s14675_s2 + $0x28] sm:$0xff]  }
 0x7c7   :  { %11277 = vpow2.f32 %v4766_v22  ;;  %v13739_v22 = vld [vmem:[%s14675_s2 + $0x30] sm:$0xff]  }
 0x7c8   :  { %11279 = vpow2.f32 %v4762_v16  ;;  %v13748_v16 = vld [vmem:[%s14675_s2 + $0x38] sm:$0xff]  }
 0x7cb   :  { %v11266_v13 = vpop.eup %11265 }
 0x7cc   :  { %v11268_v49 = vpop.eup %11267  ;;  %v4850_v41 = vmul.f32 %v11266_v13, %v4802_v18  ;;  %v13753_v13 = vld [vmem:[%s14675_s2 + $0x40] sm:$0xff]  }
 0x7cd   :  { %v11270_v37 = vpop.eup %11269  ;;  %v4848_v53 = vmul.f32 %v11268_v49, %v4800_v40  ;;  %v4590_v33 = vpop.permute.xlu1 %4589  ;;  %v13762_v49 = vld [vmem:[%s14675_s2 + $0x48] sm:$0xff]  }
 0x7ce   :  { %v11272_v5 = vpop.eup %11271  ;;  %v4851_v23 = vmul.f32 %v11270_v37, %v4803_v57  ;;  %v4588_v54 = vpop.permute.xlu0 %4587  ;;  %v4866_v59 = vmul.f32 %v4850_v41, %v13646_v63  ;;  %v13767_v41 = vld [vmem:[%s14675_s2 + $0x50] sm:$0xff]   ;;  %v13776_v37 = vld [vmem:[%s14675_s2 + $0x58] sm:$0xff]  }
 0x7cf   :  { %v11274_v17 = vpop.eup %11273  ;;  %v4849_v55 = vmul.f32 %v11272_v5, %v4801_v7  ;;  %9878 = vmatprep.mubr.msk.bf16.mxu1 %vm4281_vm1, %v4588_v54  ;;  %v4864_v12 = vmul.f32 %v4848_v53, %v13649_v56  ;;  %v13781_v53 = vld [vmem:[%s14675_s2 + $0x60] sm:$0xff]   ;;  %v13790_v5 = vld [vmem:[%s14675_s2 + $0x68] sm:$0xff]   ;;  %v13804_v54 = vld [vmem:[%s14675_s2 + $0x78] sm:$0xff]  }
 0x7d0   :  { %v11276_v50 = vpop.eup %11275  ;;  %v4867_v60 = vmul.f32 %v4851_v23, %v13653_v30  ;;  %v4790_v26 = vadd.f32 2.0, %v11274_v17  ;;  %9879 = vmatmul.mubr.msk.bf16.gmra.mrb[172].mxu1 %vm4281_vm1, %v4590_v33  ;;  %v13795_v23 = vld [vmem:[%s14675_s2 + $0x70] sm:$0xff]  }
 0x7d1   :  { %v11278_v47 = vpop.eup %11277  ;;  %v4865_v51 = vmul.f32 %v4849_v55, %v13657_v20  ;;  %v4788_v32 = vadd.f32 2.0, %v11276_v50  ;;  %9890 = vmatprep.mubr.msk.bf16.mxu1 %vm4281_vm1, %v13682_v27  ;;  %v13818_v55 = vld [vmem:[%s14675_s2 + $0x88] sm:$0xff]   ;;  %v13823_v33 = vld [vmem:[%s14675_s2 + $0x90] sm:$0xff]  }
 0x7d2   :  { %v11280_v39 = vpop.eup %11279  ;;  %v4806_v11 = vmul.f32 %v11274_v17, %v4790_v26  ;;  %v4791_v43 = vadd.f32 2.0, %v11278_v47  ;;  %v4881_v19 = vpack.c.bf16 %v4867_v60, %v4866_v59  ;;  %v13809_v17 = vld [vmem:[%s14675_s2 + $0x80] sm:$0xff]   ;;  %v13846_v60 = vld [vmem:[%s14675_s2 + $0xa8] sm:$0xff]   ;;  %v13851_v26 = vld [vmem:[%s14675_s2 + $0xb0] sm:$0xff]  }
 0x7d3   :  { %v4804_v61 = vmul.f32 %v11276_v50, %v4788_v32  ;;  %v4789_v63 = vadd.f32 2.0, %v11280_v39  ;;  %v4880_v45 = vpack.c.bf16 %v4865_v51, %v4864_v12  ;;  %v13832_v50 = vld [vmem:[%s14675_s2 + $0x98] sm:$0xff]   ;;  %v13837_v59 = vld [vmem:[%s14675_s2 + $0xa0] sm:$0xff]   ;;  %v13874_v51 = vld [vmem:[%s14675_s2 + $0xc8] sm:$0xff]  }
 0x7d4   :  { %v4822_v30 = vadd.f32 2.0, %v4806_v11  ;;  %v4807_v3 = vmul.f32 %v11278_v47, %v4791_v43  ;;  %v13860_v47 = vld [vmem:[%s14675_s2 + $0xb8] sm:$0xff]   ;;  %v13865_v12 = vld [vmem:[%s14675_s2 + $0xc0] sm:$0xff]   ;;  %v13879_v32 = vld [vmem:[%s14675_s2 + $0xd0] sm:$0xff]  }
 0x7d5   :  { %v4820_v18 = vadd.f32 2.0, %v4804_v61  ;;  %v4805_v4 = vmul.f32 %v11280_v39, %v4789_v63  ;;  %9882 = vmatprep.subr.bf16.mxu1 %v4880_v45  ;;  %v13888_v39 = vld [vmem:[%s14675_s2 + $0xd8] sm:$0xff]   ;;  %v13898_v43 = vld [vmem:[%s14675_s2 + $0xe0] sm:$0xff]  }
 0x7d6   :  { %11281 = vrcp.f32 %v4822_v30  ;;  %v4823_v56 = vadd.f32 2.0, %v4807_v3  ;;  %9883 = vmatpush3.bf16.msra.mxu1 %v4880_v45  ;;  %v13921_v63 = vld [vmem:[%s14680_s7] sm:$0xff]   ;;  %v13929_v45 = vld [vmem:[%s14675_s2 + $0xf8] sm:$0xff]  }
 0x7d7   :  { %11283 = vrcp.f32 %v4820_v18  ;;  %v4821_v20 = vadd.f32 2.0, %v4805_v4  ;;  %9884 = vmatprep.subr.bf16.mxu1 %v4881_v19  ;;  %v13934_v30 = vld [vmem:[%s14675_s2 + $0x100] sm:$0xff]   ;;  %v13948_v18 = vld [vmem:[%s14675_s2 + $0x110] sm:$0xff]  }
 0x7d8   :  { %11285 = vrcp.f32 %v4823_v56  ;;  %14806 = vst [vmem:[#allocation16_spill] sm:$0xff] %v13948_v18 }
 0x7d9   :  { %11287 = vrcp.f32 %v4821_v20 }
 0x7da   :  { %9885 = vmatpush3.bf16.msra.mxu1 %v4881_v19  ;;  %v13909_v19 = vld [vmem:[%s14675_s2 + $0xe8] sm:$0xff]  }
 0x7e0   :  { %v11282_v34 = vpop.eup %11281 }
 0x7e1   :  { %v11284_v40 = vpop.eup %11283  ;;  %v4854_v2 = vmul.f32 %v11282_v34, %v4806_v11  ;;  %v13893_v11 = vld [vmem:[%s14680_s7 + $0x18] sm:$0xff]  }
 0x7e2   :  { %v11286_v9 = vpop.eup %11285  ;;  %v4852_v0 = vmul.f32 %v11284_v40, %v4804_v61  ;;  %14804 = vst [vmem:[#allocation14_spill] sm:$0xff] %v13893_v11  ;;  %v13914_v61 = vld [vmem:[%s14675_s2 + $0xf0] sm:$0xff]  }
 0x7e3   :  { %v11288_v25 = vpop.eup %11287  ;;  %v4855_v57 = vmul.f32 %v11286_v9, %v4807_v3  ;;  %v4870_v35 = vmul.f32 %v4854_v2, %v13664_v29  ;;  %v13704_v29 = vld [vmem:[%s14675_s2 + $0x10] sm:$0xff]   ;;  %v13943_v3 = vld [vmem:[%s14675_s2 + $0x108] sm:$0xff]  }
 0x7e4   :  { %v4853_v24 = vmul.f32 %v11288_v25, %v4805_v4  ;;  %v4868_v28 = vmul.f32 %v4852_v0, %v13667_v1  ;;  %v13713_v1 = vld [vmem:[%s14675_s2 + $0x18] sm:$0xff]   ;;  %14805 = vst [vmem:[#allocation15_spill] sm:$0xff] %v13943_v3 }
 0x7e5   :  { %v4871_v7 = vmul.f32 %v4855_v57, %v13671_v62  ;;  %v13718_v62 = vld [vmem:[%s14675_s2 + $0x20] sm:$0xff]   ;;  %v13957_v4 = vld [vmem:[%s14675_s2 + $0x118] sm:$0xff]  }
 0x7e6   :  { %v4869_v58 = vmul.f32 %v4853_v24, %v13675_v38  ;;  %v13725_v38 = vld [vmem:[%s14680_s7 + $0x10] sm:$0xff]   ;;  %14807 = vst [vmem:[#allocation17_spill] sm:$0xff] %v13957_v4 }
 0x7e7   :  { %v4883_v52 = vpack.c.bf16 %v4871_v7, %v4870_v35  ;;  %14803 = vst [vmem:[#allocation13_spill] sm:$0xff] %v13725_v38  ;;  %9962 = vmatprep.subr.bf16.mxu0 %v13725_v38 }
 0x7e8   :  { %v4882_v21 = vpack.c.bf16 %v4869_v58, %v4868_v28  ;;  %9963 = vmatpush3.bf16.msra.mxu0 %v13725_v38 }
 0x7e9   :  { %9964 = vmatprep.subr.bf16.mxu0 %v13893_v11 }
 0x7ea   :  { %9886 = vmatprep.subr.bf16.mxu1 %v4882_v21 }
 0x7eb   :  { %9887 = vmatpush3.bf16.msra.mxu1 %v4882_v21 }
 0x7ec   :  { %9888 = vmatprep.subr.bf16.mxu1 %v4883_v52  ;;  %9965 = vmatpush3.bf16.msra.mxu0 %v13893_v11 }
 0x7ed   :  { %9974 = vmatprep.subr.bf16.mxu0 %v13921_v63 }
 0x7ef   :  { %9889 = vmatpush3.bf16.msra.mxu1 %v4883_v52 }
 0x7f2   :  { %9891 = vmatmul.mubr.msk.bf16.vlgmr.msra.gmra.mrb[176].mxu1 %vm4281_vm1, %v13699_v36 }
 0x7f3   :  { %9894 = vmatprep.mubr.msk.bf16.mxu1 %vm4281_vm1, %v13704_v29 }
 0x7fa   :  { %9895 = vmatmul.mubr.msk.bf16.gmra.mrb[180].mxu1 %vm4281_vm1, %v13713_v1 }
 0x7fb   :  { %9898 = vmatprep.mubr.msk.bf16.mxu1 %vm4281_vm1, %v13718_v62 }
 0x802   :  { %9899 = vmatmul.mubr.msk.bf16.gmra.mrb[184].mxu1 %vm4281_vm1, %v13734_v6 }
 0x803   :  { %9902 = vmatprep.mubr.msk.bf16.mxu1 %vm4281_vm1, %v13739_v22 }
 0x80a   :  { %9903 = vmatmul.mubr.msk.bf16.gmra.mrb[188].mxu1 %vm4281_vm1, %v13748_v16 }
 0x80b   :  { %9906 = vmatprep.mubr.msk.bf16.mxu1 %vm4281_vm1, %v13753_v13 }
 0x812   :  { %9907 = vmatmul.mubr.msk.bf16.gmra.mrb[192].mxu1 %vm4281_vm1, %v13762_v49 }
 0x813   :  { %9910 = vmatprep.mubr.msk.bf16.mxu1 %vm4281_vm1, %v13767_v41 }
 0x81a   :  { %9911 = vmatmul.mubr.msk.bf16.gmra.mrb[196].mxu1 %vm4281_vm1, %v13776_v37 }
 0x81b   :  { %9914 = vmatprep.mubr.msk.bf16.mxu1 %vm4281_vm1, %v13781_v53 }
 0x822   :  { %9915 = vmatmul.mubr.msk.bf16.gmra.mrb[200].mxu1 %vm4281_vm1, %v13790_v5 }
 0x823   :  { %9918 = vmatprep.mubr.msk.bf16.mxu1 %vm4281_vm1, %v13795_v23 }
 0x82a   :  { %9919 = vmatmul.mubr.msk.bf16.gmra.mrb[204].mxu1 %vm4281_vm1, %v13804_v54 }
 0x82b   :  { %9922 = vmatprep.mubr.msk.bf16.mxu1 %vm4281_vm1, %v13809_v17 }
 0x832   :  { %9923 = vmatmul.mubr.msk.bf16.gmra.mrb[208].mxu1 %vm4281_vm1, %v13818_v55 }
 0x833   :  { %9926 = vmatprep.mubr.msk.bf16.mxu1 %vm4281_vm1, %v13823_v33 }
 0x83a   :  { %9927 = vmatmul.mubr.msk.bf16.gmra.mrb[212].mxu1 %vm4281_vm1, %v13832_v50 }
 0x83b   :  { %9930 = vmatprep.mubr.msk.bf16.mxu1 %vm4281_vm1, %v13837_v59 }
 0x842   :  { %9931 = vmatmul.mubr.msk.bf16.gmra.mrb[216].mxu1 %vm4281_vm1, %v13846_v60 }
 0x843   :  { %9934 = vmatprep.mubr.msk.bf16.mxu1 %vm4281_vm1, %v13851_v26 }
 0x84a   :  { %9935 = vmatmul.mubr.msk.bf16.gmra.mrb[220].mxu1 %vm4281_vm1, %v13860_v47 }
 0x84b   :  { %9938 = vmatprep.mubr.msk.bf16.mxu1 %vm4281_vm1, %v13865_v12 }
 0x852   :  { %9939 = vmatmul.mubr.msk.bf16.gmra.mrb[224].mxu1 %vm4281_vm1, %v13874_v51 }
 0x853   :  { %9942 = vmatprep.mubr.msk.bf16.mxu1 %vm4281_vm1, %v13879_v32 }
 0x85a   :  { %9943 = vmatmul.mubr.msk.bf16.gmra.mrb[228].mxu1 %vm4281_vm1, %v13888_v39 }
 0x85b   :  { %9946 = vmatprep.mubr.msk.bf16.mxu1 %vm4281_vm1, %v13898_v43 }
 0x862   :  { %9947 = vmatmul.mubr.msk.bf16.gmra.mrb[232].mxu1 %vm4281_vm1, %v13909_v19 }
 0x863   :  { %9950 = vmatprep.mubr.msk.bf16.mxu1 %vm4281_vm1, %v13914_v61 }
 0x86a   :  { %9951 = vmatmul.mubr.msk.bf16.gmra.mrb[236].mxu1 %vm4281_vm1, %v13929_v45 }
 0x86b   :  { %9954 = vmatprep.mubr.msk.bf16.mxu1 %vm4281_vm1, %v13934_v30 }
 0x872   :  { %9955 = vmatmul.mubr.msk.bf16.gmra.mrb[240].mxu1 %vm4281_vm1, %v13943_v3 }
 0x873   :  { %9958 = vmatprep.mubr.msk.bf16.mxu1 %vm4281_vm1, %v13948_v18 }
 0x87a   :  { %9959 = vmatmul.mubr.msk.bf16.gmra.mrb[244].mxu1 %vm4281_vm1, %v13957_v4 }
 0x87b   :  { %10078 = vmatprep.mubr.msk.bf16.mxu1 %vm4281_vm1, %v13682_v27 }
 0x88e   :  { %v9876_v56 = vpop.f32.mrb[168].mxu1 }
 0x88f   :  { %v13964_v20 = vadd.f32 %v9876_v56, %v13643_v15  ;;  %v4705_v34 = vpop.f32.mrb[169].mxu1 }
 0x890   :  { %v13967_v40 = vadd.f32 %v13643_v15, %v4705_v34  ;;  %v9877_v2 = vpop.f32.mrb[170].mxu1 }
 0x891   :  { %v4746_v9 = vmin.f32 %v13964_v20, 20.0  ;;  %v13971_v0 = vadd.f32 %v9877_v2, %v13643_v15  ;;  %v4708_v25 = vpop.f32.mrb[171].mxu1 }
 0x892   :  { %v4744_v57 = vmin.f32 %v13967_v40, 20.0  ;;  %v13975_v24 = vadd.f32 %v13643_v15, %v4708_v25 }
 0x893   :  { %v4772_v27 = vmul.f32 1.442695, %v4746_v9  ;;  %v4747_v35 = vmin.f32 %v13971_v0, 20.0 }
 0x894   :  { %v4768_v7 = vmul.f32 1.442695, %v4744_v57  ;;  %v4745_v28 = vmin.f32 %v13975_v24, 20.0 }
 0x895   :  { %11289 = vpow2.f32 %v4772_v27  ;;  %v4774_v58 = vmul.f32 1.442695, %v4747_v35 }
 0x896   :  { %11291 = vpow2.f32 %v4768_v7  ;;  %v4770_v52 = vmul.f32 1.442695, %v4745_v28 }
 0x897   :  { %11293 = vpow2.f32 %v4774_v58 }
 0x898   :  { %11295 = vpow2.f32 %v4770_v52 }
 0x89f   :  { %v11290_v21 = vpop.eup %11289 }
 0x8a0   :  { %v11292_v56 = vpop.eup %11291  ;;  %v4794_v34 = vadd.f32 2.0, %v11290_v21 }
 0x8a1   :  { %v11294_v2 = vpop.eup %11293  ;;  %v4792_v44 = vadd.f32 2.0, %v11292_v56 }
 0x8a2   :  { %v11296_v46 = vpop.eup %11295  ;;  %v4810_v25 = vmul.f32 %v11290_v21, %v4794_v34  ;;  %v4795_v14 = vadd.f32 2.0, %v11294_v2 }
 0x8a3   :  { %v4808_v9 = vmul.f32 %v11292_v56, %v4792_v44  ;;  %v4793_v8 = vadd.f32 2.0, %v11296_v46  ;;  %v9880_v10 = vpop.f32.mrb[172].mxu1 }
 0x8a4   :  { %v4826_v57 = vadd.f32 2.0, %v4810_v25  ;;  %v4811_v42 = vmul.f32 %v11294_v2, %v4795_v14  ;;  %v13980_v27 = vadd.f32 %v9880_v10, %v13643_v15  ;;  %v4721_v35 = vpop.f32.mrb[173].mxu1 }
 0x8a5   :  { %v4824_v7 = vadd.f32 2.0, %v4808_v9  ;;  %v4809_v28 = vmul.f32 %v11296_v46, %v4793_v8  ;;  %v13983_v58 = vadd.f32 %v13643_v15, %v4721_v35  ;;  %v9881_v52 = vpop.f32.mrb[174].mxu1 }
 0x8a6   :  { %11297 = vrcp.f32 %v4826_v57  ;;  %v4827_v48 = vadd.f32 2.0, %v4811_v42  ;;  %v4750_v21 = vmin.f32 %v13980_v27, 20.0  ;;  %v13987_v44 = vadd.f32 %v9881_v52, %v13643_v15  ;;  %v4724_v56 = vpop.f32.mrb[175].mxu1 }
 0x8a7   :  { %11299 = vrcp.f32 %v4824_v7  ;;  %v4825_v14 = vadd.f32 2.0, %v4809_v28  ;;  %v4748_v10 = vmin.f32 %v13983_v58, 20.0  ;;  %v13991_v34 = vadd.f32 %v13643_v15, %v4724_v56 }
 0x8a8   :  { %11301 = vrcp.f32 %v4827_v48  ;;  %v4780_v8 = vmul.f32 1.442695, %v4750_v21  ;;  %v4751_v46 = vmin.f32 %v13987_v44, 20.0 }
 0x8a9   :  { %11303 = vrcp.f32 %v4825_v14  ;;  %v4776_v2 = vmul.f32 1.442695, %v4748_v10  ;;  %v4749_v57 = vmin.f32 %v13991_v34, 20.0 }
 0x8aa   :  { %11305 = vpow2.f32 %v4780_v8  ;;  %v4782_v35 = vmul.f32 1.442695, %v4751_v46 }
 0x8ab   :  { %11307 = vpow2.f32 %v4776_v2  ;;  %v4778_v52 = vmul.f32 1.442695, %v4749_v57 }
 0x8ac   :  { %11309 = vpow2.f32 %v4782_v35 }
 0x8ad   :  { %11311 = vpow2.f32 %v4778_v52 }
 0x8b0   :  { %v11298_v7 = vpop.eup %11297 }
 0x8b1   :  { %v11300_v31 = vpop.eup %11299  ;;  %v4858_v4 = vmul.f32 %v11298_v7, %v4810_v25 }
 0x8b2   :  { %v11302_v11 = vpop.eup %11301  ;;  %v4856_v15 = vmul.f32 %v11300_v31, %v4808_v9 }
 0x8b3   :  { %v11304_v56 = vpop.eup %11303  ;;  %v4859_v48 = vmul.f32 %v11302_v11, %v4811_v42  ;;  %v4874_v14 = vmul.f32 %v4858_v4, %v13964_v20 }
 0x8b4   :  { %v11306_v21 = vpop.eup %11305  ;;  %v4857_v18 = vmul.f32 %v11304_v56, %v4809_v28  ;;  %v4872_v2 = vmul.f32 %v4856_v15, %v13967_v40 }
 0x8b5   :  { %v11308_v3 = vpop.eup %11307  ;;  %v4875_v10 = vmul.f32 %v4859_v48, %v13971_v0  ;;  %v4798_v8 = vadd.f32 2.0, %v11306_v21 }
 0x8b6   :  { %v11310_v46 = vpop.eup %11309  ;;  %v4873_v57 = vmul.f32 %v4857_v18, %v13975_v24  ;;  %v4796_v35 = vadd.f32 2.0, %v11308_v3 }
 0x8b7   :  { %v11312_v52 = vpop.eup %11311  ;;  %v4814_v25 = vmul.f32 %v11306_v21, %v4798_v8  ;;  %v4799_v7 = vadd.f32 2.0, %v11310_v46  ;;  %v4885_v31 = vpack.c.bf16 %v4875_v10, %v4874_v14 }
 0x8b8   :  { %v4812_v9 = vmul.f32 %v11308_v3, %v4796_v35  ;;  %v4797_v42 = vadd.f32 2.0, %v11312_v52  ;;  %v4884_v11 = vpack.c.bf16 %v4873_v57, %v4872_v2 }
 0x8b9   :  { %v4830_v28 = vadd.f32 2.0, %v4814_v25  ;;  %v4815_v56 = vmul.f32 %v11310_v46, %v4799_v7 }
 0x8ba   :  { %v4828_v38 = vadd.f32 2.0, %v4812_v9  ;;  %v4813_v4 = vmul.f32 %v11312_v52, %v4797_v42  ;;  %10070 = vmatprep.subr.bf16.mxu1 %v4884_v11 }
 0x8bb   :  { %11313 = vrcp.f32 %v4830_v28  ;;  %v4831_v20 = vadd.f32 2.0, %v4815_v56  ;;  %10071 = vmatpush3.bf16.msra.mxu1 %v4884_v11 }
 0x8bc   :  { %11315 = vrcp.f32 %v4828_v38  ;;  %v4829_v40 = vadd.f32 2.0, %v4813_v4  ;;  %10072 = vmatprep.subr.bf16.mxu1 %v4885_v31 }
 0x8bd   :  { %11317 = vrcp.f32 %v4831_v20 }
 0x8be   :  { %11319 = vrcp.f32 %v4829_v40 }
 0x8bf   :  { %10073 = vmatpush3.bf16.msra.mxu1 %v4885_v31 }
 0x8c5   :  { %v11314_v18 = vpop.eup %11313  ;;  %v13999_v0 = vpop.f32.mrb[176].mxu1 }
 0x8c6   :  { %v11316_v3 = vpop.eup %11315  ;;  %v4862_v24 = vmul.f32 %v11314_v18, %v4814_v25  ;;  %v5282_v15 = vpop.f32.mrb[177].mxu1 }
 0x8c7   :  { %v11318_v48 = vpop.eup %11317  ;;  %v4860_v21 = vmul.f32 %v11316_v3, %v4812_v9  ;;  %v9893_v14 = vpop.f32.mrb[178].mxu1 }
 0x8c8   :  { %v11320_v10 = vpop.eup %11319  ;;  %v4863_v8 = vmul.f32 %v11318_v48, %v4815_v56  ;;  %v5570_v46 = vpack.c.bf16 %v9893_v14, %v13999_v0  ;;  %v5285_v2 = vpop.f32.mrb[179].mxu1  ;;  %v4878_v35 = vmul.f32 %v4862_v24, %v13980_v27  ;;  %v14016_v0 = vld [vmem:[%s14680_s7 + $0x8] sm:$0xff]  }
 0x8c9   :  { %v4861_v38 = vmul.f32 %v11320_v10, %v4813_v4  ;;  %v5569_v57 = vpack.c.bf16 %v5285_v2, %v5282_v15  ;;  %v4876_v7 = vmul.f32 %v4860_v21, %v13983_v58 }
 0x8ca   :  { %v4879_v52 = vmul.f32 %v4863_v8, %v13987_v44 }
 0x8cb   :  { %v4877_v31 = vmul.f32 %v4861_v38, %v13991_v34  ;;  %v14043_v38 = vld [vmem:[%s14680_s7 + $0x28] sm:$0xff]  }
 0x8cc   :  { %v4887_v25 = vpack.c.bf16 %v4879_v52, %v4878_v35 }
 0x8cd   :  { %v14006_v42 = vpop.f32.mrb[180].mxu1  ;;  %v4886_v9 = vpack.c.bf16 %v4877_v31, %v4876_v7 }
 0x8ce   :  { %v5298_v11 = vpop.f32.mrb[181].mxu1 }
 0x8cf   :  { %v9897_v28 = vpop.f32.mrb[182].mxu1  ;;  %10074 = vmatprep.subr.bf16.mxu1 %v4886_v9 }
 0x8d0   :  { %v5572_v56 = vpack.c.bf16 %v9897_v28, %v14006_v42  ;;  %v5301_v20 = vpop.f32.mrb[183].mxu1  ;;  %10075 = vmatpush3.bf16.msra.mxu1 %v4886_v9 }
 0x8d1   :  { %v5571_v4 = vpack.c.bf16 %v5301_v20, %v5298_v11  ;;  %10076 = vmatprep.subr.bf16.mxu1 %v4887_v25  ;;  %v14069_v11 = vld [vmem:[%s14680_s7 + $0x38] sm:$0xff]  }
 0x8d4   :  { %10077 = vmatpush3.bf16.msra.mxu1 %v4887_v25 }
 0x8d5   :  { %v9900_v27 = vpop.f32.mrb[184].mxu1 }
 0x8d6   :  { %v5314_v44 = vpop.f32.mrb[185].mxu1 }
 0x8d7   :  { %v9901_v40 = vpop.f32.mrb[186].mxu1  ;;  %10079 = vmatmul.mubr.msk.bf16.vlgmr.msra.gmra.mrb[248].mxu1 %vm4281_vm1, %v13699_v36  ;;  %v14025_v36 = vld [vmem:[%s14680_s7 + $0x20] sm:$0xff]  }
 0x8d8   :  { %v5578_v58 = vpack.c.bf16 %v9901_v40, %v9900_v27  ;;  %v5317_v34 = vpop.f32.mrb[187].mxu1  ;;  %10082 = vmatprep.mubr.msk.bf16.mxu1 %vm4281_vm1, %v13704_v29 }
 0x8d9   :  { %v5577_v18 = vpack.c.bf16 %v5317_v34, %v5314_v44 }
 0x8db   :  { %9966 = vmatprep.mubr.msk.bf16.mxu0 %vm291_vm0, %v5577_v18  ;;  %v14095_v18 = vld [vmem:[%s14680_s7 + $0x48] sm:$0xff]  }
 0x8dc   :  { %9967 = vmatmul.mubr.msk.bf16.vlgmr.msra.gmra.mrb[224].mxu0 %vm291_vm0, %v5578_v58 }
 0x8dd   :  { %v9904_v3 = vpop.f32.mrb[188].mxu1  ;;  %9975 = vmatpush3.bf16.msra.mxu0 %v13921_v63 }
 0x8de   :  { %v5330_v24 = vpop.f32.mrb[189].mxu1  ;;  %9976 = vmatprep.subr.bf16.mxu0 %v14016_v0 }
 0x8df   :  { %v9905_v29 = vpop.f32.mrb[190].mxu1  ;;  %10083 = vmatmul.mubr.msk.bf16.gmra.mrb[252].mxu1 %vm4281_vm1, %v13713_v1 }
 0x8e0   :  { %v5580_v15 = vpack.c.bf16 %v9905_v29, %v9904_v3  ;;  %v5333_v48 = vpop.f32.mrb[191].mxu1  ;;  %10086 = vmatprep.mubr.msk.bf16.mxu1 %vm4281_vm1, %v13718_v62 }
 0x8e1   :  { %v5579_v21 = vpack.c.bf16 %v5333_v48, %v5330_v24  ;;  %9977 = vmatpush3.bf16.msra.mxu0 %v14016_v0 }
 0x8e2   :  { %9986 = vmatprep.subr.bf16.mxu0 %v14025_v36 }
 0x8e3   :  { %9970 = vmatprep.mubr.msk.bf16.mxu0 %vm291_vm0, %v5579_v21 }
 0x8e4   :  { %9971 = vmatmul.mubr.msk.bf16.gmra.mrb[228].mxu0 %vm291_vm0, %v5580_v15 }
 0x8e5   :  { %9978 = vmatprep.mubr.msk.bf16.mxu0 %vm291_vm0, %v5569_v57  ;;  %v9908_v14 = vpop.f32.mrb[192].mxu1 }
 0x8e6   :  { %v5346_v10 = vpop.f32.mrb[193].mxu1 }
 0x8e7   :  { %10087 = vmatmul.mubr.msk.bf16.gmra.mrb[0].mxu1 %vm4281_vm1, %v13734_v6  ;;  %v9909_v1 = vpop.f32.mrb[194].mxu1 }
 0x8e8   :  { %10090 = vmatprep.mubr.msk.bf16.mxu1 %vm4281_vm1, %v13739_v22  ;;  %v5764_v62 = vpack.c.bf16 %v9909_v1, %v9908_v14  ;;  %v5349_v8 = vpop.f32.mrb[195].mxu1  ;;  %v14052_v22 = vld [vmem:[%s14680_s7 + $0x30] sm:$0xff]  }
 0x8e9   :  { %v5763_v2 = vpack.c.bf16 %v5349_v8, %v5346_v10 }
 0x8ec   :  { %9979 = vmatmul.mubr.msk.bf16.vlgmr.msra.gmra.mrb[224].mxu0 %vm291_vm0, %v5570_v46 }
 0x8ed   :  { %9982 = vmatprep.mubr.msk.bf16.mxu0 %vm291_vm0, %v5571_v4  ;;  %9987 = vmatpush3.bf16.msra.mxu0 %v14025_v36  ;;  %v9912_v57 = vpop.f32.mrb[196].mxu1 }
 0x8ee   :  { %9988 = vmatprep.subr.bf16.mxu0 %v14043_v38  ;;  %v5362_v6 = vpop.f32.mrb[197].mxu1 }
 0x8ef   :  { %10091 = vmatmul.mubr.msk.bf16.gmra.mrb[4].mxu1 %vm4281_vm1, %v13748_v16  ;;  %v9913_v35 = vpop.f32.mrb[198].mxu1 }
 0x8f0   :  { %v5766_v52 = vpack.c.bf16 %v9913_v35, %v9912_v57  ;;  %v5365_v7 = vpop.f32.mrb[199].mxu1  ;;  %10094 = vmatprep.mubr.msk.bf16.mxu1 %vm4281_vm1, %v13753_v13 }
 0x8f1   :  { %9989 = vmatpush3.bf16.msra.mxu0 %v14043_v38  ;;  %v5765_v46 = vpack.c.bf16 %v5365_v7, %v5362_v6 }
 0x8f2   :  { %9998 = vmatprep.subr.bf16.mxu0 %v14052_v22 }
 0x8f4   :  { %9983 = vmatmul.mubr.msk.bf16.gmra.mrb[228].mxu0 %vm291_vm0, %v5572_v56 }
 0x8f5   :  { %9990 = vmatprep.mubr.msk.bf16.mxu0 %vm291_vm0, %v5763_v2  ;;  %v9916_v31 = vpop.f32.mrb[200].mxu1 }
 0x8f6   :  { %v5378_v25 = vpop.f32.mrb[201].mxu1 }
 0x8f7   :  { %v9917_v42 = vpop.f32.mrb[202].mxu1  ;;  %10095 = vmatmul.mubr.msk.bf16.gmra.mrb[8].mxu1 %vm4281_vm1, %v13762_v49 }
 0x8f8   :  { %v5869_v16 = vpack.c.bf16 %v9917_v42, %v9916_v31  ;;  %v5381_v9 = vpop.f32.mrb[203].mxu1  ;;  %10098 = vmatprep.mubr.msk.bf16.mxu1 %vm4281_vm1, %v13767_v41  ;;  %v14078_v41 = vld [vmem:[%s14680_s7 + $0x40] sm:$0xff]  }
 0x8f9   :  { %v5868_v13 = vpack.c.bf16 %v5381_v9, %v5378_v25  ;;  %v14147_v25 = vld [vmem:[%s14680_s7 + $0x68] sm:$0xff]  }
 0x8fc   :  { %9991 = vmatmul.mubr.msk.bf16.vlgmr.msra.gmra.mrb[224].mxu0 %vm291_vm0, %v5764_v62  ;;  %v14121_v62 = vld [vmem:[%s14680_s7 + $0x58] sm:$0xff]  }
 0x8fd   :  { %9994 = vmatprep.mubr.msk.bf16.mxu0 %vm291_vm0, %v5765_v46  ;;  %9999 = vmatpush3.bf16.msra.mxu0 %v14052_v22  ;;  %v9920_v28 = vpop.f32.mrb[204].mxu1 }
 0x8fe   :  { %10000 = vmatprep.subr.bf16.mxu0 %v14069_v11  ;;  %v5394_v49 = vpop.f32.mrb[205].mxu1 }
 0x8ff   :  { %v9921_v56 = vpop.f32.mrb[206].mxu1  ;;  %10099 = vmatmul.mubr.msk.bf16.gmra.mrb[12].mxu1 %vm4281_vm1, %v13776_v37 }
 0x900   :  { %v5871_v20 = vpack.c.bf16 %v9921_v56, %v9920_v28  ;;  %v5397_v4 = vpop.f32.mrb[207].mxu1  ;;  %10102 = vmatprep.mubr.msk.bf16.mxu1 %vm4281_vm1, %v13781_v53 }
 0x901   :  { %10001 = vmatpush3.bf16.msra.mxu0 %v14069_v11  ;;  %v5870_v27 = vpack.c.bf16 %v5397_v4, %v5394_v49 }
 0x902   :  { %10010 = vmatprep.subr.bf16.mxu0 %v14078_v41 }
 0x904   :  { %9995 = vmatmul.mubr.msk.bf16.gmra.mrb[228].mxu0 %vm291_vm0, %v5766_v52 }
 0x905   :  { %10002 = vmatprep.mubr.msk.bf16.mxu0 %vm291_vm0, %v5868_v13  ;;  %v9924_v44 = vpop.f32.mrb[208].mxu1 }
 0x906   :  { %v5410_v40 = vpop.f32.mrb[209].mxu1 }
 0x907   :  { %v9925_v58 = vpop.f32.mrb[210].mxu1  ;;  %10103 = vmatmul.mubr.msk.bf16.gmra.mrb[16].mxu1 %vm4281_vm1, %v13790_v5 }
 0x908   :  { %v5974_v37 = vpack.c.bf16 %v9925_v58, %v9924_v44  ;;  %v5413_v34 = vpop.f32.mrb[211].mxu1  ;;  %10106 = vmatprep.mubr.msk.bf16.mxu1 %vm4281_vm1, %v13795_v23  ;;  %v14104_v23 = vld [vmem:[%s14680_s7 + $0x50] sm:$0xff]  }
 0x909   :  { %v5973_v53 = vpack.c.bf16 %v5413_v34, %v5410_v40 }
 0x90c   :  { %10003 = vmatmul.mubr.msk.bf16.vlgmr.msra.gmra.mrb[224].mxu0 %vm291_vm0, %v5869_v16 }
 0x90d   :  { %10006 = vmatprep.mubr.msk.bf16.mxu0 %vm291_vm0, %v5870_v27  ;;  %10011 = vmatpush3.bf16.msra.mxu0 %v14078_v41  ;;  %v9928_v3 = vpop.f32.mrb[212].mxu1  ;;  %v14173_v27 = vld [vmem:[%s14680_s7 + $0x78] sm:$0xff]  }
 0x90e   :  { %10012 = vmatprep.subr.bf16.mxu0 %v14095_v18  ;;  %v5426_v5 = vpop.f32.mrb[213].mxu1 }
 0x90f   :  { %v9929_v24 = vpop.f32.mrb[214].mxu1  ;;  %10107 = vmatmul.mubr.msk.bf16.gmra.mrb[20].mxu1 %vm4281_vm1, %v13804_v54 }
 0x910   :  { %v5976_v29 = vpack.c.bf16 %v9929_v24, %v9928_v3  ;;  %v5429_v15 = vpop.f32.mrb[215].mxu1  ;;  %10110 = vmatprep.mubr.msk.bf16.mxu1 %vm4281_vm1, %v13809_v17 }
 0x911   :  { %10013 = vmatpush3.bf16.msra.mxu0 %v14095_v18  ;;  %v5975_v48 = vpack.c.bf16 %v5429_v15, %v5426_v5 }
 0x912   :  { %10022 = vmatprep.subr.bf16.mxu0 %v14104_v23 }
 0x914   :  { %10007 = vmatmul.mubr.msk.bf16.gmra.mrb[228].mxu0 %vm291_vm0, %v5871_v20 }
 0x915   :  { %10014 = vmatprep.mubr.msk.bf16.mxu0 %vm291_vm0, %v5973_v53  ;;  %v9932_v21 = vpop.f32.mrb[216].mxu1 }
 0x916   :  { %v5442_v14 = vpop.f32.mrb[217].mxu1 }
 0x917   :  { %v9933_v10 = vpop.f32.mrb[218].mxu1  ;;  %10111 = vmatmul.mubr.msk.bf16.gmra.mrb[24].mxu1 %vm4281_vm1, %v13818_v55 }
 0x918   :  { %v6079_v54 = vpack.c.bf16 %v9933_v10, %v9932_v21  ;;  %v5445_v1 = vpop.f32.mrb[219].mxu1  ;;  %10114 = vmatprep.mubr.msk.bf16.mxu1 %vm4281_vm1, %v13823_v33  ;;  %v14130_v33 = vld [vmem:[%s14680_s7 + $0x60] sm:$0xff]  }
 0x919   :  { %v6078_v17 = vpack.c.bf16 %v5445_v1, %v5442_v14  ;;  %v14808_v10 = vld [vmem:[#allocation13_spill] sm:$0xff]  ;;  %v14810_v1 = vld [vmem:[#allocation16_spill] sm:$0xff] }
 0x91c   :  { %10015 = vmatmul.mubr.msk.bf16.vlgmr.msra.gmra.mrb[224].mxu0 %vm291_vm0, %v5974_v37 }
 0x91d   :  { %10018 = vmatprep.mubr.msk.bf16.mxu0 %vm291_vm0, %v5975_v48  ;;  %10023 = vmatpush3.bf16.msra.mxu0 %v14104_v23  ;;  %v9936_v8 = vpop.f32.mrb[220].mxu1 }
 0x91e   :  { %10024 = vmatprep.subr.bf16.mxu0 %v14121_v62  ;;  %v5458_v55 = vpop.f32.mrb[221].mxu1 }
 0x91f   :  { %v9937_v2 = vpop.f32.mrb[222].mxu1  ;;  %10115 = vmatmul.mubr.msk.bf16.gmra.mrb[28].mxu1 %vm4281_vm1, %v13832_v50 }
 0x920   :  { %v6081_v57 = vpack.c.bf16 %v9937_v2, %v9936_v8  ;;  %v5461_v6 = vpop.f32.mrb[223].mxu1  ;;  %10118 = vmatprep.mubr.msk.bf16.mxu1 %vm4281_vm1, %v13837_v59 }
 0x921   :  { %10025 = vmatpush3.bf16.msra.mxu0 %v14121_v62  ;;  %v6080_v35 = vpack.c.bf16 %v5461_v6, %v5458_v55 }
 0x922   :  { %10034 = vmatprep.subr.bf16.mxu0 %v14130_v33 }
 0x924   :  { %10019 = vmatmul.mubr.msk.bf16.gmra.mrb[228].mxu0 %vm291_vm0, %v5976_v29  ;;  %v14199_v29 = vld [vmem:[%s14680_s7 + $0x88] sm:$0xff]  }
 0x925   :  { %10026 = vmatprep.mubr.msk.bf16.mxu0 %vm291_vm0, %v6078_v17  ;;  %v9940_v52 = vpop.f32.mrb[224].mxu1 }
 0x926   :  { %v5474_v7 = vpop.f32.mrb[225].mxu1 }
 0x927   :  { %v9941_v46 = vpop.f32.mrb[226].mxu1  ;;  %10119 = vmatmul.mubr.msk.bf16.gmra.mrb[32].mxu1 %vm4281_vm1, %v13846_v60 }
 0x928   :  { %v6184_v50 = vpack.c.bf16 %v9941_v46, %v9940_v52  ;;  %v5477_v31 = vpop.f32.mrb[227].mxu1  ;;  %10122 = vmatprep.mubr.msk.bf16.mxu1 %vm4281_vm1, %v13851_v26  ;;  %v14156_v26 = vld [vmem:[%s14680_s7 + $0x70] sm:$0xff]  }
 0x929   :  { %v6183_v59 = vpack.c.bf16 %v5477_v31, %v5474_v7 }
 0x92c   :  { %10027 = vmatmul.mubr.msk.bf16.vlgmr.msra.gmra.mrb[224].mxu0 %vm291_vm0, %v6079_v54  ;;  %v14809_v54 = vld [vmem:[#allocation15_spill] sm:$0xff] }
 0x92d   :  { %10030 = vmatprep.mubr.msk.bf16.mxu0 %vm291_vm0, %v6080_v35  ;;  %10035 = vmatpush3.bf16.msra.mxu0 %v14130_v33  ;;  %v9944_v42 = vpop.f32.mrb[228].mxu1 }
 0x92e   :  { %10036 = vmatprep.subr.bf16.mxu0 %v14147_v25  ;;  %v5490_v60 = vpop.f32.mrb[229].mxu1 }
 0x92f   :  { %v9945_v16 = vpop.f32.mrb[230].mxu1  ;;  %10123 = vmatmul.mubr.msk.bf16.gmra.mrb[36].mxu1 %vm4281_vm1, %v13860_v47 }
 0x930   :  { %v6186_v9 = vpack.c.bf16 %v9945_v16, %v9944_v42  ;;  %v5493_v13 = vpop.f32.mrb[231].mxu1  ;;  %10126 = vmatprep.mubr.msk.bf16.mxu1 %vm4281_vm1, %v13865_v12 }
 0x931   :  { %10037 = vmatpush3.bf16.msra.mxu0 %v14147_v25  ;;  %v6185_v28 = vpack.c.bf16 %v5493_v13, %v5490_v60 }
 0x932   :  { %10046 = vmatprep.subr.bf16.mxu0 %v14156_v26 }
 0x934   :  { %10031 = vmatmul.mubr.msk.bf16.gmra.mrb[228].mxu0 %vm291_vm0, %v6081_v57 }
 0x935   :  { %10038 = vmatprep.mubr.msk.bf16.mxu0 %vm291_vm0, %v6183_v59  ;;  %v9948_v49 = vpop.f32.mrb[232].mxu1 }
 0x936   :  { %v5506_v56 = vpop.f32.mrb[233].mxu1 }
 0x937   :  { %v9949_v20 = vpop.f32.mrb[234].mxu1  ;;  %10127 = vmatmul.mubr.msk.bf16.gmra.mrb[40].mxu1 %vm4281_vm1, %v13874_v51 }
 0x938   :  { %v6289_v47 = vpack.c.bf16 %v9949_v20, %v9948_v49  ;;  %v5509_v4 = vpop.f32.mrb[235].mxu1  ;;  %10130 = vmatprep.mubr.msk.bf16.mxu1 %vm4281_vm1, %v13879_v32  ;;  %v14182_v32 = vld [vmem:[%s14680_s7 + $0x80] sm:$0xff]  }
 0x939   :  { %v6288_v12 = vpack.c.bf16 %v5509_v4, %v5506_v56 }
 0x93c   :  { %10039 = vmatmul.mubr.msk.bf16.vlgmr.msra.gmra.mrb[224].mxu0 %vm291_vm0, %v6184_v50 }
 0x93d   :  { %10042 = vmatprep.mubr.msk.bf16.mxu0 %vm291_vm0, %v6185_v28  ;;  %10047 = vmatpush3.bf16.msra.mxu0 %v14156_v26  ;;  %v9952_v44 = vpop.f32.mrb[236].mxu1 }
 0x93e   :  { %10048 = vmatprep.subr.bf16.mxu0 %v14173_v27  ;;  %v5522_v51 = vpop.f32.mrb[237].mxu1 }
 0x93f   :  { %v9953_v40 = vpop.f32.mrb[238].mxu1  ;;  %10131 = vmatmul.mubr.msk.bf16.gmra.mrb[44].mxu1 %vm4281_vm1, %v13888_v39 }
 0x940   :  { %v6291_v58 = vpack.c.bf16 %v9953_v40, %v9952_v44  ;;  %v5525_v37 = vpop.f32.mrb[239].mxu1  ;;  %10134 = vmatprep.mubr.msk.bf16.mxu1 %vm4281_vm1, %v13898_v43 }
 0x941   :  { %10049 = vmatpush3.bf16.msra.mxu0 %v14173_v27  ;;  %v6290_v34 = vpack.c.bf16 %v5525_v37, %v5522_v51  ;;  %v10861_v51 = vld [vmem:[%s14681_s8] sm:$0xff]  }
 0x942   :  { %10058 = vmatprep.subr.bf16.mxu0 %v14182_v32  ;;  %10258 = vmatprep.subr.bf16.mxu1 %v10861_v51 }
 0x943   :  { %10259 = vmatpush3.bf16.msra.mxu1 %v10861_v51 }
 0x944   :  { %10043 = vmatmul.mubr.msk.bf16.gmra.mrb[228].mxu0 %vm291_vm0, %v6186_v9 }
 0x945   :  { %10050 = vmatprep.mubr.msk.bf16.mxu0 %vm291_vm0, %v6288_v12  ;;  %v9956_v53 = vpop.f32.mrb[240].mxu1 }
 0x946   :  { %v5538_v3 = vpop.f32.mrb[241].mxu1 }
 0x947   :  { %v9957_v5 = vpop.f32.mrb[242].mxu1  ;;  %10135 = vmatmul.mubr.msk.bf16.gmra.mrb[48].mxu1 %vm4281_vm1, %v13909_v19 }
 0x948   :  { %v6394_v39 = vpack.c.bf16 %v9957_v5, %v9956_v53  ;;  %v5541_v24 = vpop.f32.mrb[243].mxu1  ;;  %10138 = vmatprep.mubr.msk.bf16.mxu1 %vm4281_vm1, %v13914_v61  ;;  %v10863_v5 = vld [vmem:[%s14681_s8 + $0x10] sm:$0xff]  }
 0x949   :  { %v6393_v43 = vpack.c.bf16 %v5541_v24, %v5538_v3 }
 0x94c   :  { %10051 = vmatmul.mubr.msk.bf16.vlgmr.msra.gmra.mrb[224].mxu0 %vm291_vm0, %v6289_v47 }
 0x94d   :  { %10054 = vmatprep.mubr.msk.bf16.mxu0 %vm291_vm0, %v6290_v34  ;;  %10059 = vmatpush3.bf16.msra.mxu0 %v14182_v32  ;;  %v9960_v15 = vpop.f32.mrb[244].mxu1 }
 0x94e   :  { %10060 = vmatprep.subr.bf16.mxu0 %v14199_v29  ;;  %v5554_v19 = vpop.f32.mrb[245].mxu1 }
 0x94f   :  { %v9961_v48 = vpop.f32.mrb[246].mxu1  ;;  %10139 = vmatmul.mubr.msk.bf16.gmra.mrb[52].mxu1 %vm4281_vm1, %v13929_v45  ;;  %v14811_v45 = vld [vmem:[#allocation14_spill] sm:$0xff] }
 0x950   :  { %v6396_v61 = vpack.c.bf16 %v9961_v48, %v9960_v15  ;;  %v5557_v21 = vpop.f32.mrb[247].mxu1  ;;  %10142 = vmatprep.mubr.msk.bf16.mxu1 %vm4281_vm1, %v13934_v30  ;;  %v14812_v30 = vld [vmem:[#allocation17_spill] sm:$0xff] }
 0x951   :  { %10061 = vmatpush3.bf16.msra.mxu0 %v14199_v29  ;;  %v6395_v14 = vpack.c.bf16 %v5557_v21, %v5554_v19 }
 0x952   :  { %10150 = vmatprep.subr.bf16.mxu0 %v14808_v10 }
 0x954   :  { %10055 = vmatmul.mubr.msk.bf16.gmra.mrb[228].mxu0 %vm291_vm0, %v6291_v58 }
 0x955   :  { %10062 = vmatprep.mubr.msk.bf16.mxu0 %vm291_vm0, %v6393_v43 }
 0x957   :  { %10143 = vmatmul.mubr.msk.bf16.gmra.mrb[56].mxu1 %vm4281_vm1, %v14809_v54 }
 0x958   :  { %10146 = vmatprep.mubr.msk.bf16.mxu1 %vm4281_vm1, %v14810_v1 }
 0x95c   :  { %10063 = vmatmul.mubr.msk.bf16.vlgmr.msra.gmra.mrb[224].mxu0 %vm291_vm0, %v6394_v39 }
 0x95d   :  { %10066 = vmatprep.mubr.msk.bf16.mxu0 %vm291_vm0, %v6395_v14  ;;  %10151 = vmatpush3.bf16.msra.mxu0 %v14808_v10 }
 0x95e   :  { %10152 = vmatprep.subr.bf16.mxu0 %v14811_v45 }
 0x95f   :  { %10147 = vmatmul.mubr.msk.bf16.gmra.mrb[60].mxu1 %vm4281_vm1, %v14812_v30 }
 0x961   :  { %10153 = vmatpush3.bf16.msra.mxu0 %v14811_v45 }
 0x962   :  { %10162 = vmatprep.subr.bf16.mxu0 %v13921_v63 }
 0x964   :  { %10067 = vmatmul.mubr.msk.bf16.gmra.mrb[228].mxu0 %vm291_vm0, %v6396_v61 }
 0x9aa   :  { %v10080_v17 = vpop.f32.mrb[248].mxu1 }
 0x9ab   :  { %v6532_v8 = vpop.f32.mrb[249].mxu1 }
 0x9ac   :  { %v10081_v55 = vpop.f32.mrb[250].mxu1 }
 0x9ad   :  { %v6820_v2 = vpack.c.bf16 %v10081_v55, %v10080_v17  ;;  %v6535_v57 = vpop.f32.mrb[251].mxu1 }
 0x9ae   :  { %v6819_v6 = vpack.c.bf16 %v6535_v57, %v6532_v8 }
 0x9b2   :  { %v10084_v35 = vpop.f32.mrb[252].mxu1 }
 0x9b3   :  { %v6548_v52 = vpop.f32.mrb[253].mxu1 }
 0x9b4   :  { %v10085_v7 = vpop.f32.mrb[254].mxu1 }
 0x9b5   :  { %v6822_v46 = vpack.c.bf16 %v10085_v7, %v10084_v35  ;;  %v6551_v50 = vpop.f32.mrb[255].mxu1 }
 0x9b6   :  { %v6821_v31 = vpack.c.bf16 %v6551_v50, %v6548_v52 }
 0x9ba   :  { %v10088_v59 = vpop.f32.mrb[0].mxu1 }
 0x9bb   :  { %v6564_v42 = vpop.f32.mrb[1].mxu1 }
 0x9bc   :  { %v10089_v60 = vpop.f32.mrb[2].mxu1 }
 0x9bd   :  { %v6824_v16 = vpack.c.bf16 %v10089_v60, %v10088_v59  ;;  %v6567_v9 = vpop.f32.mrb[3].mxu1 }
 0x9be   :  { %v6823_v13 = vpack.c.bf16 %v6567_v9, %v6564_v42 }
 0x9c0   :  { %10154 = vmatprep.mubr.msk.bf16.mxu0 %vm291_vm0, %v6823_v13 }
 0x9c1   :  { %10155 = vmatmul.mubr.msk.bf16.vlgmr.msra.gmra.mrb[232].mxu0 %vm291_vm0, %v6824_v16 }
 0x9c2   :  { %v10092_v28 = vpop.f32.mrb[4].mxu1  ;;  %10163 = vmatpush3.bf16.msra.mxu0 %v13921_v63 }
 0x9c3   :  { %v6580_v49 = vpop.f32.mrb[5].mxu1  ;;  %10164 = vmatprep.subr.bf16.mxu0 %v14016_v0 }
 0x9c4   :  { %v10093_v56 = vpop.f32.mrb[6].mxu1 }
 0x9c5   :  { %v6826_v20 = vpack.c.bf16 %v10093_v56, %v10092_v28  ;;  %v6583_v47 = vpop.f32.mrb[7].mxu1 }
 0x9c6   :  { %v6825_v4 = vpack.c.bf16 %v6583_v47, %v6580_v49  ;;  %10165 = vmatpush3.bf16.msra.mxu0 %v14016_v0  ;;  %v10862_v0 = vld [vmem:[%s14681_s8 + $0x8] sm:$0xff]  }
 0x9c7   :  { %10174 = vmatprep.subr.bf16.mxu0 %v14025_v36  ;;  %10260 = vmatprep.subr.bf16.mxu1 %v10862_v0 }
 0x9c8   :  { %10158 = vmatprep.mubr.msk.bf16.mxu0 %vm291_vm0, %v6825_v4  ;;  %10261 = vmatpush3.bf16.msra.mxu1 %v10862_v0 }
 0x9c9   :  { %10159 = vmatmul.mubr.msk.bf16.gmra.mrb[236].mxu0 %vm291_vm0, %v6826_v20  ;;  %10262 = vmatprep.subr.bf16.mxu1 %v10863_v5 }
 0x9ca   :  { %10166 = vmatprep.mubr.msk.bf16.mxu0 %vm291_vm0, %v6819_v6  ;;  %v10096_v12 = vpop.f32.mrb[8].mxu1 }
 0x9cb   :  { %v6596_v44 = vpop.f32.mrb[9].mxu1 }
 0x9cc   :  { %v10097_v63 = vpop.f32.mrb[10].mxu1  ;;  %10263 = vmatpush3.bf16.msra.mxu1 %v10863_v5 }
 0x9cd   :  { %v6982_v40 = vpack.c.bf16 %v10097_v63, %v10096_v12  ;;  %v6599_v58 = vpop.f32.mrb[11].mxu1 }
 0x9ce   :  { %v6981_v37 = vpack.c.bf16 %v6599_v58, %v6596_v44 }
 0x9d1   :  { %10167 = vmatmul.mubr.msk.bf16.vlgmr.msra.gmra.mrb[232].mxu0 %vm291_vm0, %v6820_v2 }
 0x9d2   :  { %10170 = vmatprep.mubr.msk.bf16.mxu0 %vm291_vm0, %v6821_v31  ;;  %10175 = vmatpush3.bf16.msra.mxu0 %v14025_v36  ;;  %v10100_v34 = vpop.f32.mrb[12].mxu1  ;;  %v10864_v36 = vld [vmem:[%s14681_s8 + $0x18] sm:$0xff]  }
 0x9d3   :  { %10176 = vmatprep.subr.bf16.mxu0 %v14043_v38  ;;  %v6612_v53 = vpop.f32.mrb[13].mxu1  ;;  %10264 = vmatprep.subr.bf16.mxu1 %v10864_v36 }
 0x9d4   :  { %v10101_v3 = vpop.f32.mrb[14].mxu1  ;;  %10265 = vmatpush3.bf16.msra.mxu1 %v10864_v36 }
 0x9d5   :  { %v6984_v39 = vpack.c.bf16 %v10101_v3, %v10100_v34  ;;  %v6615_v24 = vpop.f32.mrb[15].mxu1 }
 0x9d6   :  { %10177 = vmatpush3.bf16.msra.mxu0 %v14043_v38  ;;  %v6983_v43 = vpack.c.bf16 %v6615_v24, %v6612_v53 }
 0x9d7   :  { %10186 = vmatprep.subr.bf16.mxu0 %v14052_v22 }
 0x9d9   :  { %10171 = vmatmul.mubr.msk.bf16.gmra.mrb[236].mxu0 %vm291_vm0, %v6822_v46 }
 0x9da   :  { %10178 = vmatprep.mubr.msk.bf16.mxu0 %vm291_vm0, %v6981_v37  ;;  %v10104_v15 = vpop.f32.mrb[16].mxu1 }
 0x9db   :  { %v6628_v19 = vpop.f32.mrb[17].mxu1 }
 0x9dc   :  { %v10105_v48 = vpop.f32.mrb[18].mxu1 }
 0x9dd   :  { %v7071_v61 = vpack.c.bf16 %v10105_v48, %v10104_v15  ;;  %v6631_v38 = vpop.f32.mrb[19].mxu1  ;;  %v14300_v48 = vld [vmem:[%s14683_s10 + $0x4] ss:$0 sm:$0xff] }
 0x9de   :  { %v7070_v21 = vpack.c.bf16 %v6631_v38, %v6628_v19 }
 0x9e1   :  { %10179 = vmatmul.mubr.msk.bf16.vlgmr.msra.gmra.mrb[232].mxu0 %vm291_vm0, %v6982_v40 }
 0x9e2   :  { %10182 = vmatprep.mubr.msk.bf16.mxu0 %vm291_vm0, %v6983_v43  ;;  %10187 = vmatpush3.bf16.msra.mxu0 %v14052_v22  ;;  %v10108_v14 = vpop.f32.mrb[20].mxu1 }
 0x9e3   :  { %10188 = vmatprep.subr.bf16.mxu0 %v14069_v11  ;;  %v6644_v10 = vpop.f32.mrb[21].mxu1 }
 0x9e4   :  { %v10109_v54 = vpop.f32.mrb[22].mxu1 }
 0x9e5   :  { %v7073_v1 = vpack.c.bf16 %v10109_v54, %v10108_v14  ;;  %v6647_v45 = vpop.f32.mrb[23].mxu1 }
 0x9e6   :  { %10189 = vmatpush3.bf16.msra.mxu0 %v14069_v11  ;;  %v7072_v30 = vpack.c.bf16 %v6647_v45, %v6644_v10 }
 0x9e7   :  { %10198 = vmatprep.subr.bf16.mxu0 %v14078_v41 }
 0x9e9   :  { %10183 = vmatmul.mubr.msk.bf16.gmra.mrb[236].mxu0 %vm291_vm0, %v6984_v39 }
 0x9ea   :  { %10190 = vmatprep.mubr.msk.bf16.mxu0 %vm291_vm0, %v7070_v21  ;;  %v10112_v17 = vpop.f32.mrb[24].mxu1 }
 0x9eb   :  { %v6660_v8 = vpop.f32.mrb[25].mxu1 }
 0x9ec   :  { %v10113_v55 = vpop.f32.mrb[26].mxu1 }
 0x9ed   :  { %v7160_v22 = vpack.c.bf16 %v10113_v55, %v10112_v17  ;;  %v6663_v2 = vpop.f32.mrb[27].mxu1 }
 0x9ee   :  { %v7159_v57 = vpack.c.bf16 %v6663_v2, %v6660_v8 }
 0x9f1   :  { %10191 = vmatmul.mubr.msk.bf16.vlgmr.msra.gmra.mrb[232].mxu0 %vm291_vm0, %v7071_v61 }
 0x9f2   :  { %10194 = vmatprep.mubr.msk.bf16.mxu0 %vm291_vm0, %v7072_v30  ;;  %10199 = vmatpush3.bf16.msra.mxu0 %v14078_v41  ;;  %v10116_v11 = vpop.f32.mrb[28].mxu1 }
 0x9f3   :  { %10200 = vmatprep.subr.bf16.mxu0 %v14095_v18  ;;  %v6676_v6 = vpop.f32.mrb[29].mxu1 }
 0x9f4   :  { %v10117_v35 = vpop.f32.mrb[30].mxu1 }
 0x9f5   :  { %v7162_v52 = vpack.c.bf16 %v10117_v35, %v10116_v11  ;;  %v6679_v7 = vpop.f32.mrb[31].mxu1 }
 0x9f6   :  { %10201 = vmatpush3.bf16.msra.mxu0 %v14095_v18  ;;  %v7161_v46 = vpack.c.bf16 %v6679_v7, %v6676_v6 }
 0x9f7   :  { %10210 = vmatprep.subr.bf16.mxu0 %v14104_v23 }
 0x9f9   :  { %10195 = vmatmul.mubr.msk.bf16.gmra.mrb[236].mxu0 %vm291_vm0, %v7073_v1 }
 0x9fa   :  { %10202 = vmatprep.mubr.msk.bf16.mxu0 %vm291_vm0, %v7159_v57  ;;  %v10120_v50 = vpop.f32.mrb[32].mxu1 }
 0x9fb   :  { %v6692_v31 = vpop.f32.mrb[33].mxu1 }
 0x9fc   :  { %v10121_v59 = vpop.f32.mrb[34].mxu1 }
 0x9fd   :  { %v7249_v41 = vpack.c.bf16 %v10121_v59, %v10120_v50  ;;  %v6695_v42 = vpop.f32.mrb[35].mxu1 }
 0x9fe   :  { %v7248_v60 = vpack.c.bf16 %v6695_v42, %v6692_v31 }
 0xa01   :  { %10203 = vmatmul.mubr.msk.bf16.vlgmr.msra.gmra.mrb[232].mxu0 %vm291_vm0, %v7160_v22 }
 0xa02   :  { %10206 = vmatprep.mubr.msk.bf16.mxu0 %vm291_vm0, %v7161_v46  ;;  %10211 = vmatpush3.bf16.msra.mxu0 %v14104_v23  ;;  %v10124_v18 = vpop.f32.mrb[36].mxu1 }
 0xa03   :  { %10212 = vmatprep.subr.bf16.mxu0 %v14121_v62  ;;  %v6708_v16 = vpop.f32.mrb[37].mxu1 }
 0xa04   :  { %v10125_v9 = vpop.f32.mrb[38].mxu1 }
 0xa05   :  { %v7251_v13 = vpack.c.bf16 %v10125_v9, %v10124_v18  ;;  %v6711_v28 = vpop.f32.mrb[39].mxu1 }
 0xa06   :  { %10213 = vmatpush3.bf16.msra.mxu0 %v14121_v62  ;;  %v7250_v49 = vpack.c.bf16 %v6711_v28, %v6708_v16 }
 0xa07   :  { %10222 = vmatprep.subr.bf16.mxu0 %v14130_v33 }
 0xa09   :  { %10207 = vmatmul.mubr.msk.bf16.gmra.mrb[236].mxu0 %vm291_vm0, %v7162_v52 }
 0xa0a   :  { %10214 = vmatprep.mubr.msk.bf16.mxu0 %vm291_vm0, %v7248_v60  ;;  %v10128_v56 = vpop.f32.mrb[40].mxu1 }
 0xa0b   :  { %v6724_v20 = vpop.f32.mrb[41].mxu1 }
 0xa0c   :  { %v10129_v47 = vpop.f32.mrb[42].mxu1 }
 0xa0d   :  { %v7338_v23 = vpack.c.bf16 %v10129_v47, %v10128_v56  ;;  %v6727_v4 = vpop.f32.mrb[43].mxu1 }
 0xa0e   :  { %v7337_v12 = vpack.c.bf16 %v6727_v4, %v6724_v20 }
 0xa11   :  { %10215 = vmatmul.mubr.msk.bf16.vlgmr.msra.gmra.mrb[232].mxu0 %vm291_vm0, %v7249_v41 }
 0xa12   :  { %10218 = vmatprep.mubr.msk.bf16.mxu0 %vm291_vm0, %v7250_v49  ;;  %10223 = vmatpush3.bf16.msra.mxu0 %v14130_v33  ;;  %v10132_v62 = vpop.f32.mrb[44].mxu1 }
 0xa13   :  { %10224 = vmatprep.subr.bf16.mxu0 %v14147_v25  ;;  %v6740_v44 = vpop.f32.mrb[45].mxu1 }
 0xa14   :  { %v10133_v63 = vpop.f32.mrb[46].mxu1 }
 0xa15   :  { %v7340_v51 = vpack.c.bf16 %v10133_v63, %v10132_v62  ;;  %v6743_v40 = vpop.f32.mrb[47].mxu1 }
 0xa16   :  { %10225 = vmatpush3.bf16.msra.mxu0 %v14147_v25  ;;  %v7339_v58 = vpack.c.bf16 %v6743_v40, %v6740_v44 }
 0xa17   :  { %10234 = vmatprep.subr.bf16.mxu0 %v14156_v26 }
 0xa19   :  { %10219 = vmatmul.mubr.msk.bf16.gmra.mrb[236].mxu0 %vm291_vm0, %v7251_v13 }
 0xa1a   :  { %10226 = vmatprep.mubr.msk.bf16.mxu0 %vm291_vm0, %v7337_v12  ;;  %v10136_v37 = vpop.f32.mrb[48].mxu1 }
 0xa1b   :  { %v6756_v0 = vpop.f32.mrb[49].mxu1 }
 0xa1c   :  { %v10137_v34 = vpop.f32.mrb[50].mxu1 }
 0xa1d   :  { %v7427_v33 = vpack.c.bf16 %v10137_v34, %v10136_v37  ;;  %v6759_v53 = vpop.f32.mrb[51].mxu1 }
 0xa1e   :  { %v7426_v3 = vpack.c.bf16 %v6759_v53, %v6756_v0 }
 0xa21   :  { %10227 = vmatmul.mubr.msk.bf16.vlgmr.msra.gmra.mrb[232].mxu0 %vm291_vm0, %v7338_v23 }
 0xa22   :  { %10230 = vmatprep.mubr.msk.bf16.mxu0 %vm291_vm0, %v7339_v58  ;;  %10235 = vmatpush3.bf16.msra.mxu0 %v14156_v26  ;;  %v10140_v25 = vpop.f32.mrb[52].mxu1 }
 0xa23   :  { %10236 = vmatprep.subr.bf16.mxu0 %v14173_v27  ;;  %v6772_v5 = vpop.f32.mrb[53].mxu1 }
 0xa24   :  { %v10141_v39 = vpop.f32.mrb[54].mxu1 }
 0xa25   :  { %v7429_v24 = vpack.c.bf16 %v10141_v39, %v10140_v25  ;;  %v6775_v43 = vpop.f32.mrb[55].mxu1 }
 0xa26   :  { %10237 = vmatpush3.bf16.msra.mxu0 %v14173_v27  ;;  %v7428_v36 = vpack.c.bf16 %v6775_v43, %v6772_v5 }
 0xa27   :  { %10246 = vmatprep.subr.bf16.mxu0 %v14182_v32 }
 0xa29   :  { %10231 = vmatmul.mubr.msk.bf16.gmra.mrb[236].mxu0 %vm291_vm0, %v7340_v51 }
 0xa2a   :  { %10238 = vmatprep.mubr.msk.bf16.mxu0 %vm291_vm0, %v7426_v3  ;;  %v14295_v15 = vpop.f32.mrb[56].mxu1 }
 0xa2b   :  { %v6788_v19 = vpop.f32.mrb[57].mxu1 }
 0xa2c   :  { %v10145_v26 = vpop.f32.mrb[58].mxu1 }
 0xa2d   :  { %v7516_v61 = vpack.c.bf16 %v10145_v26, %v14295_v15  ;;  %v6791_v38 = vpop.f32.mrb[59].mxu1 }
 0xa2e   :  { %v7515_v27 = vpack.c.bf16 %v6791_v38, %v6788_v19 }
 0xa2f   :  { %v10064_v21 = vpop.f32.mrb[224].mxu0 }
 0xa30   :  { %v14304_v14 = vadd.f32 %v10064_v21, %v14300_v48  ;;  %v6459_v10 = vpop.f32.mrb[225].mxu0 }
 0xa31   :  { %v14307_v54 = vadd.f32 %v14300_v48, %v6459_v10  ;;  %v10065_v1 = vpop.f32.mrb[226].mxu0  ;;  %10239 = vmatmul.mubr.msk.bf16.vlgmr.msra.gmra.mrb[232].mxu0 %vm291_vm0, %v7427_v33  ;;  %v7787_v10 = vpop.permute.xlu1 %7786 }
 0xa32   :  { %v7626_v45 = vmin.f32 %v14304_v14, 20.0  ;;  %v14312_v30 = vadd.f32 %v10065_v1, %v14300_v48  ;;  %v6462_v17 = vpop.f32.mrb[227].mxu0  ;;  %10242 = vmatprep.mubr.msk.bf16.mxu0 %vm291_vm0, %v7428_v36  ;;  %10247 = vmatpush3.bf16.msra.mxu0 %v14182_v32  ;;  %v14316_v8 = vpop.f32.mrb[60].mxu1 }
 0xa33   :  { %v7624_v55 = vmin.f32 %v14307_v54, 20.0  ;;  %v14320_v22 = vadd.f32 %v14300_v48, %v6462_v17  ;;  %10248 = vmatprep.subr.bf16.mxu0 %v14199_v29  ;;  %v6804_v2 = vpop.f32.mrb[61].mxu1  ;;  %v7785_v1 = vpop.permute.xlu0 %7784 }
 0xa34   :  { %v7644_v57 = vmul.f32 1.442695, %v7626_v45  ;;  %v7627_v11 = vmin.f32 %v14312_v30, 20.0  ;;  %v10149_v6 = vpop.f32.mrb[62].mxu1 }
 0xa35   :  { %v7640_v35 = vmul.f32 1.442695, %v7624_v55  ;;  %v7625_v52 = vmin.f32 %v14320_v22, 20.0  ;;  %v7518_v7 = vpack.c.bf16 %v10149_v6, %v14316_v8  ;;  %v6807_v32 = vpop.f32.mrb[63].mxu1 }
 0xa36   :  { %11321 = vpow2.f32 %v7644_v57  ;;  %v7646_v46 = vmul.f32 1.442695, %v7627_v11  ;;  %10249 = vmatpush3.bf16.msra.mxu0 %v14199_v29  ;;  %v7517_v50 = vpack.c.bf16 %v6807_v32, %v6804_v2 }
 0xa37   :  { %11323 = vpow2.f32 %v7640_v35  ;;  %v7642_v31 = vmul.f32 1.442695, %v7625_v52  ;;  %v10068_v59 = vpop.f32.mrb[228].mxu0  ;;  %v7789_v32 = vpop.permute.xlu0 %7788 }
 0xa38   :  { %11325 = vpow2.f32 %v7646_v46  ;;  %v14328_v41 = vadd.f32 %v10068_v59, %v14300_v48  ;;  %v6475_v42 = vpop.f32.mrb[229].mxu0 }
 0xa39   :  { %11327 = vpow2.f32 %v7642_v31  ;;  %v14331_v60 = vadd.f32 %v14300_v48, %v6475_v42  ;;  %v10069_v18 = vpop.f32.mrb[230].mxu0  ;;  %10243 = vmatmul.mubr.msk.bf16.gmra.mrb[236].mxu0 %vm291_vm0, %v7429_v24 }
 0xa3a   :  { %v7630_v16 = vmin.f32 %v14328_v41, 20.0  ;;  %v14336_v29 = vadd.f32 %v10069_v18, %v14300_v48  ;;  %v6478_v9 = vpop.f32.mrb[231].mxu0  ;;  %10250 = vmatprep.mubr.msk.bf16.mxu0 %vm291_vm0, %v7515_v27 }
 0xa3b   :  { %v7628_v13 = vmin.f32 %v14331_v60, 20.0  ;;  %v14341_v28 = vadd.f32 %v14300_v48, %v6478_v9 }
 0xa3c   :  { %v7652_v49 = vmul.f32 1.442695, %v7630_v16  ;;  %v7631_v56 = vmin.f32 %v14336_v29, 20.0 }
 0xa3d   :  { %v7648_v20 = vmul.f32 1.442695, %v7628_v13  ;;  %v7629_v47 = vmin.f32 %v14341_v28, 20.0 }
 0xa3e   :  { %11329 = vpow2.f32 %v7652_v49  ;;  %v7654_v23 = vmul.f32 1.442695, %v7631_v56 }
 0xa3f   :  { %11331 = vpow2.f32 %v7648_v20  ;;  %v7650_v4 = vmul.f32 1.442695, %v7629_v47  ;;  %v7793_v47 = vpop.permute.xlu0 %7792 }
 0xa40   :  { %v11322_v12 = vpop.eup %11321  ;;  %11333 = vpow2.f32 %v7654_v23 }
 0xa41   :  { %v11324_v62 = vpop.eup %11323  ;;  %v7674_v44 = vadd.f32 2.0, %v11322_v12  ;;  %11335 = vpow2.f32 %v7650_v4  ;;  %10251 = vmatmul.mubr.msk.bf16.vlgmr.msra.gmra.mrb[232].mxu0 %vm291_vm0, %v7516_v61 }
 0xa42   :  { %v11326_v63 = vpop.eup %11325  ;;  %v7672_v51 = vadd.f32 2.0, %v11324_v62  ;;  %10254 = vmatprep.mubr.msk.bf16.mxu0 %vm291_vm0, %v7517_v50 }
 0xa43   :  { %v11328_v40 = vpop.eup %11327  ;;  %v7690_v58 = vmul.f32 %v11322_v12, %v7674_v44  ;;  %v7675_v37 = vadd.f32 2.0, %v11326_v63 }
 0xa44   :  { %v7688_v0 = vmul.f32 %v11324_v62, %v7672_v51  ;;  %v7673_v34 = vadd.f32 2.0, %v11328_v40 }
 0xa45   :  { %v7706_v33 = vadd.f32 2.0, %v7690_v58  ;;  %v7691_v53 = vmul.f32 %v11326_v63, %v7675_v37 }
 0xa46   :  { %v7704_v3 = vadd.f32 2.0, %v7688_v0  ;;  %v7689_v25 = vmul.f32 %v11328_v40, %v7673_v34  ;;  %v7797_v34 = vpop.permute.xlu0 %7796 }
 0xa47   :  { %11337 = vrcp.f32 %v7706_v33  ;;  %v7707_v5 = vadd.f32 2.0, %v7691_v53 }
 0xa48   :  { %v11330_v39 = vpop.eup %11329  ;;  %11339 = vrcp.f32 %v7704_v3  ;;  %v7705_v24 = vadd.f32 2.0, %v7689_v25 }
 0xa49   :  { %v11332_v43 = vpop.eup %11331  ;;  %11341 = vrcp.f32 %v7707_v5  ;;  %v7678_v36 = vadd.f32 2.0, %v11330_v39  ;;  %10255 = vmatmul.mubr.msk.bf16.gmra.mrb[236].mxu0 %vm291_vm0, %v7518_v7  ;;  %v7791_v7 = vpop.permute.xlu1 %7790 }
 0xa4a   :  { %v11334_v15 = vpop.eup %11333  ;;  %11343 = vrcp.f32 %v7705_v24  ;;  %v7676_v19 = vadd.f32 2.0, %v11332_v43  ;;  %v10868_v24 = vld [vmem:[%s14682_s9 + $0x38] sm:$0xff]  }
 0xa4b   :  { %v11336_v26 = vpop.eup %11335  ;;  %v7694_v61 = vmul.f32 %v11330_v39, %v7678_v36  ;;  %v7679_v38 = vadd.f32 2.0, %v11334_v15 }
 0xa4c   :  { %v7692_v27 = vmul.f32 %v11332_v43, %v7676_v19  ;;  %v7677_v21 = vadd.f32 2.0, %v11336_v26  ;;  %v14375_v43 = vld [vmem:[%s14682_s9] sm:$0xff]  }
 0xa4d   :  { %v7710_v45 = vadd.f32 2.0, %v7694_v61  ;;  %v7695_v17 = vmul.f32 %v11334_v15, %v7679_v38  ;;  %v7795_v20 = vpop.permute.xlu1 %7794 }
 0xa4e   :  { %v7708_v8 = vadd.f32 2.0, %v7692_v27  ;;  %v7693_v55 = vmul.f32 %v11336_v26, %v7677_v21 }
 0xa4f   :  { %11345 = vrcp.f32 %v7710_v45  ;;  %v7711_v2 = vadd.f32 2.0, %v7695_v17 }
 0xa50   :  { %11347 = vrcp.f32 %v7708_v8  ;;  %v7709_v57 = vadd.f32 2.0, %v7693_v55 }
 0xa51   :  { %v11338_v11 = vpop.eup %11337  ;;  %11349 = vrcp.f32 %v7711_v2 }
 0xa52   :  { %v11340_v6 = vpop.eup %11339  ;;  %v7738_v35 = vmul.f32 %v11338_v11, %v7690_v58  ;;  %11351 = vrcp.f32 %v7709_v57 }
 0xa53   :  { %v11342_v52 = vpop.eup %11341  ;;  %v7736_v46 = vmul.f32 %v11340_v6, %v7688_v0  ;;  %v7799_v0 = vpop.permute.xlu1 %7798 }
 0xa54   :  { %v11344_v50 = vpop.eup %11343  ;;  %v7754_v31 = vmul.f32 %v7738_v35, %v14304_v14  ;;  %v7739_v59 = vmul.f32 %v11342_v52, %v7691_v53 }
 0xa55   :  { %v7752_v42 = vmul.f32 %v7736_v46, %v14307_v54  ;;  %v7737_v18 = vmul.f32 %v11344_v50, %v7689_v25 }
 0xa56   :  { %v7755_v16 = vmul.f32 %v7739_v59, %v14312_v30  ;;  %v7834_v13 = vadd.f32 %v7789_v32, %v7754_v31 }
 0xa57   :  { %v7753_v9 = vmul.f32 %v7737_v18, %v14320_v22  ;;  %v7832_v23 = vadd.f32 %v7785_v1, %v7752_v42 }
 0xa58   :  { %v7835_v49 = vadd.f32 %v7791_v7, %v7755_v16 }
 0xa59   :  { %v11346_v56 = vpop.eup %11345  ;;  %v7833_v4 = vadd.f32 %v7787_v10, %v7753_v9 }
 0xa5a   :  { %v11348_v12 = vpop.eup %11347  ;;  %v7857_v62 = vpack.c.bf16 %v7835_v49, %v7834_v13  ;;  %v7742_v44 = vmul.f32 %v11346_v56, %v7694_v61 }
 0xa5b   :  { %v11350_v63 = vpop.eup %11349  ;;  %v7856_v14 = vpack.c.bf16 %v7833_v4, %v7832_v23  ;;  %v7740_v51 = vmul.f32 %v11348_v12, %v7692_v27 }
 0xa5c   :  { %v11352_v40 = vpop.eup %11351  ;;  %v7758_v54 = vmul.f32 %v7742_v44, %v14328_v41  ;;  %v7743_v58 = vmul.f32 %v11350_v63, %v7695_v17 }
 0xa5d   :  { %v7756_v30 = vmul.f32 %v7740_v51, %v14331_v60  ;;  %v7741_v22 = vmul.f32 %v11352_v40, %v7693_v55  ;;  %10266 = vmatprep.mubr.msk.bf16.mxu1 %vm4281_vm1, %v7856_v14  ;;  %v10865_v60 = vld [vmem:[%s14682_s9 + $0x20] sm:$0xff]  }
 0xa5e   :  { %v7759_v37 = vmul.f32 %v7743_v58, %v14336_v29  ;;  %10267 = vmatmul.mubr.msk.bf16.vlgmr.msra.gmra.mrb[64].mxu1 %vm4281_vm1, %v7857_v62  ;;  %v7838_v53 = vadd.f32 %v7797_v34, %v7758_v54  ;;  %10282 = vmatprep.subr.bf16.mxu1 %v10865_v60  ;;  %v10866_v29 = vld [vmem:[%s14682_s9 + $0x28] sm:$0xff]  }
 0xa5f   :  { %v7757_v33 = vmul.f32 %v7741_v22, %v14341_v28  ;;  %v7836_v25 = vadd.f32 %v7793_v47, %v7756_v30  ;;  %10283 = vmatpush3.bf16.msra.mxu1 %v10865_v60  ;;  %v10867_v28 = vld [vmem:[%s14682_s9 + $0x30] sm:$0xff]  }
 0xa60   :  { %v7839_v3 = vadd.f32 %v7799_v0, %v7759_v37  ;;  %10284 = vmatprep.subr.bf16.mxu1 %v10866_v29 }
 0xa61   :  { %v7837_v5 = vadd.f32 %v7795_v20, %v7757_v33 }
 0xa62   :  { %v7859_v39 = vpack.c.bf16 %v7839_v3, %v7838_v53  ;;  %v14413_v53 = vld [vmem:[%s14683_s10 + $0x5] ss:$0 sm:$0xff] }
 0xa63   :  { %v7858_v41 = vpack.c.bf16 %v7837_v5, %v7836_v25  ;;  %10285 = vmatpush3.bf16.msra.mxu1 %v10866_v29 }
 0xa64   :  { %10286 = vmatprep.subr.bf16.mxu1 %v10867_v28 }
 0xa65   :  { %10270 = vmatprep.mubr.msk.bf16.mxu1 %vm4281_vm1, %v7858_v41 }
 0xa66   :  { %10271 = vmatmul.mubr.msk.bf16.gmra.mrb[68].mxu1 %vm4281_vm1, %v7859_v39  ;;  %v14417_v39 = vpop.permute.xlu1 %7802 }
 0xa67   :  { %10287 = vmatpush3.bf16.msra.mxu1 %v10867_v28  ;;  %v7801_v28 = vpop.permute.xlu0 %7800 }
 0xa68   :  { %10288 = vmatprep.subr.bf16.mxu1 %v10868_v24 }
 0xa6b   :  { %10289 = vmatpush3.bf16.msra.mxu1 %v10868_v24 }
 0xa6c   :  { %10306 = vmatprep.subr.bf16.mxu1 %v14375_v43 }
 0xb14   :  { %v10252_v36 = vpop.f32.mrb[232].mxu0 }
 0xb15   :  { %v14379_v15 = vadd.f32 %v10252_v36, %v14300_v48  ;;  %v7565_v19 = vpop.f32.mrb[233].mxu0 }
 0xb16   :  { %v14382_v26 = vadd.f32 %v14300_v48, %v7565_v19  ;;  %v10253_v61 = vpop.f32.mrb[234].mxu0 }
 0xb17   :  { %v7634_v38 = vmin.f32 %v14379_v15, 20.0  ;;  %v14386_v27 = vadd.f32 %v10253_v61, %v14300_v48  ;;  %v7568_v21 = vpop.f32.mrb[235].mxu0 }
 0xb18   :  { %v7632_v10 = vmin.f32 %v14382_v26, 20.0  ;;  %v14390_v1 = vadd.f32 %v14300_v48, %v7568_v21 }
 0xb19   :  { %v7660_v45 = vmul.f32 1.442695, %v7634_v38  ;;  %v7635_v17 = vmin.f32 %v14386_v27, 20.0 }
 0xb1a   :  { %v7656_v8 = vmul.f32 1.442695, %v7632_v10  ;;  %v7633_v55 = vmin.f32 %v14390_v1, 20.0 }
 0xb1b   :  { %11353 = vpow2.f32 %v7660_v45  ;;  %v7662_v2 = vmul.f32 1.442695, %v7635_v17 }
 0xb1c   :  { %11355 = vpow2.f32 %v7656_v8  ;;  %v7658_v57 = vmul.f32 1.442695, %v7633_v55  ;;  %v10256_v11 = vpop.f32.mrb[236].mxu0 }
 0xb1d   :  { %11357 = vpow2.f32 %v7662_v2  ;;  %v14395_v6 = vadd.f32 %v10256_v11, %v14300_v48  ;;  %v7581_v35 = vpop.f32.mrb[237].mxu0 }
 0xb1e   :  { %11359 = vpow2.f32 %v7658_v57  ;;  %v14398_v52 = vadd.f32 %v14300_v48, %v7581_v35  ;;  %v10257_v7 = vpop.f32.mrb[238].mxu0 }
 0xb1f   :  { %v7638_v32 = vmin.f32 %v14395_v6, 20.0  ;;  %v14402_v46 = vadd.f32 %v10257_v7, %v14300_v48  ;;  %v7584_v50 = vpop.f32.mrb[239].mxu0 }
 0xb20   :  { %v7636_v31 = vmin.f32 %v14398_v52, 20.0  ;;  %v14406_v59 = vadd.f32 %v14300_v48, %v7584_v50 }
 0xb21   :  { %v7668_v42 = vmul.f32 1.442695, %v7638_v32  ;;  %v7639_v18 = vmin.f32 %v14402_v46, 20.0 }
 0xb22   :  { %v7664_v16 = vmul.f32 1.442695, %v7636_v31  ;;  %v7637_v9 = vmin.f32 %v14406_v59, 20.0 }
 0xb23   :  { %11361 = vpow2.f32 %v7668_v42  ;;  %v7670_v13 = vmul.f32 1.442695, %v7639_v18 }
 0xb24   :  { %11363 = vpow2.f32 %v7664_v16  ;;  %v7666_v49 = vmul.f32 1.442695, %v7637_v9 }
 0xb25   :  { %v11354_v56 = vpop.eup %11353  ;;  %11365 = vpow2.f32 %v7670_v13  ;;  %v7807_v13 = vpop.permute.xlu1 %7806 }
 0xb26   :  { %v11356_v20 = vpop.eup %11355  ;;  %v7682_v47 = vadd.f32 2.0, %v11354_v56  ;;  %11367 = vpow2.f32 %v7666_v49  ;;  %v7805_v49 = vpop.permute.xlu0 %7804 }
 0xb27   :  { %v11358_v23 = vpop.eup %11357  ;;  %v7680_v4 = vadd.f32 2.0, %v11356_v20 }
 0xb28   :  { %v11360_v12 = vpop.eup %11359  ;;  %v7698_v48 = vmul.f32 %v11354_v56, %v7682_v47  ;;  %v7683_v62 = vadd.f32 2.0, %v11358_v23 }
 0xb29   :  { %v7696_v44 = vmul.f32 %v11356_v20, %v7680_v4  ;;  %v7681_v63 = vadd.f32 2.0, %v11360_v12 }
 0xb2a   :  { %v7714_v14 = vadd.f32 2.0, %v7698_v48  ;;  %v7699_v51 = vmul.f32 %v11358_v23, %v7683_v62 }
 0xb2b   :  { %v7712_v40 = vadd.f32 2.0, %v7696_v44  ;;  %v7697_v54 = vmul.f32 %v11360_v12, %v7681_v63 }
 0xb2c   :  { %11369 = vrcp.f32 %v7714_v14  ;;  %v7715_v58 = vadd.f32 2.0, %v7699_v51 }
 0xb2d   :  { %v11362_v30 = vpop.eup %11361  ;;  %11371 = vrcp.f32 %v7712_v40  ;;  %v7713_v22 = vadd.f32 2.0, %v7697_v54 }
 0xb2e   :  { %v11364_v37 = vpop.eup %11363  ;;  %11373 = vrcp.f32 %v7715_v58  ;;  %v7686_v0 = vadd.f32 2.0, %v11362_v30 }
 0xb2f   :  { %v11366_v34 = vpop.eup %11365  ;;  %11375 = vrcp.f32 %v7713_v22  ;;  %v7684_v33 = vadd.f32 2.0, %v11364_v37 }
 0xb30   :  { %v11368_v3 = vpop.eup %11367  ;;  %v14415_v25 = vmul.f32 %v11362_v30, %v7686_v0  ;;  %v7687_v5 = vadd.f32 2.0, %v11366_v34 }
 0xb31   :  { %v14419_v41 = vmul.f32 %v11364_v37, %v7684_v33  ;;  %v7685_v60 = vadd.f32 2.0, %v11368_v3  ;;  %v10268_v29 = vpop.f32.mrb[64].mxu1  ;;  %v7811_v33 = vpop.permute.xlu1 %7810 }
 0xb32   :  { %v7718_v24 = vadd.f32 2.0, %v14415_v25  ;;  %v14422_v36 = vmul.f32 %v11366_v34, %v7687_v5  ;;  %v14425_v19 = vadd.f32 %v10268_v29, %v14413_v53  ;;  %v7950_v61 = vpop.f32.mrb[65].mxu1 }
 0xb33   :  { %v7716_v38 = vadd.f32 2.0, %v14419_v41  ;;  %v14428_v21 = vmul.f32 %v11368_v3, %v7685_v60  ;;  %v14431_v10 = vadd.f32 %v14413_v53, %v7950_v61  ;;  %v10269_v45 = vpop.f32.mrb[66].mxu1  ;;  %v7809_v3 = vpop.permute.xlu0 %7808 }
 0xb34   :  { %11377 = vrcp.f32 %v7718_v24  ;;  %v7719_v17 = vadd.f32 2.0, %v14422_v36  ;;  %v8015_v8 = vmin.f32 %v14425_v19, 20.0  ;;  %v14436_v55 = vadd.f32 %v10269_v45, %v14413_v53  ;;  %v7953_v2 = vpop.f32.mrb[67].mxu1 }
 0xb35   :  { %11379 = vrcp.f32 %v7716_v38  ;;  %v7717_v57 = vadd.f32 2.0, %v14428_v21  ;;  %v8013_v11 = vmin.f32 %v14431_v10, 20.0  ;;  %v14441_v35 = vadd.f32 %v14413_v53, %v7953_v2 }
 0xb36   :  { %v11370_v7 = vpop.eup %11369  ;;  %11381 = vrcp.f32 %v7719_v17  ;;  %v8033_v32 = vmul.f32 1.442695, %v8015_v8  ;;  %v8016_v50 = vmin.f32 %v14436_v55, 20.0 }
 0xb37   :  { %v11372_v31 = vpop.eup %11371  ;;  %v7746_v42 = vmul.f32 %v11370_v7, %v7698_v48  ;;  %11383 = vrcp.f32 %v7717_v57  ;;  %v8029_v18 = vmul.f32 1.442695, %v8013_v11  ;;  %v8014_v16 = vmin.f32 %v14441_v35, 20.0 }
 0xb38   :  { %v11374_v9 = vpop.eup %11373  ;;  %v7744_v56 = vmul.f32 %v11372_v31, %v7696_v44  ;;  %11385 = vpow2.f32 %v8033_v32  ;;  %v8035_v20 = vmul.f32 1.442695, %v8016_v50 }
 0xb39   :  { %v11376_v47 = vpop.eup %11375  ;;  %v7762_v23 = vmul.f32 %v7746_v42, %v14379_v15  ;;  %v7747_v4 = vmul.f32 %v11374_v9, %v7699_v51  ;;  %11387 = vpow2.f32 %v8029_v18  ;;  %v8031_v12 = vmul.f32 1.442695, %v8014_v16  ;;  %v10272_v62 = vpop.f32.mrb[68].mxu1 }
 0xb3a   :  { %v7760_v63 = vmul.f32 %v7744_v56, %v14382_v26  ;;  %v7745_v48 = vmul.f32 %v11376_v47, %v7697_v54  ;;  %11389 = vpow2.f32 %v8035_v20  ;;  %v14448_v14 = vadd.f32 %v10272_v62, %v14413_v53  ;;  %v7966_v40 = vpop.f32.mrb[69].mxu1  ;;  %v7815_v16 = vpop.permute.xlu1 %7814 }
 0xb3b   :  { %v7763_v58 = vmul.f32 %v7747_v4, %v14386_v27  ;;  %11391 = vpow2.f32 %v8031_v12  ;;  %v14452_v44 = vadd.f32 %v14413_v53, %v7966_v40  ;;  %v10273_v30 = vpop.f32.mrb[70].mxu1  ;;  %v7842_v54 = vadd.f32 %v7805_v49, %v7762_v23 }
 0xb3c   :  { %v7761_v15 = vmul.f32 %v7745_v48, %v14390_v1  ;;  %v8019_v51 = vmin.f32 %v14448_v14, 20.0  ;;  %v14457_v22 = vadd.f32 %v10273_v30, %v14413_v53  ;;  %v7969_v26 = vpop.f32.mrb[71].mxu1  ;;  %v7840_v5 = vadd.f32 %v7801_v28, %v7760_v63 }
 0xb3d   :  { %v7843_v37 = vadd.f32 %v7807_v13, %v7763_v58  ;;  %v8017_v0 = vmin.f32 %v14452_v44, 20.0  ;;  %v14461_v34 = vadd.f32 %v14413_v53, %v7969_v26 }
 0xb3e   :  { %v11378_v27 = vpop.eup %11377  ;;  %v7841_v60 = vadd.f32 %v14417_v39, %v7761_v15  ;;  %v8041_v1 = vmul.f32 1.442695, %v8019_v51  ;;  %v8020_v29 = vmin.f32 %v14457_v22, 20.0 }
 0xb3f   :  { %v11380_v24 = vpop.eup %11379  ;;  %v7861_v61 = vpack.c.bf16 %v7843_v37, %v7842_v54  ;;  %v7750_v38 = vmul.f32 %v11378_v27, %v14415_v25  ;;  %v8037_v45 = vmul.f32 1.442695, %v8017_v0  ;;  %v8018_v17 = vmin.f32 %v14461_v34, 20.0  ;;  %v14813_v0 = vld [vmem:[#allocation5_spill] sm:$0xff] }
 0xb40   :  { %v11382_v8 = vpop.eup %11381  ;;  %v7860_v2 = vpack.c.bf16 %v7841_v60, %v7840_v5  ;;  %v7748_v57 = vmul.f32 %v11380_v24, %v14419_v41  ;;  %11393 = vpow2.f32 %v8041_v1  ;;  %v8043_v11 = vmul.f32 1.442695, %v8020_v29 }
 0xb41   :  { %v11384_v7 = vpop.eup %11383  ;;  %v7766_v28 = vmul.f32 %v7750_v38, %v14395_v6  ;;  %v7751_v39 = vmul.f32 %v11382_v8, %v14422_v36  ;;  %11395 = vpow2.f32 %v8037_v45  ;;  %v8039_v32 = vmul.f32 1.442695, %v8018_v17  ;;  %v7813_v36 = vpop.permute.xlu0 %7812  ;;  %v10870_v45 = vld [vmem:[%s14682_s9 + $0x8] sm:$0xff]  }
 0xb42   :  { %v11386_v50 = vpop.eup %11385  ;;  %v7764_v31 = vmul.f32 %v7748_v57, %v14398_v52  ;;  %v7749_v25 = vmul.f32 %v11384_v7, %v14428_v21  ;;  %11397 = vpow2.f32 %v8043_v11  ;;  %10274 = vmatprep.mubr.msk.bf16.mxu1 %vm4281_vm1, %v7860_v2  ;;  %v14814_v2 = vld [vmem:[#allocation6_spill] sm:$0xff]  ;;  %v14815_v7 = vld [vmem:[#allocation7_spill] sm:$0xff] }
 0xb43   :  { %v11388_v42 = vpop.eup %11387  ;;  %v7767_v41 = vmul.f32 %v7751_v39, %v14402_v46  ;;  %v8063_v18 = vadd.f32 2.0, %v11386_v50  ;;  %11399 = vpow2.f32 %v8039_v32  ;;  %10275 = vmatmul.mubr.msk.bf16.gmra.mrb[72].mxu1 %vm4281_vm1, %v7861_v61  ;;  %v7846_v52 = vadd.f32 %v7813_v36, %v7766_v28  ;;  %v10871_v32 = vld [vmem:[%s14682_s9 + $0x10] sm:$0xff]  }
 0xb44   :  { %v11390_v6 = vpop.eup %11389  ;;  %v7765_v9 = vmul.f32 %v7749_v25, %v14406_v59  ;;  %v8061_v13 = vadd.f32 2.0, %v11388_v42  ;;  %v7844_v47 = vadd.f32 %v7809_v3, %v7764_v31 }
 0xb45   :  { %v11392_v49 = vpop.eup %11391  ;;  %v7847_v56 = vadd.f32 %v7815_v16, %v7767_v41  ;;  %v8079_v21 = vmul.f32 %v11386_v50, %v8063_v18  ;;  %v8064_v20 = vadd.f32 2.0, %v11390_v6 }
 0xb46   :  { %v7845_v23 = vadd.f32 %v7811_v33, %v7765_v9  ;;  %v8077_v4 = vmul.f32 %v11388_v42, %v8061_v13  ;;  %v8062_v12 = vadd.f32 2.0, %v11392_v49  ;;  %v14816_v13 = vld [vmem:[#allocation8_spill] sm:$0xff] }
 0xb47   :  { %v7863_v46 = vpack.c.bf16 %v7847_v56, %v7846_v52  ;;  %v8095_v62 = vadd.f32 2.0, %v8079_v21  ;;  %v8080_v63 = vmul.f32 %v11390_v6, %v8064_v20  ;;  %v14817_v52 = vld [vmem:[#allocation10_spill] sm:$0xff] }
 0xb48   :  { %v7862_v48 = vpack.c.bf16 %v7845_v23, %v7844_v47  ;;  %v8093_v40 = vadd.f32 2.0, %v8077_v4  ;;  %v8078_v58 = vmul.f32 %v11392_v49, %v8062_v12 }
 0xb49   :  { %11401 = vrcp.f32 %v8095_v62  ;;  %v8096_v30 = vadd.f32 2.0, %v8080_v63  ;;  %v14818_v62 = vld [vmem:[#allocation9_spill] sm:$0xff] }
 0xb4a   :  { %v11394_v15 = vpop.eup %11393  ;;  %11403 = vrcp.f32 %v8093_v40  ;;  %v8094_v59 = vadd.f32 2.0, %v8078_v58  ;;  %10278 = vmatprep.mubr.msk.bf16.mxu1 %vm4281_vm1, %v7862_v48  ;;  %v14820_v48 = vld [vmem:[#allocation11_spill] sm:$0xff] }
 0xb4b   :  { %v11396_v51 = vpop.eup %11395  ;;  %11405 = vrcp.f32 %v8096_v30  ;;  %v8067_v26 = vadd.f32 2.0, %v11394_v15  ;;  %10279 = vmatmul.mubr.msk.bf16.gmra.mrb[76].mxu1 %vm4281_vm1, %v7863_v46 }
 0xb4c   :  { %v11398_v54 = vpop.eup %11397  ;;  %11407 = vrcp.f32 %v8094_v59  ;;  %v8065_v37 = vadd.f32 2.0, %v11396_v51  ;;  %10290 = vmatprep.mubr.msk.bf16.mxu1 %vm4281_vm1, %v14813_v0 }
 0xb4d   :  { %v11400_v27 = vpop.eup %11399  ;;  %v8083_v33 = vmul.f32 %v11394_v15, %v8067_v26  ;;  %v8068_v3 = vadd.f32 2.0, %v11398_v54 }
 0xb4e   :  { %v8081_v5 = vmul.f32 %v11396_v51, %v8065_v37  ;;  %v8066_v60 = vadd.f32 2.0, %v11400_v27 }
 0xb4f   :  { %v8099_v1 = vadd.f32 2.0, %v8083_v33  ;;  %v8084_v29 = vmul.f32 %v11398_v54, %v8068_v3 }
 0xb50   :  { %v8097_v24 = vadd.f32 2.0, %v8081_v5  ;;  %v8082_v61 = vmul.f32 %v11400_v27, %v8066_v60 }
 0xb51   :  { %11409 = vrcp.f32 %v8099_v1  ;;  %v8100_v38 = vadd.f32 2.0, %v8084_v29 }
 0xb52   :  { %11411 = vrcp.f32 %v8097_v24  ;;  %v8098_v17 = vadd.f32 2.0, %v8082_v61 }
 0xb53   :  { %v11402_v8 = vpop.eup %11401  ;;  %11413 = vrcp.f32 %v8100_v38  ;;  %10291 = vmatmul.mubr.msk.bf16.vlgmr.msra.gmra.mrb[80].mxu1 %vm4281_vm1, %v14814_v2 }
 0xb54   :  { %v11404_v57 = vpop.eup %11403  ;;  %v8127_v11 = vmul.f32 %v11402_v8, %v8079_v21  ;;  %11415 = vrcp.f32 %v8098_v17  ;;  %10294 = vmatprep.mubr.msk.bf16.mxu1 %vm4281_vm1, %v14815_v7  ;;  %10307 = vmatpush3.bf16.msra.mxu1 %v14375_v43  ;;  %v10872_v43 = vld [vmem:[%s14682_s9 + $0x18] sm:$0xff]  }
 0xb55   :  { %v11406_v28 = vpop.eup %11405  ;;  %v8125_v39 = vmul.f32 %v11404_v57, %v8077_v4  ;;  %10308 = vmatprep.subr.bf16.mxu1 %v10870_v45 }
 0xb56   :  { %v11408_v50 = vpop.eup %11407  ;;  %v8128_v31 = vmul.f32 %v11406_v28, %v8080_v63  ;;  %v8143_v42 = vmul.f32 %v8127_v11, %v14425_v19  ;;  %v14819_v63 = vld [vmem:[#allocation12_spill] sm:$0xff] }
 0xb57   :  { %v8126_v25 = vmul.f32 %v11408_v50, %v8078_v58  ;;  %v8141_v18 = vmul.f32 %v8125_v39, %v14431_v10 }
 0xb58   :  { %v8144_v41 = vmul.f32 %v8128_v31, %v14436_v55  ;;  %10309 = vmatpush3.bf16.msra.mxu1 %v10870_v45 }
 0xb59   :  { %v8142_v6 = vmul.f32 %v8126_v25, %v14441_v35  ;;  %10310 = vmatprep.subr.bf16.mxu1 %v10871_v32 }
 0xb5a   :  { %v8158_v16 = vpack.c.bf16 %v8144_v41, %v8143_v42 }
 0xb5b   :  { %v11410_v36 = vpop.eup %11409  ;;  %v8157_v9 = vpack.c.bf16 %v8142_v6, %v8141_v18  ;;  %10295 = vmatmul.mubr.msk.bf16.gmra.mrb[84].mxu1 %vm4281_vm1, %v14816_v13 }
 0xb5c   :  { %v11412_v49 = vpop.eup %11411  ;;  %v8131_v19 = vmul.f32 %v11410_v36, %v8083_v33  ;;  %10298 = vmatprep.mubr.msk.bf16.mxu1 %vm4281_vm1, %v14817_v52  ;;  %10311 = vmatpush3.bf16.msra.mxu1 %v10871_v32 }
 0xb5d   :  { %v11414_v10 = vpop.eup %11413  ;;  %v8129_v55 = vmul.f32 %v11412_v49, %v8081_v5  ;;  %10312 = vmatprep.subr.bf16.mxu1 %v10872_v43 }
 0xb5e   :  { %v11416_v35 = vpop.eup %11415  ;;  %v8132_v56 = vmul.f32 %v11414_v10, %v8084_v29  ;;  %v8147_v20 = vmul.f32 %v8131_v19, %v14448_v14 }
 0xb5f   :  { %v8130_v21 = vmul.f32 %v11416_v35, %v8082_v61  ;;  %v8145_v23 = vmul.f32 %v8129_v55, %v14452_v44 }
 0xb60   :  { %v8148_v47 = vmul.f32 %v8132_v56, %v14457_v22  ;;  %10313 = vmatpush3.bf16.msra.mxu1 %v10872_v43 }
 0xb61   :  { %v8146_v4 = vmul.f32 %v8130_v21, %v14461_v34 }
 0xb62   :  { %v8160_v12 = vpack.c.bf16 %v8148_v47, %v8147_v20 }
 0xb63   :  { %v8159_v46 = vpack.c.bf16 %v8146_v4, %v8145_v23  ;;  %10299 = vmatmul.mubr.msk.bf16.gmra.mrb[88].mxu1 %vm4281_vm1, %v14818_v62 }
 0xb64   :  { %10302 = vmatprep.mubr.msk.bf16.mxu1 %vm4281_vm1, %v14819_v63 }
 0xb6b   :  { %10303 = vmatmul.mubr.msk.bf16.gmra.mrb[92].mxu1 %vm4281_vm1, %v14820_v48 }
 0xb6c   :  { %10314 = vmatprep.mubr.msk.bf16.mxu1 %vm4281_vm1, %v8157_v9 }
 0xb73   :  { %10315 = vmatmul.mubr.msk.bf16.vlgmr.msra.gmra.mrb[80].mxu1 %vm4281_vm1, %v8158_v16 }
 0xb74   :  { %10318 = vmatprep.mubr.msk.bf16.mxu1 %vm4281_vm1, %v8159_v46 }
 0xb7b   :  { %10319 = vmatmul.mubr.msk.bf16.gmra.mrb[84].mxu1 %vm4281_vm1, %v8160_v12 }
 0xc16   :  { %v10276_v14 = vpop.f32.mrb[72].mxu1 }
 0xc17   :  { %v14517_v44 = vadd.f32 %v10276_v14, %v14413_v53  ;;  %v7982_v22 = vpop.f32.mrb[73].mxu1 }
 0xc18   :  { %v14520_v34 = vadd.f32 %v14413_v53, %v7982_v22  ;;  %v10277_v40 = vpop.f32.mrb[74].mxu1 }
 0xc19   :  { %v8023_v58 = vmin.f32 %v14517_v44, 20.0  ;;  %v14524_v30 = vadd.f32 %v10277_v40, %v14413_v53  ;;  %v7985_v15 = vpop.f32.mrb[75].mxu1 }
 0xc1a   :  { %v8021_v59 = vmin.f32 %v14520_v34, 20.0  ;;  %v14528_v51 = vadd.f32 %v14413_v53, %v7985_v15 }
 0xc1b   :  { %v8049_v26 = vmul.f32 1.442695, %v8023_v58  ;;  %v8024_v54 = vmin.f32 %v14524_v30, 20.0 }
 0xc1c   :  { %v8045_v37 = vmul.f32 1.442695, %v8021_v59  ;;  %v8022_v0 = vmin.f32 %v14528_v51, 20.0 }
 0xc1d   :  { %11417 = vpow2.f32 %v8049_v26  ;;  %v8051_v27 = vmul.f32 1.442695, %v8024_v54 }
 0xc1e   :  { %11419 = vpow2.f32 %v8045_v37  ;;  %v8047_v33 = vmul.f32 1.442695, %v8022_v0  ;;  %v10280_v3 = vpop.f32.mrb[76].mxu1 }
 0xc1f   :  { %11421 = vpow2.f32 %v8051_v27  ;;  %v14533_v5 = vadd.f32 %v10280_v3, %v14413_v53  ;;  %v7998_v60 = vpop.f32.mrb[77].mxu1 }
 0xc20   :  { %11423 = vpow2.f32 %v8047_v33  ;;  %v14536_v1 = vadd.f32 %v14413_v53, %v7998_v60  ;;  %v10281_v29 = vpop.f32.mrb[78].mxu1 }
 0xc21   :  { %v8027_v24 = vmin.f32 %v14533_v5, 20.0  ;;  %v14540_v61 = vadd.f32 %v10281_v29, %v14413_v53  ;;  %v8001_v38 = vpop.f32.mrb[79].mxu1 }
 0xc22   :  { %v8025_v45 = vmin.f32 %v14536_v1, 20.0  ;;  %v14544_v17 = vadd.f32 %v14413_v53, %v8001_v38 }
 0xc23   :  { %v8057_v8 = vmul.f32 1.442695, %v8027_v24  ;;  %v8028_v2 = vmin.f32 %v14540_v61, 20.0 }
 0xc24   :  { %v8053_v57 = vmul.f32 1.442695, %v8025_v45  ;;  %v8026_v11 = vmin.f32 %v14544_v17, 20.0 }
 0xc25   :  { %11425 = vpow2.f32 %v8057_v8  ;;  %v8059_v7 = vmul.f32 1.442695, %v8028_v2 }
 0xc26   :  { %11427 = vpow2.f32 %v8053_v57  ;;  %v8055_v28 = vmul.f32 1.442695, %v8026_v11 }
 0xc27   :  { %v11418_v39 = vpop.eup %11417  ;;  %11429 = vpow2.f32 %v8059_v7 }
 0xc28   :  { %v11420_v32 = vpop.eup %11419  ;;  %v8071_v50 = vadd.f32 2.0, %v11418_v39  ;;  %11431 = vpow2.f32 %v8055_v28 }
 0xc29   :  { %v11422_v31 = vpop.eup %11421  ;;  %v8069_v25 = vadd.f32 2.0, %v11420_v32 }
 0xc2a   :  { %v11424_v42 = vpop.eup %11423  ;;  %v8087_v53 = vmul.f32 %v11418_v39, %v8071_v50  ;;  %v8072_v41 = vadd.f32 2.0, %v11422_v31 }
 0xc2b   :  { %v8085_v18 = vmul.f32 %v11420_v32, %v8069_v25  ;;  %v8070_v6 = vadd.f32 2.0, %v11424_v42 }
 0xc2c   :  { %v8103_v43 = vadd.f32 2.0, %v8087_v53  ;;  %v8088_v16 = vmul.f32 %v11422_v31, %v8072_v41 }
 0xc2d   :  { %v8101_v36 = vadd.f32 2.0, %v8085_v18  ;;  %v8086_v9 = vmul.f32 %v11424_v42, %v8070_v6 }
 0xc2e   :  { %11433 = vrcp.f32 %v8103_v43  ;;  %v8104_v13 = vadd.f32 2.0, %v8088_v16 }
 0xc2f   :  { %v11426_v49 = vpop.eup %11425  ;;  %11435 = vrcp.f32 %v8101_v36  ;;  %v8102_v19 = vadd.f32 2.0, %v8086_v9 }
 0xc30   :  { %v11428_v52 = vpop.eup %11427  ;;  %11437 = vrcp.f32 %v8104_v13  ;;  %v8075_v10 = vadd.f32 2.0, %v11426_v49 }
 0xc31   :  { %v11430_v55 = vpop.eup %11429  ;;  %11439 = vrcp.f32 %v8102_v19  ;;  %v8073_v35 = vadd.f32 2.0, %v11428_v52 }
 0xc32   :  { %v11432_v56 = vpop.eup %11431  ;;  %v8091_v21 = vmul.f32 %v11426_v49, %v8075_v10  ;;  %v8076_v20 = vadd.f32 2.0, %v11430_v55 }
 0xc33   :  { %v8089_v47 = vmul.f32 %v11428_v52, %v8073_v35  ;;  %v8074_v23 = vadd.f32 2.0, %v11432_v56 }
 0xc34   :  { %v8107_v4 = vadd.f32 2.0, %v8091_v21  ;;  %v8092_v12 = vmul.f32 %v11430_v55, %v8076_v20 }
 0xc35   :  { %v8105_v46 = vadd.f32 2.0, %v8089_v47  ;;  %v8090_v62 = vmul.f32 %v11432_v56, %v8074_v23 }
 0xc36   :  { %11441 = vrcp.f32 %v8107_v4  ;;  %v8108_v63 = vadd.f32 2.0, %v8092_v12 }
 0xc37   :  { %11443 = vrcp.f32 %v8105_v46  ;;  %v8106_v48 = vadd.f32 2.0, %v8090_v62 }
 0xc38   :  { %v11434_v14 = vpop.eup %11433  ;;  %11445 = vrcp.f32 %v8108_v63 }
 0xc39   :  { %v11436_v22 = vpop.eup %11435  ;;  %v8135_v40 = vmul.f32 %v11434_v14, %v8087_v53  ;;  %11447 = vrcp.f32 %v8106_v48 }
 0xc3a   :  { %v11438_v58 = vpop.eup %11437  ;;  %v8133_v15 = vmul.f32 %v11436_v22, %v8085_v18 }
 0xc3b   :  { %v11440_v59 = vpop.eup %11439  ;;  %v8136_v26 = vmul.f32 %v11438_v58, %v8088_v16  ;;  %v8151_v37 = vmul.f32 %v8135_v40, %v14517_v44 }
 0xc3c   :  { %v8134_v54 = vmul.f32 %v11440_v59, %v8086_v9  ;;  %v8149_v27 = vmul.f32 %v8133_v15, %v14520_v34  ;;  %v14557_v34 = vld [vmem:[%s14683_s10 + $0x6] ss:$0 sm:$0xff]  ;;  %s11594_s10 = smov [#allocation2]  }
 0xc3d   :  { %v8152_v0 = vmul.f32 %v8136_v26, %v14524_v30  ;;  %s8656_s25 = sshll.u32 %s11594_s10, 4  ;;  %s8657_s25 = int_to_ptr.vmem [resolvable:$true] %s8656_s25 }
 0xc3e   :  { %v8150_v33 = vmul.f32 %v8134_v54, %v14528_v51  ;;  %s11568_s26 = scalar_lea.vmem %s8657_s25, 2048  ;;  %p11573_p1 = scmp.lt.s32.totalorder %s8657_s25, %s8657_s25 }
 0xc3f   :  { %v8162_v3 = vpack.c.bf16 %v8152_v0, %v8151_v37  ;;  %p11569_p0 = scmp.ne.s32.totalorder %s8657_s25, %s11568_s26  ;;  %p11574_p2 = scmp.lt.s32.totalorder %s11568_s26, %s11568_s26 }
 0xc40   :  { %v11442_v60 = vpop.eup %11441  ;;  %v8161_v29 = vpack.c.bf16 %v8150_v33, %v8149_v27 }
 0xc41   :  { %v11444_v24 = vpop.eup %11443  ;;  %v8139_v38 = vmul.f32 %v11442_v60, %v8091_v21  ;;  %p11575_p3 = por %p11574_p2, %p11573_p1 }
 0xc42   :  { %v11446_v45 = vpop.eup %11445  ;;  %v8137_v8 = vmul.f32 %v11444_v24, %v8089_v47  ;;  %10322 = vmatprep.mubr.msk.bf16.mxu1 %vm4281_vm1, %v8161_v29 }
 0xc43   :  { %v11448_v2 = vpop.eup %11447  ;;  %v8140_v57 = vmul.f32 %v11446_v45, %v8092_v12  ;;  %10323 = vmatmul.mubr.msk.bf16.gmra.mrb[88].mxu1 %vm4281_vm1, %v8162_v3  ;;  %v8155_v30 = vmul.f32 %v8139_v38, %v14533_v5  ;;  %p11576_p4 = pnand %p11575_p3, %p11569_p0 }
 0xc44   :  { %v8138_v44 = vmul.f32 %v11448_v2, %v8090_v62  ;;  %v8153_v11 = vmul.f32 %v8137_v8, %v14536_v1 }
 0xc45   :  { %v8156_v51 = vmul.f32 %v8140_v57, %v14540_v61 }
 0xc46   :  { %v8154_v7 = vmul.f32 %v8138_v44, %v14544_v17  ;;  %v10316_v28 = vpop.f32.mrb[80].mxu1 }
 0xc47   :  { %v8164_v39 = vpack.c.bf16 %v8156_v51, %v8155_v30  ;;  %v14564_v32 = vadd.f32 %v10316_v28, %v14557_v34  ;;  %v8408_v50 = vpop.f32.mrb[81].mxu1 }
 0xc48   :  { %v8163_v31 = vpack.c.bf16 %v8154_v7, %v8153_v11  ;;  %v14567_v25 = vadd.f32 %v14557_v34, %v8408_v50  ;;  %v10317_v42 = vpop.f32.mrb[82].mxu1 }
 0xc49   :  { %v8493_v53 = vmin.f32 %v14564_v32, 20.0  ;;  %v14571_v5 = vadd.f32 %v10317_v42, %v14557_v34  ;;  %v8411_v61 = vpop.f32.mrb[83].mxu1 }
 0xc4a   :  { %v8491_v1 = vmin.f32 %v14567_v25, 20.0  ;;  %v14575_v17 = vadd.f32 %v14557_v34, %v8411_v61  ;;  %10326 = vmatprep.mubr.msk.bf16.mxu1 %vm4281_vm1, %v8163_v31 }
 0xc4b   :  { %v8511_v41 = vmul.f32 1.442695, %v8493_v53  ;;  %v8494_v18 = vmin.f32 %v14571_v5, 20.0  ;;  %10327 = vmatmul.mubr.msk.bf16.gmra.mrb[92].mxu1 %vm4281_vm1, %v8164_v39 }
 0xc4c   :  { %v8507_v6 = vmul.f32 1.442695, %v8491_v1  ;;  %v8492_v43 = vmin.f32 %v14575_v17, 20.0 }
 0xc4d   :  { %11449 = vpow2.f32 %v8511_v41  ;;  %v8513_v16 = vmul.f32 1.442695, %v8494_v18 }
 0xc4e   :  { %11451 = vpow2.f32 %v8507_v6  ;;  %v8509_v36 = vmul.f32 1.442695, %v8492_v43  ;;  %v10320_v9 = vpop.f32.mrb[84].mxu1 }
 0xc4f   :  { %11453 = vpow2.f32 %v8513_v16  ;;  %v14582_v13 = vadd.f32 %v10320_v9, %v14557_v34  ;;  %v8424_v49 = vpop.f32.mrb[85].mxu1 }
 0xc50   :  { %11455 = vpow2.f32 %v8509_v36  ;;  %v14585_v19 = vadd.f32 %v14557_v34, %v8424_v49  ;;  %v10321_v52 = vpop.f32.mrb[86].mxu1 }
 0xc51   :  { %v8497_v10 = vmin.f32 %v14582_v13, 20.0  ;;  %v14589_v55 = vadd.f32 %v10321_v52, %v14557_v34  ;;  %v8427_v35 = vpop.f32.mrb[87].mxu1 }
 0xc52   :  { %v8495_v56 = vmin.f32 %v14585_v19, 20.0  ;;  %v14593_v21 = vadd.f32 %v14557_v34, %v8427_v35 }
 0xc53   :  { %v8519_v20 = vmul.f32 1.442695, %v8497_v10  ;;  %v8498_v47 = vmin.f32 %v14589_v55, 20.0 }
 0xc54   :  { %v8515_v23 = vmul.f32 1.442695, %v8495_v56  ;;  %v8496_v4 = vmin.f32 %v14593_v21, 20.0 }
 0xc55   :  { %11457 = vpow2.f32 %v8519_v20  ;;  %v8521_v12 = vmul.f32 1.442695, %v8498_v47 }
 0xc56   :  { %11459 = vpow2.f32 %v8515_v23  ;;  %v8517_v46 = vmul.f32 1.442695, %v8496_v4 }
 0xc57   :  { %v11450_v62 = vpop.eup %11449  ;;  %11461 = vpow2.f32 %v8521_v12 }
 0xc58   :  { %v11452_v63 = vpop.eup %11451  ;;  %v8541_v48 = vadd.f32 2.0, %v11450_v62  ;;  %11463 = vpow2.f32 %v8517_v46 }
 0xc59   :  { %v11454_v14 = vpop.eup %11453  ;;  %v8539_v22 = vadd.f32 2.0, %v11452_v63 }
 0xc5a   :  { %v11456_v40 = vpop.eup %11455  ;;  %v8557_v58 = vmul.f32 %v11450_v62, %v8541_v48  ;;  %v8542_v15 = vadd.f32 2.0, %v11454_v14 }
 0xc5b   :  { %v8555_v59 = vmul.f32 %v11452_v63, %v8539_v22  ;;  %v8540_v26 = vadd.f32 2.0, %v11456_v40 }
 0xc5c   :  { %v8573_v54 = vadd.f32 2.0, %v8557_v58  ;;  %v8558_v37 = vmul.f32 %v11454_v14, %v8542_v15 }
 0xc5d   :  { %v8571_v0 = vadd.f32 2.0, %v8555_v59  ;;  %v8556_v27 = vmul.f32 %v11456_v40, %v8540_v26 }
 0xc5e   :  { %11465 = vrcp.f32 %v8573_v54  ;;  %v8574_v33 = vadd.f32 2.0, %v8558_v37 }
 0xc5f   :  { %v11458_v3 = vpop.eup %11457  ;;  %11467 = vrcp.f32 %v8571_v0  ;;  %v8572_v60 = vadd.f32 2.0, %v8556_v27 }
 0xc60   :  { %v11460_v29 = vpop.eup %11459  ;;  %11469 = vrcp.f32 %v8574_v33  ;;  %v8545_v24 = vadd.f32 2.0, %v11458_v3 }
 0xc61   :  { %v11462_v38 = vpop.eup %11461  ;;  %11471 = vrcp.f32 %v8572_v60  ;;  %v8543_v45 = vadd.f32 2.0, %v11460_v29 }
 0xc62   :  { %v11464_v8 = vpop.eup %11463  ;;  %v8561_v2 = vmul.f32 %v11458_v3, %v8545_v24  ;;  %v8546_v57 = vadd.f32 2.0, %v11462_v38 }
 0xc63   :  { %v8559_v44 = vmul.f32 %v11460_v29, %v8543_v45  ;;  %v8544_v30 = vadd.f32 2.0, %v11464_v8 }
 0xc64   :  { %v8577_v51 = vadd.f32 2.0, %v8561_v2  ;;  %v8562_v11 = vmul.f32 %v11462_v38, %v8546_v57 }
 0xc65   :  { %v8575_v7 = vadd.f32 2.0, %v8559_v44  ;;  %v8560_v28 = vmul.f32 %v11464_v8, %v8544_v30 }
 0xc66   :  { %11473 = vrcp.f32 %v8577_v51  ;;  %v8578_v39 = vadd.f32 2.0, %v8562_v11 }
 0xc67   :  { %11475 = vrcp.f32 %v8575_v7  ;;  %v8576_v50 = vadd.f32 2.0, %v8560_v28 }
 0xc68   :  { %v11466_v31 = vpop.eup %11465  ;;  %11477 = vrcp.f32 %v8578_v39 }
 0xc69   :  { %v11468_v42 = vpop.eup %11467  ;;  %v8605_v53 = vmul.f32 %v11466_v31, %v8557_v58  ;;  %11479 = vrcp.f32 %v8576_v50 }
 0xc6a   :  { %v11470_v61 = vpop.eup %11469  ;;  %v8603_v1 = vmul.f32 %v11468_v42, %v8555_v59 }
 0xc6b   :  { %v11472_v41 = vpop.eup %11471  ;;  %v8621_v18 = vmul.f32 %v8605_v53, %v14564_v32  ;;  %v8606_v6 = vmul.f32 %v11470_v61, %v8558_v37 }
 0xc6c   :  { %v8619_v43 = vmul.f32 %v8603_v1, %v14567_v25  ;;  %v8604_v16 = vmul.f32 %v11472_v41, %v8556_v27 }
 0xc6d   :  { %8637 = vst.msk [vmem:[#allocation2 + $0x10] sm:$0xff] %vm4281_vm1, %v8621_v18  ;;  %v8622_v36 = vmul.f32 %v8606_v6, %v14571_v5 }
 0xc6e   :  { %8635 = vst.msk [vmem:[#allocation2] sm:$0xff] %vm4281_vm1, %v8619_v43  ;;  %v8620_v9 = vmul.f32 %v8604_v16, %v14575_v17 }
 0xc6f   :  { %8638 = vst.msk [vmem:[#allocation2 + $0x18] sm:$0xff] %vm4281_vm1, %v8622_v36 }
 0xc70   :  { %v11474_v49 = vpop.eup %11473  ;;  %8636 = vst.msk [vmem:[#allocation2 + $0x8] sm:$0xff] %vm4281_vm1, %v8620_v9 }
 0xc71   :  { %v11476_v52 = vpop.eup %11475  ;;  %v8609_v10 = vmul.f32 %v11474_v49, %v8561_v2 }
 0xc72   :  { %v11478_v32 = vpop.eup %11477  ;;  %v8607_v35 = vmul.f32 %v11476_v52, %v8559_v44 }
 0xc73   :  { %v11480_v56 = vpop.eup %11479  ;;  %v8625_v25 = vmul.f32 %v8609_v10, %v14582_v13  ;;  %v8610_v20 = vmul.f32 %v11478_v32, %v8562_v11 }
 0xc74   :  { %v8623_v47 = vmul.f32 %v8607_v35, %v14585_v19  ;;  %v8608_v5 = vmul.f32 %v11480_v56, %v8560_v28 }
 0xc75   :  { %8641 = vst.msk [vmem:[#allocation2 + $0x30] sm:$0xff] %vm4281_vm1, %v8625_v25  ;;  %v8626_v17 = vmul.f32 %v8610_v20, %v14589_v55 }
 0xc76   :  { %8639 = vst.msk [vmem:[#allocation2 + $0x20] sm:$0xff] %vm4281_vm1, %v8623_v47  ;;  %v8624_v23 = vmul.f32 %v8608_v5, %v14593_v21 }
 0xc77   :  { %8642 = vst.msk [vmem:[#allocation2 + $0x38] sm:$0xff] %vm4281_vm1, %v8626_v17 }
 0xc78   :  { %8640 = vst.msk [vmem:[#allocation2 + $0x28] sm:$0xff] %vm4281_vm1, %v8624_v23 }
 0xd16   :  { %v10324_v4 = vpop.f32.mrb[88].mxu1 }
 0xd17   :  { %v14614_v12 = vadd.f32 %v10324_v4, %v14557_v34  ;;  %v8440_v13 = vpop.f32.mrb[89].mxu1 }
 0xd18   :  { %v14617_v19 = vadd.f32 %v14557_v34, %v8440_v13  ;;  %v10325_v46 = vpop.f32.mrb[90].mxu1 }
 0xd19   :  { %v8501_v62 = vmin.f32 %v14614_v12, 20.0  ;;  %v14621_v55 = vadd.f32 %v10325_v46, %v14557_v34  ;;  %v8443_v63 = vpop.f32.mrb[91].mxu1 }
 0xd1a   :  { %v8499_v21 = vmin.f32 %v14617_v19, 20.0  ;;  %v14625_v48 = vadd.f32 %v14557_v34, %v8443_v63 }
 0xd1b   :  { %v8527_v14 = vmul.f32 1.442695, %v8501_v62  ;;  %v8502_v22 = vmin.f32 %v14621_v55, 20.0 }
 0xd1c   :  { %v8523_v40 = vmul.f32 1.442695, %v8499_v21  ;;  %v8500_v58 = vmin.f32 %v14625_v48, 20.0 }
 0xd1d   :  { %11481 = vpow2.f32 %v8527_v14  ;;  %v8529_v15 = vmul.f32 1.442695, %v8502_v22 }
 0xd1e   :  { %11483 = vpow2.f32 %v8523_v40  ;;  %v8525_v59 = vmul.f32 1.442695, %v8500_v58  ;;  %v10328_v26 = vpop.f32.mrb[92].mxu1 }
 0xd1f   :  { %11485 = vpow2.f32 %v8529_v15  ;;  %v14630_v54 = vadd.f32 %v10328_v26, %v14557_v34  ;;  %v8456_v37 = vpop.f32.mrb[93].mxu1 }
 0xd20   :  { %11487 = vpow2.f32 %v8525_v59  ;;  %v14633_v0 = vadd.f32 %v14557_v34, %v8456_v37  ;;  %v10329_v27 = vpop.f32.mrb[94].mxu1 }
 0xd21   :  { %v8505_v33 = vmin.f32 %v14630_v54, 20.0  ;;  %v14637_v3 = vadd.f32 %v10329_v27, %v14557_v34  ;;  %v8459_v60 = vpop.f32.mrb[95].mxu1 }
 0xd22   :  { %v8503_v29 = vmin.f32 %v14633_v0, 20.0  ;;  %v14641_v24 = vadd.f32 %v14557_v34, %v8459_v60 }
 0xd23   :  { %v8535_v38 = vmul.f32 1.442695, %v8505_v33  ;;  %v8506_v45 = vmin.f32 %v14637_v3, 20.0 }
 0xd24   :  { %v8531_v8 = vmul.f32 1.442695, %v8503_v29  ;;  %v8504_v2 = vmin.f32 %v14641_v24, 20.0 }
 0xd25   :  { %11489 = vpow2.f32 %v8535_v38  ;;  %v8537_v57 = vmul.f32 1.442695, %v8506_v45 }
 0xd26   :  { %11491 = vpow2.f32 %v8531_v8  ;;  %v8533_v44 = vmul.f32 1.442695, %v8504_v2 }
 0xd27   :  { %v11482_v30 = vpop.eup %11481  ;;  %11493 = vpow2.f32 %v8537_v57 }
 0xd28   :  { %v11484_v51 = vpop.eup %11483  ;;  %v8549_v11 = vadd.f32 2.0, %v11482_v30  ;;  %11495 = vpow2.f32 %v8533_v44 }
 0xd29   :  { %v11486_v7 = vpop.eup %11485  ;;  %v8547_v28 = vadd.f32 2.0, %v11484_v51 }
 0xd2a   :  { %v11488_v39 = vpop.eup %11487  ;;  %v8565_v34 = vmul.f32 %v11482_v30, %v8549_v11  ;;  %v8550_v50 = vadd.f32 2.0, %v11486_v7 }
 0xd2b   :  { %v8563_v31 = vmul.f32 %v11484_v51, %v8547_v28  ;;  %v8548_v42 = vadd.f32 2.0, %v11488_v39 }
 0xd2c   :  { %v8581_v53 = vadd.f32 2.0, %v8565_v34  ;;  %v8566_v61 = vmul.f32 %v11486_v7, %v8550_v50 }
 0xd2d   :  { %v8579_v1 = vadd.f32 2.0, %v8563_v31  ;;  %v8564_v41 = vmul.f32 %v11488_v39, %v8548_v42 }
 0xd2e   :  { %11497 = vrcp.f32 %v8581_v53  ;;  %v8582_v18 = vadd.f32 2.0, %v8566_v61 }
 0xd2f   :  { %v11490_v6 = vpop.eup %11489  ;;  %11499 = vrcp.f32 %v8579_v1  ;;  %v8580_v43 = vadd.f32 2.0, %v8564_v41 }
 0xd30   :  { %v11492_v16 = vpop.eup %11491  ;;  %11501 = vrcp.f32 %v8582_v18  ;;  %v8553_v36 = vadd.f32 2.0, %v11490_v6 }
 0xd31   :  { %v11494_v9 = vpop.eup %11493  ;;  %11503 = vrcp.f32 %v8580_v43  ;;  %v8551_v49 = vadd.f32 2.0, %v11492_v16 }
 0xd32   :  { %v11496_v52 = vpop.eup %11495  ;;  %v8569_v10 = vmul.f32 %v11490_v6, %v8553_v36  ;;  %v8554_v32 = vadd.f32 2.0, %v11494_v9 }
 0xd33   :  { %v8567_v35 = vmul.f32 %v11492_v16, %v8551_v49  ;;  %v8552_v56 = vadd.f32 2.0, %v11496_v52 }
 0xd34   :  { %v8585_v25 = vadd.f32 2.0, %v8569_v10  ;;  %v8570_v20 = vmul.f32 %v11494_v9, %v8554_v32 }
 0xd35   :  { %v8583_v47 = vadd.f32 2.0, %v8567_v35  ;;  %v8568_v5 = vmul.f32 %v11496_v52, %v8552_v56 }
 0xd36   :  { %11505 = vrcp.f32 %v8585_v25  ;;  %v8586_v17 = vadd.f32 2.0, %v8570_v20 }
 0xd37   :  { %11507 = vrcp.f32 %v8583_v47  ;;  %v8584_v23 = vadd.f32 2.0, %v8568_v5 }
 0xd38   :  { %v11498_v4 = vpop.eup %11497  ;;  %11509 = vrcp.f32 %v8586_v17 }
 0xd39   :  { %v11500_v13 = vpop.eup %11499  ;;  %v8613_v46 = vmul.f32 %v11498_v4, %v8565_v34  ;;  %11511 = vrcp.f32 %v8584_v23 }
 0xd3a   :  { %v11502_v62 = vpop.eup %11501  ;;  %v8611_v63 = vmul.f32 %v11500_v13, %v8563_v31 }
 0xd3b   :  { %v11504_v21 = vpop.eup %11503  ;;  %v8629_v14 = vmul.f32 %v8613_v46, %v14614_v12  ;;  %v8614_v22 = vmul.f32 %v11502_v62, %v8566_v61 }
 0xd3c   :  { %v8627_v40 = vmul.f32 %v8611_v63, %v14617_v19  ;;  %v8612_v58 = vmul.f32 %v11504_v21, %v8564_v41 }
 0xd3d   :  { %8645 = vst.msk [vmem:[#allocation2 + $0x50] sm:$0xff] %vm4281_vm1, %v8629_v14  ;;  %v8630_v15 = vmul.f32 %v8614_v22, %v14621_v55 }
 0xd3e   :  { %8643 = vst.msk [vmem:[#allocation2 + $0x40] sm:$0xff] %vm4281_vm1, %v8627_v40  ;;  %v8628_v59 = vmul.f32 %v8612_v58, %v14625_v48 }
 0xd3f   :  { %8646 = vst.msk [vmem:[#allocation2 + $0x58] sm:$0xff] %vm4281_vm1, %v8630_v15 }
 0xd40   :  { %v11506_v26 = vpop.eup %11505  ;;  %8644 = vst.msk [vmem:[#allocation2 + $0x48] sm:$0xff] %vm4281_vm1, %v8628_v59 }
 0xd41   :  { %v11508_v37 = vpop.eup %11507  ;;  %v8617_v27 = vmul.f32 %v11506_v26, %v8569_v10 }
 0xd42   :  { %v11510_v12 = vpop.eup %11509  ;;  %v8615_v33 = vmul.f32 %v11508_v37, %v8567_v35 }
 0xd43   :  { %v11512_v60 = vpop.eup %11511  ;;  %v8633_v19 = vmul.f32 %v8617_v27, %v14630_v54  ;;  %v8618_v29 = vmul.f32 %v11510_v12, %v8570_v20 }
 0xd44   :  { %v8631_v55 = vmul.f32 %v8615_v33, %v14633_v0  ;;  %v8616_v38 = vmul.f32 %v11512_v60, %v8568_v5 }
 0xd45   :  { %8649 = vst.msk [vmem:[#allocation2 + $0x70] sm:$0xff] %vm4281_vm1, %v8633_v19  ;;  %v8634_v48 = vmul.f32 %v8618_v29, %v14637_v3 }
 0xd46   :  { %8647 = vst.msk [vmem:[#allocation2 + $0x60] sm:$0xff] %vm4281_vm1, %v8631_v55  ;;  %v8632_v45 = vmul.f32 %v8616_v38, %v14641_v24 }
 0xd47   :  { %8650 = vst.msk [vmem:[#allocation2 + $0x78] sm:$0xff] %vm4281_vm1, %v8634_v48 }
 0xd48   :  { %8648 = vst.msk [vmem:[#allocation2 + $0x68] sm:$0xff] %vm4281_vm1, %v8632_v45 }
 0xd49   :  { %11579 = shalt.err (!%p11576_p4)
}
 0xd4a   :  { %s11580_s0 = scalar_lea.hbm %s14684_s11, 2048 }
 0xd4b   :  { %p11581_p5 = scmp.ne.s32.totalorder %s14684_s11, %s11580_s0  ;;  %p11584_p6 = scmp.lt.u32.totalorder %s11580_s0, %s14684_s11 }
 0xd4d   :  { %p11586_p7 = pnand %p11584_p6, %p11581_p5 }
 0xd4f   :  { %11589 = shalt.err (!%p11586_p7)
}
 0xd50   :  { %s11595_s30 = smov 128   ;;  %s11596_s12 = smov 8  }
 0xd51   :  { %8662 = dma.vmem_to_hbm [thread:$0]  %s8657_s25, 2048, %s14684_s11, [#allocation3], %s11595_s30, %s11595_s30, %s11596_s12  }
 0xd52   :  { %11590 = dma.done.wait [#allocation3], 2048  }
 0xd53   :  { %11591 = vsyncadd [#allocation3], 4294965248 }
 0xd54   :  { %8666 = vsyncpa [#allocation3], 1 }

</bundles_post_ra>
